<compile_context>
chip_gen: v5e
topology: v5e:2x2
jax: 0.10.0
libtpu: 0.0.40
codegen_flags: <defaults>
</compile_context>

<pallas_src>
import functools

import jax
import jax.numpy as jnp
from jax import lax
from jax.experimental import pallas as pl
from jax.experimental.pallas import tpu as pltpu


# ---------------- helpers ----------------
def _round_up(x, m):
    return (x + m - 1) // m * m


def _pick_tile(dim, max_tile, align):
    """Pad `dim` to a multiple of `align`; pick the largest tile (multiple of
    `align`, <= max_tile) that evenly divides the padded size."""
    padded = _round_up(dim, align)
    tile = align
    t = align
    limit = min(max_tile, padded)
    while t <= limit:
        if padded % t == 0:
            tile = t
        t += align
    return tile, padded


# ---------------- fused matmul kernel (conv / fc hot path) ----------------
def _mm_kernel(relu, has_res, a_ref, b_ref, s_ref, c_ref, *rest):
    if has_res:
        r_ref, o_ref, acc_ref = rest
    else:
        (o_ref, acc_ref), r_ref = rest, None
    k = pl.program_id(2)

    @pl.when(k == 0)
    def _():
        acc_ref[...] = jnp.zeros_like(acc_ref)

    acc_ref[...] += jnp.dot(a_ref[...], b_ref[...],
                            preferred_element_type=jnp.float32)

    @pl.when(k == pl.num_programs(2) - 1)
    def _():
        out = acc_ref[...] * s_ref[...] + c_ref[...]
        if has_res:
            out = out + r_ref[...].astype(jnp.float32)
        if relu:
            out = jnp.maximum(out, 0.0)
        o_ref[...] = out.astype(o_ref.dtype)


def fused_matmul(a, b, scale, bias, *, relu=False, residual=None):
    """(M,K)@(K,N) * scale + bias (+ residual) (+ relu), tiled Pallas matmul.

    Operands are cast to bf16 (MXU-native), accumulation + epilogue in f32.
    """
    M, K = a.shape
    N = b.shape[1]
    tm, Mp = _pick_tile(M, 256, 8)
    tk, Kp = _pick_tile(K, 512, 128)
    tn, Np = _pick_tile(N, 256, 128)

    a_p = jnp.pad(a, ((0, Mp - M), (0, Kp - K))).astype(jnp.bfloat16)
    b_p = jnp.pad(b, ((0, Kp - K), (0, Np - N))).astype(jnp.bfloat16)
    s_p = jnp.pad(scale.astype(jnp.float32), ((0, 0), (0, Np - N)))
    c_p = jnp.pad(bias.astype(jnp.float32), ((0, 0), (0, Np - N)))

    args = [a_p, b_p, s_p, c_p]
    in_specs = [
        pl.BlockSpec((tm, tk), lambda i, j, k: (i, k)),
        pl.BlockSpec((tk, tn), lambda i, j, k: (k, j)),
        pl.BlockSpec((1, tn), lambda i, j, k: (0, j)),
        pl.BlockSpec((1, tn), lambda i, j, k: (0, j)),
    ]
    has_res = residual is not None
    if has_res:
        r_p = jnp.pad(residual.astype(jnp.float32),
                      ((0, Mp - M), (0, Np - N)))
        args.append(r_p)
        in_specs.append(pl.BlockSpec((tm, tn), lambda i, j, k: (i, j)))

    out = pl.pallas_call(
        functools.partial(_mm_kernel, relu, has_res),
        grid=(Mp // tm, Np // tn, Kp // tk),
        in_specs=in_specs,
        out_specs=pl.BlockSpec((tm, tn), lambda i, j, k: (i, j)),
        out_shape=jax.ShapeDtypeStruct((Mp, Np), jnp.float32),
        scratch_shapes=[pltpu.VMEM((tm, tn), jnp.float32)],
        compiler_params=pltpu.CompilerParams(
            dimension_semantics=("parallel", "parallel", "arbitrary")),
    )(*args)
    if Mp != M or Np != N:
        out = out[:M, :N]
    return out


# ---------------- conv-as-im2col glue (channels-last) ----------------
# TODO(synk): im2col is still materialized by XLA (NHWC, bf16 fed to the kernel);
# a fully fused in-kernel halo-DMA im2col is left for a follow-up.
def im2col_nhwc(x, kh, kw, stride, pad):
    N, H, W, C = x.shape
    xp = jnp.pad(x, ((0, 0), (pad, pad), (pad, pad), (0, 0)))
    Ho = (H + 2 * pad - kh) // stride + 1
    Wo = (W + 2 * pad - kw) // stride + 1
    cols = []
    for i in range(kh):
        for j in range(kw):
            cols.append(xp[:, i:i + stride * Ho:stride,
                           j:j + stride * Wo:stride, :])
    col = jnp.concatenate(cols, axis=-1)                # (N,Ho,Wo, kh*kw*C)
    return col.reshape(N * Ho * Wo, kh * kw * C), Ho, Wo


def conv_bn(x, w, bn, *, stride, pad, relu, residual=None):
    """x: (N,H,W,Cin) NHWC; w: (Cout,Cin,kh,kw) torch layout; returns NHWC."""
    N = x.shape[0]
    Cout, Cin, kh, kw = w.shape
    patches, Ho, Wo = im2col_nhwc(x, kh, kw, stride, pad)
    wmat = w.transpose(2, 3, 1, 0).reshape(kh * kw * Cin, Cout)
    res_flat = None
    if residual is not None:
        res_flat = residual.reshape(N * Ho * Wo, Cout)   # already NHWC, no transpose
    scale, bias = bn
    out = fused_matmul(patches, wmat, scale, bias, relu=relu, residual=res_flat)
    return out.reshape(N, Ho, Wo, Cout)


# TODO(synk): 3x3/s2 maxpool and global avg-pool stay as XLA reductions, but in
# channels-last layout so no layout change is forced between Pallas calls.
def maxpool_3x3_s2_p1(x):   # NHWC
    return lax.reduce_window(
        x, -jnp.inf, lax.max,
        window_dimensions=(1, 3, 3, 1),
        window_strides=(1, 2, 2, 1),
        padding=((0, 0), (1, 1), (1, 1), (0, 0)))


# ---------------- ResNet-18 backbone (theta regressor), NHWC ----------------
def resnet18_forward(params, x_nhwc):
    h = conv_bn(x_nhwc, params['conv1_w'], params['bn1'], stride=2, pad=3, relu=True)
    h = maxpool_3x3_s2_p1(h)
    for blocks in params['layers']:
        for blk in blocks:
            s = blk['stride']
            identity = h
            out = conv_bn(h, blk['conv1_w'], blk['bn1'], stride=s, pad=1, relu=True)
            if 'ds_w' in blk:
                identity = conv_bn(h, blk['ds_w'], blk['ds_bn'], stride=s, pad=0,
                                   relu=False)
            h = conv_bn(out, blk['conv2_w'], blk['bn2'], stride=1, pad=1, relu=True,
                        residual=identity)
    feat = h.mean(axis=(1, 2))                           # adaptive avg pool -> (N, 512)
    ones = jnp.ones((1, 6), jnp.float32)
    theta6 = fused_matmul(feat, params['fc_w'].T, ones,
                          params['fc_b'].reshape(1, 6), relu=False)
    return theta6                                        # (N, 6)


# ---------------- affine_grid + grid_sample Pallas kernel (separable) ----------------
def _grid_sample_kernel(theta_ref, xn_ref, yn_ref, x_ref, o_ref, *, H, W, C):
    # theta_ref: (1,1,6)  xn/yn: (1,P) batch-invariant  x_ref: (1, C*H, W)
    # o_ref: (1, C, P)
    th = theta_ref[0]                                    # (1, 6)
    t00 = th[:, 0:1]; t01 = th[:, 1:2]; t02 = th[:, 2:3]
    t10 = th[:, 3:4]; t11 = th[:, 4:5]; t12 = th[:, 5:6]

    xn = xn_ref[...]                                     # (1, P)
    yn = yn_ref[...]                                     # (1, P)

    gx = t00 * xn + t01 * yn + t02                       # (1, P)
    gy = t10 * xn + t11 * yn + t12

    # unnormalize (align_corners=False), bilinear weights, zeros padding
    ix = ((gx + 1.0) * W - 1.0) * 0.5
    iy = ((gy + 1.0) * H - 1.0) * 0.5
    x0f = jnp.floor(ix); y0f = jnp.floor(iy)
    wx1 = ix - x0f; wx0 = 1.0 - wx1
    wy1 = iy - y0f; wy0 = 1.0 - wy1
    x0 = x0f.astype(jnp.int32)                           # (1, P)
    y0 = y0f.astype(jnp.int32)

    P = H * W
    # Separable one-hot-weight matrices, lane-dense in P (no dense (P,P) matrix).
    wi = lax.broadcasted_iota(jnp.int32, (W, P), 0)
    hi = lax.broadcasted_iota(jnp.int32, (H, P), 0)
    RXT = jnp.where(wi == x0, wx0, 0.0) + jnp.where(wi == x0 + 1, wx1, 0.0)  # (W, P)
    RYT = jnp.where(hi == y0, wy0, 0.0) + jnp.where(hi == y0 + 1, wy1, 0.0)  # (H, P)

    img = x_ref[0].astype(jnp.float32)                   # (C*H, W)
    B = jnp.dot(img, RXT, preferred_element_type=jnp.float32)   # (C*H, P)
    B = B.reshape(C, H, P)
    out = jnp.sum(B * RYT[None, :, :], axis=1)           # (C, P)
    o_ref[0] = out.astype(o_ref.dtype)


def affine_grid_sample(x, theta):
    # F.grid_sample(x, F.affine_grid(theta, x.size())) with align_corners=False.
    N, C, H, W = x.shape
    P = H * W
    x_flat = x.reshape(N, C * H, W).astype(jnp.float32)
    theta_flat = theta.reshape(N, 1, 6).astype(jnp.float32)

    # batch-invariant normalized target coords, computed once outside the grid
    j = jnp.arange(W, dtype=jnp.float32)
    i = jnp.arange(H, dtype=jnp.float32)
    xn = jnp.tile((2.0 * j + 1.0) / W - 1.0, (H,)).reshape(1, P)
    yn = jnp.repeat((2.0 * i + 1.0) / H - 1.0, W).reshape(1, P)

    out = pl.pallas_call(
        functools.partial(_grid_sample_kernel, H=H, W=W, C=C),
        grid=(N,),
        in_specs=[pl.BlockSpec((1, 1, 6), lambda n: (n, 0, 0)),
                  pl.BlockSpec((1, P), lambda n: (0, 0)),
                  pl.BlockSpec((1, P), lambda n: (0, 0)),
                  pl.BlockSpec((1, C * H, W), lambda n: (n, 0, 0))],
        out_specs=pl.BlockSpec((1, C, P), lambda n: (n, 0, 0)),
        out_shape=jax.ShapeDtypeStruct((N, C, P), jnp.float32),
        compiler_params=pltpu.CompilerParams(dimension_semantics=("parallel",)),
    )(theta_flat, xn, yn, x_flat)
    return out.reshape(N, C, H, W)


# ---------------- parameters (deterministic, torch-default-like) ----------------
def fold_bn(c):
    eps = 1e-5
    gamma = jnp.ones((c,), jnp.float32)
    beta = jnp.zeros((c,), jnp.float32)
    running_mean = jnp.zeros((c,), jnp.float32)
    running_var = jnp.ones((c,), jnp.float32)
    scale = gamma / jnp.sqrt(running_var + eps)
    bias = beta - running_mean * scale
    return scale.reshape(1, c), bias.reshape(1, c)


def init_resstn_params(key):
    keys = list(jax.random.split(key, 64))
    kidx = [0]

    def nk():
        k = keys[kidx[0]]
        kidx[0] += 1
        return k

    def conv(cout, cin, k):
        fan_in = cin * k * k
        return jax.random.normal(nk(), (cout, cin, k, k), jnp.float32) * jnp.sqrt(2.0 / fan_in)

    params = {'conv1_w': conv(64, 6, 7), 'bn1': fold_bn(64)}   # patched conv1: 6 -> 64
    layers = []
    inplanes = 64
    for planes, stride in [(64, 1), (128, 2), (256, 2), (512, 2)]:
        blocks = []
        for b in range(2):
            s = stride if b == 0 else 1
            blk = {'stride': s,
                   'conv1_w': conv(planes, inplanes, 3), 'bn1': fold_bn(planes),
                   'conv2_w': conv(planes, planes, 3), 'bn2': fold_bn(planes)}
            if s != 1 or inplanes != planes:
                blk['ds_w'] = conv(planes, inplanes, 1)
                blk['ds_bn'] = fold_bn(planes)
            blocks.append(blk)
            inplanes = planes
        layers.append(blocks)
    params['layers'] = layers
    # fc: weight zeroed, bias = identity affine (exactly as in the PyTorch __init__)
    params['fc_w'] = jnp.zeros((6, 512), jnp.float32)
    params['fc_b'] = jnp.array([1., 0., 0., 0., 1., 0.], jnp.float32)
    return params


# ---------------- ResSTN forward ----------------
def resstn_forward(params, x, y):
    # NCHW -> NHWC once at the boundary; the whole backbone stays channels-last.
    x_nhwc = x.transpose(0, 2, 3, 1)
    y_nhwc = y.transpose(0, 2, 3, 1)
    two_frames = jnp.concatenate([x_nhwc, y_nhwc], axis=-1)   # (N, H, W, 6)
    theta6 = resnet18_forward(params, two_frames)             # (N, 6)
    theta = theta6.reshape(-1, 2, 3)
    warped = affine_grid_sample(x, theta)                     # NCHW, like PyTorch
    return warped, theta


if __name__ == "__main__":
    key = jax.random.PRNGKey(0)
    kp, kx, ky = jax.random.split(key, 3)
    params = init_resstn_params(kp)

    x = jax.random.normal(kx, (2, 3, 16, 16), jnp.float32)
    y = jax.random.normal(ky, (2, 3, 16, 16), jnp.float32)

    fwd = jax.jit(lambda a, b: resstn_forward(params, a, b))
    warped, theta = fwd(x, y)
    jax.block_until_ready((warped, theta))

    # Since fc.weight is zeroed and fc.bias is the identity affine, theta == identity
    # and grid_sample must reproduce x (bilinear sampling at pixel centers).
    assert warped.shape == x.shape and theta.shape == (2, 2, 3)
    ident = jnp.tile(jnp.array([[1., 0., 0.], [0., 1., 0.]], jnp.float32), (2, 1, 1))
    assert jnp.allclose(theta, ident, atol=1e-6)
    assert jnp.allclose(warped, x, atol=1e-4)
    print("KERNEL_OK")
</pallas_src>

<mosaic_0001>
module attributes {stable_mosaic.version = 11 : i64} {
  func.func @_mm_kernel(%arg0: i32, %arg1: i32, %arg2: i32, %arg3: memref<128x384xbf16, #tpu.memory_space<vmem>>, %arg4: memref<384x128xbf16, #tpu.memory_space<vmem>>, %arg5: memref<1x128xf32, #tpu.memory_space<vmem>>, %arg6: memref<1x128xf32, #tpu.memory_space<vmem>>, %arg7: memref<128x128xf32, #tpu.memory_space<vmem>>, %arg8: memref<128x128xf32, #tpu.memory_space<vmem>>) attributes {dimension_semantics = [#tpu.dimension_semantics<parallel>, #tpu.dimension_semantics<parallel>, #tpu.dimension_semantics<arbitrary>], iteration_bounds = array<i64: 1, 1, 1>, scalar_prefetch = 0 : i64, scratch_operands = 1 : i64, tpu.core_type = #tpu.core_type<tc>, window_params = [{transform_indices = @transform_0, window_bounds = array<i64: 128, 384>}, {transform_indices = @transform_1, window_bounds = array<i64: 384, 128>}, {transform_indices = @transform_2, window_bounds = array<i64: 1, 128>}, {transform_indices = @transform_3, window_bounds = array<i64: 1, 128>}, {transform_indices = @transform_4, window_bounds = array<i64: 128, 128>}]} {
    %c0_i32 = arith.constant 0 : i32
    %0 = arith.cmpi eq, %arg2, %c0_i32 : i32
    %1 = arith.extui %0 : i1 to i32
    %c0_i32_0 = arith.constant 0 : i32
    %2 = arith.cmpi ne, %1, %c0_i32_0 : i32
    scf.if %2 {
      %cst_10 = arith.constant 0.000000e+00 : f32
      %12 = vector.broadcast %cst_10 : f32 to vector<128x128xf32>
      %c0_11 = arith.constant 0 : index
      %c0_12 = arith.constant 0 : index
      %13 = vector.load %arg8[%c0_11, %c0_12] : memref<128x128xf32, #tpu.memory_space<vmem>>, vector<128x128xf32>
      tpu.vector_store %arg8[%c0_11, %c0_12], %12 {strides = array<i32>} : memref<128x128xf32, #tpu.memory_space<vmem>>, vector<128x128xf32>,
    } else {
    }
    %c0 = arith.constant 0 : index
    %c0_1 = arith.constant 0 : index
    %3 = vector.load %arg8[%c0, %c0_1] : memref<128x128xf32, #tpu.memory_space<vmem>>, vector<128x128xf32>
    %c0_2 = arith.constant 0 : index
    %c0_3 = arith.constant 0 : index
    %4 = vector.load %arg3[%c0_2, %c0_3] : memref<128x384xbf16, #tpu.memory_space<vmem>>, vector<128x384xbf16>
    %c0_4 = arith.constant 0 : index
    %c0_5 = arith.constant 0 : index
    %5 = vector.load %arg4[%c0_4, %c0_5] : memref<384x128xbf16, #tpu.memory_space<vmem>>, vector<384x128xbf16>
    %cst = arith.constant dense<0.000000e+00> : vector<128x128xf32>
    %6 = tpu.matmul %4, %5, %cst {dimension_numbers = #tpu.dot_dimension_numbers<[1], [0], [0], [1], [0, 0, 1, 1], [], []>} : vector<128x384xbf16>, vector<384x128xbf16>, vector<128x128xf32> -> vector<128x128xf32>
    %7 = arith.addf %3, %6 : vector<128x128xf32>
    %c0_6 = arith.constant 0 : index
    %c0_7 = arith.constant 0 : index
    %8 = vector.load %arg8[%c0_6, %c0_7] : memref<128x128xf32, #tpu.memory_space<vmem>>, vector<128x128xf32>
    tpu.vector_store %arg8[%c0_6, %c0_7], %7 {strides = array<i32>} : memref<128x128xf32, #tpu.memory_space<vmem>>, vector<128x128xf32>,
    %c0_i32_8 = arith.constant 0 : i32
    %9 = arith.cmpi eq, %arg2, %c0_i32_8 : i32
    %10 = arith.extui %9 : i1 to i32
    %c0_i32_9 = arith.constant 0 : i32
    %11 = arith.cmpi ne, %10, %c0_i32_9 : i32
    scf.if %11 {
      %c0_10 = arith.constant 0 : index
      %c0_11 = arith.constant 0 : index
      %12 = vector.load %arg8[%c0_10, %c0_11] : memref<128x128xf32, #tpu.memory_space<vmem>>, vector<128x128xf32>
      %c0_12 = arith.constant 0 : index
      %c0_13 = arith.constant 0 : index
      %13 = vector.load %arg5[%c0_12, %c0_13] : memref<1x128xf32, #tpu.memory_space<vmem>>, vector<1x128xf32>
      %14 = vector.broadcast %13 : vector<1x128xf32> to vector<128x128xf32>
      %15 = arith.mulf %12, %14 : vector<128x128xf32>
      %c0_14 = arith.constant 0 : index
      %c0_15 = arith.constant 0 : index
      %16 = vector.load %arg6[%c0_14, %c0_15] : memref<1x128xf32, #tpu.memory_space<vmem>>, vector<1x128xf32>
      %17 = vector.broadcast %16 : vector<1x128xf32> to vector<128x128xf32>
      %18 = arith.addf %15, %17 : vector<128x128xf32>
      %cst_16 = arith.constant 0.000000e+00 : f32
      %19 = vector.broadcast %cst_16 : f32 to vector<128x128xf32>
      %20 = arith.maximumf %18, %19 : vector<128x128xf32>
      %c0_17 = arith.constant 0 : index
      %c0_18 = arith.constant 0 : index
      %21 = vector.load %arg7[%c0_17, %c0_18] : memref<128x128xf32, #tpu.memory_space<vmem>>, vector<128x128xf32>
      tpu.vector_store %arg7[%c0_17, %c0_18], %20 {strides = array<i32>} : memref<128x128xf32, #tpu.memory_space<vmem>>, vector<128x128xf32>,
    } else {
    }
    return
  }
  func.func @transform_0(%arg0: i32, %arg1: i32, %arg2: i32) -> (i32, i32) {
    %c0_i32 = arith.constant 0 : i32
    return %arg0, %arg2 : i32, i32
  }
  func.func @transform_1(%arg0: i32, %arg1: i32, %arg2: i32) -> (i32, i32) {
    %c0_i32 = arith.constant 0 : i32
    return %arg2, %arg1 : i32, i32
  }
  func.func @transform_2(%arg0: i32, %arg1: i32, %arg2: i32) -> (i32, i32) {
    %c0_i32 = arith.constant 0 : i32
    %c0_i32_0 = arith.constant 0 : i32
    return %c0_i32, %arg1 : i32, i32
  }
  func.func @transform_3(%arg0: i32, %arg1: i32, %arg2: i32) -> (i32, i32) {
    %c0_i32 = arith.constant 0 : i32
    %c0_i32_0 = arith.constant 0 : i32
    return %c0_i32, %arg1 : i32, i32
  }
  func.func @transform_4(%arg0: i32, %arg1: i32, %arg2: i32) -> (i32, i32) {
    %c0_i32 = arith.constant 0 : i32
    return %arg0, %arg1 : i32, i32
  }
}

module attributes {stable_mosaic.version = 11 : i64} {
  func.func @_mm_kernel(%arg0: i32, %arg1: i32, %arg2: i32, %arg3: memref<32x128xbf16, #tpu.memory_space<vmem>>, %arg4: memref<128x128xbf16, #tpu.memory_space<vmem>>, %arg5: memref<1x128xf32, #tpu.memory_space<vmem>>, %arg6: memref<1x128xf32, #tpu.memory_space<vmem>>, %arg7: memref<32x128xf32, #tpu.memory_space<vmem>>, %arg8: memref<32x128xf32, #tpu.memory_space<vmem>>) attributes {dimension_semantics = [#tpu.dimension_semantics<parallel>, #tpu.dimension_semantics<parallel>, #tpu.dimension_semantics<arbitrary>], iteration_bounds = array<i64: 1, 1, 5>, scalar_prefetch = 0 : i64, scratch_operands = 1 : i64, tpu.core_type = #tpu.core_type<tc>, window_params = [{transform_indices = @transform_0, window_bounds = array<i64: 32, 128>}, {transform_indices = @transform_1, window_bounds = array<i64: 128, 128>}, {transform_indices = @transform_2, window_bounds = array<i64: 1, 128>}, {transform_indices = @transform_3, window_bounds = array<i64: 1, 128>}, {transform_indices = @transform_4, window_bounds = array<i64: 32, 128>}]} {
    %c0_i32 = arith.constant 0 : i32
    %0 = arith.cmpi eq, %arg2, %c0_i32 : i32
    %1 = arith.extui %0 : i1 to i32
    %c0_i32_0 = arith.constant 0 : i32
    %2 = arith.cmpi ne, %1, %c0_i32_0 : i32
    scf.if %2 {
      %cst_9 = arith.constant 0.000000e+00 : f32
      %12 = vector.broadcast %cst_9 : f32 to vector<32x128xf32>
      %c0_10 = arith.constant 0 : index
      %c0_11 = arith.constant 0 : index
      %13 = vector.load %arg8[%c0_10, %c0_11] : memref<32x128xf32, #tpu.memory_space<vmem>>, vector<32x128xf32>
      tpu.vector_store %arg8[%c0_10, %c0_11], %12 {strides = array<i32>} : memref<32x128xf32, #tpu.memory_space<vmem>>, vector<32x128xf32>,
    } else {
    }
    %c0 = arith.constant 0 : index
    %c0_1 = arith.constant 0 : index
    %3 = vector.load %arg8[%c0, %c0_1] : memref<32x128xf32, #tpu.memory_space<vmem>>, vector<32x128xf32>
    %c0_2 = arith.constant 0 : index
    %c0_3 = arith.constant 0 : index
    %4 = vector.load %arg3[%c0_2, %c0_3] : memref<32x128xbf16, #tpu.memory_space<vmem>>, vector<32x128xbf16>
    %c0_4 = arith.constant 0 : index
    %c0_5 = arith.constant 0 : index
    %5 = vector.load %arg4[%c0_4, %c0_5] : memref<128x128xbf16, #tpu.memory_space<vmem>>, vector<128x128xbf16>
    %cst = arith.constant dense<0.000000e+00> : vector<32x128xf32>
    %6 = tpu.matmul %4, %5, %cst {dimension_numbers = #tpu.dot_dimension_numbers<[1], [0], [0], [1], [0, 0, 1, 1], [], []>} : vector<32x128xbf16>, vector<128x128xbf16>, vector<32x128xf32> -> vector<32x128xf32>
    %7 = arith.addf %3, %6 : vector<32x128xf32>
    %c0_6 = arith.constant 0 : index
    %c0_7 = arith.constant 0 : index
    %8 = vector.load %arg8[%c0_6, %c0_7] : memref<32x128xf32, #tpu.memory_space<vmem>>, vector<32x128xf32>
    tpu.vector_store %arg8[%c0_6, %c0_7], %7 {strides = array<i32>} : memref<32x128xf32, #tpu.memory_space<vmem>>, vector<32x128xf32>,
    %c4_i32 = arith.constant 4 : i32
    %9 = arith.cmpi eq, %arg2, %c4_i32 : i32
    %10 = arith.extui %9 : i1 to i32
    %c0_i32_8 = arith.constant 0 : i32
    %11 = arith.cmpi ne, %10, %c0_i32_8 : i32
    scf.if %11 {
      %c0_9 = arith.constant 0 : index
      %c0_10 = arith.constant 0 : index
      %12 = vector.load %arg8[%c0_9, %c0_10] : memref<32x128xf32, #tpu.memory_space<vmem>>, vector<32x128xf32>
      %c0_11 = arith.constant 0 : index
      %c0_12 = arith.constant 0 : index
      %13 = vector.load %arg5[%c0_11, %c0_12] : memref<1x128xf32, #tpu.memory_space<vmem>>, vector<1x128xf32>
      %14 = vector.broadcast %13 : vector<1x128xf32> to vector<32x128xf32>
      %15 = arith.mulf %12, %14 : vector<32x128xf32>
      %c0_13 = arith.constant 0 : index
      %c0_14 = arith.constant 0 : index
      %16 = vector.load %arg6[%c0_13, %c0_14] : memref<1x128xf32, #tpu.memory_space<vmem>>, vector<1x128xf32>
      %17 = vector.broadcast %16 : vector<1x128xf32> to vector<32x128xf32>
      %18 = arith.addf %15, %17 : vector<32x128xf32>
      %cst_15 = arith.constant 0.000000e+00 : f32
      %19 = vector.broadcast %cst_15 : f32 to vector<32x128xf32>
      %20 = arith.maximumf %18, %19 : vector<32x128xf32>
      %c0_16 = arith.constant 0 : index
      %c0_17 = arith.constant 0 : index
      %21 = vector.load %arg7[%c0_16, %c0_17] : memref<32x128xf32, #tpu.memory_space<vmem>>, vector<32x128xf32>
      tpu.vector_store %arg7[%c0_16, %c0_17], %20 {strides = array<i32>} : memref<32x128xf32, #tpu.memory_space<vmem>>, vector<32x128xf32>,
    } else {
    }
    return
  }
  func.func @transform_0(%arg0: i32, %arg1: i32, %arg2: i32) -> (i32, i32) {
    %c0_i32 = arith.constant 0 : i32
    return %arg0, %arg2 : i32, i32
  }
  func.func @transform_1(%arg0: i32, %arg1: i32, %arg2: i32) -> (i32, i32) {
    %c0_i32 = arith.constant 0 : i32
    return %arg2, %arg1 : i32, i32
  }
  func.func @transform_2(%arg0: i32, %arg1: i32, %arg2: i32) -> (i32, i32) {
    %c0_i32 = arith.constant 0 : i32
    %c0_i32_0 = arith.constant 0 : i32
    return %c0_i32, %arg1 : i32, i32
  }
  func.func @transform_3(%arg0: i32, %arg1: i32, %arg2: i32) -> (i32, i32) {
    %c0_i32 = arith.constant 0 : i32
    %c0_i32_0 = arith.constant 0 : i32
    return %c0_i32, %arg1 : i32, i32
  }
  func.func @transform_4(%arg0: i32, %arg1: i32, %arg2: i32) -> (i32, i32) {
    %c0_i32 = arith.constant 0 : i32
    return %arg0, %arg1 : i32, i32
  }
}

module attributes {stable_mosaic.version = 11 : i64} {
  func.func @_mm_kernel(%arg0: i32, %arg1: i32, %arg2: i32, %arg3: memref<32x128xbf16, #tpu.memory_space<vmem>>, %arg4: memref<128x128xbf16, #tpu.memory_space<vmem>>, %arg5: memref<1x128xf32, #tpu.memory_space<vmem>>, %arg6: memref<1x128xf32, #tpu.memory_space<vmem>>, %arg7: memref<32x128xf32, #tpu.memory_space<vmem>>, %arg8: memref<32x128xf32, #tpu.memory_space<vmem>>, %arg9: memref<32x128xf32, #tpu.memory_space<vmem>>) attributes {dimension_semantics = [#tpu.dimension_semantics<parallel>, #tpu.dimension_semantics<parallel>, #tpu.dimension_semantics<arbitrary>], iteration_bounds = array<i64: 1, 1, 5>, scalar_prefetch = 0 : i64, scratch_operands = 1 : i64, tpu.core_type = #tpu.core_type<tc>, window_params = [{transform_indices = @transform_0, window_bounds = array<i64: 32, 128>}, {transform_indices = @transform_1, window_bounds = array<i64: 128, 128>}, {transform_indices = @transform_2, window_bounds = array<i64: 1, 128>}, {transform_indices = @transform_3, window_bounds = array<i64: 1, 128>}, {transform_indices = @transform_4, window_bounds = array<i64: 32, 128>}, {transform_indices = @transform_5, window_bounds = array<i64: 32, 128>}]} {
    %c0_i32 = arith.constant 0 : i32
    %0 = arith.cmpi eq, %arg2, %c0_i32 : i32
    %1 = arith.extui %0 : i1 to i32
    %c0_i32_0 = arith.constant 0 : i32
    %2 = arith.cmpi ne, %1, %c0_i32_0 : i32
    scf.if %2 {
      %cst_9 = arith.constant 0.000000e+00 : f32
      %12 = vector.broadcast %cst_9 : f32 to vector<32x128xf32>
      %c0_10 = arith.constant 0 : index
      %c0_11 = arith.constant 0 : index
      %13 = vector.load %arg9[%c0_10, %c0_11] : memref<32x128xf32, #tpu.memory_space<vmem>>, vector<32x128xf32>
      tpu.vector_store %arg9[%c0_10, %c0_11], %12 {strides = array<i32>} : memref<32x128xf32, #tpu.memory_space<vmem>>, vector<32x128xf32>,
    } else {
    }
    %c0 = arith.constant 0 : index
    %c0_1 = arith.constant 0 : index
    %3 = vector.load %arg9[%c0, %c0_1] : memref<32x128xf32, #tpu.memory_space<vmem>>, vector<32x128xf32>
    %c0_2 = arith.constant 0 : index
    %c0_3 = arith.constant 0 : index
    %4 = vector.load %arg3[%c0_2, %c0_3] : memref<32x128xbf16, #tpu.memory_space<vmem>>, vector<32x128xbf16>
    %c0_4 = arith.constant 0 : index
    %c0_5 = arith.constant 0 : index
    %5 = vector.load %arg4[%c0_4, %c0_5] : memref<128x128xbf16, #tpu.memory_space<vmem>>, vector<128x128xbf16>
    %cst = arith.constant dense<0.000000e+00> : vector<32x128xf32>
    %6 = tpu.matmul %4, %5, %cst {dimension_numbers = #tpu.dot_dimension_numbers<[1], [0], [0], [1], [0, 0, 1, 1], [], []>} : vector<32x128xbf16>, vector<128x128xbf16>, vector<32x128xf32> -> vector<32x128xf32>
    %7 = arith.addf %3, %6 : vector<32x128xf32>
    %c0_6 = arith.constant 0 : index
    %c0_7 = arith.constant 0 : index
    %8 = vector.load %arg9[%c0_6, %c0_7] : memref<32x128xf32, #tpu.memory_space<vmem>>, vector<32x128xf32>
    tpu.vector_store %arg9[%c0_6, %c0_7], %7 {strides = array<i32>} : memref<32x128xf32, #tpu.memory_space<vmem>>, vector<32x128xf32>,
    %c4_i32 = arith.constant 4 : i32
    %9 = arith.cmpi eq, %arg2, %c4_i32 : i32
    %10 = arith.extui %9 : i1 to i32
    %c0_i32_8 = arith.constant 0 : i32
    %11 = arith.cmpi ne, %10, %c0_i32_8 : i32
    scf.if %11 {
      %c0_9 = arith.constant 0 : index
      %c0_10 = arith.constant 0 : index
      %12 = vector.load %arg9[%c0_9, %c0_10] : memref<32x128xf32, #tpu.memory_space<vmem>>, vector<32x128xf32>
      %c0_11 = arith.constant 0 : index
      %c0_12 = arith.constant 0 : index
      %13 = vector.load %arg5[%c0_11, %c0_12] : memref<1x128xf32, #tpu.memory_space<vmem>>, vector<1x128xf32>
      %14 = vector.broadcast %13 : vector<1x128xf32> to vector<32x128xf32>
      %15 = arith.mulf %12, %14 : vector<32x128xf32>
      %c0_13 = arith.constant 0 : index
      %c0_14 = arith.constant 0 : index
      %16 = vector.load %arg6[%c0_13, %c0_14] : memref<1x128xf32, #tpu.memory_space<vmem>>, vector<1x128xf32>
      %17 = vector.broadcast %16 : vector<1x128xf32> to vector<32x128xf32>
      %18 = arith.addf %15, %17 : vector<32x128xf32>
      %c0_15 = arith.constant 0 : index
      %c0_16 = arith.constant 0 : index
      %19 = vector.load %arg7[%c0_15, %c0_16] : memref<32x128xf32, #tpu.memory_space<vmem>>, vector<32x128xf32>
      %20 = arith.addf %18, %19 : vector<32x128xf32>
      %cst_17 = arith.constant 0.000000e+00 : f32
      %21 = vector.broadcast %cst_17 : f32 to vector<32x128xf32>
      %22 = arith.maximumf %20, %21 : vector<32x128xf32>
      %c0_18 = arith.constant 0 : index
      %c0_19 = arith.constant 0 : index
      %23 = vector.load %arg8[%c0_18, %c0_19] : memref<32x128xf32, #tpu.memory_space<vmem>>, vector<32x128xf32>
      tpu.vector_store %arg8[%c0_18, %c0_19], %22 {strides = array<i32>} : memref<32x128xf32, #tpu.memory_space<vmem>>, vector<32x128xf32>,
    } else {
    }
    return
  }
  func.func @transform_0(%arg0: i32, %arg1: i32, %arg2: i32) -> (i32, i32) {
    %c0_i32 = arith.constant 0 : i32
    return %arg0, %arg2 : i32, i32
  }
  func.func @transform_1(%arg0: i32, %arg1: i32, %arg2: i32) -> (i32, i32) {
    %c0_i32 = arith.constant 0 : i32
    return %arg2, %arg1 : i32, i32
  }
  func.func @transform_2(%arg0: i32, %arg1: i32, %arg2: i32) -> (i32, i32) {
    %c0_i32 = arith.constant 0 : i32
    %c0_i32_0 = arith.constant 0 : i32
    return %c0_i32, %arg1 : i32, i32
  }
  func.func @transform_3(%arg0: i32, %arg1: i32, %arg2: i32) -> (i32, i32) {
    %c0_i32 = arith.constant 0 : i32
    %c0_i32_0 = arith.constant 0 : i32
    return %c0_i32, %arg1 : i32, i32
  }
  func.func @transform_4(%arg0: i32, %arg1: i32, %arg2: i32) -> (i32, i32) {
    %c0_i32 = arith.constant 0 : i32
    return %arg0, %arg1 : i32, i32
  }
  func.func @transform_5(%arg0: i32, %arg1: i32, %arg2: i32) -> (i32, i32) {
    %c0_i32 = arith.constant 0 : i32
    return %arg0, %arg1 : i32, i32
  }
}

module attributes {stable_mosaic.version = 11 : i64} {
  func.func @_mm_kernel(%arg0: i32, %arg1: i32, %arg2: i32, %arg3: memref<8x128xbf16, #tpu.memory_space<vmem>>, %arg4: memref<128x128xbf16, #tpu.memory_space<vmem>>, %arg5: memref<1x128xf32, #tpu.memory_space<vmem>>, %arg6: memref<1x128xf32, #tpu.memory_space<vmem>>, %arg7: memref<8x128xf32, #tpu.memory_space<vmem>>, %arg8: memref<8x128xf32, #tpu.memory_space<vmem>>) attributes {dimension_semantics = [#tpu.dimension_semantics<parallel>, #tpu.dimension_semantics<parallel>, #tpu.dimension_semantics<arbitrary>], iteration_bounds = array<i64: 1, 1, 5>, scalar_prefetch = 0 : i64, scratch_operands = 1 : i64, tpu.core_type = #tpu.core_type<tc>, window_params = [{transform_indices = @transform_0, window_bounds = array<i64: 8, 128>}, {transform_indices = @transform_1, window_bounds = array<i64: 128, 128>}, {transform_indices = @transform_2, window_bounds = array<i64: 1, 128>}, {transform_indices = @transform_3, window_bounds = array<i64: 1, 128>}, {transform_indices = @transform_4, window_bounds = array<i64: 8, 128>}]} {
    %c0_i32 = arith.constant 0 : i32
    %0 = arith.cmpi eq, %arg2, %c0_i32 : i32
    %1 = arith.extui %0 : i1 to i32
    %c0_i32_0 = arith.constant 0 : i32
    %2 = arith.cmpi ne, %1, %c0_i32_0 : i32
    scf.if %2 {
      %cst_9 = arith.constant 0.000000e+00 : f32
      %12 = vector.broadcast %cst_9 : f32 to vector<8x128xf32>
      %c0_10 = arith.constant 0 : index
      %c0_11 = arith.constant 0 : index
      %13 = vector.load %arg8[%c0_10, %c0_11] : memref<8x128xf32, #tpu.memory_space<vmem>>, vector<8x128xf32>
      tpu.vector_store %arg8[%c0_10, %c0_11], %12 {strides = array<i32>} : memref<8x128xf32, #tpu.memory_space<vmem>>, vector<8x128xf32>,
    } else {
    }
    %c0 = arith.constant 0 : index
    %c0_1 = arith.constant 0 : index
    %3 = vector.load %arg8[%c0, %c0_1] : memref<8x128xf32, #tpu.memory_space<vmem>>, vector<8x128xf32>
    %c0_2 = arith.constant 0 : index
    %c0_3 = arith.constant 0 : index
    %4 = vector.load %arg3[%c0_2, %c0_3] : memref<8x128xbf16, #tpu.memory_space<vmem>>, vector<8x128xbf16>
    %c0_4 = arith.constant 0 : index
    %c0_5 = arith.constant 0 : index
    %5 = vector.load %arg4[%c0_4, %c0_5] : memref<128x128xbf16, #tpu.memory_space<vmem>>, vector<128x128xbf16>
    %cst = arith.constant dense<0.000000e+00> : vector<8x128xf32>
    %6 = tpu.matmul %4, %5, %cst {dimension_numbers = #tpu.dot_dimension_numbers<[1], [0], [0], [1], [0, 0, 1, 1], [], []>} : vector<8x128xbf16>, vector<128x128xbf16>, vector<8x128xf32> -> vector<8x128xf32>
    %7 = arith.addf %3, %6 : vector<8x128xf32>
    %c0_6 = arith.constant 0 : index
    %c0_7 = arith.constant 0 : index
    %8 = vector.load %arg8[%c0_6, %c0_7] : memref<8x128xf32, #tpu.memory_space<vmem>>, vector<8x128xf32>
    tpu.vector_store %arg8[%c0_6, %c0_7], %7 {strides = array<i32>} : memref<8x128xf32, #tpu.memory_space<vmem>>, vector<8x128xf32>,
    %c4_i32 = arith.constant 4 : i32
    %9 = arith.cmpi eq, %arg2, %c4_i32 : i32
    %10 = arith.extui %9 : i1 to i32
    %c0_i32_8 = arith.constant 0 : i32
    %11 = arith.cmpi ne, %10, %c0_i32_8 : i32
    scf.if %11 {
      %c0_9 = arith.constant 0 : index
      %c0_10 = arith.constant 0 : index
      %12 = vector.load %arg8[%c0_9, %c0_10] : memref<8x128xf32, #tpu.memory_space<vmem>>, vector<8x128xf32>
      %c0_11 = arith.constant 0 : index
      %c0_12 = arith.constant 0 : index
      %13 = vector.load %arg5[%c0_11, %c0_12] : memref<1x128xf32, #tpu.memory_space<vmem>>, vector<1x128xf32>
      %14 = vector.broadcast %13 : vector<1x128xf32> to vector<8x128xf32>
      %15 = arith.mulf %12, %14 : vector<8x128xf32>
      %c0_13 = arith.constant 0 : index
      %c0_14 = arith.constant 0 : index
      %16 = vector.load %arg6[%c0_13, %c0_14] : memref<1x128xf32, #tpu.memory_space<vmem>>, vector<1x128xf32>
      %17 = vector.broadcast %16 : vector<1x128xf32> to vector<8x128xf32>
      %18 = arith.addf %15, %17 : vector<8x128xf32>
      %cst_15 = arith.constant 0.000000e+00 : f32
      %19 = vector.broadcast %cst_15 : f32 to vector<8x128xf32>
      %20 = arith.maximumf %18, %19 : vector<8x128xf32>
      %c0_16 = arith.constant 0 : index
      %c0_17 = arith.constant 0 : index
      %21 = vector.load %arg7[%c0_16, %c0_17] : memref<8x128xf32, #tpu.memory_space<vmem>>, vector<8x128xf32>
      tpu.vector_store %arg7[%c0_16, %c0_17], %20 {strides = array<i32>} : memref<8x128xf32, #tpu.memory_space<vmem>>, vector<8x128xf32>,
    } else {
    }
    return
  }
  func.func @transform_0(%arg0: i32, %arg1: i32, %arg2: i32) -> (i32, i32) {
    %c0_i32 = arith.constant 0 : i32
    return %arg0, %arg2 : i32, i32
  }
  func.func @transform_1(%arg0: i32, %arg1: i32, %arg2: i32) -> (i32, i32) {
    %c0_i32 = arith.constant 0 : i32
    return %arg2, %arg1 : i32, i32
  }
  func.func @transform_2(%arg0: i32, %arg1: i32, %arg2: i32) -> (i32, i32) {
    %c0_i32 = arith.constant 0 : i32
    %c0_i32_0 = arith.constant 0 : i32
    return %c0_i32, %arg1 : i32, i32
  }
  func.func @transform_3(%arg0: i32, %arg1: i32, %arg2: i32) -> (i32, i32) {
    %c0_i32 = arith.constant 0 : i32
    %c0_i32_0 = arith.constant 0 : i32
    return %c0_i32, %arg1 : i32, i32
  }
  func.func @transform_4(%arg0: i32, %arg1: i32, %arg2: i32) -> (i32, i32) {
    %c0_i32 = arith.constant 0 : i32
    return %arg0, %arg1 : i32, i32
  }
}

module attributes {stable_mosaic.version = 11 : i64} {
  func.func @_mm_kernel(%arg0: i32, %arg1: i32, %arg2: i32, %arg3: memref<8x128xbf16, #tpu.memory_space<vmem>>, %arg4: memref<128x128xbf16, #tpu.memory_space<vmem>>, %arg5: memref<1x128xf32, #tpu.memory_space<vmem>>, %arg6: memref<1x128xf32, #tpu.memory_space<vmem>>, %arg7: memref<8x128xf32, #tpu.memory_space<vmem>>, %arg8: memref<8x128xf32, #tpu.memory_space<vmem>>) attributes {dimension_semantics = [#tpu.dimension_semantics<parallel>, #tpu.dimension_semantics<parallel>, #tpu.dimension_semantics<arbitrary>], iteration_bounds = array<i64: 1, 1, 1>, scalar_prefetch = 0 : i64, scratch_operands = 1 : i64, tpu.core_type = #tpu.core_type<tc>, window_params = [{transform_indices = @transform_0, window_bounds = array<i64: 8, 128>}, {transform_indices = @transform_1, window_bounds = array<i64: 128, 128>}, {transform_indices = @transform_2, window_bounds = array<i64: 1, 128>}, {transform_indices = @transform_3, window_bounds = array<i64: 1, 128>}, {transform_indices = @transform_4, window_bounds = array<i64: 8, 128>}]} {
    %c0_i32 = arith.constant 0 : i32
    %0 = arith.cmpi eq, %arg2, %c0_i32 : i32
    %1 = arith.extui %0 : i1 to i32
    %c0_i32_0 = arith.constant 0 : i32
    %2 = arith.cmpi ne, %1, %c0_i32_0 : i32
    scf.if %2 {
      %cst_10 = arith.constant 0.000000e+00 : f32
      %12 = vector.broadcast %cst_10 : f32 to vector<8x128xf32>
      %c0_11 = arith.constant 0 : index
      %c0_12 = arith.constant 0 : index
      %13 = vector.load %arg8[%c0_11, %c0_12] : memref<8x128xf32, #tpu.memory_space<vmem>>, vector<8x128xf32>
      tpu.vector_store %arg8[%c0_11, %c0_12], %12 {strides = array<i32>} : memref<8x128xf32, #tpu.memory_space<vmem>>, vector<8x128xf32>,
    } else {
    }
    %c0 = arith.constant 0 : index
    %c0_1 = arith.constant 0 : index
    %3 = vector.load %arg8[%c0, %c0_1] : memref<8x128xf32, #tpu.memory_space<vmem>>, vector<8x128xf32>
    %c0_2 = arith.constant 0 : index
    %c0_3 = arith.constant 0 : index
    %4 = vector.load %arg3[%c0_2, %c0_3] : memref<8x128xbf16, #tpu.memory_space<vmem>>, vector<8x128xbf16>
    %c0_4 = arith.constant 0 : index
    %c0_5 = arith.constant 0 : index
    %5 = vector.load %arg4[%c0_4, %c0_5] : memref<128x128xbf16, #tpu.memory_space<vmem>>, vector<128x128xbf16>
    %cst = arith.constant dense<0.000000e+00> : vector<8x128xf32>
    %6 = tpu.matmul %4, %5, %cst {dimension_numbers = #tpu.dot_dimension_numbers<[1], [0], [0], [1], [0, 0, 1, 1], [], []>} : vector<8x128xbf16>, vector<128x128xbf16>, vector<8x128xf32> -> vector<8x128xf32>
    %7 = arith.addf %3, %6 : vector<8x128xf32>
    %c0_6 = arith.constant 0 : index
    %c0_7 = arith.constant 0 : index
    %8 = vector.load %arg8[%c0_6, %c0_7] : memref<8x128xf32, #tpu.memory_space<vmem>>, vector<8x128xf32>
    tpu.vector_store %arg8[%c0_6, %c0_7], %7 {strides = array<i32>} : memref<8x128xf32, #tpu.memory_space<vmem>>, vector<8x128xf32>,
    %c0_i32_8 = arith.constant 0 : i32
    %9 = arith.cmpi eq, %arg2, %c0_i32_8 : i32
    %10 = arith.extui %9 : i1 to i32
    %c0_i32_9 = arith.constant 0 : i32
    %11 = arith.cmpi ne, %10, %c0_i32_9 : i32
    scf.if %11 {
      %c0_10 = arith.constant 0 : index
      %c0_11 = arith.constant 0 : index
      %12 = vector.load %arg8[%c0_10, %c0_11] : memref<8x128xf32, #tpu.memory_space<vmem>>, vector<8x128xf32>
      %c0_12 = arith.constant 0 : index
      %c0_13 = arith.constant 0 : index
      %13 = vector.load %arg5[%c0_12, %c0_13] : memref<1x128xf32, #tpu.memory_space<vmem>>, vector<1x128xf32>
      %14 = vector.broadcast %13 : vector<1x128xf32> to vector<8x128xf32>
      %15 = arith.mulf %12, %14 : vector<8x128xf32>
      %c0_14 = arith.constant 0 : index
      %c0_15 = arith.constant 0 : index
      %16 = vector.load %arg6[%c0_14, %c0_15] : memref<1x128xf32, #tpu.memory_space<vmem>>, vector<1x128xf32>
      %17 = vector.broadcast %16 : vector<1x128xf32> to vector<8x128xf32>
      %18 = arith.addf %15, %17 : vector<8x128xf32>
      %c0_16 = arith.constant 0 : index
      %c0_17 = arith.constant 0 : index
      %19 = vector.load %arg7[%c0_16, %c0_17] : memref<8x128xf32, #tpu.memory_space<vmem>>, vector<8x128xf32>
      tpu.vector_store %arg7[%c0_16, %c0_17], %18 {strides = array<i32>} : memref<8x128xf32, #tpu.memory_space<vmem>>, vector<8x128xf32>,
    } else {
    }
    return
  }
  func.func @transform_0(%arg0: i32, %arg1: i32, %arg2: i32) -> (i32, i32) {
    %c0_i32 = arith.constant 0 : i32
    return %arg0, %arg2 : i32, i32
  }
  func.func @transform_1(%arg0: i32, %arg1: i32, %arg2: i32) -> (i32, i32) {
    %c0_i32 = arith.constant 0 : i32
    return %arg2, %arg1 : i32, i32
  }
  func.func @transform_2(%arg0: i32, %arg1: i32, %arg2: i32) -> (i32, i32) {
    %c0_i32 = arith.constant 0 : i32
    %c0_i32_0 = arith.constant 0 : i32
    return %c0_i32, %arg1 : i32, i32
  }
  func.func @transform_3(%arg0: i32, %arg1: i32, %arg2: i32) -> (i32, i32) {
    %c0_i32 = arith.constant 0 : i32
    %c0_i32_0 = arith.constant 0 : i32
    return %c0_i32, %arg1 : i32, i32
  }
  func.func @transform_4(%arg0: i32, %arg1: i32, %arg2: i32) -> (i32, i32) {
    %c0_i32 = arith.constant 0 : i32
    return %arg0, %arg1 : i32, i32
  }
}

module attributes {stable_mosaic.version = 11 : i64} {
  func.func @_mm_kernel(%arg0: i32, %arg1: i32, %arg2: i32, %arg3: memref<8x384xbf16, #tpu.memory_space<vmem>>, %arg4: memref<384x128xbf16, #tpu.memory_space<vmem>>, %arg5: memref<1x128xf32, #tpu.memory_space<vmem>>, %arg6: memref<1x128xf32, #tpu.memory_space<vmem>>, %arg7: memref<8x128xf32, #tpu.memory_space<vmem>>, %arg8: memref<8x128xf32, #tpu.memory_space<vmem>>) attributes {dimension_semantics = [#tpu.dimension_semantics<parallel>, #tpu.dimension_semantics<parallel>, #tpu.dimension_semantics<arbitrary>], iteration_bounds = array<i64: 1, 1, 3>, scalar_prefetch = 0 : i64, scratch_operands = 1 : i64, tpu.core_type = #tpu.core_type<tc>, window_params = [{transform_indices = @transform_0, window_bounds = array<i64: 8, 384>}, {transform_indices = @transform_1, window_bounds = array<i64: 384, 128>}, {transform_indices = @transform_2, window_bounds = array<i64: 1, 128>}, {transform_indices = @transform_3, window_bounds = array<i64: 1, 128>}, {transform_indices = @transform_4, window_bounds = array<i64: 8, 128>}]} {
    %c0_i32 = arith.constant 0 : i32
    %0 = arith.cmpi eq, %arg2, %c0_i32 : i32
    %1 = arith.extui %0 : i1 to i32
    %c0_i32_0 = arith.constant 0 : i32
    %2 = arith.cmpi ne, %1, %c0_i32_0 : i32
    scf.if %2 {
      %cst_9 = arith.constant 0.000000e+00 : f32
      %12 = vector.broadcast %cst_9 : f32 to vector<8x128xf32>
      %c0_10 = arith.constant 0 : index
      %c0_11 = arith.constant 0 : index
      %13 = vector.load %arg8[%c0_10, %c0_11] : memref<8x128xf32, #tpu.memory_space<vmem>>, vector<8x128xf32>
      tpu.vector_store %arg8[%c0_10, %c0_11], %12 {strides = array<i32>} : memref<8x128xf32, #tpu.memory_space<vmem>>, vector<8x128xf32>,
    } else {
    }
    %c0 = arith.constant 0 : index
    %c0_1 = arith.constant 0 : index
    %3 = vector.load %arg8[%c0, %c0_1] : memref<8x128xf32, #tpu.memory_space<vmem>>, vector<8x128xf32>
    %c0_2 = arith.constant 0 : index
    %c0_3 = arith.constant 0 : index
    %4 = vector.load %arg3[%c0_2, %c0_3] : memref<8x384xbf16, #tpu.memory_space<vmem>>, vector<8x384xbf16>
    %c0_4 = arith.constant 0 : index
    %c0_5 = arith.constant 0 : index
    %5 = vector.load %arg4[%c0_4, %c0_5] : memref<384x128xbf16, #tpu.memory_space<vmem>>, vector<384x128xbf16>
    %cst = arith.constant dense<0.000000e+00> : vector<8x128xf32>
    %6 = tpu.matmul %4, %5, %cst {dimension_numbers = #tpu.dot_dimension_numbers<[1], [0], [0], [1], [0, 0, 1, 1], [], []>} : vector<8x384xbf16>, vector<384x128xbf16>, vector<8x128xf32> -> vector<8x128xf32>
    %7 = arith.addf %3, %6 : vector<8x128xf32>
    %c0_6 = arith.constant 0 : index
    %c0_7 = arith.constant 0 : index
    %8 = vector.load %arg8[%c0_6, %c0_7] : memref<8x128xf32, #tpu.memory_space<vmem>>, vector<8x128xf32>
    tpu.vector_store %arg8[%c0_6, %c0_7], %7 {strides = array<i32>} : memref<8x128xf32, #tpu.memory_space<vmem>>, vector<8x128xf32>,
    %c2_i32 = arith.constant 2 : i32
    %9 = arith.cmpi eq, %arg2, %c2_i32 : i32
    %10 = arith.extui %9 : i1 to i32
    %c0_i32_8 = arith.constant 0 : i32
    %11 = arith.cmpi ne, %10, %c0_i32_8 : i32
    scf.if %11 {
      %c0_9 = arith.constant 0 : index
      %c0_10 = arith.constant 0 : index
      %12 = vector.load %arg8[%c0_9, %c0_10] : memref<8x128xf32, #tpu.memory_space<vmem>>, vector<8x128xf32>
      %c0_11 = arith.constant 0 : index
      %c0_12 = arith.constant 0 : index
      %13 = vector.load %arg5[%c0_11, %c0_12] : memref<1x128xf32, #tpu.memory_space<vmem>>, vector<1x128xf32>
      %14 = vector.broadcast %13 : vector<1x128xf32> to vector<8x128xf32>
      %15 = arith.mulf %12, %14 : vector<8x128xf32>
      %c0_13 = arith.constant 0 : index
      %c0_14 = arith.constant 0 : index
      %16 = vector.load %arg6[%c0_13, %c0_14] : memref<1x128xf32, #tpu.memory_space<vmem>>, vector<1x128xf32>
      %17 = vector.broadcast %16 : vector<1x128xf32> to vector<8x128xf32>
      %18 = arith.addf %15, %17 : vector<8x128xf32>
      %cst_15 = arith.constant 0.000000e+00 : f32
      %19 = vector.broadcast %cst_15 : f32 to vector<8x128xf32>
      %20 = arith.maximumf %18, %19 : vector<8x128xf32>
      %c0_16 = arith.constant 0 : index
      %c0_17 = arith.constant 0 : index
      %21 = vector.load %arg7[%c0_16, %c0_17] : memref<8x128xf32, #tpu.memory_space<vmem>>, vector<8x128xf32>
      tpu.vector_store %arg7[%c0_16, %c0_17], %20 {strides = array<i32>} : memref<8x128xf32, #tpu.memory_space<vmem>>, vector<8x128xf32>,
    } else {
    }
    return
  }
  func.func @transform_0(%arg0: i32, %arg1: i32, %arg2: i32) -> (i32, i32) {
    %c0_i32 = arith.constant 0 : i32
    return %arg0, %arg2 : i32, i32
  }
  func.func @transform_1(%arg0: i32, %arg1: i32, %arg2: i32) -> (i32, i32) {
    %c0_i32 = arith.constant 0 : i32
    return %arg2, %arg1 : i32, i32
  }
  func.func @transform_2(%arg0: i32, %arg1: i32, %arg2: i32) -> (i32, i32) {
    %c0_i32 = arith.constant 0 : i32
    %c0_i32_0 = arith.constant 0 : i32
    return %c0_i32, %arg1 : i32, i32
  }
  func.func @transform_3(%arg0: i32, %arg1: i32, %arg2: i32) -> (i32, i32) {
    %c0_i32 = arith.constant 0 : i32
    %c0_i32_0 = arith.constant 0 : i32
    return %c0_i32, %arg1 : i32, i32
  }
  func.func @transform_4(%arg0: i32, %arg1: i32, %arg2: i32) -> (i32, i32) {
    %c0_i32 = arith.constant 0 : i32
    return %arg0, %arg1 : i32, i32
  }
}

module attributes {stable_mosaic.version = 11 : i64} {
  func.func @_mm_kernel(%arg0: i32, %arg1: i32, %arg2: i32, %arg3: memref<8x384xbf16, #tpu.memory_space<vmem>>, %arg4: memref<384x128xbf16, #tpu.memory_space<vmem>>, %arg5: memref<1x128xf32, #tpu.memory_space<vmem>>, %arg6: memref<1x128xf32, #tpu.memory_space<vmem>>, %arg7: memref<8x128xf32, #tpu.memory_space<vmem>>, %arg8: memref<8x128xf32, #tpu.memory_space<vmem>>, %arg9: memref<8x128xf32, #tpu.memory_space<vmem>>) attributes {dimension_semantics = [#tpu.dimension_semantics<parallel>, #tpu.dimension_semantics<parallel>, #tpu.dimension_semantics<arbitrary>], iteration_bounds = array<i64: 1, 1, 3>, scalar_prefetch = 0 : i64, scratch_operands = 1 : i64, tpu.core_type = #tpu.core_type<tc>, window_params = [{transform_indices = @transform_0, window_bounds = array<i64: 8, 384>}, {transform_indices = @transform_1, window_bounds = array<i64: 384, 128>}, {transform_indices = @transform_2, window_bounds = array<i64: 1, 128>}, {transform_indices = @transform_3, window_bounds = array<i64: 1, 128>}, {transform_indices = @transform_4, window_bounds = array<i64: 8, 128>}, {transform_indices = @transform_5, window_bounds = array<i64: 8, 128>}]} {
    %c0_i32 = arith.constant 0 : i32
    %0 = arith.cmpi eq, %arg2, %c0_i32 : i32
    %1 = arith.extui %0 : i1 to i32
    %c0_i32_0 = arith.constant 0 : i32
    %2 = arith.cmpi ne, %1, %c0_i32_0 : i32
    scf.if %2 {
      %cst_9 = arith.constant 0.000000e+00 : f32
      %12 = vector.broadcast %cst_9 : f32 to vector<8x128xf32>
      %c0_10 = arith.constant 0 : index
      %c0_11 = arith.constant 0 : index
      %13 = vector.load %arg9[%c0_10, %c0_11] : memref<8x128xf32, #tpu.memory_space<vmem>>, vector<8x128xf32>
      tpu.vector_store %arg9[%c0_10, %c0_11], %12 {strides = array<i32>} : memref<8x128xf32, #tpu.memory_space<vmem>>, vector<8x128xf32>,
    } else {
    }
    %c0 = arith.constant 0 : index
    %c0_1 = arith.constant 0 : index
    %3 = vector.load %arg9[%c0, %c0_1] : memref<8x128xf32, #tpu.memory_space<vmem>>, vector<8x128xf32>
    %c0_2 = arith.constant 0 : index
    %c0_3 = arith.constant 0 : index
    %4 = vector.load %arg3[%c0_2, %c0_3] : memref<8x384xbf16, #tpu.memory_space<vmem>>, vector<8x384xbf16>
    %c0_4 = arith.constant 0 : index
    %c0_5 = arith.constant 0 : index
    %5 = vector.load %arg4[%c0_4, %c0_5] : memref<384x128xbf16, #tpu.memory_space<vmem>>, vector<384x128xbf16>
    %cst = arith.constant dense<0.000000e+00> : vector<8x128xf32>
    %6 = tpu.matmul %4, %5, %cst {dimension_numbers = #tpu.dot_dimension_numbers<[1], [0], [0], [1], [0, 0, 1, 1], [], []>} : vector<8x384xbf16>, vector<384x128xbf16>, vector<8x128xf32> -> vector<8x128xf32>
    %7 = arith.addf %3, %6 : vector<8x128xf32>
    %c0_6 = arith.constant 0 : index
    %c0_7 = arith.constant 0 : index
    %8 = vector.load %arg9[%c0_6, %c0_7] : memref<8x128xf32, #tpu.memory_space<vmem>>, vector<8x128xf32>
    tpu.vector_store %arg9[%c0_6, %c0_7], %7 {strides = array<i32>} : memref<8x128xf32, #tpu.memory_space<vmem>>, vector<8x128xf32>,
    %c2_i32 = arith.constant 2 : i32
    %9 = arith.cmpi eq, %arg2, %c2_i32 : i32
    %10 = arith.extui %9 : i1 to i32
    %c0_i32_8 = arith.constant 0 : i32
    %11 = arith.cmpi ne, %10, %c0_i32_8 : i32
    scf.if %11 {
      %c0_9 = arith.constant 0 : index
      %c0_10 = arith.constant 0 : index
      %12 = vector.load %arg9[%c0_9, %c0_10] : memref<8x128xf32, #tpu.memory_space<vmem>>, vector<8x128xf32>
      %c0_11 = arith.constant 0 : index
      %c0_12 = arith.constant 0 : index
      %13 = vector.load %arg5[%c0_11, %c0_12] : memref<1x128xf32, #tpu.memory_space<vmem>>, vector<1x128xf32>
      %14 = vector.broadcast %13 : vector<1x128xf32> to vector<8x128xf32>
      %15 = arith.mulf %12, %14 : vector<8x128xf32>
      %c0_13 = arith.constant 0 : index
      %c0_14 = arith.constant 0 : index
      %16 = vector.load %arg6[%c0_13, %c0_14] : memref<1x128xf32, #tpu.memory_space<vmem>>, vector<1x128xf32>
      %17 = vector.broadcast %16 : vector<1x128xf32> to vector<8x128xf32>
      %18 = arith.addf %15, %17 : vector<8x128xf32>
      %c0_15 = arith.constant 0 : index
      %c0_16 = arith.constant 0 : index
      %19 = vector.load %arg7[%c0_15, %c0_16] : memref<8x128xf32, #tpu.memory_space<vmem>>, vector<8x128xf32>
      %20 = arith.addf %18, %19 : vector<8x128xf32>
      %cst_17 = arith.constant 0.000000e+00 : f32
      %21 = vector.broadcast %cst_17 : f32 to vector<8x128xf32>
      %22 = arith.maximumf %20, %21 : vector<8x128xf32>
      %c0_18 = arith.constant 0 : index
      %c0_19 = arith.constant 0 : index
      %23 = vector.load %arg8[%c0_18, %c0_19] : memref<8x128xf32, #tpu.memory_space<vmem>>, vector<8x128xf32>
      tpu.vector_store %arg8[%c0_18, %c0_19], %22 {strides = array<i32>} : memref<8x128xf32, #tpu.memory_space<vmem>>, vector<8x128xf32>,
    } else {
    }
    return
  }
  func.func @transform_0(%arg0: i32, %arg1: i32, %arg2: i32) -> (i32, i32) {
    %c0_i32 = arith.constant 0 : i32
    return %arg0, %arg2 : i32, i32
  }
  func.func @transform_1(%arg0: i32, %arg1: i32, %arg2: i32) -> (i32, i32) {
    %c0_i32 = arith.constant 0 : i32
    return %arg2, %arg1 : i32, i32
  }
  func.func @transform_2(%arg0: i32, %arg1: i32, %arg2: i32) -> (i32, i32) {
    %c0_i32 = arith.constant 0 : i32
    %c0_i32_0 = arith.constant 0 : i32
    return %c0_i32, %arg1 : i32, i32
  }
  func.func @transform_3(%arg0: i32, %arg1: i32, %arg2: i32) -> (i32, i32) {
    %c0_i32 = arith.constant 0 : i32
    %c0_i32_0 = arith.constant 0 : i32
    return %c0_i32, %arg1 : i32, i32
  }
  func.func @transform_4(%arg0: i32, %arg1: i32, %arg2: i32) -> (i32, i32) {
    %c0_i32 = arith.constant 0 : i32
    return %arg0, %arg1 : i32, i32
  }
  func.func @transform_5(%arg0: i32, %arg1: i32, %arg2: i32) -> (i32, i32) {
    %c0_i32 = arith.constant 0 : i32
    return %arg0, %arg1 : i32, i32
  }
}

module attributes {stable_mosaic.version = 11 : i64} {
  func.func @_mm_kernel(%arg0: i32, %arg1: i32, %arg2: i32, %arg3: memref<8x384xbf16, #tpu.memory_space<vmem>>, %arg4: memref<384x256xbf16, #tpu.memory_space<vmem>>, %arg5: memref<1x256xf32, #tpu.memory_space<vmem>>, %arg6: memref<1x256xf32, #tpu.memory_space<vmem>>, %arg7: memref<8x256xf32, #tpu.memory_space<vmem>>, %arg8: memref<8x256xf32, #tpu.memory_space<vmem>>) attributes {dimension_semantics = [#tpu.dimension_semantics<parallel>, #tpu.dimension_semantics<parallel>, #tpu.dimension_semantics<arbitrary>], iteration_bounds = array<i64: 1, 1, 3>, scalar_prefetch = 0 : i64, scratch_operands = 1 : i64, tpu.core_type = #tpu.core_type<tc>, window_params = [{transform_indices = @transform_0, window_bounds = array<i64: 8, 384>}, {transform_indices = @transform_1, window_bounds = array<i64: 384, 256>}, {transform_indices = @transform_2, window_bounds = array<i64: 1, 256>}, {transform_indices = @transform_3, window_bounds = array<i64: 1, 256>}, {transform_indices = @transform_4, window_bounds = array<i64: 8, 256>}]} {
    %c0_i32 = arith.constant 0 : i32
    %0 = arith.cmpi eq, %arg2, %c0_i32 : i32
    %1 = arith.extui %0 : i1 to i32
    %c0_i32_0 = arith.constant 0 : i32
    %2 = arith.cmpi ne, %1, %c0_i32_0 : i32
    scf.if %2 {
      %cst_9 = arith.constant 0.000000e+00 : f32
      %12 = vector.broadcast %cst_9 : f32 to vector<8x256xf32>
      %c0_10 = arith.constant 0 : index
      %c0_11 = arith.constant 0 : index
      %13 = vector.load %arg8[%c0_10, %c0_11] : memref<8x256xf32, #tpu.memory_space<vmem>>, vector<8x256xf32>
      tpu.vector_store %arg8[%c0_10, %c0_11], %12 {strides = array<i32>} : memref<8x256xf32, #tpu.memory_space<vmem>>, vector<8x256xf32>,
    } else {
    }
    %c0 = arith.constant 0 : index
    %c0_1 = arith.constant 0 : index
    %3 = vector.load %arg8[%c0, %c0_1] : memref<8x256xf32, #tpu.memory_space<vmem>>, vector<8x256xf32>
    %c0_2 = arith.constant 0 : index
    %c0_3 = arith.constant 0 : index
    %4 = vector.load %arg3[%c0_2, %c0_3] : memref<8x384xbf16, #tpu.memory_space<vmem>>, vector<8x384xbf16>
    %c0_4 = arith.constant 0 : index
    %c0_5 = arith.constant 0 : index
    %5 = vector.load %arg4[%c0_4, %c0_5] : memref<384x256xbf16, #tpu.memory_space<vmem>>, vector<384x256xbf16>
    %cst = arith.constant dense<0.000000e+00> : vector<8x256xf32>
    %6 = tpu.matmul %4, %5, %cst {dimension_numbers = #tpu.dot_dimension_numbers<[1], [0], [0], [1], [0, 0, 1, 1], [], []>} : vector<8x384xbf16>, vector<384x256xbf16>, vector<8x256xf32> -> vector<8x256xf32>
    %7 = arith.addf %3, %6 : vector<8x256xf32>
    %c0_6 = arith.constant 0 : index
    %c0_7 = arith.constant 0 : index
    %8 = vector.load %arg8[%c0_6, %c0_7] : memref<8x256xf32, #tpu.memory_space<vmem>>, vector<8x256xf32>
    tpu.vector_store %arg8[%c0_6, %c0_7], %7 {strides = array<i32>} : memref<8x256xf32, #tpu.memory_space<vmem>>, vector<8x256xf32>,
    %c2_i32 = arith.constant 2 : i32
    %9 = arith.cmpi eq, %arg2, %c2_i32 : i32
    %10 = arith.extui %9 : i1 to i32
    %c0_i32_8 = arith.constant 0 : i32
    %11 = arith.cmpi ne, %10, %c0_i32_8 : i32
    scf.if %11 {
      %c0_9 = arith.constant 0 : index
      %c0_10 = arith.constant 0 : index
      %12 = vector.load %arg8[%c0_9, %c0_10] : memref<8x256xf32, #tpu.memory_space<vmem>>, vector<8x256xf32>
      %c0_11 = arith.constant 0 : index
      %c0_12 = arith.constant 0 : index
      %13 = vector.load %arg5[%c0_11, %c0_12] : memref<1x256xf32, #tpu.memory_space<vmem>>, vector<1x256xf32>
      %14 = vector.broadcast %13 : vector<1x256xf32> to vector<8x256xf32>
      %15 = arith.mulf %12, %14 : vector<8x256xf32>
      %c0_13 = arith.constant 0 : index
      %c0_14 = arith.constant 0 : index
      %16 = vector.load %arg6[%c0_13, %c0_14] : memref<1x256xf32, #tpu.memory_space<vmem>>, vector<1x256xf32>
      %17 = vector.broadcast %16 : vector<1x256xf32> to vector<8x256xf32>
      %18 = arith.addf %15, %17 : vector<8x256xf32>
      %cst_15 = arith.constant 0.000000e+00 : f32
      %19 = vector.broadcast %cst_15 : f32 to vector<8x256xf32>
      %20 = arith.maximumf %18, %19 : vector<8x256xf32>
      %c0_16 = arith.constant 0 : index
      %c0_17 = arith.constant 0 : index
      %21 = vector.load %arg7[%c0_16, %c0_17] : memref<8x256xf32, #tpu.memory_space<vmem>>, vector<8x256xf32>
      tpu.vector_store %arg7[%c0_16, %c0_17], %20 {strides = array<i32>} : memref<8x256xf32, #tpu.memory_space<vmem>>, vector<8x256xf32>,
    } else {
    }
    return
  }
  func.func @transform_0(%arg0: i32, %arg1: i32, %arg2: i32) -> (i32, i32) {
    %c0_i32 = arith.constant 0 : i32
    return %arg0, %arg2 : i32, i32
  }
  func.func @transform_1(%arg0: i32, %arg1: i32, %arg2: i32) -> (i32, i32) {
    %c0_i32 = arith.constant 0 : i32
    return %arg2, %arg1 : i32, i32
  }
  func.func @transform_2(%arg0: i32, %arg1: i32, %arg2: i32) -> (i32, i32) {
    %c0_i32 = arith.constant 0 : i32
    %c0_i32_0 = arith.constant 0 : i32
    return %c0_i32, %arg1 : i32, i32
  }
  func.func @transform_3(%arg0: i32, %arg1: i32, %arg2: i32) -> (i32, i32) {
    %c0_i32 = arith.constant 0 : i32
    %c0_i32_0 = arith.constant 0 : i32
    return %c0_i32, %arg1 : i32, i32
  }
  func.func @transform_4(%arg0: i32, %arg1: i32, %arg2: i32) -> (i32, i32) {
    %c0_i32 = arith.constant 0 : i32
    return %arg0, %arg1 : i32, i32
  }
}

module attributes {stable_mosaic.version = 11 : i64} {
  func.func @_mm_kernel(%arg0: i32, %arg1: i32, %arg2: i32, %arg3: memref<8x128xbf16, #tpu.memory_space<vmem>>, %arg4: memref<128x256xbf16, #tpu.memory_space<vmem>>, %arg5: memref<1x256xf32, #tpu.memory_space<vmem>>, %arg6: memref<1x256xf32, #tpu.memory_space<vmem>>, %arg7: memref<8x256xf32, #tpu.memory_space<vmem>>, %arg8: memref<8x256xf32, #tpu.memory_space<vmem>>) attributes {dimension_semantics = [#tpu.dimension_semantics<parallel>, #tpu.dimension_semantics<parallel>, #tpu.dimension_semantics<arbitrary>], iteration_bounds = array<i64: 1, 1, 1>, scalar_prefetch = 0 : i64, scratch_operands = 1 : i64, tpu.core_type = #tpu.core_type<tc>, window_params = [{transform_indices = @transform_0, window_bounds = array<i64: 8, 128>}, {transform_indices = @transform_1, window_bounds = array<i64: 128, 256>}, {transform_indices = @transform_2, window_bounds = array<i64: 1, 256>}, {transform_indices = @transform_3, window_bounds = array<i64: 1, 256>}, {transform_indices = @transform_4, window_bounds = array<i64: 8, 256>}]} {
    %c0_i32 = arith.constant 0 : i32
    %0 = arith.cmpi eq, %arg2, %c0_i32 : i32
    %1 = arith.extui %0 : i1 to i32
    %c0_i32_0 = arith.constant 0 : i32
    %2 = arith.cmpi ne, %1, %c0_i32_0 : i32
    scf.if %2 {
      %cst_10 = arith.constant 0.000000e+00 : f32
      %12 = vector.broadcast %cst_10 : f32 to vector<8x256xf32>
      %c0_11 = arith.constant 0 : index
      %c0_12 = arith.constant 0 : index
      %13 = vector.load %arg8[%c0_11, %c0_12] : memref<8x256xf32, #tpu.memory_space<vmem>>, vector<8x256xf32>
      tpu.vector_store %arg8[%c0_11, %c0_12], %12 {strides = array<i32>} : memref<8x256xf32, #tpu.memory_space<vmem>>, vector<8x256xf32>,
    } else {
    }
    %c0 = arith.constant 0 : index
    %c0_1 = arith.constant 0 : index
    %3 = vector.load %arg8[%c0, %c0_1] : memref<8x256xf32, #tpu.memory_space<vmem>>, vector<8x256xf32>
    %c0_2 = arith.constant 0 : index
    %c0_3 = arith.constant 0 : index
    %4 = vector.load %arg3[%c0_2, %c0_3] : memref<8x128xbf16, #tpu.memory_space<vmem>>, vector<8x128xbf16>
    %c0_4 = arith.constant 0 : index
    %c0_5 = arith.constant 0 : index
    %5 = vector.load %arg4[%c0_4, %c0_5] : memref<128x256xbf16, #tpu.memory_space<vmem>>, vector<128x256xbf16>
    %cst = arith.constant dense<0.000000e+00> : vector<8x256xf32>
    %6 = tpu.matmul %4, %5, %cst {dimension_numbers = #tpu.dot_dimension_numbers<[1], [0], [0], [1], [0, 0, 1, 1], [], []>} : vector<8x128xbf16>, vector<128x256xbf16>, vector<8x256xf32> -> vector<8x256xf32>
    %7 = arith.addf %3, %6 : vector<8x256xf32>
    %c0_6 = arith.constant 0 : index
    %c0_7 = arith.constant 0 : index
    %8 = vector.load %arg8[%c0_6, %c0_7] : memref<8x256xf32, #tpu.memory_space<vmem>>, vector<8x256xf32>
    tpu.vector_store %arg8[%c0_6, %c0_7], %7 {strides = array<i32>} : memref<8x256xf32, #tpu.memory_space<vmem>>, vector<8x256xf32>,
    %c0_i32_8 = arith.constant 0 : i32
    %9 = arith.cmpi eq, %arg2, %c0_i32_8 : i32
    %10 = arith.extui %9 : i1 to i32
    %c0_i32_9 = arith.constant 0 : i32
    %11 = arith.cmpi ne, %10, %c0_i32_9 : i32
    scf.if %11 {
      %c0_10 = arith.constant 0 : index
      %c0_11 = arith.constant 0 : index
      %12 = vector.load %arg8[%c0_10, %c0_11] : memref<8x256xf32, #tpu.memory_space<vmem>>, vector<8x256xf32>
      %c0_12 = arith.constant 0 : index
      %c0_13 = arith.constant 0 : index
      %13 = vector.load %arg5[%c0_12, %c0_13] : memref<1x256xf32, #tpu.memory_space<vmem>>, vector<1x256xf32>
      %14 = vector.broadcast %13 : vector<1x256xf32> to vector<8x256xf32>
      %15 = arith.mulf %12, %14 : vector<8x256xf32>
      %c0_14 = arith.constant 0 : index
      %c0_15 = arith.constant 0 : index
      %16 = vector.load %arg6[%c0_14, %c0_15] : memref<1x256xf32, #tpu.memory_space<vmem>>, vector<1x256xf32>
      %17 = vector.broadcast %16 : vector<1x256xf32> to vector<8x256xf32>
      %18 = arith.addf %15, %17 : vector<8x256xf32>
      %c0_16 = arith.constant 0 : index
      %c0_17 = arith.constant 0 : index
      %19 = vector.load %arg7[%c0_16, %c0_17] : memref<8x256xf32, #tpu.memory_space<vmem>>, vector<8x256xf32>
      tpu.vector_store %arg7[%c0_16, %c0_17], %18 {strides = array<i32>} : memref<8x256xf32, #tpu.memory_space<vmem>>, vector<8x256xf32>,
    } else {
    }
    return
  }
  func.func @transform_0(%arg0: i32, %arg1: i32, %arg2: i32) -> (i32, i32) {
    %c0_i32 = arith.constant 0 : i32
    return %arg0, %arg2 : i32, i32
  }
  func.func @transform_1(%arg0: i32, %arg1: i32, %arg2: i32) -> (i32, i32) {
    %c0_i32 = arith.constant 0 : i32
    return %arg2, %arg1 : i32, i32
  }
  func.func @transform_2(%arg0: i32, %arg1: i32, %arg2: i32) -> (i32, i32) {
    %c0_i32 = arith.constant 0 : i32
    %c0_i32_0 = arith.constant 0 : i32
    return %c0_i32, %arg1 : i32, i32
  }
  func.func @transform_3(%arg0: i32, %arg1: i32, %arg2: i32) -> (i32, i32) {
    %c0_i32 = arith.constant 0 : i32
    %c0_i32_0 = arith.constant 0 : i32
    return %c0_i32, %arg1 : i32, i32
  }
  func.func @transform_4(%arg0: i32, %arg1: i32, %arg2: i32) -> (i32, i32) {
    %c0_i32 = arith.constant 0 : i32
    return %arg0, %arg1 : i32, i32
  }
}

module attributes {stable_mosaic.version = 11 : i64} {
  func.func @_mm_kernel(%arg0: i32, %arg1: i32, %arg2: i32, %arg3: memref<8x384xbf16, #tpu.memory_space<vmem>>, %arg4: memref<384x256xbf16, #tpu.memory_space<vmem>>, %arg5: memref<1x256xf32, #tpu.memory_space<vmem>>, %arg6: memref<1x256xf32, #tpu.memory_space<vmem>>, %arg7: memref<8x256xf32, #tpu.memory_space<vmem>>, %arg8: memref<8x256xf32, #tpu.memory_space<vmem>>) attributes {dimension_semantics = [#tpu.dimension_semantics<parallel>, #tpu.dimension_semantics<parallel>, #tpu.dimension_semantics<arbitrary>], iteration_bounds = array<i64: 1, 1, 6>, scalar_prefetch = 0 : i64, scratch_operands = 1 : i64, tpu.core_type = #tpu.core_type<tc>, window_params = [{transform_indices = @transform_0, window_bounds = array<i64: 8, 384>}, {transform_indices = @transform_1, window_bounds = array<i64: 384, 256>}, {transform_indices = @transform_2, window_bounds = array<i64: 1, 256>}, {transform_indices = @transform_3, window_bounds = array<i64: 1, 256>}, {transform_indices = @transform_4, window_bounds = array<i64: 8, 256>}]} {
    %c0_i32 = arith.constant 0 : i32
    %0 = arith.cmpi eq, %arg2, %c0_i32 : i32
    %1 = arith.extui %0 : i1 to i32
    %c0_i32_0 = arith.constant 0 : i32
    %2 = arith.cmpi ne, %1, %c0_i32_0 : i32
    scf.if %2 {
      %cst_9 = arith.constant 0.000000e+00 : f32
      %12 = vector.broadcast %cst_9 : f32 to vector<8x256xf32>
      %c0_10 = arith.constant 0 : index
      %c0_11 = arith.constant 0 : index
      %13 = vector.load %arg8[%c0_10, %c0_11] : memref<8x256xf32, #tpu.memory_space<vmem>>, vector<8x256xf32>
      tpu.vector_store %arg8[%c0_10, %c0_11], %12 {strides = array<i32>} : memref<8x256xf32, #tpu.memory_space<vmem>>, vector<8x256xf32>,
    } else {
    }
    %c0 = arith.constant 0 : index
    %c0_1 = arith.constant 0 : index
    %3 = vector.load %arg8[%c0, %c0_1] : memref<8x256xf32, #tpu.memory_space<vmem>>, vector<8x256xf32>
    %c0_2 = arith.constant 0 : index
    %c0_3 = arith.constant 0 : index
    %4 = vector.load %arg3[%c0_2, %c0_3] : memref<8x384xbf16, #tpu.memory_space<vmem>>, vector<8x384xbf16>
    %c0_4 = arith.constant 0 : index
    %c0_5 = arith.constant 0 : index
    %5 = vector.load %arg4[%c0_4, %c0_5] : memref<384x256xbf16, #tpu.memory_space<vmem>>, vector<384x256xbf16>
    %cst = arith.constant dense<0.000000e+00> : vector<8x256xf32>
    %6 = tpu.matmul %4, %5, %cst {dimension_numbers = #tpu.dot_dimension_numbers<[1], [0], [0], [1], [0, 0, 1, 1], [], []>} : vector<8x384xbf16>, vector<384x256xbf16>, vector<8x256xf32> -> vector<8x256xf32>
    %7 = arith.addf %3, %6 : vector<8x256xf32>
    %c0_6 = arith.constant 0 : index
    %c0_7 = arith.constant 0 : index
    %8 = vector.load %arg8[%c0_6, %c0_7] : memref<8x256xf32, #tpu.memory_space<vmem>>, vector<8x256xf32>
    tpu.vector_store %arg8[%c0_6, %c0_7], %7 {strides = array<i32>} : memref<8x256xf32, #tpu.memory_space<vmem>>, vector<8x256xf32>,
    %c5_i32 = arith.constant 5 : i32
    %9 = arith.cmpi eq, %arg2, %c5_i32 : i32
    %10 = arith.extui %9 : i1 to i32
    %c0_i32_8 = arith.constant 0 : i32
    %11 = arith.cmpi ne, %10, %c0_i32_8 : i32
    scf.if %11 {
      %c0_9 = arith.constant 0 : index
      %c0_10 = arith.constant 0 : index
      %12 = vector.load %arg8[%c0_9, %c0_10] : memref<8x256xf32, #tpu.memory_space<vmem>>, vector<8x256xf32>
      %c0_11 = arith.constant 0 : index
      %c0_12 = arith.constant 0 : index
      %13 = vector.load %arg5[%c0_11, %c0_12] : memref<1x256xf32, #tpu.memory_space<vmem>>, vector<1x256xf32>
      %14 = vector.broadcast %13 : vector<1x256xf32> to vector<8x256xf32>
      %15 = arith.mulf %12, %14 : vector<8x256xf32>
      %c0_13 = arith.constant 0 : index
      %c0_14 = arith.constant 0 : index
      %16 = vector.load %arg6[%c0_13, %c0_14] : memref<1x256xf32, #tpu.memory_space<vmem>>, vector<1x256xf32>
      %17 = vector.broadcast %16 : vector<1x256xf32> to vector<8x256xf32>
      %18 = arith.addf %15, %17 : vector<8x256xf32>
      %cst_15 = arith.constant 0.000000e+00 : f32
      %19 = vector.broadcast %cst_15 : f32 to vector<8x256xf32>
      %20 = arith.maximumf %18, %19 : vector<8x256xf32>
      %c0_16 = arith.constant 0 : index
      %c0_17 = arith.constant 0 : index
      %21 = vector.load %arg7[%c0_16, %c0_17] : memref<8x256xf32, #tpu.memory_space<vmem>>, vector<8x256xf32>
      tpu.vector_store %arg7[%c0_16, %c0_17], %20 {strides = array<i32>} : memref<8x256xf32, #tpu.memory_space<vmem>>, vector<8x256xf32>,
    } else {
    }
    return
  }
  func.func @transform_0(%arg0: i32, %arg1: i32, %arg2: i32) -> (i32, i32) {
    %c0_i32 = arith.constant 0 : i32
    return %arg0, %arg2 : i32, i32
  }
  func.func @transform_1(%arg0: i32, %arg1: i32, %arg2: i32) -> (i32, i32) {
    %c0_i32 = arith.constant 0 : i32
    return %arg2, %arg1 : i32, i32
  }
  func.func @transform_2(%arg0: i32, %arg1: i32, %arg2: i32) -> (i32, i32) {
    %c0_i32 = arith.constant 0 : i32
    %c0_i32_0 = arith.constant 0 : i32
    return %c0_i32, %arg1 : i32, i32
  }
  func.func @transform_3(%arg0: i32, %arg1: i32, %arg2: i32) -> (i32, i32) {
    %c0_i32 = arith.constant 0 : i32
    %c0_i32_0 = arith.constant 0 : i32
    return %c0_i32, %arg1 : i32, i32
  }
  func.func @transform_4(%arg0: i32, %arg1: i32, %arg2: i32) -> (i32, i32) {
    %c0_i32 = arith.constant 0 : i32
    return %arg0, %arg1 : i32, i32
  }
}

module attributes {stable_mosaic.version = 11 : i64} {
  func.func @_mm_kernel(%arg0: i32, %arg1: i32, %arg2: i32, %arg3: memref<8x384xbf16, #tpu.memory_space<vmem>>, %arg4: memref<384x256xbf16, #tpu.memory_space<vmem>>, %arg5: memref<1x256xf32, #tpu.memory_space<vmem>>, %arg6: memref<1x256xf32, #tpu.memory_space<vmem>>, %arg7: memref<8x256xf32, #tpu.memory_space<vmem>>, %arg8: memref<8x256xf32, #tpu.memory_space<vmem>>, %arg9: memref<8x256xf32, #tpu.memory_space<vmem>>) attributes {dimension_semantics = [#tpu.dimension_semantics<parallel>, #tpu.dimension_semantics<parallel>, #tpu.dimension_semantics<arbitrary>], iteration_bounds = array<i64: 1, 1, 6>, scalar_prefetch = 0 : i64, scratch_operands = 1 : i64, tpu.core_type = #tpu.core_type<tc>, window_params = [{transform_indices = @transform_0, window_bounds = array<i64: 8, 384>}, {transform_indices = @transform_1, window_bounds = array<i64: 384, 256>}, {transform_indices = @transform_2, window_bounds = array<i64: 1, 256>}, {transform_indices = @transform_3, window_bounds = array<i64: 1, 256>}, {transform_indices = @transform_4, window_bounds = array<i64: 8, 256>}, {transform_indices = @transform_5, window_bounds = array<i64: 8, 256>}]} {
    %c0_i32 = arith.constant 0 : i32
    %0 = arith.cmpi eq, %arg2, %c0_i32 : i32
    %1 = arith.extui %0 : i1 to i32
    %c0_i32_0 = arith.constant 0 : i32
    %2 = arith.cmpi ne, %1, %c0_i32_0 : i32
    scf.if %2 {
      %cst_9 = arith.constant 0.000000e+00 : f32
      %12 = vector.broadcast %cst_9 : f32 to vector<8x256xf32>
      %c0_10 = arith.constant 0 : index
      %c0_11 = arith.constant 0 : index
      %13 = vector.load %arg9[%c0_10, %c0_11] : memref<8x256xf32, #tpu.memory_space<vmem>>, vector<8x256xf32>
      tpu.vector_store %arg9[%c0_10, %c0_11], %12 {strides = array<i32>} : memref<8x256xf32, #tpu.memory_space<vmem>>, vector<8x256xf32>,
    } else {
    }
    %c0 = arith.constant 0 : index
    %c0_1 = arith.constant 0 : index
    %3 = vector.load %arg9[%c0, %c0_1] : memref<8x256xf32, #tpu.memory_space<vmem>>, vector<8x256xf32>
    %c0_2 = arith.constant 0 : index
    %c0_3 = arith.constant 0 : index
    %4 = vector.load %arg3[%c0_2, %c0_3] : memref<8x384xbf16, #tpu.memory_space<vmem>>, vector<8x384xbf16>
    %c0_4 = arith.constant 0 : index
    %c0_5 = arith.constant 0 : index
    %5 = vector.load %arg4[%c0_4, %c0_5] : memref<384x256xbf16, #tpu.memory_space<vmem>>, vector<384x256xbf16>
    %cst = arith.constant dense<0.000000e+00> : vector<8x256xf32>
    %6 = tpu.matmul %4, %5, %cst {dimension_numbers = #tpu.dot_dimension_numbers<[1], [0], [0], [1], [0, 0, 1, 1], [], []>} : vector<8x384xbf16>, vector<384x256xbf16>, vector<8x256xf32> -> vector<8x256xf32>
    %7 = arith.addf %3, %6 : vector<8x256xf32>
    %c0_6 = arith.constant 0 : index
    %c0_7 = arith.constant 0 : index
    %8 = vector.load %arg9[%c0_6, %c0_7] : memref<8x256xf32, #tpu.memory_space<vmem>>, vector<8x256xf32>
    tpu.vector_store %arg9[%c0_6, %c0_7], %7 {strides = array<i32>} : memref<8x256xf32, #tpu.memory_space<vmem>>, vector<8x256xf32>,
    %c5_i32 = arith.constant 5 : i32
    %9 = arith.cmpi eq, %arg2, %c5_i32 : i32
    %10 = arith.extui %9 : i1 to i32
    %c0_i32_8 = arith.constant 0 : i32
    %11 = arith.cmpi ne, %10, %c0_i32_8 : i32
    scf.if %11 {
      %c0_9 = arith.constant 0 : index
      %c0_10 = arith.constant 0 : index
      %12 = vector.load %arg9[%c0_9, %c0_10] : memref<8x256xf32, #tpu.memory_space<vmem>>, vector<8x256xf32>
      %c0_11 = arith.constant 0 : index
      %c0_12 = arith.constant 0 : index
      %13 = vector.load %arg5[%c0_11, %c0_12] : memref<1x256xf32, #tpu.memory_space<vmem>>, vector<1x256xf32>
      %14 = vector.broadcast %13 : vector<1x256xf32> to vector<8x256xf32>
      %15 = arith.mulf %12, %14 : vector<8x256xf32>
      %c0_13 = arith.constant 0 : index
      %c0_14 = arith.constant 0 : index
      %16 = vector.load %arg6[%c0_13, %c0_14] : memref<1x256xf32, #tpu.memory_space<vmem>>, vector<1x256xf32>
      %17 = vector.broadcast %16 : vector<1x256xf32> to vector<8x256xf32>
      %18 = arith.addf %15, %17 : vector<8x256xf32>
      %c0_15 = arith.constant 0 : index
      %c0_16 = arith.constant 0 : index
      %19 = vector.load %arg7[%c0_15, %c0_16] : memref<8x256xf32, #tpu.memory_space<vmem>>, vector<8x256xf32>
      %20 = arith.addf %18, %19 : vector<8x256xf32>
      %cst_17 = arith.constant 0.000000e+00 : f32
      %21 = vector.broadcast %cst_17 : f32 to vector<8x256xf32>
      %22 = arith.maximumf %20, %21 : vector<8x256xf32>
      %c0_18 = arith.constant 0 : index
      %c0_19 = arith.constant 0 : index
      %23 = vector.load %arg8[%c0_18, %c0_19] : memref<8x256xf32, #tpu.memory_space<vmem>>, vector<8x256xf32>
      tpu.vector_store %arg8[%c0_18, %c0_19], %22 {strides = array<i32>} : memref<8x256xf32, #tpu.memory_space<vmem>>, vector<8x256xf32>,
    } else {
    }
    return
  }
  func.func @transform_0(%arg0: i32, %arg1: i32, %arg2: i32) -> (i32, i32) {
    %c0_i32 = arith.constant 0 : i32
    return %arg0, %arg2 : i32, i32
  }
  func.func @transform_1(%arg0: i32, %arg1: i32, %arg2: i32) -> (i32, i32) {
    %c0_i32 = arith.constant 0 : i32
    return %arg2, %arg1 : i32, i32
  }
  func.func @transform_2(%arg0: i32, %arg1: i32, %arg2: i32) -> (i32, i32) {
    %c0_i32 = arith.constant 0 : i32
    %c0_i32_0 = arith.constant 0 : i32
    return %c0_i32, %arg1 : i32, i32
  }
  func.func @transform_3(%arg0: i32, %arg1: i32, %arg2: i32) -> (i32, i32) {
    %c0_i32 = arith.constant 0 : i32
    %c0_i32_0 = arith.constant 0 : i32
    return %c0_i32, %arg1 : i32, i32
  }
  func.func @transform_4(%arg0: i32, %arg1: i32, %arg2: i32) -> (i32, i32) {
    %c0_i32 = arith.constant 0 : i32
    return %arg0, %arg1 : i32, i32
  }
  func.func @transform_5(%arg0: i32, %arg1: i32, %arg2: i32) -> (i32, i32) {
    %c0_i32 = arith.constant 0 : i32
    return %arg0, %arg1 : i32, i32
  }
}

module attributes {stable_mosaic.version = 11 : i64} {
  func.func @_mm_kernel(%arg0: i32, %arg1: i32, %arg2: i32, %arg3: memref<8x384xbf16, #tpu.memory_space<vmem>>, %arg4: memref<384x256xbf16, #tpu.memory_space<vmem>>, %arg5: memref<1x256xf32, #tpu.memory_space<vmem>>, %arg6: memref<1x256xf32, #tpu.memory_space<vmem>>, %arg7: memref<8x256xf32, #tpu.memory_space<vmem>>, %arg8: memref<8x256xf32, #tpu.memory_space<vmem>>) attributes {dimension_semantics = [#tpu.dimension_semantics<parallel>, #tpu.dimension_semantics<parallel>, #tpu.dimension_semantics<arbitrary>], iteration_bounds = array<i64: 1, 2, 6>, scalar_prefetch = 0 : i64, scratch_operands = 1 : i64, tpu.core_type = #tpu.core_type<tc>, window_params = [{transform_indices = @transform_0, window_bounds = array<i64: 8, 384>}, {transform_indices = @transform_1, window_bounds = array<i64: 384, 256>}, {transform_indices = @transform_2, window_bounds = array<i64: 1, 256>}, {transform_indices = @transform_3, window_bounds = array<i64: 1, 256>}, {transform_indices = @transform_4, window_bounds = array<i64: 8, 256>}]} {
    %c0_i32 = arith.constant 0 : i32
    %0 = arith.cmpi eq, %arg2, %c0_i32 : i32
    %1 = arith.extui %0 : i1 to i32
    %c0_i32_0 = arith.constant 0 : i32
    %2 = arith.cmpi ne, %1, %c0_i32_0 : i32
    scf.if %2 {
      %cst_9 = arith.constant 0.000000e+00 : f32
      %12 = vector.broadcast %cst_9 : f32 to vector<8x256xf32>
      %c0_10 = arith.constant 0 : index
      %c0_11 = arith.constant 0 : index
      %13 = vector.load %arg8[%c0_10, %c0_11] : memref<8x256xf32, #tpu.memory_space<vmem>>, vector<8x256xf32>
      tpu.vector_store %arg8[%c0_10, %c0_11], %12 {strides = array<i32>} : memref<8x256xf32, #tpu.memory_space<vmem>>, vector<8x256xf32>,
    } else {
    }
    %c0 = arith.constant 0 : index
    %c0_1 = arith.constant 0 : index
    %3 = vector.load %arg8[%c0, %c0_1] : memref<8x256xf32, #tpu.memory_space<vmem>>, vector<8x256xf32>
    %c0_2 = arith.constant 0 : index
    %c0_3 = arith.constant 0 : index
    %4 = vector.load %arg3[%c0_2, %c0_3] : memref<8x384xbf16, #tpu.memory_space<vmem>>, vector<8x384xbf16>
    %c0_4 = arith.constant 0 : index
    %c0_5 = arith.constant 0 : index
    %5 = vector.load %arg4[%c0_4, %c0_5] : memref<384x256xbf16, #tpu.memory_space<vmem>>, vector<384x256xbf16>
    %cst = arith.constant dense<0.000000e+00> : vector<8x256xf32>
    %6 = tpu.matmul %4, %5, %cst {dimension_numbers = #tpu.dot_dimension_numbers<[1], [0], [0], [1], [0, 0, 1, 1], [], []>} : vector<8x384xbf16>, vector<384x256xbf16>, vector<8x256xf32> -> vector<8x256xf32>
    %7 = arith.addf %3, %6 : vector<8x256xf32>
    %c0_6 = arith.constant 0 : index
    %c0_7 = arith.constant 0 : index
    %8 = vector.load %arg8[%c0_6, %c0_7] : memref<8x256xf32, #tpu.memory_space<vmem>>, vector<8x256xf32>
    tpu.vector_store %arg8[%c0_6, %c0_7], %7 {strides = array<i32>} : memref<8x256xf32, #tpu.memory_space<vmem>>, vector<8x256xf32>,
    %c5_i32 = arith.constant 5 : i32
    %9 = arith.cmpi eq, %arg2, %c5_i32 : i32
    %10 = arith.extui %9 : i1 to i32
    %c0_i32_8 = arith.constant 0 : i32
    %11 = arith.cmpi ne, %10, %c0_i32_8 : i32
    scf.if %11 {
      %c0_9 = arith.constant 0 : index
      %c0_10 = arith.constant 0 : index
      %12 = vector.load %arg8[%c0_9, %c0_10] : memref<8x256xf32, #tpu.memory_space<vmem>>, vector<8x256xf32>
      %c0_11 = arith.constant 0 : index
      %c0_12 = arith.constant 0 : index
      %13 = vector.load %arg5[%c0_11, %c0_12] : memref<1x256xf32, #tpu.memory_space<vmem>>, vector<1x256xf32>
      %14 = vector.broadcast %13 : vector<1x256xf32> to vector<8x256xf32>
      %15 = arith.mulf %12, %14 : vector<8x256xf32>
      %c0_13 = arith.constant 0 : index
      %c0_14 = arith.constant 0 : index
      %16 = vector.load %arg6[%c0_13, %c0_14] : memref<1x256xf32, #tpu.memory_space<vmem>>, vector<1x256xf32>
      %17 = vector.broadcast %16 : vector<1x256xf32> to vector<8x256xf32>
      %18 = arith.addf %15, %17 : vector<8x256xf32>
      %cst_15 = arith.constant 0.000000e+00 : f32
      %19 = vector.broadcast %cst_15 : f32 to vector<8x256xf32>
      %20 = arith.maximumf %18, %19 : vector<8x256xf32>
      %c0_16 = arith.constant 0 : index
      %c0_17 = arith.constant 0 : index
      %21 = vector.load %arg7[%c0_16, %c0_17] : memref<8x256xf32, #tpu.memory_space<vmem>>, vector<8x256xf32>
      tpu.vector_store %arg7[%c0_16, %c0_17], %20 {strides = array<i32>} : memref<8x256xf32, #tpu.memory_space<vmem>>, vector<8x256xf32>,
    } else {
    }
    return
  }
  func.func @transform_0(%arg0: i32, %arg1: i32, %arg2: i32) -> (i32, i32) {
    %c0_i32 = arith.constant 0 : i32
    return %arg0, %arg2 : i32, i32
  }
  func.func @transform_1(%arg0: i32, %arg1: i32, %arg2: i32) -> (i32, i32) {
    %c0_i32 = arith.constant 0 : i32
    return %arg2, %arg1 : i32, i32
  }
  func.func @transform_2(%arg0: i32, %arg1: i32, %arg2: i32) -> (i32, i32) {
    %c0_i32 = arith.constant 0 : i32
    %c0_i32_0 = arith.constant 0 : i32
    return %c0_i32, %arg1 : i32, i32
  }
  func.func @transform_3(%arg0: i32, %arg1: i32, %arg2: i32) -> (i32, i32) {
    %c0_i32 = arith.constant 0 : i32
    %c0_i32_0 = arith.constant 0 : i32
    return %c0_i32, %arg1 : i32, i32
  }
  func.func @transform_4(%arg0: i32, %arg1: i32, %arg2: i32) -> (i32, i32) {
    %c0_i32 = arith.constant 0 : i32
    return %arg0, %arg1 : i32, i32
  }
}

module attributes {stable_mosaic.version = 11 : i64} {
  func.func @_mm_kernel(%arg0: i32, %arg1: i32, %arg2: i32, %arg3: memref<8x256xbf16, #tpu.memory_space<vmem>>, %arg4: memref<256x256xbf16, #tpu.memory_space<vmem>>, %arg5: memref<1x256xf32, #tpu.memory_space<vmem>>, %arg6: memref<1x256xf32, #tpu.memory_space<vmem>>, %arg7: memref<8x256xf32, #tpu.memory_space<vmem>>, %arg8: memref<8x256xf32, #tpu.memory_space<vmem>>) attributes {dimension_semantics = [#tpu.dimension_semantics<parallel>, #tpu.dimension_semantics<parallel>, #tpu.dimension_semantics<arbitrary>], iteration_bounds = array<i64: 1, 2, 1>, scalar_prefetch = 0 : i64, scratch_operands = 1 : i64, tpu.core_type = #tpu.core_type<tc>, window_params = [{transform_indices = @transform_0, window_bounds = array<i64: 8, 256>}, {transform_indices = @transform_1, window_bounds = array<i64: 256, 256>}, {transform_indices = @transform_2, window_bounds = array<i64: 1, 256>}, {transform_indices = @transform_3, window_bounds = array<i64: 1, 256>}, {transform_indices = @transform_4, window_bounds = array<i64: 8, 256>}]} {
    %c0_i32 = arith.constant 0 : i32
    %0 = arith.cmpi eq, %arg2, %c0_i32 : i32
    %1 = arith.extui %0 : i1 to i32
    %c0_i32_0 = arith.constant 0 : i32
    %2 = arith.cmpi ne, %1, %c0_i32_0 : i32
    scf.if %2 {
      %cst_10 = arith.constant 0.000000e+00 : f32
      %12 = vector.broadcast %cst_10 : f32 to vector<8x256xf32>
      %c0_11 = arith.constant 0 : index
      %c0_12 = arith.constant 0 : index
      %13 = vector.load %arg8[%c0_11, %c0_12] : memref<8x256xf32, #tpu.memory_space<vmem>>, vector<8x256xf32>
      tpu.vector_store %arg8[%c0_11, %c0_12], %12 {strides = array<i32>} : memref<8x256xf32, #tpu.memory_space<vmem>>, vector<8x256xf32>,
    } else {
    }
    %c0 = arith.constant 0 : index
    %c0_1 = arith.constant 0 : index
    %3 = vector.load %arg8[%c0, %c0_1] : memref<8x256xf32, #tpu.memory_space<vmem>>, vector<8x256xf32>
    %c0_2 = arith.constant 0 : index
    %c0_3 = arith.constant 0 : index
    %4 = vector.load %arg3[%c0_2, %c0_3] : memref<8x256xbf16, #tpu.memory_space<vmem>>, vector<8x256xbf16>
    %c0_4 = arith.constant 0 : index
    %c0_5 = arith.constant 0 : index
    %5 = vector.load %arg4[%c0_4, %c0_5] : memref<256x256xbf16, #tpu.memory_space<vmem>>, vector<256x256xbf16>
    %cst = arith.constant dense<0.000000e+00> : vector<8x256xf32>
    %6 = tpu.matmul %4, %5, %cst {dimension_numbers = #tpu.dot_dimension_numbers<[1], [0], [0], [1], [0, 0, 1, 1], [], []>} : vector<8x256xbf16>, vector<256x256xbf16>, vector<8x256xf32> -> vector<8x256xf32>
    %7 = arith.addf %3, %6 : vector<8x256xf32>
    %c0_6 = arith.constant 0 : index
    %c0_7 = arith.constant 0 : index
    %8 = vector.load %arg8[%c0_6, %c0_7] : memref<8x256xf32, #tpu.memory_space<vmem>>, vector<8x256xf32>
    tpu.vector_store %arg8[%c0_6, %c0_7], %7 {strides = array<i32>} : memref<8x256xf32, #tpu.memory_space<vmem>>, vector<8x256xf32>,
    %c0_i32_8 = arith.constant 0 : i32
    %9 = arith.cmpi eq, %arg2, %c0_i32_8 : i32
    %10 = arith.extui %9 : i1 to i32
    %c0_i32_9 = arith.constant 0 : i32
    %11 = arith.cmpi ne, %10, %c0_i32_9 : i32
    scf.if %11 {
      %c0_10 = arith.constant 0 : index
      %c0_11 = arith.constant 0 : index
      %12 = vector.load %arg8[%c0_10, %c0_11] : memref<8x256xf32, #tpu.memory_space<vmem>>, vector<8x256xf32>
      %c0_12 = arith.constant 0 : index
      %c0_13 = arith.constant 0 : index
      %13 = vector.load %arg5[%c0_12, %c0_13] : memref<1x256xf32, #tpu.memory_space<vmem>>, vector<1x256xf32>
      %14 = vector.broadcast %13 : vector<1x256xf32> to vector<8x256xf32>
      %15 = arith.mulf %12, %14 : vector<8x256xf32>
      %c0_14 = arith.constant 0 : index
      %c0_15 = arith.constant 0 : index
      %16 = vector.load %arg6[%c0_14, %c0_15] : memref<1x256xf32, #tpu.memory_space<vmem>>, vector<1x256xf32>
      %17 = vector.broadcast %16 : vector<1x256xf32> to vector<8x256xf32>
      %18 = arith.addf %15, %17 : vector<8x256xf32>
      %c0_16 = arith.constant 0 : index
      %c0_17 = arith.constant 0 : index
      %19 = vector.load %arg7[%c0_16, %c0_17] : memref<8x256xf32, #tpu.memory_space<vmem>>, vector<8x256xf32>
      tpu.vector_store %arg7[%c0_16, %c0_17], %18 {strides = array<i32>} : memref<8x256xf32, #tpu.memory_space<vmem>>, vector<8x256xf32>,
    } else {
    }
    return
  }
  func.func @transform_0(%arg0: i32, %arg1: i32, %arg2: i32) -> (i32, i32) {
    %c0_i32 = arith.constant 0 : i32
    return %arg0, %arg2 : i32, i32
  }
  func.func @transform_1(%arg0: i32, %arg1: i32, %arg2: i32) -> (i32, i32) {
    %c0_i32 = arith.constant 0 : i32
    return %arg2, %arg1 : i32, i32
  }
  func.func @transform_2(%arg0: i32, %arg1: i32, %arg2: i32) -> (i32, i32) {
    %c0_i32 = arith.constant 0 : i32
    %c0_i32_0 = arith.constant 0 : i32
    return %c0_i32, %arg1 : i32, i32
  }
  func.func @transform_3(%arg0: i32, %arg1: i32, %arg2: i32) -> (i32, i32) {
    %c0_i32 = arith.constant 0 : i32
    %c0_i32_0 = arith.constant 0 : i32
    return %c0_i32, %arg1 : i32, i32
  }
  func.func @transform_4(%arg0: i32, %arg1: i32, %arg2: i32) -> (i32, i32) {
    %c0_i32 = arith.constant 0 : i32
    return %arg0, %arg1 : i32, i32
  }
}

module attributes {stable_mosaic.version = 11 : i64} {
  func.func @_mm_kernel(%arg0: i32, %arg1: i32, %arg2: i32, %arg3: memref<8x512xbf16, #tpu.memory_space<vmem>>, %arg4: memref<512x256xbf16, #tpu.memory_space<vmem>>, %arg5: memref<1x256xf32, #tpu.memory_space<vmem>>, %arg6: memref<1x256xf32, #tpu.memory_space<vmem>>, %arg7: memref<8x256xf32, #tpu.memory_space<vmem>>, %arg8: memref<8x256xf32, #tpu.memory_space<vmem>>, %arg9: memref<8x256xf32, #tpu.memory_space<vmem>>) attributes {dimension_semantics = [#tpu.dimension_semantics<parallel>, #tpu.dimension_semantics<parallel>, #tpu.dimension_semantics<arbitrary>], iteration_bounds = array<i64: 1, 2, 9>, scalar_prefetch = 0 : i64, scratch_operands = 1 : i64, tpu.core_type = #tpu.core_type<tc>, window_params = [{transform_indices = @transform_0, window_bounds = array<i64: 8, 512>}, {transform_indices = @transform_1, window_bounds = array<i64: 512, 256>}, {transform_indices = @transform_2, window_bounds = array<i64: 1, 256>}, {transform_indices = @transform_3, window_bounds = array<i64: 1, 256>}, {transform_indices = @transform_4, window_bounds = array<i64: 8, 256>}, {transform_indices = @transform_5, window_bounds = array<i64: 8, 256>}]} {
    %c0_i32 = arith.constant 0 : i32
    %0 = arith.cmpi eq, %arg2, %c0_i32 : i32
    %1 = arith.extui %0 : i1 to i32
    %c0_i32_0 = arith.constant 0 : i32
    %2 = arith.cmpi ne, %1, %c0_i32_0 : i32
    scf.if %2 {
      %cst_9 = arith.constant 0.000000e+00 : f32
      %12 = vector.broadcast %cst_9 : f32 to vector<8x256xf32>
      %c0_10 = arith.constant 0 : index
      %c0_11 = arith.constant 0 : index
      %13 = vector.load %arg9[%c0_10, %c0_11] : memref<8x256xf32, #tpu.memory_space<vmem>>, vector<8x256xf32>
      tpu.vector_store %arg9[%c0_10, %c0_11], %12 {strides = array<i32>} : memref<8x256xf32, #tpu.memory_space<vmem>>, vector<8x256xf32>,
    } else {
    }
    %c0 = arith.constant 0 : index
    %c0_1 = arith.constant 0 : index
    %3 = vector.load %arg9[%c0, %c0_1] : memref<8x256xf32, #tpu.memory_space<vmem>>, vector<8x256xf32>
    %c0_2 = arith.constant 0 : index
    %c0_3 = arith.constant 0 : index
    %4 = vector.load %arg3[%c0_2, %c0_3] : memref<8x512xbf16, #tpu.memory_space<vmem>>, vector<8x512xbf16>
    %c0_4 = arith.constant 0 : index
    %c0_5 = arith.constant 0 : index
    %5 = vector.load %arg4[%c0_4, %c0_5] : memref<512x256xbf16, #tpu.memory_space<vmem>>, vector<512x256xbf16>
    %cst = arith.constant dense<0.000000e+00> : vector<8x256xf32>
    %6 = tpu.matmul %4, %5, %cst {dimension_numbers = #tpu.dot_dimension_numbers<[1], [0], [0], [1], [0, 0, 1, 1], [], []>} : vector<8x512xbf16>, vector<512x256xbf16>, vector<8x256xf32> -> vector<8x256xf32>
    %7 = arith.addf %3, %6 : vector<8x256xf32>
    %c0_6 = arith.constant 0 : index
    %c0_7 = arith.constant 0 : index
    %8 = vector.load %arg9[%c0_6, %c0_7] : memref<8x256xf32, #tpu.memory_space<vmem>>, vector<8x256xf32>
    tpu.vector_store %arg9[%c0_6, %c0_7], %7 {strides = array<i32>} : memref<8x256xf32, #tpu.memory_space<vmem>>, vector<8x256xf32>,
    %c8_i32 = arith.constant 8 : i32
    %9 = arith.cmpi eq, %arg2, %c8_i32 : i32
    %10 = arith.extui %9 : i1 to i32
    %c0_i32_8 = arith.constant 0 : i32
    %11 = arith.cmpi ne, %10, %c0_i32_8 : i32
    scf.if %11 {
      %c0_9 = arith.constant 0 : index
      %c0_10 = arith.constant 0 : index
      %12 = vector.load %arg9[%c0_9, %c0_10] : memref<8x256xf32, #tpu.memory_space<vmem>>, vector<8x256xf32>
      %c0_11 = arith.constant 0 : index
      %c0_12 = arith.constant 0 : index
      %13 = vector.load %arg5[%c0_11, %c0_12] : memref<1x256xf32, #tpu.memory_space<vmem>>, vector<1x256xf32>
      %14 = vector.broadcast %13 : vector<1x256xf32> to vector<8x256xf32>
      %15 = arith.mulf %12, %14 : vector<8x256xf32>
      %c0_13 = arith.constant 0 : index
      %c0_14 = arith.constant 0 : index
      %16 = vector.load %arg6[%c0_13, %c0_14] : memref<1x256xf32, #tpu.memory_space<vmem>>, vector<1x256xf32>
      %17 = vector.broadcast %16 : vector<1x256xf32> to vector<8x256xf32>
      %18 = arith.addf %15, %17 : vector<8x256xf32>
      %c0_15 = arith.constant 0 : index
      %c0_16 = arith.constant 0 : index
      %19 = vector.load %arg7[%c0_15, %c0_16] : memref<8x256xf32, #tpu.memory_space<vmem>>, vector<8x256xf32>
      %20 = arith.addf %18, %19 : vector<8x256xf32>
      %cst_17 = arith.constant 0.000000e+00 : f32
      %21 = vector.broadcast %cst_17 : f32 to vector<8x256xf32>
      %22 = arith.maximumf %20, %21 : vector<8x256xf32>
      %c0_18 = arith.constant 0 : index
      %c0_19 = arith.constant 0 : index
      %23 = vector.load %arg8[%c0_18, %c0_19] : memref<8x256xf32, #tpu.memory_space<vmem>>, vector<8x256xf32>
      tpu.vector_store %arg8[%c0_18, %c0_19], %22 {strides = array<i32>} : memref<8x256xf32, #tpu.memory_space<vmem>>, vector<8x256xf32>,
    } else {
    }
    return
  }
  func.func @transform_0(%arg0: i32, %arg1: i32, %arg2: i32) -> (i32, i32) {
    %c0_i32 = arith.constant 0 : i32
    return %arg0, %arg2 : i32, i32
  }
  func.func @transform_1(%arg0: i32, %arg1: i32, %arg2: i32) -> (i32, i32) {
    %c0_i32 = arith.constant 0 : i32
    return %arg2, %arg1 : i32, i32
  }
  func.func @transform_2(%arg0: i32, %arg1: i32, %arg2: i32) -> (i32, i32) {
    %c0_i32 = arith.constant 0 : i32
    %c0_i32_0 = arith.constant 0 : i32
    return %c0_i32, %arg1 : i32, i32
  }
  func.func @transform_3(%arg0: i32, %arg1: i32, %arg2: i32) -> (i32, i32) {
    %c0_i32 = arith.constant 0 : i32
    %c0_i32_0 = arith.constant 0 : i32
    return %c0_i32, %arg1 : i32, i32
  }
  func.func @transform_4(%arg0: i32, %arg1: i32, %arg2: i32) -> (i32, i32) {
    %c0_i32 = arith.constant 0 : i32
    return %arg0, %arg1 : i32, i32
  }
  func.func @transform_5(%arg0: i32, %arg1: i32, %arg2: i32) -> (i32, i32) {
    %c0_i32 = arith.constant 0 : i32
    return %arg0, %arg1 : i32, i32
  }
}

module attributes {stable_mosaic.version = 11 : i64} {
  func.func @_mm_kernel(%arg0: i32, %arg1: i32, %arg2: i32, %arg3: memref<8x512xbf16, #tpu.memory_space<vmem>>, %arg4: memref<512x256xbf16, #tpu.memory_space<vmem>>, %arg5: memref<1x256xf32, #tpu.memory_space<vmem>>, %arg6: memref<1x256xf32, #tpu.memory_space<vmem>>, %arg7: memref<8x256xf32, #tpu.memory_space<vmem>>, %arg8: memref<8x256xf32, #tpu.memory_space<vmem>>) attributes {dimension_semantics = [#tpu.dimension_semantics<parallel>, #tpu.dimension_semantics<parallel>, #tpu.dimension_semantics<arbitrary>], iteration_bounds = array<i64: 1, 2, 9>, scalar_prefetch = 0 : i64, scratch_operands = 1 : i64, tpu.core_type = #tpu.core_type<tc>, window_params = [{transform_indices = @transform_0, window_bounds = array<i64: 8, 512>}, {transform_indices = @transform_1, window_bounds = array<i64: 512, 256>}, {transform_indices = @transform_2, window_bounds = array<i64: 1, 256>}, {transform_indices = @transform_3, window_bounds = array<i64: 1, 256>}, {transform_indices = @transform_4, window_bounds = array<i64: 8, 256>}]} {
    %c0_i32 = arith.constant 0 : i32
    %0 = arith.cmpi eq, %arg2, %c0_i32 : i32
    %1 = arith.extui %0 : i1 to i32
    %c0_i32_0 = arith.constant 0 : i32
    %2 = arith.cmpi ne, %1, %c0_i32_0 : i32
    scf.if %2 {
      %cst_9 = arith.constant 0.000000e+00 : f32
      %12 = vector.broadcast %cst_9 : f32 to vector<8x256xf32>
      %c0_10 = arith.constant 0 : index
      %c0_11 = arith.constant 0 : index
      %13 = vector.load %arg8[%c0_10, %c0_11] : memref<8x256xf32, #tpu.memory_space<vmem>>, vector<8x256xf32>
      tpu.vector_store %arg8[%c0_10, %c0_11], %12 {strides = array<i32>} : memref<8x256xf32, #tpu.memory_space<vmem>>, vector<8x256xf32>,
    } else {
    }
    %c0 = arith.constant 0 : index
    %c0_1 = arith.constant 0 : index
    %3 = vector.load %arg8[%c0, %c0_1] : memref<8x256xf32, #tpu.memory_space<vmem>>, vector<8x256xf32>
    %c0_2 = arith.constant 0 : index
    %c0_3 = arith.constant 0 : index
    %4 = vector.load %arg3[%c0_2, %c0_3] : memref<8x512xbf16, #tpu.memory_space<vmem>>, vector<8x512xbf16>
    %c0_4 = arith.constant 0 : index
    %c0_5 = arith.constant 0 : index
    %5 = vector.load %arg4[%c0_4, %c0_5] : memref<512x256xbf16, #tpu.memory_space<vmem>>, vector<512x256xbf16>
    %cst = arith.constant dense<0.000000e+00> : vector<8x256xf32>
    %6 = tpu.matmul %4, %5, %cst {dimension_numbers = #tpu.dot_dimension_numbers<[1], [0], [0], [1], [0, 0, 1, 1], [], []>} : vector<8x512xbf16>, vector<512x256xbf16>, vector<8x256xf32> -> vector<8x256xf32>
    %7 = arith.addf %3, %6 : vector<8x256xf32>
    %c0_6 = arith.constant 0 : index
    %c0_7 = arith.constant 0 : index
    %8 = vector.load %arg8[%c0_6, %c0_7] : memref<8x256xf32, #tpu.memory_space<vmem>>, vector<8x256xf32>
    tpu.vector_store %arg8[%c0_6, %c0_7], %7 {strides = array<i32>} : memref<8x256xf32, #tpu.memory_space<vmem>>, vector<8x256xf32>,
    %c8_i32 = arith.constant 8 : i32
    %9 = arith.cmpi eq, %arg2, %c8_i32 : i32
    %10 = arith.extui %9 : i1 to i32
    %c0_i32_8 = arith.constant 0 : i32
    %11 = arith.cmpi ne, %10, %c0_i32_8 : i32
    scf.if %11 {
      %c0_9 = arith.constant 0 : index
      %c0_10 = arith.constant 0 : index
      %12 = vector.load %arg8[%c0_9, %c0_10] : memref<8x256xf32, #tpu.memory_space<vmem>>, vector<8x256xf32>
      %c0_11 = arith.constant 0 : index
      %c0_12 = arith.constant 0 : index
      %13 = vector.load %arg5[%c0_11, %c0_12] : memref<1x256xf32, #tpu.memory_space<vmem>>, vector<1x256xf32>
      %14 = vector.broadcast %13 : vector<1x256xf32> to vector<8x256xf32>
      %15 = arith.mulf %12, %14 : vector<8x256xf32>
      %c0_13 = arith.constant 0 : index
      %c0_14 = arith.constant 0 : index
      %16 = vector.load %arg6[%c0_13, %c0_14] : memref<1x256xf32, #tpu.memory_space<vmem>>, vector<1x256xf32>
      %17 = vector.broadcast %16 : vector<1x256xf32> to vector<8x256xf32>
      %18 = arith.addf %15, %17 : vector<8x256xf32>
      %cst_15 = arith.constant 0.000000e+00 : f32
      %19 = vector.broadcast %cst_15 : f32 to vector<8x256xf32>
      %20 = arith.maximumf %18, %19 : vector<8x256xf32>
      %c0_16 = arith.constant 0 : index
      %c0_17 = arith.constant 0 : index
      %21 = vector.load %arg7[%c0_16, %c0_17] : memref<8x256xf32, #tpu.memory_space<vmem>>, vector<8x256xf32>
      tpu.vector_store %arg7[%c0_16, %c0_17], %20 {strides = array<i32>} : memref<8x256xf32, #tpu.memory_space<vmem>>, vector<8x256xf32>,
    } else {
    }
    return
  }
  func.func @transform_0(%arg0: i32, %arg1: i32, %arg2: i32) -> (i32, i32) {
    %c0_i32 = arith.constant 0 : i32
    return %arg0, %arg2 : i32, i32
  }
  func.func @transform_1(%arg0: i32, %arg1: i32, %arg2: i32) -> (i32, i32) {
    %c0_i32 = arith.constant 0 : i32
    return %arg2, %arg1 : i32, i32
  }
  func.func @transform_2(%arg0: i32, %arg1: i32, %arg2: i32) -> (i32, i32) {
    %c0_i32 = arith.constant 0 : i32
    %c0_i32_0 = arith.constant 0 : i32
    return %c0_i32, %arg1 : i32, i32
  }
  func.func @transform_3(%arg0: i32, %arg1: i32, %arg2: i32) -> (i32, i32) {
    %c0_i32 = arith.constant 0 : i32
    %c0_i32_0 = arith.constant 0 : i32
    return %c0_i32, %arg1 : i32, i32
  }
  func.func @transform_4(%arg0: i32, %arg1: i32, %arg2: i32) -> (i32, i32) {
    %c0_i32 = arith.constant 0 : i32
    return %arg0, %arg1 : i32, i32
  }
}

module attributes {stable_mosaic.version = 11 : i64} {
  func.func @_mm_kernel(%arg0: i32, %arg1: i32, %arg2: i32, %arg3: memref<8x512xbf16, #tpu.memory_space<vmem>>, %arg4: memref<512x256xbf16, #tpu.memory_space<vmem>>, %arg5: memref<1x256xf32, #tpu.memory_space<vmem>>, %arg6: memref<1x256xf32, #tpu.memory_space<vmem>>, %arg7: memref<8x256xf32, #tpu.memory_space<vmem>>, %arg8: memref<8x256xf32, #tpu.memory_space<vmem>>, %arg9: memref<8x256xf32, #tpu.memory_space<vmem>>) attributes {dimension_semantics = [#tpu.dimension_semantics<parallel>, #tpu.dimension_semantics<parallel>, #tpu.dimension_semantics<arbitrary>], iteration_bounds = array<i64: 1, 2, 9>, scalar_prefetch = 0 : i64, scratch_operands = 1 : i64, tpu.core_type = #tpu.core_type<tc>, window_params = [{transform_indices = @transform_0, window_bounds = array<i64: 8, 512>}, {transform_indices = @transform_1, window_bounds = array<i64: 512, 256>}, {transform_indices = @transform_2, window_bounds = array<i64: 1, 256>}, {transform_indices = @transform_3, window_bounds = array<i64: 1, 256>}, {transform_indices = @transform_4, window_bounds = array<i64: 8, 256>}, {transform_indices = @transform_5, window_bounds = array<i64: 8, 256>}]} {
    %c0_i32 = arith.constant 0 : i32
    %0 = arith.cmpi eq, %arg2, %c0_i32 : i32
    %1 = arith.extui %0 : i1 to i32
    %c0_i32_0 = arith.constant 0 : i32
    %2 = arith.cmpi ne, %1, %c0_i32_0 : i32
    scf.if %2 {
      %cst_9 = arith.constant 0.000000e+00 : f32
      %12 = vector.broadcast %cst_9 : f32 to vector<8x256xf32>
      %c0_10 = arith.constant 0 : index
      %c0_11 = arith.constant 0 : index
      %13 = vector.load %arg9[%c0_10, %c0_11] : memref<8x256xf32, #tpu.memory_space<vmem>>, vector<8x256xf32>
      tpu.vector_store %arg9[%c0_10, %c0_11], %12 {strides = array<i32>} : memref<8x256xf32, #tpu.memory_space<vmem>>, vector<8x256xf32>,
    } else {
    }
    %c0 = arith.constant 0 : index
    %c0_1 = arith.constant 0 : index
    %3 = vector.load %arg9[%c0, %c0_1] : memref<8x256xf32, #tpu.memory_space<vmem>>, vector<8x256xf32>
    %c0_2 = arith.constant 0 : index
    %c0_3 = arith.constant 0 : index
    %4 = vector.load %arg3[%c0_2, %c0_3] : memref<8x512xbf16, #tpu.memory_space<vmem>>, vector<8x512xbf16>
    %c0_4 = arith.constant 0 : index
    %c0_5 = arith.constant 0 : index
    %5 = vector.load %arg4[%c0_4, %c0_5] : memref<512x256xbf16, #tpu.memory_space<vmem>>, vector<512x256xbf16>
    %cst = arith.constant dense<0.000000e+00> : vector<8x256xf32>
    %6 = tpu.matmul %4, %5, %cst {dimension_numbers = #tpu.dot_dimension_numbers<[1], [0], [0], [1], [0, 0, 1, 1], [], []>} : vector<8x512xbf16>, vector<512x256xbf16>, vector<8x256xf32> -> vector<8x256xf32>
    %7 = arith.addf %3, %6 : vector<8x256xf32>
    %c0_6 = arith.constant 0 : index
    %c0_7 = arith.constant 0 : index
    %8 = vector.load %arg9[%c0_6, %c0_7] : memref<8x256xf32, #tpu.memory_space<vmem>>, vector<8x256xf32>
    tpu.vector_store %arg9[%c0_6, %c0_7], %7 {strides = array<i32>} : memref<8x256xf32, #tpu.memory_space<vmem>>, vector<8x256xf32>,
    %c8_i32 = arith.constant 8 : i32
    %9 = arith.cmpi eq, %arg2, %c8_i32 : i32
    %10 = arith.extui %9 : i1 to i32
    %c0_i32_8 = arith.constant 0 : i32
    %11 = arith.cmpi ne, %10, %c0_i32_8 : i32
    scf.if %11 {
      %c0_9 = arith.constant 0 : index
      %c0_10 = arith.constant 0 : index
      %12 = vector.load %arg9[%c0_9, %c0_10] : memref<8x256xf32, #tpu.memory_space<vmem>>, vector<8x256xf32>
      %c0_11 = arith.constant 0 : index
      %c0_12 = arith.constant 0 : index
      %13 = vector.load %arg5[%c0_11, %c0_12] : memref<1x256xf32, #tpu.memory_space<vmem>>, vector<1x256xf32>
      %14 = vector.broadcast %13 : vector<1x256xf32> to vector<8x256xf32>
      %15 = arith.mulf %12, %14 : vector<8x256xf32>
      %c0_13 = arith.constant 0 : index
      %c0_14 = arith.constant 0 : index
      %16 = vector.load %arg6[%c0_13, %c0_14] : memref<1x256xf32, #tpu.memory_space<vmem>>, vector<1x256xf32>
      %17 = vector.broadcast %16 : vector<1x256xf32> to vector<8x256xf32>
      %18 = arith.addf %15, %17 : vector<8x256xf32>
      %c0_15 = arith.constant 0 : index
      %c0_16 = arith.constant 0 : index
      %19 = vector.load %arg7[%c0_15, %c0_16] : memref<8x256xf32, #tpu.memory_space<vmem>>, vector<8x256xf32>
      %20 = arith.addf %18, %19 : vector<8x256xf32>
      %cst_17 = arith.constant 0.000000e+00 : f32
      %21 = vector.broadcast %cst_17 : f32 to vector<8x256xf32>
      %22 = arith.maximumf %20, %21 : vector<8x256xf32>
      %c0_18 = arith.constant 0 : index
      %c0_19 = arith.constant 0 : index
      %23 = vector.load %arg8[%c0_18, %c0_19] : memref<8x256xf32, #tpu.memory_space<vmem>>, vector<8x256xf32>
      tpu.vector_store %arg8[%c0_18, %c0_19], %22 {strides = array<i32>} : memref<8x256xf32, #tpu.memory_space<vmem>>, vector<8x256xf32>,
    } else {
    }
    return
  }
  func.func @transform_0(%arg0: i32, %arg1: i32, %arg2: i32) -> (i32, i32) {
    %c0_i32 = arith.constant 0 : i32
    return %arg0, %arg2 : i32, i32
  }
  func.func @transform_1(%arg0: i32, %arg1: i32, %arg2: i32) -> (i32, i32) {
    %c0_i32 = arith.constant 0 : i32
    return %arg2, %arg1 : i32, i32
  }
  func.func @transform_2(%arg0: i32, %arg1: i32, %arg2: i32) -> (i32, i32) {
    %c0_i32 = arith.constant 0 : i32
    %c0_i32_0 = arith.constant 0 : i32
    return %c0_i32, %arg1 : i32, i32
  }
  func.func @transform_3(%arg0: i32, %arg1: i32, %arg2: i32) -> (i32, i32) {
    %c0_i32 = arith.constant 0 : i32
    %c0_i32_0 = arith.constant 0 : i32
    return %c0_i32, %arg1 : i32, i32
  }
  func.func @transform_4(%arg0: i32, %arg1: i32, %arg2: i32) -> (i32, i32) {
    %c0_i32 = arith.constant 0 : i32
    return %arg0, %arg1 : i32, i32
  }
  func.func @transform_5(%arg0: i32, %arg1: i32, %arg2: i32) -> (i32, i32) {
    %c0_i32 = arith.constant 0 : i32
    return %arg0, %arg1 : i32, i32
  }
}

module attributes {stable_mosaic.version = 11 : i64} {
  func.func @_mm_kernel(%arg0: i32, %arg1: i32, %arg2: i32, %arg3: memref<8x512xbf16, #tpu.memory_space<vmem>>, %arg4: memref<512x128xbf16, #tpu.memory_space<vmem>>, %arg5: memref<1x128xf32, #tpu.memory_space<vmem>>, %arg6: memref<1x128xf32, #tpu.memory_space<vmem>>, %arg7: memref<8x128xf32, #tpu.memory_space<vmem>>, %arg8: memref<8x128xf32, #tpu.memory_space<vmem>>) attributes {dimension_semantics = [#tpu.dimension_semantics<parallel>, #tpu.dimension_semantics<parallel>, #tpu.dimension_semantics<arbitrary>], iteration_bounds = array<i64: 1, 1, 1>, scalar_prefetch = 0 : i64, scratch_operands = 1 : i64, tpu.core_type = #tpu.core_type<tc>, window_params = [{transform_indices = @transform_0, window_bounds = array<i64: 8, 512>}, {transform_indices = @transform_1, window_bounds = array<i64: 512, 128>}, {transform_indices = @transform_2, window_bounds = array<i64: 1, 128>}, {transform_indices = @transform_3, window_bounds = array<i64: 1, 128>}, {transform_indices = @transform_4, window_bounds = array<i64: 8, 128>}]} {
    %c0_i32 = arith.constant 0 : i32
    %0 = arith.cmpi eq, %arg2, %c0_i32 : i32
    %1 = arith.extui %0 : i1 to i32
    %c0_i32_0 = arith.constant 0 : i32
    %2 = arith.cmpi ne, %1, %c0_i32_0 : i32
    scf.if %2 {
      %cst_10 = arith.constant 0.000000e+00 : f32
      %12 = vector.broadcast %cst_10 : f32 to vector<8x128xf32>
      %c0_11 = arith.constant 0 : index
      %c0_12 = arith.constant 0 : index
      %13 = vector.load %arg8[%c0_11, %c0_12] : memref<8x128xf32, #tpu.memory_space<vmem>>, vector<8x128xf32>
      tpu.vector_store %arg8[%c0_11, %c0_12], %12 {strides = array<i32>} : memref<8x128xf32, #tpu.memory_space<vmem>>, vector<8x128xf32>,
    } else {
    }
    %c0 = arith.constant 0 : index
    %c0_1 = arith.constant 0 : index
    %3 = vector.load %arg8[%c0, %c0_1] : memref<8x128xf32, #tpu.memory_space<vmem>>, vector<8x128xf32>
    %c0_2 = arith.constant 0 : index
    %c0_3 = arith.constant 0 : index
    %4 = vector.load %arg3[%c0_2, %c0_3] : memref<8x512xbf16, #tpu.memory_space<vmem>>, vector<8x512xbf16>
    %c0_4 = arith.constant 0 : index
    %c0_5 = arith.constant 0 : index
    %5 = vector.load %arg4[%c0_4, %c0_5] : memref<512x128xbf16, #tpu.memory_space<vmem>>, vector<512x128xbf16>
    %cst = arith.constant dense<0.000000e+00> : vector<8x128xf32>
    %6 = tpu.matmul %4, %5, %cst {dimension_numbers = #tpu.dot_dimension_numbers<[1], [0], [0], [1], [0, 0, 1, 1], [], []>} : vector<8x512xbf16>, vector<512x128xbf16>, vector<8x128xf32> -> vector<8x128xf32>
    %7 = arith.addf %3, %6 : vector<8x128xf32>
    %c0_6 = arith.constant 0 : index
    %c0_7 = arith.constant 0 : index
    %8 = vector.load %arg8[%c0_6, %c0_7] : memref<8x128xf32, #tpu.memory_space<vmem>>, vector<8x128xf32>
    tpu.vector_store %arg8[%c0_6, %c0_7], %7 {strides = array<i32>} : memref<8x128xf32, #tpu.memory_space<vmem>>, vector<8x128xf32>,
    %c0_i32_8 = arith.constant 0 : i32
    %9 = arith.cmpi eq, %arg2, %c0_i32_8 : i32
    %10 = arith.extui %9 : i1 to i32
    %c0_i32_9 = arith.constant 0 : i32
    %11 = arith.cmpi ne, %10, %c0_i32_9 : i32
    scf.if %11 {
      %c0_10 = arith.constant 0 : index
      %c0_11 = arith.constant 0 : index
      %12 = vector.load %arg8[%c0_10, %c0_11] : memref<8x128xf32, #tpu.memory_space<vmem>>, vector<8x128xf32>
      %c0_12 = arith.constant 0 : index
      %c0_13 = arith.constant 0 : index
      %13 = vector.load %arg5[%c0_12, %c0_13] : memref<1x128xf32, #tpu.memory_space<vmem>>, vector<1x128xf32>
      %14 = vector.broadcast %13 : vector<1x128xf32> to vector<8x128xf32>
      %15 = arith.mulf %12, %14 : vector<8x128xf32>
      %c0_14 = arith.constant 0 : index
      %c0_15 = arith.constant 0 : index
      %16 = vector.load %arg6[%c0_14, %c0_15] : memref<1x128xf32, #tpu.memory_space<vmem>>, vector<1x128xf32>
      %17 = vector.broadcast %16 : vector<1x128xf32> to vector<8x128xf32>
      %18 = arith.addf %15, %17 : vector<8x128xf32>
      %c0_16 = arith.constant 0 : index
      %c0_17 = arith.constant 0 : index
      %19 = vector.load %arg7[%c0_16, %c0_17] : memref<8x128xf32, #tpu.memory_space<vmem>>, vector<8x128xf32>
      tpu.vector_store %arg7[%c0_16, %c0_17], %18 {strides = array<i32>} : memref<8x128xf32, #tpu.memory_space<vmem>>, vector<8x128xf32>,
    } else {
    }
    return
  }
  func.func @transform_0(%arg0: i32, %arg1: i32, %arg2: i32) -> (i32, i32) {
    %c0_i32 = arith.constant 0 : i32
    return %arg0, %arg2 : i32, i32
  }
  func.func @transform_1(%arg0: i32, %arg1: i32, %arg2: i32) -> (i32, i32) {
    %c0_i32 = arith.constant 0 : i32
    return %arg2, %arg1 : i32, i32
  }
  func.func @transform_2(%arg0: i32, %arg1: i32, %arg2: i32) -> (i32, i32) {
    %c0_i32 = arith.constant 0 : i32
    %c0_i32_0 = arith.constant 0 : i32
    return %c0_i32, %arg1 : i32, i32
  }
  func.func @transform_3(%arg0: i32, %arg1: i32, %arg2: i32) -> (i32, i32) {
    %c0_i32 = arith.constant 0 : i32
    %c0_i32_0 = arith.constant 0 : i32
    return %c0_i32, %arg1 : i32, i32
  }
  func.func @transform_4(%arg0: i32, %arg1: i32, %arg2: i32) -> (i32, i32) {
    %c0_i32 = arith.constant 0 : i32
    return %arg0, %arg1 : i32, i32
  }
}

module attributes {stable_mosaic.version = 11 : i64} {
  func.func @_grid_sample_kernel(%arg0: i32, %arg1: memref<1x1x6xf32, #tpu.memory_space<vmem>>, %arg2: memref<1x256xf32, #tpu.memory_space<vmem>>, %arg3: memref<1x256xf32, #tpu.memory_space<vmem>>, %arg4: memref<1x48x16xf32, #tpu.memory_space<vmem>>, %arg5: memref<1x3x256xf32, #tpu.memory_space<vmem>>) attributes {dimension_semantics = [#tpu.dimension_semantics<parallel>], iteration_bounds = array<i64: 2>, scalar_prefetch = 0 : i64, scratch_operands = 0 : i64, tpu.core_type = #tpu.core_type<tc>, window_params = [{transform_indices = @transform_0, window_bounds = array<i64: 1, 1, 6>}, {pipeline_mode = #tpu.pipeline_mode<synchronous>, transform_indices = @transform_1, window_bounds = array<i64: 1, 256>}, {pipeline_mode = #tpu.pipeline_mode<synchronous>, transform_indices = @transform_2, window_bounds = array<i64: 1, 256>}, {transform_indices = @transform_3, window_bounds = array<i64: 1, 48, 16>}, {transform_indices = @transform_4, window_bounds = array<i64: 1, 3, 256>}]} {
    %c0 = arith.constant 0 : index
    %c0_0 = arith.constant 0 : index
    %c0_1 = arith.constant 0 : index
    %0 = vector.load %arg1[%c0, %c0_0, %c0_1] : memref<1x1x6xf32, #tpu.memory_space<vmem>>, vector<1x1x6xf32>
    %1 = vector.shape_cast %0 : vector<1x1x6xf32> to vector<1x6xf32>
    %2 = vector.extract_strided_slice %1 {offsets = [0, 0], sizes = [1, 1], strides = [1, 1]} : vector<1x6xf32> to vector<1x1xf32>
    %3 = vector.extract_strided_slice %1 {offsets = [0, 1], sizes = [1, 1], strides = [1, 1]} : vector<1x6xf32> to vector<1x1xf32>
    %4 = vector.extract_strided_slice %1 {offsets = [0, 2], sizes = [1, 1], strides = [1, 1]} : vector<1x6xf32> to vector<1x1xf32>
    %5 = vector.extract_strided_slice %1 {offsets = [0, 3], sizes = [1, 1], strides = [1, 1]} : vector<1x6xf32> to vector<1x1xf32>
    %6 = vector.extract_strided_slice %1 {offsets = [0, 4], sizes = [1, 1], strides = [1, 1]} : vector<1x6xf32> to vector<1x1xf32>
    %7 = vector.extract_strided_slice %1 {offsets = [0, 5], sizes = [1, 1], strides = [1, 1]} : vector<1x6xf32> to vector<1x1xf32>
    %c0_2 = arith.constant 0 : index
    %c0_3 = arith.constant 0 : index
    %8 = vector.load %arg2[%c0_2, %c0_3] : memref<1x256xf32, #tpu.memory_space<vmem>>, vector<1x256xf32>
    %c0_4 = arith.constant 0 : index
    %c0_5 = arith.constant 0 : index
    %9 = vector.load %arg3[%c0_4, %c0_5] : memref<1x256xf32, #tpu.memory_space<vmem>>, vector<1x256xf32>
    %10 = vector.broadcast %2 : vector<1x1xf32> to vector<1x256xf32>
    %11 = arith.mulf %10, %8 : vector<1x256xf32>
    %12 = vector.broadcast %3 : vector<1x1xf32> to vector<1x256xf32>
    %13 = arith.mulf %12, %9 : vector<1x256xf32>
    %14 = arith.addf %11, %13 : vector<1x256xf32>
    %15 = vector.broadcast %4 : vector<1x1xf32> to vector<1x256xf32>
    %16 = arith.addf %14, %15 : vector<1x256xf32>
    %17 = vector.broadcast %5 : vector<1x1xf32> to vector<1x256xf32>
    %18 = arith.mulf %17, %8 : vector<1x256xf32>
    %19 = vector.broadcast %6 : vector<1x1xf32> to vector<1x256xf32>
    %20 = arith.mulf %19, %9 : vector<1x256xf32>
    %21 = arith.addf %18, %20 : vector<1x256xf32>
    %22 = vector.broadcast %7 : vector<1x1xf32> to vector<1x256xf32>
    %23 = arith.addf %21, %22 : vector<1x256xf32>
    %cst = arith.constant 1.000000e+00 : f32
    %24 = vector.broadcast %cst : f32 to vector<1x256xf32>
    %25 = arith.addf %16, %24 : vector<1x256xf32>
    %cst_6 = arith.constant 1.600000e+01 : f32
    %26 = vector.broadcast %cst_6 : f32 to vector<1x256xf32>
    %27 = arith.mulf %25, %26 : vector<1x256xf32>
    %cst_7 = arith.constant 1.000000e+00 : f32
    %28 = vector.broadcast %cst_7 : f32 to vector<1x256xf32>
    %29 = arith.subf %27, %28 : vector<1x256xf32>
    %cst_8 = arith.constant 5.000000e-01 : f32
    %30 = vector.broadcast %cst_8 : f32 to vector<1x256xf32>
    %31 = arith.mulf %29, %30 : vector<1x256xf32>
    %cst_9 = arith.constant 1.000000e+00 : f32
    %32 = vector.broadcast %cst_9 : f32 to vector<1x256xf32>
    %33 = arith.addf %23, %32 : vector<1x256xf32>
    %cst_10 = arith.constant 1.600000e+01 : f32
    %34 = vector.broadcast %cst_10 : f32 to vector<1x256xf32>
    %35 = arith.mulf %33, %34 : vector<1x256xf32>
    %cst_11 = arith.constant 1.000000e+00 : f32
    %36 = vector.broadcast %cst_11 : f32 to vector<1x256xf32>
    %37 = arith.subf %35, %36 : vector<1x256xf32>
    %cst_12 = arith.constant 5.000000e-01 : f32
    %38 = vector.broadcast %cst_12 : f32 to vector<1x256xf32>
    %39 = arith.mulf %37, %38 : vector<1x256xf32>
    %40 = math.floor %31 : vector<1x256xf32>
    %41 = math.floor %39 : vector<1x256xf32>
    %42 = arith.subf %31, %40 : vector<1x256xf32>
    %cst_13 = arith.constant 1.000000e+00 : f32
    %43 = vector.broadcast %cst_13 : f32 to vector<1x256xf32>
    %44 = arith.subf %43, %42 : vector<1x256xf32>
    %45 = arith.subf %39, %41 : vector<1x256xf32>
    %cst_14 = arith.constant 1.000000e+00 : f32
    %46 = vector.broadcast %cst_14 : f32 to vector<1x256xf32>
    %47 = arith.subf %46, %45 : vector<1x256xf32>
    %48 = arith.fptosi %40 : vector<1x256xf32> to vector<1x256xi32>
    %49 = arith.fptosi %41 : vector<1x256xf32> to vector<1x256xi32>
    %50 = tpu.iota {dimensions = array<i32: 0>} : vector<16x256xi32>
    %51 = tpu.iota {dimensions = array<i32: 0>} : vector<16x256xi32>
    %52 = vector.broadcast %48 : vector<1x256xi32> to vector<16x256xi32>
    %53 = arith.cmpi eq, %50, %52 : vector<16x256xi32>
    %cst_15 = arith.constant 0.000000e+00 : f32
    %54 = vector.shape_cast %44 : vector<1x256xf32> to vector<1x256xf32>
    %55 = vector.broadcast %54 : vector<1x256xf32> to vector<16x256xf32>
    %56 = vector.broadcast %cst_15 : f32 to vector<16x256xf32>
    %57 = arith.select %53, %55, %56 : vector<16x256xi1>, vector<16x256xf32>
    %c1_i32 = arith.constant 1 : i32
    %58 = vector.broadcast %c1_i32 : i32 to vector<1x256xi32>
    %59 = arith.addi %48, %58 : vector<1x256xi32>
    %60 = vector.broadcast %59 : vector<1x256xi32> to vector<16x256xi32>
    %61 = arith.cmpi eq, %50, %60 : vector<16x256xi32>
    %cst_16 = arith.constant 0.000000e+00 : f32
    %62 = vector.shape_cast %42 : vector<1x256xf32> to vector<1x256xf32>
    %63 = vector.broadcast %62 : vector<1x256xf32> to vector<16x256xf32>
    %64 = vector.broadcast %cst_16 : f32 to vector<16x256xf32>
    %65 = arith.select %61, %63, %64 : vector<16x256xi1>, vector<16x256xf32>
    %66 = arith.addf %57, %65 : vector<16x256xf32>
    %67 = vector.broadcast %49 : vector<1x256xi32> to vector<16x256xi32>
    %68 = arith.cmpi eq, %51, %67 : vector<16x256xi32>
    %cst_17 = arith.constant 0.000000e+00 : f32
    %69 = vector.shape_cast %47 : vector<1x256xf32> to vector<1x256xf32>
    %70 = vector.broadcast %69 : vector<1x256xf32> to vector<16x256xf32>
    %71 = vector.broadcast %cst_17 : f32 to vector<16x256xf32>
    %72 = arith.select %68, %70, %71 : vector<16x256xi1>, vector<16x256xf32>
    %c1_i32_18 = arith.constant 1 : i32
    %73 = vector.broadcast %c1_i32_18 : i32 to vector<1x256xi32>
    %74 = arith.addi %49, %73 : vector<1x256xi32>
    %75 = vector.broadcast %74 : vector<1x256xi32> to vector<16x256xi32>
    %76 = arith.cmpi eq, %51, %75 : vector<16x256xi32>
    %cst_19 = arith.constant 0.000000e+00 : f32
    %77 = vector.shape_cast %45 : vector<1x256xf32> to vector<1x256xf32>
    %78 = vector.broadcast %77 : vector<1x256xf32> to vector<16x256xf32>
    %79 = vector.broadcast %cst_19 : f32 to vector<16x256xf32>
    %80 = arith.select %76, %78, %79 : vector<16x256xi1>, vector<16x256xf32>
    %81 = arith.addf %72, %80 : vector<16x256xf32>
    %c0_20 = arith.constant 0 : index
    %c0_21 = arith.constant 0 : index
    %c0_22 = arith.constant 0 : index
    %82 = vector.load %arg4[%c0_20, %c0_21, %c0_22] : memref<1x48x16xf32, #tpu.memory_space<vmem>>, vector<1x48x16xf32>
    %83 = vector.shape_cast %82 : vector<1x48x16xf32> to vector<48x16xf32>
    %cst_23 = arith.constant dense<0.000000e+00> : vector<48x256xf32>
    %84 = tpu.matmul %83, %66, %cst_23 {dimension_numbers = #tpu.dot_dimension_numbers<[1], [0], [0], [1], [0, 0, 1, 1], [], []>} : vector<48x16xf32>, vector<16x256xf32>, vector<48x256xf32> -> vector<48x256xf32>
    %85 = vector.shape_cast %84 : vector<48x256xf32> to vector<3x16x256xf32>
    %86 = vector.shape_cast %81 : vector<16x256xf32> to vector<1x16x256xf32>
    %87 = vector.broadcast %86 : vector<1x16x256xf32> to vector<3x16x256xf32>
    %88 = arith.mulf %85, %87 : vector<3x16x256xf32>
    %cst_24 = arith.constant dense<0.000000e+00> : vector<3x256xf32>
    %89 = vector.multi_reduction <add>, %88, %cst_24 [1] : vector<3x16x256xf32> to vector<3x256xf32>
    %c0_25 = arith.constant 0 : index
    %c0_26 = arith.constant 0 : index
    %c0_27 = arith.constant 0 : index
    %90 = vector.load %arg5[%c0_25, %c0_26, %c0_27] : memref<1x3x256xf32, #tpu.memory_space<vmem>>, vector<1x3x256xf32>
    %91 = vector.shape_cast %90 : vector<1x3x256xf32> to vector<3x256xf32>
    %92 = vector.shape_cast %89 : vector<3x256xf32> to vector<1x3x256xf32>
    tpu.vector_store %arg5[%c0_25, %c0_26, %c0_27], %92 {strides = array<i32>} : memref<1x3x256xf32, #tpu.memory_space<vmem>>, vector<1x3x256xf32>,
    return
  }
  func.func @transform_0(%arg0: i32) -> (i32, i32, i32) {
    %c0_i32 = arith.constant 0 : i32
    %c0_i32_0 = arith.constant 0 : i32
    %c0_i32_1 = arith.constant 0 : i32
    return %arg0, %c0_i32, %c0_i32_0 : i32, i32, i32
  }
  func.func @transform_1(%arg0: i32) -> (i32, i32) {
    %c0_i32 = arith.constant 0 : i32
    %c0_i32_0 = arith.constant 0 : i32
    %c0_i32_1 = arith.constant 0 : i32
    return %c0_i32, %c0_i32_0 : i32, i32
  }
  func.func @transform_2(%arg0: i32) -> (i32, i32) {
    %c0_i32 = arith.constant 0 : i32
    %c0_i32_0 = arith.constant 0 : i32
    %c0_i32_1 = arith.constant 0 : i32
    return %c0_i32, %c0_i32_0 : i32, i32
  }
  func.func @transform_3(%arg0: i32) -> (i32, i32, i32) {
    %c0_i32 = arith.constant 0 : i32
    %c0_i32_0 = arith.constant 0 : i32
    %c0_i32_1 = arith.constant 0 : i32
    return %arg0, %c0_i32, %c0_i32_0 : i32, i32, i32
  }
  func.func @transform_4(%arg0: i32) -> (i32, i32, i32) {
    %c0_i32 = arith.constant 0 : i32
    %c0_i32_0 = arith.constant 0 : i32
    %c0_i32_1 = arith.constant 0 : i32
    return %arg0, %c0_i32, %c0_i32_0 : i32, i32, i32
  }
}

</mosaic_0001>

<bundles_post_ra>
// kernel: _lambda_.22
= control target key start
LH: loop header
LB: loop body
LE: loop exit
PB: predicated region body
PF: predicated region fallthrough
CT: control target
= control target key end

     0   :  { %9 = vsyncpa [#allocation4], 0  ;;  %s991_s18 = smov [#allocation3]   ;;  %s992_s20 = smov 64   ;;  %s1308_s0 = inlined_call_operand.vmem [shape: bf16[128,384], index: 0, kind: input, shape index: {}]   ;;  %s1309_s1 = inlined_call_operand.hbm [shape: bf16[384,128], index: 1, kind: input, shape index: {}]   ;;  %s1310_s2 = inlined_call_operand.vmem [shape: f32[1,128], index: 2, kind: input, shape index: {}]   ;;  %s1311_s3 = inlined_call_operand.vmem [shape: f32[1,128], index: 3, kind: input, shape index: {}]   ;;  %s1312_s4 = inlined_call_operand.vmem [shape: f32[128,128], index: 4, kind: output, shape index: {}]  }
   0x1   :  { %s16_s17 = sshll.u32 %s1309_s1, 4  ;;  %s18_s19 = sshll.u32 %s991_s18, 4  ;;  %s17_s17 = int_to_ptr.hbm [resolvable:$true] %s16_s17  ;;  %s19_s19 = int_to_ptr.vmem [resolvable:$true] %s18_s19 }
   0x2   :  { %s993_s21 = smov 4  }
   0x3   :  { %24 = dma.hbm_to_vmem [thread:$0]  %s17_s17, 3072, %s19_s19, [#allocation4], %s992_s20, %s992_s20, %s993_s21  }
   0x4   :  { %989 = dma.done.wait [#allocation4], 3072  }
   0x5   :  { %990 = vsyncadd [#allocation4], 4294964224  ;;  %v919_v0 = vld [vmem:[#allocation3 + $0x38] sm:$0xff]  ;;  %v918_v3 = vld [vmem:[#allocation3 + $0x30] sm:$0xff] }
   0x6   :  { %v1022_v1 = vld [vmem:[#allocation3 + $0x78] sm:$0xff]  ;;  %421 = vmatpush.bf16.msra.mxu0 %v919_v0  ;;  %936 = vmatpush.bf16.msra.mxu3 %v919_v0  ;;  %v1028_v4 = vld [vmem:[#allocation3 + $0x70] sm:$0xff]  ;;  %v917_v6 = vld [vmem:[#allocation3 + $0x28] sm:$0xff] }
   0x7   :  { %v1024_v2 = vld [vmem:[#allocation3 + $0xb8] sm:$0xff]  ;;  %470 = vmatpush.bf16.msra.mxu1 %v1022_v1  ;;  %v1030_v5 = vld [vmem:[#allocation3 + $0xb0] sm:$0xff]  ;;  %v925_v7 = vld [vmem:[#allocation3 + $0x68] sm:$0xff] }
   0x8   :  { %519 = vmatpush.bf16.msra.mxu2 %v1024_v2  ;;  %v1034_v8 = vld [vmem:[#allocation3 + $0xa8] sm:$0xff]  ;;  %v916_v9 = vld [vmem:[#allocation3 + $0x20] sm:$0xff]  ;;  %v915_v12 = vld [vmem:[#allocation3 + $0x18] sm:$0xff] }
   0x9   :  { %v924_v10 = vld [vmem:[#allocation3 + $0x60] sm:$0xff]  ;;  %v923_v13 = vld [vmem:[#allocation3 + $0x58] sm:$0xff]  ;;  %v914_v15 = vld [vmem:[#allocation3 + $0x10] sm:$0xff] }
   0xa   :  { %422 = vmatpush.bf16.msra.mxu0 %v918_v3  ;;  %937 = vmatpush.bf16.msra.mxu3 %v918_v3  ;;  %v1037_v11 = vld [vmem:[#allocation3 + $0xa0] sm:$0xff]  ;;  %v1040_v14 = vld [vmem:[#allocation3 + $0x98] sm:$0xff]  ;;  %v922_v16 = vld [vmem:[#allocation3 + $0x50] sm:$0xff] }
   0xb   :  { %471 = vmatpush.bf16.msra.mxu1 %v1028_v4  ;;  %v1043_v17 = vld [vmem:[#allocation3 + $0x90] sm:$0xff]  ;;  %v913_v18 = vld [vmem:[#allocation3 + $0x8] sm:$0xff]  ;;  %v912_v21 = vld [vmem:[#allocation3] sm:$0xff] }
   0xc   :  { %520 = vmatpush.bf16.msra.mxu2 %v1030_v5  ;;  %v921_v19 = vld [vmem:[#allocation3 + $0x48] sm:$0xff]  ;;  %v920_v22 = vld [vmem:[#allocation3 + $0x40] sm:$0xff]  ;;  %v770_v26 = vld [vmem:[%s1308_s0 + $0x90] sm:$0xf] }
   0xd   :  { %v1046_v20 = vld [vmem:[#allocation3 + $0x88] sm:$0xff]  ;;  %v1048_v23 = vld [vmem:[#allocation3 + $0x80] sm:$0xff]  ;;  %v907_v27 = vld [vmem:[%s1308_s0 + $0x98] sm:$0xf0] }
   0xe   :  { %423 = vmatpush.bf16.msra.mxu0 %v917_v6  ;;  %938 = vmatpush.bf16.msra.mxu3 %v917_v6  ;;  %v698_v24 = vld [vmem:[%s1308_s0] sm:$0xf]  ;;  %v889_v25 = vld [vmem:[%s1308_s0 + $0x8] sm:$0xf0]  ;;  %v888_v28 = vld [vmem:[%s1308_s0 + $0x4] sm:$0xf]  ;;  %v771_v33 = vor.u32 %v907_v27, %v770_v26 }
   0xf   :  { %472 = vmatpush.bf16.msra.mxu1 %v925_v7  ;;  %v700_v29 = vld [vmem:[%s1308_s0 + $0xc] sm:$0xf0]  ;;  %v706_v30 = vld [vmem:[%s1308_s0 + $0x8] sm:$0xf]  ;;  %v890_v31 = vld [vmem:[%s1308_s0 + $0x10] sm:$0xf0]  ;;  %v699_v32 = vor.u32 %v889_v25, %v698_v24 }
  0x10   :  { %521 = vmatpush.bf16.msra.mxu2 %v1034_v8  ;;  %v703_v34 = vor.u32 %v888_v28, %v700_v29  ;;  %v707_v35 = vor.u32 %v890_v31, %v706_v30  ;;  %v710_v36 = vld [vmem:[%s1308_s0 + $0x18] sm:$0xf]  ;;  %v892_v37 = vld [vmem:[%s1308_s0 + $0x20] sm:$0xf0]  ;;  %v782_v38 = vld [vmem:[%s1308_s0 + $0xa8] sm:$0xf] }
  0x11   :  { %v910_v39 = vld [vmem:[%s1308_s0 + $0xb0] sm:$0xf0]  ;;  %v891_v40 = vld [vmem:[%s1308_s0 + $0x1c] sm:$0xf]  ;;  %v712_v41 = vld [vmem:[%s1308_s0 + $0x24] sm:$0xf0]  ;;  %v711_v44 = vor.u32 %v892_v37, %v710_v36 }
  0x12   :  { %424 = vmatpush.bf16.msra.mxu0 %v916_v9  ;;  %939 = vmatpush.bf16.msra.mxu3 %v916_v9  ;;  %v718_v42 = vld [vmem:[%s1308_s0 + $0x20] sm:$0xf]  ;;  %v893_v43 = vld [vmem:[%s1308_s0 + $0x28] sm:$0xf0]  ;;  %v783_v45 = vor.u32 %v910_v39, %v782_v38  ;;  %v715_v46 = vor.u32 %v891_v40, %v712_v41  ;;  %v722_v48 = vld [vmem:[%s1308_s0 + $0x30] sm:$0xf] }
  0x13   :  { %473 = vmatpush.bf16.msra.mxu1 %v924_v10  ;;  %v719_v47 = vor.u32 %v893_v43, %v718_v42  ;;  %v895_v49 = vld [vmem:[%s1308_s0 + $0x38] sm:$0xf0]  ;;  %v894_v50 = vld [vmem:[%s1308_s0 + $0x34] sm:$0xf]  ;;  %v772_v52 = vld [vmem:[%s1308_s0 + $0x9c] sm:$0xf0] }
  0x14   :  { %522 = vmatpush.bf16.msra.mxu2 %v1037_v11  ;;  %v906_v51 = vld [vmem:[%s1308_s0 + $0x94] sm:$0xf]  ;;  %v724_v53 = vld [vmem:[%s1308_s0 + $0x3c] sm:$0xf0]  ;;  %v730_v54 = vld [vmem:[%s1308_s0 + $0x38] sm:$0xf]  ;;  %v723_v56 = vor.u32 %v895_v49, %v722_v48 }
  0x15   :  { %v896_v55 = vld [vmem:[%s1308_s0 + $0x40] sm:$0xf0]  ;;  %v775_v57 = vor.u32 %v906_v51, %v772_v52  ;;  %v727_v58 = vor.u32 %v894_v50, %v724_v53  ;;  %v734_v60 = vld [vmem:[%s1308_s0 + $0x48] sm:$0xf]  ;;  %v898_v61 = vld [vmem:[%s1308_s0 + $0x50] sm:$0xf0] }
  0x16   :  { %425 = vmatpush.bf16.msra.mxu0 %v915_v12  ;;  %940 = vmatpush.bf16.msra.mxu3 %v915_v12  ;;  %v731_v59 = vor.u32 %v896_v55, %v730_v54  ;;  %v897_v62 = vld [vmem:[%s1308_s0 + $0x4c] sm:$0xf]  ;;  %v784_v0 = vld [vmem:[%s1308_s0 + $0xb4] sm:$0xf0]  ;;  %v899_v3 = vld [vmem:[%s1308_s0 + $0x58] sm:$0xf0] }
  0x17   :  { %474 = vmatpush.bf16.msra.mxu1 %v923_v13  ;;  %v909_v63 = vld [vmem:[%s1308_s0 + $0xac] sm:$0xf]  ;;  %v908_v12 = vld [vmem:[%s1308_s0 + $0xa0] sm:$0xf0]  ;;  %v911_v24 = vld [vmem:[%s1308_s0 + $0xb8] sm:$0xf0] }
  0x18   :  { %523 = vmatpush.bf16.msra.mxu2 %v1040_v14  ;;  %v901_v9 = vld [vmem:[%s1308_s0 + $0x68] sm:$0xf0]  ;;  %v760_v25 = vld [vmem:[%s1308_s0 + $0x84] sm:$0xf0]  ;;  %v766_v26 = vld [vmem:[%s1308_s0 + $0x80] sm:$0xf] }
  0x19   :  { %v905_v27 = vld [vmem:[%s1308_s0 + $0x88] sm:$0xf0]  ;;  %v1211_v36 = vld [vmem:[%s1310_s2] ss:$0 sm:$0xff] }
  0x1a   :  { %426 = vmatpush.bf16.msra.mxu0 %v914_v15  ;;  %941 = vmatpush.bf16.msra.mxu3 %v914_v15  ;;  %v902_v15 = vld [vmem:[%s1308_s0 + $0x70] sm:$0xf0]  ;;  %v767_v31 = vor.u32 %v905_v27, %v766_v26  ;;  %v1216_v39 = vld [vmem:[%s1311_s3] ss:$0 sm:$0xff] }
  0x1b   :  { %475 = vmatpush.bf16.msra.mxu1 %v922_v16 }
  0x1c   :  { %524 = vmatpush.bf16.msra.mxu2 %v1043_v17 }
  0x1e   :  { %427 = vmatpush.bf16.msra.mxu0 %v913_v18  ;;  %942 = vmatpush.bf16.msra.mxu3 %v913_v18 }
  0x1f   :  { %476 = vmatpush.bf16.msra.mxu1 %v921_v19 }
  0x20   :  { %525 = vmatpush.bf16.msra.mxu2 %v1046_v20 }
  0x22   :  { %428 = vmatpush.bf16.msra.mxu0 %v912_v21  ;;  %943 = vmatpush.bf16.msra.mxu3 %v912_v21  ;;  %v904_v21 = vld [vmem:[%s1308_s0 + $0x80] sm:$0xf0] }
  0x23   :  { %477 = vmatpush.bf16.msra.mxu1 %v920_v22 }
  0x24   :  { %526 = vmatpush.bf16.msra.mxu2 %v1048_v23 }
  0x25   :  { %429 = vmatmul.bf16.vlgmr.msra.gmra.mxu0 %v699_v32  ;;  %459 = vmatmul.bf16.vlgmr.msra.gmra.mxu3 %v771_v33 }
  0x26   :  { %944 = vmatpush.bf16.msrb.mxu3 %v1022_v1  ;;  %478 = vmatmul.bf16.vlgmr.msra.gmra.mxu1 %v703_v34  ;;  %v736_v1 = vld [vmem:[%s1308_s0 + $0x54] sm:$0xf0] }
  0x27   :  { %527 = vmatmul.bf16.vlgmr.msra.gmra.mxu2 %v707_v35  ;;  %v739_v6 = vor.u32 %v897_v62, %v736_v1 }
  0x2a   :  { %945 = vmatpush.bf16.msrb.mxu3 %v1028_v4  ;;  %v735_v4 = vor.u32 %v898_v61, %v734_v60 }
  0x2e   :  { %946 = vmatpush.bf16.msrb.mxu3 %v925_v7 }
  0x32   :  { %947 = vmatpush.bf16.msrb.mxu3 %v924_v10  ;;  %v900_v10 = vld [vmem:[%s1308_s0 + $0x64] sm:$0xf] }
  0x35   :  { %434 = vmatmul.bf16.gmra.mxu0 %v711_v44  ;;  %464 = vmatmul.bf16.gmra.mxu3 %v783_v45 }
  0x36   :  { %948 = vmatpush.bf16.msrb.mxu3 %v923_v13  ;;  %483 = vmatmul.bf16.gmra.mxu1 %v715_v46  ;;  %v748_v13 = vld [vmem:[%s1308_s0 + $0x6c] sm:$0xf0] }
  0x37   :  { %532 = vmatmul.bf16.gmra.mxu2 %v719_v47  ;;  %v751_v18 = vor.u32 %v900_v10, %v748_v13 }
  0x3a   :  { %949 = vmatpush.bf16.msrb.mxu3 %v922_v16 }
  0x3e   :  { %950 = vmatpush.bf16.msrb.mxu3 %v921_v19 }
  0x42   :  { %951 = vmatpush.bf16.msrb.mxu3 %v920_v22  ;;  %v903_v22 = vld [vmem:[%s1308_s0 + $0x7c] sm:$0xf] }
  0x43   :  { %v763_v30 = vor.u32 %v903_v22, %v760_v25 }
  0x45   :  { %439 = vmatmul.bf16.gmra.mxu0 %v723_v56  ;;  %508 = vmatmul.bf16.vlgmr.msrb.gmra.mxu3 %v775_v57 }
  0x46   :  { %952 = vmatpush.bf16.msra.mxu3 %v1024_v2  ;;  %488 = vmatmul.bf16.gmra.mxu1 %v727_v58  ;;  %v742_v2 = vld [vmem:[%s1308_s0 + $0x50] sm:$0xf] }
  0x47   :  { %537 = vmatmul.bf16.gmra.mxu2 %v731_v59  ;;  %v743_v7 = vor.u32 %v899_v3, %v742_v2 }
  0x4a   :  { %953 = vmatpush.bf16.msra.mxu3 %v1030_v5  ;;  %v787_v5 = vor.u32 %v909_v63, %v784_v0 }
  0x4e   :  { %954 = vmatpush.bf16.msra.mxu3 %v1034_v8  ;;  %v746_v8 = vld [vmem:[%s1308_s0 + $0x60] sm:$0xf] }
  0x4f   :  { %v747_v16 = vor.u32 %v901_v9, %v746_v8 }
  0x52   :  { %955 = vmatpush.bf16.msra.mxu3 %v1037_v11  ;;  %v778_v11 = vld [vmem:[%s1308_s0 + $0x98] sm:$0xf] }
  0x55   :  { %444 = vmatmul.bf16.gmra.mxu0 %v735_v4  ;;  %513 = vmatmul.bf16.gmra.mxu3 %v787_v5 }
  0x56   :  { %956 = vmatpush.bf16.msra.mxu3 %v1040_v14  ;;  %493 = vmatmul.bf16.gmra.mxu1 %v739_v6  ;;  %v754_v14 = vld [vmem:[%s1308_s0 + $0x68] sm:$0xf] }
  0x57   :  { %542 = vmatmul.bf16.gmra.mxu2 %v743_v7  ;;  %v755_v19 = vor.u32 %v902_v15, %v754_v14 }
  0x5a   :  { %957 = vmatpush.bf16.msra.mxu3 %v1043_v17  ;;  %v779_v17 = vor.u32 %v908_v12, %v778_v11 }
  0x5e   :  { %958 = vmatpush.bf16.msra.mxu3 %v1046_v20  ;;  %v758_v20 = vld [vmem:[%s1308_s0 + $0x78] sm:$0xf] }
  0x5f   :  { %v759_v28 = vor.u32 %v904_v21, %v758_v20 }
  0x62   :  { %959 = vmatpush.bf16.msra.mxu3 %v1048_v23  ;;  %v790_v23 = vld [vmem:[%s1308_s0 + $0xb0] sm:$0xf] }
  0x63   :  { %v791_v29 = vor.u32 %v911_v24, %v790_v23 }
  0x65   :  { %449 = vmatmul.bf16.gmra.mxu0 %v747_v16  ;;  %557 = vmatmul.bf16.vlgmr.msra.gmra.mxu3 %v779_v17 }
  0x66   :  { %498 = vmatmul.bf16.gmra.mxu1 %v751_v18 }
  0x67   :  { %547 = vmatmul.bf16.gmra.mxu2 %v755_v19 }
  0x75   :  { %454 = vmatmul.bf16.gmra.mxu0 %v759_v28  ;;  %562 = vmatmul.bf16.gmra.mxu3 %v791_v29 }
  0x76   :  { %503 = vmatmul.bf16.gmra.mxu1 %v763_v30 }
  0x77   :  { %552 = vmatmul.bf16.gmra.mxu2 %v767_v31 }
  0xa2   :  { %v430_v32 = vpop.f32.mrf.mxu0 }
  0xa3   :  { %v479_v33 = vpop.f32.mrf.mxu1 }
  0xa4   :  { %v480_v34 = vadd.f32 %v479_v33, %v430_v32 }
  0xa8   :  { %v1206_v35 = vpop.f32.mrf.mxu3 }
  0xaa   :  { %v528_v37 = vpop.f32.mrf.mxu2  ;;  %v432_v40 = vpop.f32.mrf.mxu0 }
  0xab   :  { %v529_v38 = vadd.f32 %v528_v37, %v480_v34  ;;  %v481_v41 = vpop.f32.mrf.mxu1 }
  0xac   :  { %v482_v45 = vadd.f32 %v481_v41, %v432_v40 }
  0xad   :  { %v623_v42 = vmul.f32 %v1211_v36, %v529_v38 }
  0xaf   :  { %v643_v43 = vadd.f32 %v1216_v39, %v623_v42 }
  0xb0   :  { %v1220_v46 = vpop.f32.mrf.mxu3 }
  0xb1   :  { %v659_v44 = vmax.f32 %v643_v43, 0.0 }
  0xb2   :  { %v530_v47 = vpop.f32.mrf.mxu2  ;;  %v435_v49 = vpop.f32.mrf.mxu0 }
  0xb3   :  { %675 = vst [vmem:[%s1312_s4] sm:$0xff] %v659_v44  ;;  %v531_v48 = vadd.f32 %v530_v47, %v482_v45  ;;  %v484_v50 = vpop.f32.mrf.mxu1 }
  0xb4   :  { %v485_v53 = vadd.f32 %v484_v50, %v435_v49 }
  0xb5   :  { %v624_v51 = vmul.f32 %v1211_v36, %v531_v48 }
  0xb7   :  { %v644_v52 = vadd.f32 %v1216_v39, %v624_v51 }
  0xb8   :  { %v1227_v55 = vpop.f32.mrf.mxu3 }
  0xb9   :  { %v660_v54 = vmax.f32 %v644_v52, 0.0 }
  0xba   :  { %v533_v56 = vpop.f32.mrf.mxu2  ;;  %v437_v58 = vpop.f32.mrf.mxu0 }
  0xbb   :  { %676 = vst [vmem:[%s1312_s4 + $0x8] sm:$0xff] %v660_v54  ;;  %v534_v57 = vadd.f32 %v533_v56, %v485_v53  ;;  %v486_v59 = vpop.f32.mrf.mxu1 }
  0xbc   :  { %v487_v63 = vadd.f32 %v486_v59, %v437_v58 }
  0xbd   :  { %v625_v60 = vmul.f32 %v1211_v36, %v534_v57 }
  0xbf   :  { %v645_v61 = vadd.f32 %v1216_v39, %v625_v60 }
  0xc0   :  { %v1234_v0 = vpop.f32.mrf.mxu3 }
  0xc1   :  { %v661_v62 = vmax.f32 %v645_v61, 0.0 }
  0xc2   :  { %v535_v1 = vpop.f32.mrf.mxu2  ;;  %v440_v3 = vpop.f32.mrf.mxu0 }
  0xc3   :  { %677 = vst [vmem:[%s1312_s4 + $0x10] sm:$0xff] %v661_v62  ;;  %v536_v2 = vadd.f32 %v535_v1, %v487_v63  ;;  %v489_v4 = vpop.f32.mrf.mxu1 }
  0xc4   :  { %v490_v7 = vadd.f32 %v489_v4, %v440_v3 }
  0xc5   :  { %v626_v5 = vmul.f32 %v1211_v36, %v536_v2 }
  0xc7   :  { %v646_v6 = vadd.f32 %v1216_v39, %v626_v5 }
  0xc8   :  { %v509_v9 = vpop.f32.mrf.mxu3 }
  0xc9   :  { %v662_v8 = vmax.f32 %v646_v6, 0.0  ;;  %v510_v48 = vadd.f32 %v509_v9, %v1206_v35 }
  0xca   :  { %v538_v10 = vpop.f32.mrf.mxu2  ;;  %v442_v12 = vpop.f32.mrf.mxu0 }
  0xcb   :  { %678 = vst [vmem:[%s1312_s4 + $0x18] sm:$0xff] %v662_v8  ;;  %v539_v11 = vadd.f32 %v538_v10, %v490_v7  ;;  %v491_v13 = vpop.f32.mrf.mxu1 }
  0xcc   :  { %v492_v17 = vadd.f32 %v491_v13, %v442_v12 }
  0xcd   :  { %v627_v14 = vmul.f32 %v1211_v36, %v539_v11 }
  0xcf   :  { %v647_v15 = vadd.f32 %v1216_v39, %v627_v14 }
  0xd0   :  { %v511_v18 = vpop.f32.mrf.mxu3 }
  0xd1   :  { %v663_v16 = vmax.f32 %v647_v15, 0.0  ;;  %v512_v35 = vadd.f32 %v511_v18, %v1220_v46 }
  0xd2   :  { %v540_v19 = vpop.f32.mrf.mxu2  ;;  %v445_v21 = vpop.f32.mrf.mxu0 }
  0xd3   :  { %679 = vst [vmem:[%s1312_s4 + $0x20] sm:$0xff] %v663_v16  ;;  %v541_v20 = vadd.f32 %v540_v19, %v492_v17  ;;  %v494_v22 = vpop.f32.mrf.mxu1 }
  0xd4   :  { %v495_v25 = vadd.f32 %v494_v22, %v445_v21 }
  0xd5   :  { %v628_v23 = vmul.f32 %v1211_v36, %v541_v20 }
  0xd7   :  { %v648_v24 = vadd.f32 %v1216_v39, %v628_v23 }
  0xd8   :  { %v514_v27 = vpop.f32.mrf.mxu3 }
  0xd9   :  { %v664_v26 = vmax.f32 %v648_v24, 0.0  ;;  %v515_v11 = vadd.f32 %v514_v27, %v1227_v55 }
  0xda   :  { %v543_v28 = vpop.f32.mrf.mxu2  ;;  %v447_v30 = vpop.f32.mrf.mxu0 }
  0xdb   :  { %680 = vst [vmem:[%s1312_s4 + $0x28] sm:$0xff] %v664_v26  ;;  %v544_v29 = vadd.f32 %v543_v28, %v495_v25  ;;  %v496_v31 = vpop.f32.mrf.mxu1 }
  0xdc   :  { %v497_v37 = vadd.f32 %v496_v31, %v447_v30 }
  0xdd   :  { %v629_v32 = vmul.f32 %v1211_v36, %v544_v29 }
  0xdf   :  { %v649_v33 = vadd.f32 %v1216_v39, %v629_v32 }
  0xe0   :  { %v516_v38 = vpop.f32.mrf.mxu3 }
  0xe1   :  { %v665_v34 = vmax.f32 %v649_v33, 0.0  ;;  %v517_v23 = vadd.f32 %v516_v38, %v1234_v0 }
  0xe2   :  { %v545_v40 = vpop.f32.mrf.mxu2  ;;  %v450_v42 = vpop.f32.mrf.mxu0 }
  0xe3   :  { %681 = vst [vmem:[%s1312_s4 + $0x30] sm:$0xff] %v665_v34  ;;  %v546_v41 = vadd.f32 %v545_v40, %v497_v37  ;;  %v499_v43 = vpop.f32.mrf.mxu1 }
  0xe4   :  { %v500_v47 = vadd.f32 %v499_v43, %v450_v42 }
  0xe5   :  { %v630_v44 = vmul.f32 %v1211_v36, %v546_v41 }
  0xe7   :  { %v650_v45 = vadd.f32 %v1216_v39, %v630_v44 }
  0xe8   :  { %v558_v50 = vpop.f32.mrf.mxu3 }
  0xe9   :  { %v666_v49 = vmax.f32 %v650_v45, 0.0  ;;  %v559_v52 = vadd.f32 %v558_v50, %v510_v48 }
  0xea   :  { %v548_v51 = vpop.f32.mrf.mxu2  ;;  %v452_v54 = vpop.f32.mrf.mxu0 }
  0xeb   :  { %682 = vst [vmem:[%s1312_s4 + $0x38] sm:$0xff] %v666_v49  ;;  %v549_v53 = vadd.f32 %v548_v51, %v500_v47  ;;  %v635_v56 = vmul.f32 %v1211_v36, %v559_v52  ;;  %v501_v57 = vpop.f32.mrf.mxu1 }
  0xec   :  { %v502_v63 = vadd.f32 %v501_v57, %v452_v54 }
  0xed   :  { %v631_v58 = vmul.f32 %v1211_v36, %v549_v53  ;;  %v655_v59 = vadd.f32 %v1216_v39, %v635_v56 }
  0xef   :  { %v651_v60 = vadd.f32 %v1216_v39, %v631_v58  ;;  %v671_v61 = vmax.f32 %v655_v59, 0.0 }
  0xf0   :  { %v560_v1 = vpop.f32.mrf.mxu3 }
  0xf1   :  { %v667_v62 = vmax.f32 %v651_v60, 0.0  ;;  %687 = vst [vmem:[%s1312_s4 + $0x60] sm:$0xff] %v671_v61  ;;  %v561_v3 = vadd.f32 %v560_v1, %v512_v35 }
  0xf2   :  { %v550_v2 = vpop.f32.mrf.mxu2  ;;  %v455_v6 = vpop.f32.mrf.mxu0 }
  0xf3   :  { %683 = vst [vmem:[%s1312_s4 + $0x40] sm:$0xff] %v667_v62  ;;  %v551_v4 = vadd.f32 %v550_v2, %v502_v63  ;;  %v636_v5 = vmul.f32 %v1211_v36, %v561_v3  ;;  %v504_v7 = vpop.f32.mrf.mxu1 }
  0xf4   :  { %v505_v10 = vadd.f32 %v504_v7, %v455_v6 }
  0xf5   :  { %v632_v46 = vmul.f32 %v1211_v36, %v551_v4  ;;  %v656_v8 = vadd.f32 %v1216_v39, %v636_v5 }
  0xf7   :  { %v652_v9 = vadd.f32 %v1216_v39, %v632_v46  ;;  %v672_v12 = vmax.f32 %v656_v8, 0.0 }
  0xf8   :  { %v563_v14 = vpop.f32.mrf.mxu3 }
  0xf9   :  { %v668_v13 = vmax.f32 %v652_v9, 0.0  ;;  %688 = vst [vmem:[%s1312_s4 + $0x68] sm:$0xff] %v672_v12  ;;  %v564_v16 = vadd.f32 %v563_v14, %v515_v11 }
  0xfa   :  { %v553_v15 = vpop.f32.mrf.mxu2  ;;  %v457_v20 = vpop.f32.mrf.mxu0 }
  0xfb   :  { %684 = vst [vmem:[%s1312_s4 + $0x48] sm:$0xff] %v668_v13  ;;  %v554_v17 = vadd.f32 %v553_v15, %v505_v10  ;;  %v637_v18 = vmul.f32 %v1211_v36, %v564_v16  ;;  %v506_v21 = vpop.f32.mrf.mxu1 }
  0xfc   :  { %v507_v26 = vadd.f32 %v506_v21, %v457_v20 }
  0xfd   :  { %v633_v19 = vmul.f32 %v1211_v36, %v554_v17  ;;  %v657_v55 = vadd.f32 %v1216_v39, %v637_v18 }
  0xff   :  { %v653_v22 = vadd.f32 %v1216_v39, %v633_v19  ;;  %v673_v24 = vmax.f32 %v657_v55, 0.0 }
 0x100   :  { %v565_v27 = vpop.f32.mrf.mxu3 }
 0x101   :  { %v669_v25 = vmax.f32 %v653_v22, 0.0  ;;  %689 = vst [vmem:[%s1312_s4 + $0x70] sm:$0xff] %v673_v24  ;;  %v566_v29 = vadd.f32 %v565_v27, %v517_v23 }
 0x102   :  { %v555_v28 = vpop.f32.mrf.mxu2 }
 0x103   :  { %685 = vst [vmem:[%s1312_s4 + $0x50] sm:$0xff] %v669_v25  ;;  %v556_v30 = vadd.f32 %v555_v28, %v507_v26  ;;  %v638_v31 = vmul.f32 %v1211_v36, %v566_v29 }
 0x105   :  { %v634_v32 = vmul.f32 %v1211_v36, %v556_v30  ;;  %v658_v0 = vadd.f32 %v1216_v39, %v638_v31 }
 0x107   :  { %v654_v33 = vadd.f32 %v1216_v39, %v634_v32  ;;  %v674_v34 = vmax.f32 %v658_v0, 0.0 }
 0x109   :  { %v670_v37 = vmax.f32 %v654_v33, 0.0  ;;  %690 = vst [vmem:[%s1312_s4 + $0x78] sm:$0xff] %v674_v34 }
 0x10b   :  { %686 = vst [vmem:[%s1312_s4 + $0x58] sm:$0xff] %v670_v37 }
 0x10c   :  { %695 = vsyncpa [#allocation4], 1 }

// kernel: _lambda_.23
= control target key start
LH: loop header
LB: loop body
LE: loop exit
PB: predicated region body
PF: predicated region fallthrough
CT: control target
= control target key end

     0   :  { %9 = vsyncpa [#allocation5], 0  ;;  %s1009_s0 = inlined_call_operand.vmem [shape: bf16[32,640], index: 0, kind: input, shape index: {}]   ;;  %s1010_s1 = inlined_call_operand.hbm [shape: bf16[640,128], index: 1, kind: input, shape index: {}]   ;;  %s1011_s2 = inlined_call_operand.vmem [shape: f32[1,128], index: 2, kind: input, shape index: {}]   ;;  %s1012_s3 = inlined_call_operand.vmem [shape: f32[1,128], index: 3, kind: input, shape index: {}]   ;;  %s1013_s4 = inlined_call_operand.vmem [shape: f32[32,128], index: 4, kind: output, shape index: {}]  }
   0x1   :  { %11 = vsyncpa [#allocation5 + $0x1], 0  ;;  %s885_s15 = smov 0   ;;  %s887_s16 = smov 0  }
   0x2   :  { %s889_s17 = smov 0   ;;  %s891_s18 = smov 0  }
   0x3   :  { %s893_s19 = smov 0   ;;  %s895_s20 = smov 0  }
   0x4 LB: > { %s644_s21 = sadd.s32 4294967295, %s855_s20   ;;  %s29_s22 = sadd.s32 1, %s851_s19  ;;  %s855_s20 = sphi %s895_s20, %s17_s20   ;;  %s851_s19 = sphi %s893_s19, %s1020_s19   ;;  %s847_s18 = sphi %s891_s18, %s1019_s18   ;;  %s843_s17 = sphi %s889_s17, %s1018_s17   ;;  %s839_s16 = sphi %s887_s16, %s1017_s16   ;;  %s835_s15 = sphi %s885_s15, %s1016_s15  }
   0x5   : > { %p30_p0 = scmp.ge.s32.totalorder %s29_s22, 5  ;;  %s45_s23 = sadd.s32 1, %s843_s17 }
   0x6   : > { %p52_p1 = scmp.ne.s32.totalorder %s843_s17, %s839_s16  ;;  %p53_p2 = scmp.eq.s32.totalorder %s855_s20, 0 }
   0x7   : > { %s1022_s22 = smov (%p30_p0, %s29_s22), 0  ;;  %p86_p4 = scmp.ne.s32.totalorder %s839_s16, %s835_s15 }
   0x8   : > { %p921_p3 = por %p53_p2, %p52_p1  ;;  %s41_s25 = ssub.s32 %s851_s19, %s1022_s22 }
   0x9   : > { %p87_p5 = scmp.eq.s32.totalorder %s644_s21, 0  ;;  %p43_p6 = scmp.eq.s32.totalorder %s41_s25, 0 }
   0xa   : > { %p648_p8 = scmp.ge.s32.totalorder %s855_s20, 5 }
   0xb   : > { %p928_p7 = por %p87_p5, %p86_p4 }
   0xc   : > { %s933_s27 = scalar_select %p43_p6, %s843_s17, %s45_s23  }
   0xd   : > { %198 = sbr.rel (%p648_p8) target bundleno = 32 (0x20), region = 24 }
  0x12   : > { %201 = sbr.rel (!%p921_p3) target bundleno = 26 (0x1a), region = 28  ;;  %s203_s28 = sand.u32 (%p921_p3), 1, %s843_s17  }
  0x13   : > { %s650_s29 = sshll.u32 (%p921_p3), %s851_s19, 2  ;;  %s649_s30 = sshll.u32 (%p921_p3), %s203_s28, 4 }
  0x14   : > { %s210_s7 = scalar_lea.vmem (%p921_p3), %s1009_s0, %s650_s29  ;;  %s205_s8 = scalar_lea.vmem (%p921_p3), [#allocation3], %s649_s30 }
  0x15   : > { %v227_v0 = vld [vmem:[%s210_s7] sm:$0xf] (%p921_p3)  ;;  %v229_v1 = vld [vmem:[%s210_s7 + $0x14] sm:$0xf] (%p921_p3)  ;;  %v231_v2 = vld [vmem:[%s210_s7 + $0x28] sm:$0xf] (%p921_p3) }
  0x16   : > { %228 = vst [vmem:[%s205_s8] sm:$0xf] (%p921_p3), %v227_v0  ;;  %v233_v3 = vld [vmem:[%s210_s7 + $0x3c] sm:$0xf] (%p921_p3) }
  0x17   : > { %230 = vst [vmem:[%s205_s8 + $0x4] sm:$0xf] %v229_v1 }
  0x18   : > { %232 = vst [vmem:[%s205_s8 + $0x8] sm:$0xf] %v231_v2 }
  0x19   : > { %234 = vst [vmem:[%s205_s8 + $0xc] sm:$0xf] %v233_v3 }
  0x1a PF: > { %s267_s9 = sand.u32 1, %s843_s17   ;;  %s703_s10 = sshll.u32 %s851_s19, 6 }
  0x1b   : > { %s651_s11 = sshll.u32 %s267_s9, 6  ;;  %s277_s14 = scalar_lea.hbm %s1010_s1, %s703_s10 }
  0x1c   : > { %s278_s15 = sshll.u32 %s277_s14, 4  ;;  %s271_s21 = scalar_lea.vmem [#allocation4], %s651_s11  ;;  %s279_s15 = int_to_ptr.hbm [resolvable:$true] %s278_s15 }
  0x1d   : > { %s280_s23 = sshll.u32 %s271_s21, 4  ;;  %s268_s25 = scalar_lea.sflag [#allocation5], %s267_s9  ;;  %s281_s23 = int_to_ptr.vmem [resolvable:$true] %s280_s23 }
  0x1e   : > { %s857_s28 = smov 64   ;;  %s858_s29 = smov 4  }
  0x1f   : > { %722 = dma.hbm_to_vmem [thread:$0]  (%p921_p3), %s279_s15, 1024, %s281_s23, %s268_s25, %s857_s28, %s857_s28, %s858_s29  }
  0x20 PF: > { %p654_p9 = scmp.ge.s32.totalorder %s855_s20, 1  ;;  %p288_p10 = scmp.lt.s32.totalorder %s855_s20, 6 }
  0x22   : > { %p289_p11 = pnand %p654_p9, %p288_p10 }
  0x23   : > { %s295_s30 = sand.u32 (!%p289_p11), 1, %s839_s16  }
  0x24   : > { %292 = sbr.rel (%p289_p11) target bundleno = 238 (0xee), region = 73  ;;  %s655_s5 = sshll.u32 (!%p289_p11), %s295_s30, 4 }
  0x25   : > { %s656_s6 = sshll.u32 (!%p289_p11), %s295_s30, 6  ;;  %s953_s7 = scalar_lea.vmem (!%p289_p11), [#allocation3], %s655_s5 }
  0x26   : > { %s302_s8 = scalar_lea.sflag (!%p289_p11), [#allocation5], %s295_s30  ;;  %s955_s9 = scalar_lea.vmem (!%p289_p11), [#allocation4], %s656_s6 }
  0x29   : > { %830 = dma.done.wait (%p928_p7), %s302_s8, 1024  }
  0x2a   : > { %832 = vsyncadd (%p928_p7), %s302_s8, 4294966272  ;;  %p657_p12 = scmp.ne.s32.totalorder %s847_s18, 0 }
  0x2c   : > { %364 = sbr.rel (%p657_p12) target bundleno = 54 (0x36), region = 85 }
  0x31   : > { %v859_v4 = vmov 0.0  }
  0x32   : > { %365 = vst [vmem:[#allocation2 + $0x10] sm:$0xff] %v859_v4 }
  0x33   : > { %366 = vst [vmem:[#allocation2] sm:$0xff] %v859_v4 }
  0x34   : > { %367 = vst [vmem:[#allocation2 + $0x18] sm:$0xff] %v859_v4 }
  0x35   : > { %368 = vst [vmem:[#allocation2 + $0x8] sm:$0xff] %v859_v4 }
  0x36 PF: > { %v713_v5 = vld [vmem:[%s955_s9 + $0x38] sm:$0xff]  ;;  %v712_v6 = vld [vmem:[%s955_s9 + $0x30] sm:$0xff]  ;;  %v711_v7 = vld [vmem:[%s955_s9 + $0x28] sm:$0xff]  ;;  %p698_p13 = scmp.ne.s32.totalorder %s847_s18, 4 }
  0x37   : > { %453 = vmatpush.bf16.msra.mxu0 %v713_v5  ;;  %714 = vmatpush.bf16.msra.mxu1 %v713_v5  ;;  %v710_v8 = vld [vmem:[%s955_s9 + $0x20] sm:$0xff]  ;;  %v709_v9 = vld [vmem:[%s955_s9 + $0x18] sm:$0xff]  ;;  %v708_v10 = vld [vmem:[%s955_s9 + $0x10] sm:$0xff] }
  0x38   : > { %v707_v11 = vld [vmem:[%s955_s9 + $0x8] sm:$0xff]  ;;  %v706_v12 = vld [vmem:[%s955_s9] sm:$0xff] }
  0x39   : > { %v704_v13 = vld [vmem:[%s953_s7] sm:$0xff]  ;;  %v705_v14 = vld [vmem:[%s953_s7 + $0x8] sm:$0xff] }
  0x3a   : > { %v369_v15 = vld [vmem:[#allocation2 + $0x10] sm:$0xff]  ;;  %v370_v21 = vld [vmem:[#allocation2] sm:$0xff] }
  0x3b   : > { %454 = vmatpush.bf16.msra.mxu0 %v712_v6  ;;  %715 = vmatpush.bf16.msra.mxu1 %v712_v6  ;;  %v371_v16 = vld [vmem:[#allocation2 + $0x18] sm:$0xff] }
  0x3c   : > { %v372_v22 = vld [vmem:[#allocation2 + $0x8] sm:$0xff] }
  0x3f   : > { %455 = vmatpush.bf16.msra.mxu0 %v711_v7  ;;  %716 = vmatpush.bf16.msra.mxu1 %v711_v7 }
  0x43   : > { %456 = vmatpush.bf16.msra.mxu0 %v710_v8  ;;  %717 = vmatpush.bf16.msra.mxu1 %v710_v8 }
  0x47   : > { %457 = vmatpush.bf16.msra.mxu0 %v709_v9  ;;  %718 = vmatpush.bf16.msra.mxu1 %v709_v9 }
  0x4b   : > { %458 = vmatpush.bf16.msra.mxu0 %v708_v10  ;;  %719 = vmatpush.bf16.msra.mxu1 %v708_v10 }
  0x4f   : > { %459 = vmatpush.bf16.msra.mxu0 %v707_v11  ;;  %720 = vmatpush.bf16.msra.mxu1 %v707_v11 }
  0x53   : > { %460 = vmatpush.bf16.msra.mxu0 %v706_v12  ;;  %721 = vmatpush.bf16.msra.mxu1 %v706_v12 }
  0x56   : > { %461 = vmatmul.bf16.vlgmr.msra.gmra.mxu0 %v704_v13  ;;  %466 = vmatmul.bf16.vlgmr.msra.gmra.mxu1 %v705_v14 }
  0xd3   : > { %v462_v17 = vpop.f32.mrf.mxu0  ;;  %v467_v18 = vpop.f32.mrf.mxu1 }
  0xd4   : > { %v472_v19 = vadd.f32 %v462_v17, %v369_v15  ;;  %v474_v20 = vadd.f32 %v467_v18, %v371_v16 }
  0xd6   : > { %476 = vst [vmem:[#allocation2 + $0x10] sm:$0xff] %v472_v19 }
  0xd7   : > { %478 = vst [vmem:[#allocation2 + $0x18] sm:$0xff] %v474_v20 }
  0xdb   : > { %v464_v23 = vpop.f32.mrf.mxu0  ;;  %v469_v24 = vpop.f32.mrf.mxu1  ;;  %483 = sbr.rel (%p698_p13) target bundleno = 238 (0xee), region = 89 }
  0xdc   : > { %v473_v25 = vadd.f32 %v464_v23, %v370_v21  ;;  %v475_v26 = vadd.f32 %v469_v24, %v372_v22 }
  0xde   : > { %477 = vst [vmem:[#allocation2] sm:$0xff] %v473_v25 }
  0xdf   : > { %479 = vst [vmem:[#allocation2 + $0x8] sm:$0xff] %v475_v26 }
  0xe0   : > { %v484_v27 = vld [vmem:[#allocation2 + $0x10] sm:$0xff]  ;;  %v775_v28 = vld [vmem:[%s1011_s2] ss:$0 sm:$0xff]  ;;  %v486_v33 = vld [vmem:[#allocation2 + $0x18] sm:$0xff] }
  0xe1   : > { %v776_v29 = vld [vmem:[%s1012_s3] ss:$0 sm:$0xff]  ;;  %v492_v31 = vmul.f32 %v775_v28, %v484_v27  ;;  %v494_v35 = vmul.f32 %v775_v28, %v486_v33 }
  0xe3   : > { %v500_v37 = vadd.f32 %v776_v29, %v492_v31  ;;  %v502_v39 = vadd.f32 %v776_v29, %v494_v35 }
  0xe5   : > { %v485_v30 = vld [vmem:[#allocation2] sm:$0xff]  ;;  %v504_v41 = vmax.f32 %v500_v37, 0.0  ;;  %v506_v43 = vmax.f32 %v502_v39, 0.0 }
  0xe6   : > { %v493_v32 = vmul.f32 %v775_v28, %v485_v30  ;;  %v487_v34 = vld [vmem:[#allocation2 + $0x8] sm:$0xff] }
  0xe7   : > { %v495_v36 = vmul.f32 %v775_v28, %v487_v34  ;;  %508 = vst [vmem:[%s1013_s4] sm:$0xff] %v504_v41 }
  0xe8   : > { %v501_v38 = vadd.f32 %v776_v29, %v493_v32  ;;  %510 = vst [vmem:[%s1013_s4 + $0x10] sm:$0xff] %v506_v43 }
  0xe9   : > { %v503_v40 = vadd.f32 %v776_v29, %v495_v36 }
  0xea   : > { %v505_v42 = vmax.f32 %v501_v38, 0.0 }
  0xeb   : > { %v507_v44 = vmax.f32 %v503_v40, 0.0 }
  0xec   : > { %509 = vst [vmem:[%s1013_s4 + $0x8] sm:$0xff] %v505_v42 }
  0xed   : > { %511 = vst [vmem:[%s1013_s4 + $0x18] sm:$0xff] %v507_v44 }
  0xee PF: > { %s17_s20 = sadd.s32 1, %s855_s20   ;;  %s1016_s15 = smov %s839_s16 }
  0xef   : > { %p14_p0 = scmp.ge.s32.totalorder %s17_s20, 7   ;;  %s1017_s16 = smov %s843_s17 }
  0xf0   : > { %s1018_s17 = smov %s933_s27  ;;  %s1019_s18 = smov %s851_s19 }
  0xf1   : > { %s1020_s19 = smov %s1022_s22  ;;  %16 = sbr.rel (!%p14_p0) target bundleno = 4 (0x4), region = 139 }
  0xf6   :  { %540 = vsyncpa [#allocation5], 1 }
  0xf7   :  { %542 = vsyncpa [#allocation5 + $0x1], 1 }

// kernel: _lambda_.24
= control target key start
LH: loop header
LB: loop body
LE: loop exit
PB: predicated region body
PF: predicated region fallthrough
CT: control target
= control target key end

     0   :  { %10 = vsyncpa [#allocation5], 0  ;;  %s1113_s0 = inlined_call_operand.vmem [shape: bf16[32,640], index: 0, kind: input, shape index: {}]   ;;  %s1114_s1 = inlined_call_operand.hbm [shape: bf16[640,128], index: 1, kind: input, shape index: {}]   ;;  %s1115_s2 = inlined_call_operand.vmem [shape: f32[1,128], index: 2, kind: input, shape index: {}]   ;;  %s1116_s3 = inlined_call_operand.vmem [shape: f32[1,128], index: 3, kind: input, shape index: {}]   ;;  %s1117_s4 = inlined_call_operand.vmem [shape: f32[32,128], index: 4, kind: input, shape index: {}]   ;;  %s1118_s5 = inlined_call_operand.vmem [shape: f32[32,128], index: 5, kind: output, shape index: {}]  }
   0x1   :  { %12 = vsyncpa [#allocation5 + $0x1], 0  ;;  %s977_s18 = smov 0   ;;  %s979_s19 = smov 0  }
   0x2   :  { %s981_s20 = smov 0   ;;  %s983_s21 = smov 0  }
   0x3   :  { %s985_s22 = smov 0   ;;  %s987_s23 = smov 0  }
   0x4 LB: > { %s730_s24 = sadd.s32 4294967295, %s942_s23   ;;  %s30_s25 = sadd.s32 1, %s938_s22  ;;  %s942_s23 = sphi %s987_s23, %s18_s23   ;;  %s938_s22 = sphi %s985_s22, %s1125_s22   ;;  %s934_s21 = sphi %s983_s21, %s1124_s21   ;;  %s930_s20 = sphi %s981_s20, %s1123_s20   ;;  %s926_s19 = sphi %s979_s19, %s1122_s19   ;;  %s922_s18 = sphi %s977_s18, %s1121_s18  }
   0x5   : > { %p31_p0 = scmp.ge.s32.totalorder %s30_s25, 5  ;;  %s46_s26 = sadd.s32 1, %s930_s20 }
   0x6   : > { %p53_p1 = scmp.ne.s32.totalorder %s930_s20, %s926_s19  ;;  %p54_p2 = scmp.eq.s32.totalorder %s942_s23, 0 }
   0x7   : > { %s1127_s25 = smov (%p31_p0, %s30_s25), 0  ;;  %p87_p4 = scmp.ne.s32.totalorder %s926_s19, %s922_s18 }
   0x8   : > { %p1013_p3 = por %p54_p2, %p53_p1  ;;  %s42_s28 = ssub.s32 %s938_s22, %s1127_s25 }
   0x9   : > { %p88_p5 = scmp.eq.s32.totalorder %s730_s24, 0  ;;  %p44_p6 = scmp.eq.s32.totalorder %s42_s28, 0 }
   0xa   : > { %p735_p8 = scmp.ge.s32.totalorder %s942_s23, 5 }
   0xb   : > { %p1020_p7 = por %p88_p5, %p87_p4 }
   0xc   : > { %s1025_s30 = scalar_select %p44_p6, %s930_s20, %s46_s26  }
   0xd   : > { %239 = sbr.rel (%p735_p8) target bundleno = 32 (0x20), region = 28 }
  0x12   : > { %242 = sbr.rel (!%p1013_p3) target bundleno = 26 (0x1a), region = 32  ;;  %s244_s6 = sand.u32 (%p1013_p3), 1, %s930_s20  }
  0x13   : > { %s737_s7 = sshll.u32 (%p1013_p3), %s938_s22, 2  ;;  %s736_s8 = sshll.u32 (%p1013_p3), %s244_s6, 4 }
  0x14   : > { %s251_s11 = scalar_lea.vmem (%p1013_p3), %s1113_s0, %s737_s7  ;;  %s246_s12 = scalar_lea.vmem (%p1013_p3), [#allocation3], %s736_s8 }
  0x15   : > { %v268_v0 = vld [vmem:[%s251_s11] sm:$0xf] (%p1013_p3)  ;;  %v270_v1 = vld [vmem:[%s251_s11 + $0x14] sm:$0xf] (%p1013_p3)  ;;  %v272_v2 = vld [vmem:[%s251_s11 + $0x28] sm:$0xf] (%p1013_p3) }
  0x16   : > { %269 = vst [vmem:[%s246_s12] sm:$0xf] (%p1013_p3), %v268_v0  ;;  %v274_v3 = vld [vmem:[%s251_s11 + $0x3c] sm:$0xf] (%p1013_p3) }
  0x17   : > { %271 = vst [vmem:[%s246_s12 + $0x4] sm:$0xf] %v270_v1 }
  0x18   : > { %273 = vst [vmem:[%s246_s12 + $0x8] sm:$0xf] %v272_v2 }
  0x19   : > { %275 = vst [vmem:[%s246_s12 + $0xc] sm:$0xf] %v274_v3 }
  0x1a PF: > { %s308_s13 = sand.u32 1, %s930_s20   ;;  %s790_s14 = sshll.u32 %s938_s22, 6 }
  0x1b   : > { %s738_s15 = sshll.u32 %s308_s13, 6  ;;  %s318_s18 = scalar_lea.hbm %s1114_s1, %s790_s14 }
  0x1c   : > { %s319_s24 = sshll.u32 %s318_s18, 4  ;;  %s312_s26 = scalar_lea.vmem [#allocation4], %s738_s15  ;;  %s320_s24 = int_to_ptr.hbm [resolvable:$true] %s319_s24 }
  0x1d   : > { %s321_s28 = sshll.u32 %s312_s26, 4  ;;  %s309_s6 = scalar_lea.sflag [#allocation5], %s308_s13  ;;  %s322_s28 = int_to_ptr.vmem [resolvable:$true] %s321_s28 }
  0x1e   : > { %s944_s7 = smov 64   ;;  %s945_s8 = smov 4  }
  0x1f   : > { %809 = dma.hbm_to_vmem [thread:$0]  (%p1013_p3), %s320_s24, 1024, %s322_s28, %s309_s6, %s944_s7, %s944_s7, %s945_s8  }
  0x20 PF: > { %p741_p9 = scmp.ge.s32.totalorder %s942_s23, 1  ;;  %p329_p10 = scmp.lt.s32.totalorder %s942_s23, 6 }
  0x22   : > { %p330_p11 = pnand %p741_p9, %p329_p10 }
  0x23   : > { %s336_s9 = sand.u32 (!%p330_p11), 1, %s926_s19  }
  0x24   : > { %333 = sbr.rel (%p330_p11) target bundleno = 240 (0xf0), region = 77  ;;  %s742_s10 = sshll.u32 (!%p330_p11), %s336_s9, 4 }
  0x25   : > { %s743_s11 = sshll.u32 (!%p330_p11), %s336_s9, 6  ;;  %s1045_s12 = scalar_lea.vmem (!%p330_p11), [#allocation3], %s742_s10 }
  0x26   : > { %s343_s14 = scalar_lea.sflag (!%p330_p11), [#allocation5], %s336_s9  ;;  %s1047_s13 = scalar_lea.vmem (!%p330_p11), [#allocation4], %s743_s11 }
  0x29   : > { %917 = dma.done.wait (%p1020_p7), %s343_s14, 1024  }
  0x2a   : > { %919 = vsyncadd (%p1020_p7), %s343_s14, 4294966272  ;;  %p744_p12 = scmp.ne.s32.totalorder %s934_s21, 0 }
  0x2c   : > { %424 = sbr.rel (%p744_p12) target bundleno = 54 (0x36), region = 89 }
  0x31   : > { %v946_v4 = vmov 0.0  }
  0x32   : > { %425 = vst [vmem:[#allocation2 + $0x10] sm:$0xff] %v946_v4 }
  0x33   : > { %426 = vst [vmem:[#allocation2] sm:$0xff] %v946_v4 }
  0x34   : > { %427 = vst [vmem:[#allocation2 + $0x18] sm:$0xff] %v946_v4 }
  0x35   : > { %428 = vst [vmem:[#allocation2 + $0x8] sm:$0xff] %v946_v4 }
  0x36 PF: > { %v800_v5 = vld [vmem:[%s1047_s13 + $0x38] sm:$0xff]  ;;  %v799_v6 = vld [vmem:[%s1047_s13 + $0x30] sm:$0xff]  ;;  %v798_v7 = vld [vmem:[%s1047_s13 + $0x28] sm:$0xff]  ;;  %p785_p13 = scmp.ne.s32.totalorder %s934_s21, 4 }
  0x37   : > { %513 = vmatpush.bf16.msra.mxu0 %v800_v5  ;;  %801 = vmatpush.bf16.msra.mxu1 %v800_v5  ;;  %v797_v8 = vld [vmem:[%s1047_s13 + $0x20] sm:$0xff]  ;;  %v796_v9 = vld [vmem:[%s1047_s13 + $0x18] sm:$0xff]  ;;  %v795_v10 = vld [vmem:[%s1047_s13 + $0x10] sm:$0xff] }
  0x38   : > { %v794_v11 = vld [vmem:[%s1047_s13 + $0x8] sm:$0xff]  ;;  %v793_v12 = vld [vmem:[%s1047_s13] sm:$0xff] }
  0x39   : > { %v791_v13 = vld [vmem:[%s1045_s12] sm:$0xff]  ;;  %v792_v14 = vld [vmem:[%s1045_s12 + $0x8] sm:$0xff] }
  0x3a   : > { %v429_v15 = vld [vmem:[#allocation2 + $0x10] sm:$0xff]  ;;  %v430_v21 = vld [vmem:[#allocation2] sm:$0xff] }
  0x3b   : > { %514 = vmatpush.bf16.msra.mxu0 %v799_v6  ;;  %802 = vmatpush.bf16.msra.mxu1 %v799_v6  ;;  %v431_v16 = vld [vmem:[#allocation2 + $0x18] sm:$0xff] }
  0x3c   : > { %v432_v22 = vld [vmem:[#allocation2 + $0x8] sm:$0xff] }
  0x3f   : > { %515 = vmatpush.bf16.msra.mxu0 %v798_v7  ;;  %803 = vmatpush.bf16.msra.mxu1 %v798_v7 }
  0x43   : > { %516 = vmatpush.bf16.msra.mxu0 %v797_v8  ;;  %804 = vmatpush.bf16.msra.mxu1 %v797_v8 }
  0x47   : > { %517 = vmatpush.bf16.msra.mxu0 %v796_v9  ;;  %805 = vmatpush.bf16.msra.mxu1 %v796_v9 }
  0x4b   : > { %518 = vmatpush.bf16.msra.mxu0 %v795_v10  ;;  %806 = vmatpush.bf16.msra.mxu1 %v795_v10 }
  0x4f   : > { %519 = vmatpush.bf16.msra.mxu0 %v794_v11  ;;  %807 = vmatpush.bf16.msra.mxu1 %v794_v11 }
  0x53   : > { %520 = vmatpush.bf16.msra.mxu0 %v793_v12  ;;  %808 = vmatpush.bf16.msra.mxu1 %v793_v12 }
  0x56   : > { %521 = vmatmul.bf16.vlgmr.msra.gmra.mxu0 %v791_v13  ;;  %526 = vmatmul.bf16.vlgmr.msra.gmra.mxu1 %v792_v14 }
  0xd3   : > { %v522_v17 = vpop.f32.mrf.mxu0  ;;  %v527_v18 = vpop.f32.mrf.mxu1 }
  0xd4   : > { %v532_v19 = vadd.f32 %v522_v17, %v429_v15  ;;  %v534_v20 = vadd.f32 %v527_v18, %v431_v16 }
  0xd6   : > { %536 = vst [vmem:[#allocation2 + $0x10] sm:$0xff] %v532_v19 }
  0xd7   : > { %538 = vst [vmem:[#allocation2 + $0x18] sm:$0xff] %v534_v20 }
  0xdb   : > { %v524_v23 = vpop.f32.mrf.mxu0  ;;  %v529_v24 = vpop.f32.mrf.mxu1  ;;  %543 = sbr.rel (%p785_p13) target bundleno = 240 (0xf0), region = 93 }
  0xdc   : > { %v533_v25 = vadd.f32 %v524_v23, %v430_v21  ;;  %v535_v26 = vadd.f32 %v529_v24, %v432_v22 }
  0xde   : > { %537 = vst [vmem:[#allocation2] sm:$0xff] %v533_v25 }
  0xdf   : > { %539 = vst [vmem:[#allocation2 + $0x8] sm:$0xff] %v535_v26 }
  0xe0   : > { %v544_v27 = vld [vmem:[#allocation2 + $0x10] sm:$0xff]  ;;  %v862_v28 = vld [vmem:[%s1115_s2] ss:$0 sm:$0xff]  ;;  %v546_v32 = vld [vmem:[#allocation2 + $0x18] sm:$0xff] }
  0xe1   : > { %v863_v29 = vld [vmem:[%s1116_s3] ss:$0 sm:$0xff]  ;;  %v552_v30 = vmul.f32 %v862_v28, %v544_v27  ;;  %v554_v35 = vmul.f32 %v862_v28, %v546_v32  ;;  %v565_v38 = vld [vmem:[%s1117_s4 + $0x8] sm:$0xff]  ;;  %v566_v39 = vld [vmem:[%s1117_s4 + $0x10] sm:$0xff] }
  0xe2   : > { %v564_v33 = vld [vmem:[%s1117_s4] sm:$0xff]  ;;  %v567_v43 = vld [vmem:[%s1117_s4 + $0x18] sm:$0xff] }
  0xe3   : > { %v560_v37 = vadd.f32 %v863_v29, %v552_v30  ;;  %v562_v42 = vadd.f32 %v863_v29, %v554_v35 }
  0xe5   : > { %v545_v31 = vld [vmem:[#allocation2] sm:$0xff]  ;;  %v568_v44 = vadd.f32 %v564_v33, %v560_v37  ;;  %v570_v47 = vadd.f32 %v566_v39, %v562_v42 }
  0xe6   : > { %v553_v34 = vmul.f32 %v862_v28, %v545_v31  ;;  %v547_v36 = vld [vmem:[#allocation2 + $0x8] sm:$0xff] }
  0xe7   : > { %v555_v40 = vmul.f32 %v862_v28, %v547_v36  ;;  %v572_v48 = vmax.f32 %v568_v44, 0.0  ;;  %v574_v51 = vmax.f32 %v570_v47, 0.0 }
  0xe8   : > { %v561_v41 = vadd.f32 %v863_v29, %v553_v34 }
  0xe9   : > { %v563_v45 = vadd.f32 %v863_v29, %v555_v40  ;;  %576 = vst [vmem:[%s1118_s5] sm:$0xff] %v572_v48 }
  0xea   : > { %v569_v46 = vadd.f32 %v565_v38, %v561_v41  ;;  %578 = vst [vmem:[%s1118_s5 + $0x10] sm:$0xff] %v574_v51 }
  0xeb   : > { %v571_v49 = vadd.f32 %v567_v43, %v563_v45 }
  0xec   : > { %v573_v50 = vmax.f32 %v569_v46, 0.0 }
  0xed   : > { %v575_v52 = vmax.f32 %v571_v49, 0.0 }
  0xee   : > { %577 = vst [vmem:[%s1118_s5 + $0x8] sm:$0xff] %v573_v50 }
  0xef   : > { %579 = vst [vmem:[%s1118_s5 + $0x18] sm:$0xff] %v575_v52 }
  0xf0 PF: > { %s18_s23 = sadd.s32 1, %s942_s23   ;;  %s1121_s18 = smov %s926_s19 }
  0xf1   : > { %p15_p0 = scmp.ge.s32.totalorder %s18_s23, 7   ;;  %s1122_s19 = smov %s930_s20 }
  0xf2   : > { %s1123_s20 = smov %s1025_s30  ;;  %s1124_s21 = smov %s938_s22 }
  0xf3   : > { %s1125_s22 = smov %s1127_s25  ;;  %17 = sbr.rel (!%p15_p0) target bundleno = 4 (0x4), region = 146 }
  0xf8   :  { %608 = vsyncpa [#allocation5], 1 }
  0xf9   :  { %610 = vsyncpa [#allocation5 + $0x1], 1 }

// kernel: _lambda_.27
= control target key start
LH: loop header
LB: loop body
LE: loop exit
PB: predicated region body
PF: predicated region fallthrough
CT: control target
= control target key end

     0   :  { %s646_s15 = smov 0   ;;  %s648_s16 = smov 0   ;;  %s695_s0 = inlined_call_operand.vmem [shape: bf16[8,640], index: 0, kind: input, shape index: {}]   ;;  %s696_s1 = inlined_call_operand.vmem [shape: bf16[640,128], index: 1, kind: input, shape index: {}]   ;;  %s697_s2 = inlined_call_operand.vmem [shape: f32[1,128], index: 2, kind: input, shape index: {}]   ;;  %s698_s3 = inlined_call_operand.vmem [shape: f32[1,128], index: 3, kind: input, shape index: {}]   ;;  %s699_s4 = inlined_call_operand.vmem [shape: f32[8,128], index: 4, kind: output, shape index: {}]  }
   0x1   :  { %s650_s17 = smov 0  }
   0x2 LB: > { %s26_s18 = sadd.s32 1, %s614_s16  ;;  %p520_p0 = scmp.ge.s32.totalorder %s618_s17, 1  ;;  %s618_s17 = sphi %s650_s17, %s14_s17   ;;  %s614_s16 = sphi %s648_s16, %s701_s16   ;;  %s610_s15 = sphi %s646_s15, %s700_s15  }
   0x3   : > { %p27_p1 = scmp.ge.s32.totalorder %s26_s18, 5  ;;  %p220_p2 = scmp.lt.s32.totalorder %s618_s17, 6 }
   0x5   : > { %s703_s18 = smov (%p27_p1, %s26_s18), 0  ;;  %p221_p3 = pnand %p520_p0, %p220_p2 }
   0x6   : > { %p267_p4 = scmp.lt.s32.totalorder (!%p221_p3), %s610_s15, 4  ;;  %s522_s19 = sshll.u32 (!%p221_p3), %s610_s15, 4 }
   0x7   : > { %224 = sbr.rel (%p221_p3) target bundleno = 195 (0xc3), region = 36  ;;  %p274_p5 = scmp.lt.s32.totalorder (!%p221_p3), %s522_s19, 79 }
   0x8   : > { %p524_p6 = scmp.ne.s32.totalorder (!%p221_p3), %s610_s15, 0 }
   0xc   : > { %s268_s20 = scalar_select %p267_p4, %s610_s15, 4 }
   0xd   : > { %s705_s19 = smov (!%p274_p5, %s522_s19), 79  ;;  %298 = sbr.rel (%p524_p6) target bundleno = 20 (0x14), region = 40 }
   0xe   : > { %s521_s21 = sshll.u32 %s268_s20, 2  ;;  %s523_s25 = sshll.u32 %s705_s19, 2 }
   0xf   : > { %s272_s24 = scalar_lea.vmem %s695_s0, %s521_s21  ;;  %s280_s28 = scalar_lea.vmem %s696_s1, %s523_s25 }
  0x12   : > { %v620_v0 = vmov 0.0  }
  0x13   : > { %299 = vst [vmem:[#allocation2] sm:$0xff] %v620_v0 }
  0x14 PF: > { %v568_v1 = vld [vmem:[%s280_s28 + $0x38] sm:$0xff]  ;;  %v567_v2 = vld [vmem:[%s280_s28 + $0x30] sm:$0xff]  ;;  %v566_v3 = vld [vmem:[%s280_s28 + $0x28] sm:$0xff]  ;;  %p557_p7 = scmp.ne.s32.totalorder %s610_s15, 4 }
  0x15   : > { %366 = vmatpush.bf16.msra.mxu0 %v568_v1  ;;  %v565_v4 = vld [vmem:[%s280_s28 + $0x20] sm:$0xff]  ;;  %v564_v5 = vld [vmem:[%s280_s28 + $0x18] sm:$0xff]  ;;  %v563_v6 = vld [vmem:[%s280_s28 + $0x10] sm:$0xff] }
  0x16   : > { %v562_v7 = vld [vmem:[%s280_s28 + $0x8] sm:$0xff]  ;;  %v561_v8 = vld [vmem:[%s280_s28] sm:$0xff] }
  0x17   : > { %v301_v9 = vld [vmem:[%s272_s24] sm:$0xf] }
  0x19   : > { %367 = vmatpush.bf16.msra.mxu0 %v567_v2 }
  0x1a   : > { %v300_v10 = vld [vmem:[#allocation2] sm:$0xff] }
  0x1d   : > { %368 = vmatpush.bf16.msra.mxu0 %v566_v3 }
  0x21   : > { %369 = vmatpush.bf16.msra.mxu0 %v565_v4 }
  0x25   : > { %370 = vmatpush.bf16.msra.mxu0 %v564_v5 }
  0x29   : > { %371 = vmatpush.bf16.msra.mxu0 %v563_v6 }
  0x2d   : > { %372 = vmatpush.bf16.msra.mxu0 %v562_v7 }
  0x31   : > { %373 = vmatpush.bf16.msra.mxu0 %v561_v8 }
  0x34   : > { %374 = vmatmul.bf16.vlgmr.msra.gmra.mxu0 %v301_v9 }
  0xb1   : > { %v375_v11 = vpop.f32.mrf.mxu0 }
  0xb2   : > { %v379_v12 = vadd.f32 %v375_v11, %v300_v10 }
  0xb4   : > { %380 = vst [vmem:[#allocation2] sm:$0xff] %v379_v12 }
  0xb5   : > { %384 = sbr.rel (%p557_p7) target bundleno = 195 (0xc3), region = 44 }
  0xb9   : > { %v377_v13 = vpop.f32.mrf.mxu0 }
  0xba   : > { %v594_v15 = vld [vmem:[%s697_s2] ss:$0 sm:$0xff] }
  0xbb   : > { %v385_v14 = vld [vmem:[#allocation2] sm:$0xff] }
  0xbc   : > { %v595_v16 = vld [vmem:[%s698_s3] ss:$0 sm:$0xff]  ;;  %v390_v17 = vmul.f32 %v594_v15, %v385_v14 }
  0xbe   : > { %v395_v18 = vadd.f32 %v595_v16, %v390_v17 }
  0xc0   : > { %v396_v19 = vmax.f32 %v395_v18, 0.0 }
  0xc2   : > { %397 = vst [vmem:[%s699_s4] sm:$0xff] %v396_v19 }
  0xc3 PF: > { %s14_s17 = sadd.s32 1, %s618_s17   ;;  %s700_s15 = smov %s614_s16 }
  0xc4   : > { %p11_p8 = scmp.ge.s32.totalorder %s14_s17, 7   ;;  %s701_s16 = smov %s703_s18 }
  0xc6   :  { %13 = sbr.rel (!%p11_p8) target bundleno = 2 (0x2), region = 83 }

// kernel: _lambda_.28
= control target key start
LH: loop header
LB: loop body
LE: loop exit
PB: predicated region body
PF: predicated region fallthrough
CT: control target
= control target key end

     0   :  { %9 = vsyncpa [#allocation4], 0  ;;  %s210_s18 = smov [#allocation3]   ;;  %s211_s20 = smov 64   ;;  %s253_s0 = inlined_call_operand.vmem [shape: bf16[8,128], index: 0, kind: input, shape index: {}]   ;;  %s254_s1 = inlined_call_operand.hbm [shape: bf16[128,128], index: 1, kind: input, shape index: {}]   ;;  %s255_s2 = inlined_call_operand.vmem [shape: f32[1,128], index: 2, kind: input, shape index: {}]   ;;  %s256_s3 = inlined_call_operand.vmem [shape: f32[1,128], index: 3, kind: input, shape index: {}]   ;;  %s257_s4 = inlined_call_operand.vmem [shape: f32[8,128], index: 4, kind: output, shape index: {}]  }
   0x1   :  { %s16_s17 = sshll.u32 %s254_s1, 4  ;;  %s18_s19 = sshll.u32 %s210_s18, 4  ;;  %s17_s17 = int_to_ptr.hbm [resolvable:$true] %s16_s17  ;;  %s19_s19 = int_to_ptr.vmem [resolvable:$true] %s18_s19 }
   0x2   :  { %s212_s21 = smov 4  }
   0x3   :  { %24 = dma.hbm_to_vmem [thread:$0]  %s17_s17, 1024, %s19_s19, [#allocation4], %s211_s20, %s211_s20, %s212_s21  }
   0x4   :  { %208 = dma.done.wait [#allocation4], 1024  }
   0x5   :  { %209 = vsyncadd [#allocation4], 4294966272  ;;  %v178_v0 = vld [vmem:[#allocation3 + $0x38] sm:$0xff]  ;;  %v177_v1 = vld [vmem:[#allocation3 + $0x30] sm:$0xff] }
   0x6   :  { %104 = vmatpush.bf16.msra.mxu0 %v178_v0  ;;  %v176_v2 = vld [vmem:[#allocation3 + $0x28] sm:$0xff]  ;;  %v175_v3 = vld [vmem:[#allocation3 + $0x20] sm:$0xff]  ;;  %v174_v4 = vld [vmem:[#allocation3 + $0x18] sm:$0xff] }
   0x7   :  { %v173_v5 = vld [vmem:[#allocation3 + $0x10] sm:$0xff]  ;;  %v172_v6 = vld [vmem:[#allocation3 + $0x8] sm:$0xff]  ;;  %v171_v7 = vld [vmem:[#allocation3] sm:$0xff] }
   0x8   :  { %v39_v8 = vld [vmem:[%s253_s0] sm:$0xf] }
   0x9   :  { %v182_v9 = vld [vmem:[%s255_s2] ss:$0 sm:$0xff] }
   0xa   :  { %105 = vmatpush.bf16.msra.mxu0 %v177_v1  ;;  %v183_v10 = vld [vmem:[%s256_s3] ss:$0 sm:$0xff] }
   0xe   :  { %106 = vmatpush.bf16.msra.mxu0 %v176_v2 }
  0x12   :  { %107 = vmatpush.bf16.msra.mxu0 %v175_v3 }
  0x16   :  { %108 = vmatpush.bf16.msra.mxu0 %v174_v4 }
  0x1a   :  { %109 = vmatpush.bf16.msra.mxu0 %v173_v5 }
  0x1e   :  { %110 = vmatpush.bf16.msra.mxu0 %v172_v6 }
  0x22   :  { %111 = vmatpush.bf16.msra.mxu0 %v171_v7 }
  0x25   :  { %112 = vmatmul.bf16.vlgmr.msra.gmra.mxu0 %v39_v8 }
  0xa2   :  { %v113_v11 = vpop.f32.mrf.mxu0 }
  0xa3   :  { %v127_v12 = vmul.f32 %v182_v9, %v113_v11 }
  0xa5   :  { %v132_v13 = vadd.f32 %v183_v10, %v127_v12 }
  0xa7   :  { %133 = vst [vmem:[%s257_s4] sm:$0xff] %v132_v13 }
  0xaa   :  { %v115_v14 = vpop.f32.mrf.mxu0 }
  0xab   :  { %138 = vsyncpa [#allocation4], 1 }

// kernel: _lambda_.30
= control target key start
LH: loop header
LB: loop body
LE: loop exit
PB: predicated region body
PF: predicated region fallthrough
CT: control target
= control target key end

     0   :  { %9 = vsyncpa [#allocation4], 0  ;;  %s1137_s0 = inlined_call_operand.vmem [shape: bf16[8,1152], index: 0, kind: input, shape index: {}]   ;;  %s1138_s1 = inlined_call_operand.hbm [shape: bf16[1152,128], index: 1, kind: input, shape index: {}]   ;;  %s1139_s2 = inlined_call_operand.vmem [shape: f32[1,128], index: 2, kind: input, shape index: {}]   ;;  %s1140_s3 = inlined_call_operand.vmem [shape: f32[1,128], index: 3, kind: input, shape index: {}]   ;;  %s1141_s4 = inlined_call_operand.vmem [shape: f32[8,128], index: 4, kind: output, shape index: {}]  }
   0x1   :  { %11 = vsyncpa [#allocation4 + $0x1], 0  ;;  %s1015_s15 = smov 0   ;;  %s1017_s16 = smov 0  }
   0x2   :  { %s1019_s17 = smov 0   ;;  %s1021_s18 = smov 0  }
   0x3   :  { %s1023_s19 = smov 0   ;;  %s1025_s20 = smov 0  }
   0x4 LB: > { %s709_s21 = sadd.s32 4294967295, %s985_s20   ;;  %s29_s22 = sadd.s32 1, %s981_s19  ;;  %s985_s20 = sphi %s1025_s20, %s17_s20   ;;  %s981_s19 = sphi %s1023_s19, %s1147_s19   ;;  %s977_s18 = sphi %s1021_s18, %s1146_s18   ;;  %s973_s17 = sphi %s1019_s17, %s1145_s17   ;;  %s969_s16 = sphi %s1017_s16, %s1144_s16   ;;  %s965_s15 = sphi %s1015_s15, %s1143_s15  }
   0x5   : > { %p30_p0 = scmp.ge.s32.totalorder %s29_s22, 3  ;;  %s73_s23 = sadd.s32 1, %s973_s17 }
   0x6   : > { %p80_p1 = scmp.ne.s32.totalorder %s973_s17, %s969_s16  ;;  %p81_p2 = scmp.eq.s32.totalorder %s985_s20, 0 }
   0x7   : > { %s1149_s22 = smov (%p30_p0, %s29_s22), 0  ;;  %p86_p4 = scmp.ne.s32.totalorder %s969_s16, %s965_s15 }
   0x8   : > { %p82_p3 = por %p81_p2, %p80_p1  ;;  %s68_s24 = ssub.s32 %s981_s19, %s1149_s22 }
   0x9   : > { %p87_p5 = scmp.eq.s32.totalorder %s709_s21, 0  ;;  %p71_p6 = scmp.eq.s32.totalorder %s68_s24, 0 }
   0xa   : > { %p851_p8 = scmp.lt.s32.totalorder %s985_s20, 3  ;;  %s215_s27 = sand.u32 1, %s973_s17  }
   0xb   : > { %p1054_p7 = por %p87_p5, %p86_p4  ;;  %s818_s28 = smul.u32 192, %s981_s19 }
   0xc   : > { %s1060_s26 = scalar_select %p71_p6, %s973_s17, %s73_s23  }
   0xd   : > { %s843_s29 = smul.u32 192, %s215_s27  ;;  %s225_s6 = scalar_lea.hbm %s1138_s1, %s818_s28 }
   0xe   : > { %p848_p9 = pnand %p851_p8, %p82_p3  ;;  %s226_s7 = sshll.u32 %s225_s6, 4  ;;  %s227_s7 = int_to_ptr.hbm [resolvable:$true] %s226_s7 }
   0xf   : > { %s219_s8 = scalar_lea.vmem [#allocation3], %s843_s29  ;;  %s216_s10 = scalar_lea.sflag [#allocation4], %s215_s27 }
  0x10   : > { %s228_s9 = sshll.u32 %s219_s8, 4  ;;  %s987_s11 = smov 64   ;;  %s229_s9 = int_to_ptr.vmem [resolvable:$true] %s228_s9 }
  0x11   : > { %s988_s12 = smov 4   ;;  %p715_p10 = scmp.ge.s32.totalorder %s985_s20, 1 }
  0x12   : > { %850 = dma.hbm_to_vmem [thread:$0]  (!%p848_p9), %s227_s7, 3072, %s229_s9, %s216_s10, %s987_s11, %s987_s11, %s988_s12  }
  0x13   : > { %p236_p11 = scmp.lt.s32.totalorder %s985_s20, 4 }
  0x15   : > { %p237_p12 = pnand %p715_p10, %p236_p11 }
  0x16   : > { %s242_s13 = sand.u32 (!%p237_p12), 1, %s969_s16  }
  0x17   : > { %240 = sbr.rel (%p237_p12) target bundleno = 223 (0xdf), region = 36  ;;  %s243_s15 = scalar_lea.sflag (!%p237_p12), [#allocation4], %s242_s13 }
  0x18   : > { %s844_s14 = smul.u32 (!%p237_p12), 192, %s242_s13 }
  0x1a   : > { %s1070_s21 = scalar_lea.vmem (!%p237_p12), [#allocation3], %s844_s14 }
  0x1c   : > { %960 = dma.done.wait (%p1054_p7), %s243_s15, 3072  }
  0x1d   : > { %962 = vsyncadd (%p1054_p7), %s243_s15, 4294964224  ;;  %s289_s23 = smul.u32 3, %s977_s18  ;;  %p717_p0 = scmp.ne.s32.totalorder %s977_s18, 0 }
  0x1f   : > { %p292_p13 = scmp.lt.s32.totalorder %s289_s23, 8  ;;  %316 = sbr.rel (%p717_p0) target bundleno = 38 (0x26), region = 44 }
  0x21   : > { %s1151_s23 = smov (!%p292_p13, %s289_s23), 8 }
  0x22   : > { %s716_s24 = sshll.u32 %s1151_s23, 2 }
  0x23   : > { %s1080_s29 = scalar_lea.vmem %s1137_s0, %s716_s24 }
  0x24   : > { %v989_v0 = vmov 0.0  }
  0x25   : > { %317 = vst [vmem:[#allocation2] sm:$0xff] %v989_v0 }
  0x26 PF: > { %v826_v1 = vld [vmem:[%s1070_s21 + $0x38] sm:$0xff]  ;;  %v825_v4 = vld [vmem:[%s1070_s21 + $0x30] sm:$0xff]  ;;  %v824_v7 = vld [vmem:[%s1070_s21 + $0x28] sm:$0xff]  ;;  %p814_p1 = scmp.ne.s32.totalorder %s977_s18, 2 }
  0x27   : > { %v834_v2 = vld [vmem:[%s1070_s21 + $0x78] sm:$0xff]  ;;  %524 = vmatpush.bf16.msra.mxu0 %v826_v1  ;;  %v833_v5 = vld [vmem:[%s1070_s21 + $0x70] sm:$0xff]  ;;  %v832_v8 = vld [vmem:[%s1070_s21 + $0x68] sm:$0xff] }
  0x28   : > { %v842_v3 = vld [vmem:[%s1070_s21 + $0xb8] sm:$0xff]  ;;  %537 = vmatpush.bf16.msra.mxu1 %v834_v2  ;;  %v841_v6 = vld [vmem:[%s1070_s21 + $0xb0] sm:$0xff]  ;;  %v840_v9 = vld [vmem:[%s1070_s21 + $0xa8] sm:$0xff] }
  0x29   : > { %550 = vmatpush.bf16.msra.mxu2 %v842_v3  ;;  %v823_v10 = vld [vmem:[%s1070_s21 + $0x20] sm:$0xff]  ;;  %v822_v13 = vld [vmem:[%s1070_s21 + $0x18] sm:$0xff]  ;;  %v821_v16 = vld [vmem:[%s1070_s21 + $0x10] sm:$0xff] }
  0x2a   : > { %v831_v11 = vld [vmem:[%s1070_s21 + $0x60] sm:$0xff]  ;;  %v830_v14 = vld [vmem:[%s1070_s21 + $0x58] sm:$0xff]  ;;  %v829_v17 = vld [vmem:[%s1070_s21 + $0x50] sm:$0xff] }
  0x2b   : > { %525 = vmatpush.bf16.msra.mxu0 %v825_v4  ;;  %v839_v12 = vld [vmem:[%s1070_s21 + $0xa0] sm:$0xff]  ;;  %v838_v15 = vld [vmem:[%s1070_s21 + $0x98] sm:$0xff]  ;;  %v837_v18 = vld [vmem:[%s1070_s21 + $0x90] sm:$0xff] }
  0x2c   : > { %538 = vmatpush.bf16.msra.mxu1 %v833_v5  ;;  %v820_v19 = vld [vmem:[%s1070_s21 + $0x8] sm:$0xff]  ;;  %v319_v21 = vld [vmem:[%s1080_s29] sm:$0xff]  ;;  %v320_v23 = vld [vmem:[%s1080_s29 + $0x8] sm:$0xf] }
  0x2d   : > { %551 = vmatpush.bf16.msra.mxu2 %v841_v6  ;;  %v828_v20 = vld [vmem:[%s1070_s21 + $0x48] sm:$0xff]  ;;  %v371_v24 = vunpack.c.l.b16 %v319_v21  ;;  %v372_v25 = vunpack.c.h.b16 %v319_v21  ;;  %v819_v26 = vld [vmem:[%s1070_s21] sm:$0xff]  ;;  %v373_v28 = vunpack.c.l.b16 %v320_v23  ;;  %v318_v36 = vld [vmem:[#allocation2] sm:$0xff] }
  0x2e   : > { %v836_v22 = vld [vmem:[%s1070_s21 + $0x88] sm:$0xff]  ;;  %v827_v27 = vld [vmem:[%s1070_s21 + $0x40] sm:$0xff] }
  0x2f   : > { %526 = vmatpush.bf16.msra.mxu0 %v824_v7  ;;  %v835_v29 = vld [vmem:[%s1070_s21 + $0x80] sm:$0xff]  ;;  %v374_v30 = vpack.c.b16 %v371_v24, %v371_v24  ;;  %v375_v31 = vpack.c.b16 %v372_v25, %v372_v25  ;;  %v376_v32 = vpack.c.b16 %v373_v28, %v373_v28 }
  0x30   : > { %539 = vmatpush.bf16.msra.mxu1 %v832_v8 }
  0x31   : > { %552 = vmatpush.bf16.msra.mxu2 %v840_v9 }
  0x33   : > { %527 = vmatpush.bf16.msra.mxu0 %v823_v10 }
  0x34   : > { %540 = vmatpush.bf16.msra.mxu1 %v831_v11 }
  0x35   : > { %553 = vmatpush.bf16.msra.mxu2 %v839_v12 }
  0x37   : > { %528 = vmatpush.bf16.msra.mxu0 %v822_v13 }
  0x38   : > { %541 = vmatpush.bf16.msra.mxu1 %v830_v14 }
  0x39   : > { %554 = vmatpush.bf16.msra.mxu2 %v838_v15 }
  0x3b   : > { %529 = vmatpush.bf16.msra.mxu0 %v821_v16 }
  0x3c   : > { %542 = vmatpush.bf16.msra.mxu1 %v829_v17 }
  0x3d   : > { %555 = vmatpush.bf16.msra.mxu2 %v837_v18 }
  0x3f   : > { %530 = vmatpush.bf16.msra.mxu0 %v820_v19 }
  0x40   : > { %543 = vmatpush.bf16.msra.mxu1 %v828_v20 }
  0x41   : > { %556 = vmatpush.bf16.msra.mxu2 %v836_v22 }
  0x43   : > { %531 = vmatpush.bf16.msra.mxu0 %v819_v26 }
  0x44   : > { %544 = vmatpush.bf16.msra.mxu1 %v827_v27 }
  0x45   : > { %557 = vmatpush.bf16.msra.mxu2 %v835_v29 }
  0x46   : > { %532 = vmatmul.bf16.vlgmr.msra.gmra.mxu0 %v374_v30 }
  0x47   : > { %545 = vmatmul.bf16.vlgmr.msra.gmra.mxu1 %v375_v31 }
  0x48   : > { %558 = vmatmul.bf16.vlgmr.msra.gmra.mxu2 %v376_v32 }
  0xc3   : > { %v533_v33 = vpop.f32.mrf.mxu0 }
  0xc4   : > { %v546_v34 = vpop.f32.mrf.mxu1 }
  0xc5   : > { %v547_v35 = vadd.f32 %v546_v34, %v533_v33 }
  0xcb   : > { %v559_v37 = vpop.f32.mrf.mxu2  ;;  %v535_v39 = vpop.f32.mrf.mxu0 }
  0xcc   : > { %v560_v38 = vadd.f32 %v559_v37, %v547_v35  ;;  %v548_v40 = vpop.f32.mrf.mxu1 }
  0xce   : > { %v563_v41 = vadd.f32 %v560_v38, %v318_v36 }
  0xcf   : > { %568 = sbr.rel (%p814_p1) target bundleno = 223 (0xdf), region = 48 }
  0xd0   : > { %564 = vst [vmem:[#allocation2] sm:$0xff] %v563_v41 }
  0xd3   : > { %v561_v42 = vpop.f32.mrf.mxu2 }
  0xd4   : > { %v903_v44 = vld [vmem:[%s1139_s2] ss:$0 sm:$0xff] }
  0xd5   : > { %v904_v45 = vld [vmem:[%s1140_s3] ss:$0 sm:$0xff] }
  0xd7   : > { %v569_v43 = vld [vmem:[#allocation2] sm:$0xff] }
  0xd8   : > { %v574_v46 = vmul.f32 %v903_v44, %v569_v43 }
  0xda   : > { %v579_v47 = vadd.f32 %v904_v45, %v574_v46 }
  0xdc   : > { %v580_v48 = vmax.f32 %v579_v47, 0.0 }
  0xde   : > { %581 = vst [vmem:[%s1141_s4] sm:$0xff] %v580_v48 }
  0xdf PF: > { %s17_s20 = sadd.s32 1, %s985_s20   ;;  %s1143_s15 = smov %s969_s16 }
  0xe0   : > { %p14_p2 = scmp.ge.s32.totalorder %s17_s20, 5   ;;  %s1144_s16 = smov %s973_s17 }
  0xe1   : > { %s1145_s17 = smov %s1060_s26  ;;  %s1146_s18 = smov %s981_s19 }
  0xe2   : > { %s1147_s19 = smov %s1149_s22  ;;  %16 = sbr.rel (!%p14_p2) target bundleno = 4 (0x4), region = 93 }
  0xe7   :  { %607 = vsyncpa [#allocation4], 1 }
  0xe8   :  { %609 = vsyncpa [#allocation4 + $0x1], 1 }

// kernel: _lambda_.29
= control target key start
LH: loop header
LB: loop body
LE: loop exit
PB: predicated region body
PF: predicated region fallthrough
CT: control target
= control target key end

     0   :  { %10 = vsyncpa [#allocation4], 0  ;;  %s1221_s0 = inlined_call_operand.vmem [shape: bf16[8,1152], index: 0, kind: input, shape index: {}]   ;;  %s1222_s1 = inlined_call_operand.hbm [shape: bf16[1152,128], index: 1, kind: input, shape index: {}]   ;;  %s1223_s2 = inlined_call_operand.vmem [shape: f32[1,128], index: 2, kind: input, shape index: {}]   ;;  %s1224_s3 = inlined_call_operand.vmem [shape: f32[1,128], index: 3, kind: input, shape index: {}]   ;;  %s1225_s4 = inlined_call_operand.vmem [shape: f32[8,128], index: 4, kind: input, shape index: {}]   ;;  %s1226_s5 = inlined_call_operand.vmem [shape: f32[8,128], index: 5, kind: output, shape index: {}]  }
   0x1   :  { %12 = vsyncpa [#allocation4 + $0x1], 0  ;;  %s1096_s18 = smov 0   ;;  %s1098_s19 = smov 0  }
   0x2   :  { %s1100_s20 = smov 0   ;;  %s1102_s21 = smov 0  }
   0x3   :  { %s1104_s22 = smov 0   ;;  %s1106_s23 = smov 0  }
   0x4 LB: > { %s784_s24 = sadd.s32 4294967295, %s1061_s23   ;;  %s30_s25 = sadd.s32 1, %s1057_s22  ;;  %s1061_s23 = sphi %s1106_s23, %s18_s23   ;;  %s1057_s22 = sphi %s1104_s22, %s1232_s22   ;;  %s1053_s21 = sphi %s1102_s21, %s1231_s21   ;;  %s1049_s20 = sphi %s1100_s20, %s1230_s20   ;;  %s1045_s19 = sphi %s1098_s19, %s1229_s19   ;;  %s1041_s18 = sphi %s1096_s18, %s1228_s18  }
   0x5   : > { %p31_p0 = scmp.ge.s32.totalorder %s30_s25, 3  ;;  %s74_s26 = sadd.s32 1, %s1049_s20 }
   0x6   : > { %p81_p1 = scmp.ne.s32.totalorder %s1049_s20, %s1045_s19  ;;  %p82_p2 = scmp.eq.s32.totalorder %s1061_s23, 0 }
   0x7   : > { %s1234_s25 = smov (%p31_p0, %s30_s25), 0  ;;  %p87_p4 = scmp.ne.s32.totalorder %s1045_s19, %s1041_s18 }
   0x8   : > { %p83_p3 = por %p82_p2, %p81_p1  ;;  %s69_s27 = ssub.s32 %s1057_s22, %s1234_s25 }
   0x9   : > { %p88_p5 = scmp.eq.s32.totalorder %s784_s24, 0  ;;  %p72_p6 = scmp.eq.s32.totalorder %s69_s27, 0 }
   0xa   : > { %p927_p8 = scmp.lt.s32.totalorder %s1061_s23, 3  ;;  %s254_s30 = sand.u32 1, %s1049_s20  }
   0xb   : > { %p1135_p7 = por %p88_p5, %p87_p4  ;;  %s894_s6 = smul.u32 192, %s1057_s22 }
   0xc   : > { %s1141_s29 = scalar_select %p72_p6, %s1049_s20, %s74_s26  }
   0xd   : > { %s919_s7 = smul.u32 192, %s254_s30  ;;  %s264_s10 = scalar_lea.hbm %s1222_s1, %s894_s6 }
   0xe   : > { %p924_p9 = pnand %p927_p8, %p83_p3  ;;  %s265_s11 = sshll.u32 %s264_s10, 4  ;;  %s266_s11 = int_to_ptr.hbm [resolvable:$true] %s265_s11 }
   0xf   : > { %s258_s12 = scalar_lea.vmem [#allocation3], %s919_s7  ;;  %s255_s14 = scalar_lea.sflag [#allocation4], %s254_s30 }
  0x10   : > { %s267_s13 = sshll.u32 %s258_s12, 4  ;;  %s1063_s15 = smov 64   ;;  %s268_s13 = int_to_ptr.vmem [resolvable:$true] %s267_s13 }
  0x11   : > { %s1064_s16 = smov 4   ;;  %p791_p10 = scmp.ge.s32.totalorder %s1061_s23, 1 }
  0x12   : > { %926 = dma.hbm_to_vmem [thread:$0]  (!%p924_p9), %s266_s11, 3072, %s268_s13, %s255_s14, %s1063_s15, %s1063_s15, %s1064_s16  }
  0x13   : > { %p275_p11 = scmp.lt.s32.totalorder %s1061_s23, 4 }
  0x15   : > { %p276_p12 = pnand %p791_p10, %p275_p11 }
  0x16   : > { %s281_s17 = sand.u32 (!%p276_p12), 1, %s1045_s19  }
  0x17   : > { %279 = sbr.rel (%p276_p12) target bundleno = 225 (0xe1), region = 40  ;;  %s282_s24 = scalar_lea.sflag (!%p276_p12), [#allocation4], %s281_s17 }
  0x18   : > { %s920_s18 = smul.u32 (!%p276_p12), 192, %s281_s17 }
  0x1a   : > { %s1151_s26 = scalar_lea.vmem (!%p276_p12), [#allocation3], %s920_s18 }
  0x1c   : > { %1036 = dma.done.wait (%p1135_p7), %s282_s24, 3072  }
  0x1d   : > { %1038 = vsyncadd (%p1135_p7), %s282_s24, 4294964224  ;;  %s337_s27 = smul.u32 3, %s1053_s21  ;;  %p793_p0 = scmp.ne.s32.totalorder %s1053_s21, 0 }
  0x1f   : > { %p340_p13 = scmp.lt.s32.totalorder %s337_s27, 8  ;;  %371 = sbr.rel (%p793_p0) target bundleno = 38 (0x26), region = 48 }
  0x21   : > { %s1236_s27 = smov (!%p340_p13, %s337_s27), 8 }
  0x22   : > { %s792_s30 = sshll.u32 %s1236_s27, 2 }
  0x23   : > { %s1161_s8 = scalar_lea.vmem %s1221_s0, %s792_s30 }
  0x24   : > { %v1065_v0 = vmov 0.0  }
  0x25   : > { %372 = vst [vmem:[#allocation2] sm:$0xff] %v1065_v0 }
  0x26 PF: > { %v902_v1 = vld [vmem:[%s1151_s26 + $0x38] sm:$0xff]  ;;  %v901_v4 = vld [vmem:[%s1151_s26 + $0x30] sm:$0xff]  ;;  %v900_v7 = vld [vmem:[%s1151_s26 + $0x28] sm:$0xff]  ;;  %p890_p1 = scmp.ne.s32.totalorder %s1053_s21, 2 }
  0x27   : > { %v910_v2 = vld [vmem:[%s1151_s26 + $0x78] sm:$0xff]  ;;  %579 = vmatpush.bf16.msra.mxu0 %v902_v1  ;;  %v909_v5 = vld [vmem:[%s1151_s26 + $0x70] sm:$0xff]  ;;  %v908_v8 = vld [vmem:[%s1151_s26 + $0x68] sm:$0xff] }
  0x28   : > { %v918_v3 = vld [vmem:[%s1151_s26 + $0xb8] sm:$0xff]  ;;  %592 = vmatpush.bf16.msra.mxu1 %v910_v2  ;;  %v917_v6 = vld [vmem:[%s1151_s26 + $0xb0] sm:$0xff]  ;;  %v916_v9 = vld [vmem:[%s1151_s26 + $0xa8] sm:$0xff] }
  0x29   : > { %605 = vmatpush.bf16.msra.mxu2 %v918_v3  ;;  %v899_v10 = vld [vmem:[%s1151_s26 + $0x20] sm:$0xff]  ;;  %v898_v13 = vld [vmem:[%s1151_s26 + $0x18] sm:$0xff]  ;;  %v897_v16 = vld [vmem:[%s1151_s26 + $0x10] sm:$0xff] }
  0x2a   : > { %v907_v11 = vld [vmem:[%s1151_s26 + $0x60] sm:$0xff]  ;;  %v906_v14 = vld [vmem:[%s1151_s26 + $0x58] sm:$0xff]  ;;  %v905_v17 = vld [vmem:[%s1151_s26 + $0x50] sm:$0xff] }
  0x2b   : > { %580 = vmatpush.bf16.msra.mxu0 %v901_v4  ;;  %v915_v12 = vld [vmem:[%s1151_s26 + $0xa0] sm:$0xff]  ;;  %v914_v15 = vld [vmem:[%s1151_s26 + $0x98] sm:$0xff]  ;;  %v913_v18 = vld [vmem:[%s1151_s26 + $0x90] sm:$0xff] }
  0x2c   : > { %593 = vmatpush.bf16.msra.mxu1 %v909_v5  ;;  %v896_v19 = vld [vmem:[%s1151_s26 + $0x8] sm:$0xff]  ;;  %v374_v21 = vld [vmem:[%s1161_s8] sm:$0xff]  ;;  %v375_v23 = vld [vmem:[%s1161_s8 + $0x8] sm:$0xf] }
  0x2d   : > { %606 = vmatpush.bf16.msra.mxu2 %v917_v6  ;;  %v904_v20 = vld [vmem:[%s1151_s26 + $0x48] sm:$0xff]  ;;  %v426_v24 = vunpack.c.l.b16 %v374_v21  ;;  %v427_v25 = vunpack.c.h.b16 %v374_v21  ;;  %v895_v26 = vld [vmem:[%s1151_s26] sm:$0xff]  ;;  %v428_v28 = vunpack.c.l.b16 %v375_v23  ;;  %v373_v36 = vld [vmem:[#allocation2] sm:$0xff] }
  0x2e   : > { %v912_v22 = vld [vmem:[%s1151_s26 + $0x88] sm:$0xff]  ;;  %v903_v27 = vld [vmem:[%s1151_s26 + $0x40] sm:$0xff] }
  0x2f   : > { %581 = vmatpush.bf16.msra.mxu0 %v900_v7  ;;  %v911_v29 = vld [vmem:[%s1151_s26 + $0x80] sm:$0xff]  ;;  %v429_v30 = vpack.c.b16 %v426_v24, %v426_v24  ;;  %v430_v31 = vpack.c.b16 %v427_v25, %v427_v25  ;;  %v431_v32 = vpack.c.b16 %v428_v28, %v428_v28 }
  0x30   : > { %594 = vmatpush.bf16.msra.mxu1 %v908_v8 }
  0x31   : > { %607 = vmatpush.bf16.msra.mxu2 %v916_v9 }
  0x33   : > { %582 = vmatpush.bf16.msra.mxu0 %v899_v10 }
  0x34   : > { %595 = vmatpush.bf16.msra.mxu1 %v907_v11 }
  0x35   : > { %608 = vmatpush.bf16.msra.mxu2 %v915_v12 }
  0x37   : > { %583 = vmatpush.bf16.msra.mxu0 %v898_v13 }
  0x38   : > { %596 = vmatpush.bf16.msra.mxu1 %v906_v14 }
  0x39   : > { %609 = vmatpush.bf16.msra.mxu2 %v914_v15 }
  0x3b   : > { %584 = vmatpush.bf16.msra.mxu0 %v897_v16 }
  0x3c   : > { %597 = vmatpush.bf16.msra.mxu1 %v905_v17 }
  0x3d   : > { %610 = vmatpush.bf16.msra.mxu2 %v913_v18 }
  0x3f   : > { %585 = vmatpush.bf16.msra.mxu0 %v896_v19 }
  0x40   : > { %598 = vmatpush.bf16.msra.mxu1 %v904_v20 }
  0x41   : > { %611 = vmatpush.bf16.msra.mxu2 %v912_v22 }
  0x43   : > { %586 = vmatpush.bf16.msra.mxu0 %v895_v26 }
  0x44   : > { %599 = vmatpush.bf16.msra.mxu1 %v903_v27 }
  0x45   : > { %612 = vmatpush.bf16.msra.mxu2 %v911_v29 }
  0x46   : > { %587 = vmatmul.bf16.vlgmr.msra.gmra.mxu0 %v429_v30 }
  0x47   : > { %600 = vmatmul.bf16.vlgmr.msra.gmra.mxu1 %v430_v31 }
  0x48   : > { %613 = vmatmul.bf16.vlgmr.msra.gmra.mxu2 %v431_v32 }
  0xc3   : > { %v588_v33 = vpop.f32.mrf.mxu0 }
  0xc4   : > { %v601_v34 = vpop.f32.mrf.mxu1 }
  0xc5   : > { %v602_v35 = vadd.f32 %v601_v34, %v588_v33 }
  0xcb   : > { %v614_v37 = vpop.f32.mrf.mxu2  ;;  %v590_v39 = vpop.f32.mrf.mxu0 }
  0xcc   : > { %v615_v38 = vadd.f32 %v614_v37, %v602_v35  ;;  %v603_v40 = vpop.f32.mrf.mxu1 }
  0xce   : > { %v618_v41 = vadd.f32 %v615_v38, %v373_v36 }
  0xcf   : > { %623 = sbr.rel (%p890_p1) target bundleno = 225 (0xe1), region = 52 }
  0xd0   : > { %619 = vst [vmem:[#allocation2] sm:$0xff] %v618_v41 }
  0xd3   : > { %v616_v42 = vpop.f32.mrf.mxu2 }
  0xd4   : > { %v979_v44 = vld [vmem:[%s1223_s2] ss:$0 sm:$0xff] }
  0xd5   : > { %v980_v45 = vld [vmem:[%s1224_s3] ss:$0 sm:$0xff] }
  0xd6   : > { %v635_v47 = vld [vmem:[%s1225_s4] sm:$0xff] }
  0xd7   : > { %v624_v43 = vld [vmem:[#allocation2] sm:$0xff] }
  0xd8   : > { %v629_v46 = vmul.f32 %v979_v44, %v624_v43 }
  0xda   : > { %v634_v48 = vadd.f32 %v980_v45, %v629_v46 }
  0xdc   : > { %v636_v49 = vadd.f32 %v635_v47, %v634_v48 }
  0xde   : > { %v637_v50 = vmax.f32 %v636_v49, 0.0 }
  0xe0   : > { %638 = vst [vmem:[%s1226_s5] sm:$0xff] %v637_v50 }
  0xe1 PF: > { %s18_s23 = sadd.s32 1, %s1061_s23   ;;  %s1228_s18 = smov %s1045_s19 }
  0xe2   : > { %p15_p2 = scmp.ge.s32.totalorder %s18_s23, 5   ;;  %s1229_s19 = smov %s1049_s20 }
  0xe3   : > { %s1230_s20 = smov %s1141_s29  ;;  %s1231_s21 = smov %s1057_s22 }
  0xe4   : > { %s1232_s22 = smov %s1234_s25  ;;  %17 = sbr.rel (!%p15_p2) target bundleno = 4 (0x4), region = 100 }
  0xe9   :  { %664 = vsyncpa [#allocation4], 1 }
  0xea   :  { %666 = vsyncpa [#allocation4 + $0x1], 1 }

// kernel: _lambda_.32
= control target key start
LH: loop header
LB: loop body
LE: loop exit
PB: predicated region body
PF: predicated region fallthrough
CT: control target
= control target key end

     0   :  { %s1200_s15 = smov 0   ;;  %s1202_s16 = smov 0   ;;  %s1357_s0 = inlined_call_operand.vmem [shape: bf16[8,1152], index: 0, kind: input, shape index: {}]   ;;  %s1358_s1 = inlined_call_operand.vmem [shape: bf16[1152,256], index: 1, kind: input, shape index: {}]   ;;  %s1359_s2 = inlined_call_operand.vmem [shape: f32[1,256], index: 2, kind: input, shape index: {}]   ;;  %s1360_s3 = inlined_call_operand.vmem [shape: f32[1,256], index: 3, kind: input, shape index: {}]   ;;  %s1361_s4 = inlined_call_operand.vmem [shape: f32[8,256], index: 4, kind: output, shape index: {}]  }
   0x1   :  { %s1204_s17 = smov 0  }
   0x2 LB: > { %s26_s18 = sadd.s32 1, %s1168_s16  ;;  %p874_p0 = scmp.ge.s32.totalorder %s1172_s17, 1  ;;  %s1172_s17 = sphi %s1204_s17, %s14_s17   ;;  %s1168_s16 = sphi %s1202_s16, %s1363_s16   ;;  %s1164_s15 = sphi %s1200_s15, %s1362_s15  }
   0x3   : > { %p27_p1 = scmp.ge.s32.totalorder %s26_s18, 3  ;;  %p229_p2 = scmp.lt.s32.totalorder %s1172_s17, 4 }
   0x5   : > { %s1365_s18 = smov (%p27_p1, %s26_s18), 0  ;;  %p230_p3 = pnand %p874_p0, %p229_p2 }
   0x6   : > { %s281_s19 = smul.u32 (!%p230_p3), 3, %s1164_s15  ;;  %p878_p6 = scmp.ne.s32.totalorder (!%p230_p3), %s1164_s15, 0 }
   0x7   : > { %233 = sbr.rel (%p230_p3) target bundleno = 236 (0xec), region = 36 }
   0x8   : > { %s291_s20 = smul.u32 (!%p230_p3), 48, %s1164_s15  ;;  %p284_p4 = scmp.lt.s32.totalorder (!%p230_p3), %s281_s19, 8 }
   0xa   : > { %p293_p5 = scmp.lt.s32.totalorder (!%p230_p3), %s291_s20, 143 }
   0xc   : > { %s1367_s19 = smov (!%p284_p4, %s281_s19), 8  ;;  %s1369_s20 = smov (!%p293_p5, %s291_s20), 143 }
   0xd   : > { %s875_s21 = sshll.u32 %s1367_s19, 2  ;;  %s1076_s25 = sshll.u32 %s1369_s20, 3 }
   0xe   : > { %s1225_s24 = scalar_lea.vmem %s1357_s0, %s875_s21  ;;  %s1230_s28 = scalar_lea.vmem %s1358_s1, %s1076_s25 }
   0xf   : > { %326 = sbr.rel (%p878_p6) target bundleno = 23 (0x17), region = 40 }
  0x14   : > { %v1174_v0 = vmov 0.0  }
  0x15   : > { %327 = vst [vmem:[#allocation2] sm:$0xff] %v1174_v0 }
  0x16   : > { %328 = vst [vmem:[#allocation2 + $0x8] sm:$0xff] %v1174_v0 }
  0x17 PF: > { %v937_v1 = vld [vmem:[%s1230_s28 + $0x70] sm:$0xf]  ;;  %v1092_v2 = vld [vmem:[%s1230_s28 + $0x74] sm:$0xf0]  ;;  %v929_v6 = vld [vmem:[%s1230_s28 + $0x60] sm:$0xf] }
  0x18   : > { %v1001_v3 = vld [vmem:[%s1230_s28 + $0xf0] sm:$0xf]  ;;  %v938_v4 = vor.u32 %v1092_v2, %v937_v1  ;;  %v1108_v5 = vld [vmem:[%s1230_s28 + $0xf4] sm:$0xf0]  ;;  %v1090_v7 = vld [vmem:[%s1230_s28 + $0x64] sm:$0xf0] }
  0x19   : > { %v1002_v8 = vor.u32 %v1108_v5, %v1001_v3  ;;  %v993_v9 = vld [vmem:[%s1230_s28 + $0xe0] sm:$0xf]  ;;  %v1106_v10 = vld [vmem:[%s1230_s28 + $0xe4] sm:$0xf0]  ;;  %v930_v11 = vor.u32 %v1090_v7, %v929_v6  ;;  %v921_v12 = vld [vmem:[%s1230_s28 + $0x50] sm:$0xf] }
  0x1a   : > { %632 = vmatpush.bf16.msra.mxu0 %v938_v4  ;;  %v994_v13 = vor.u32 %v1106_v10, %v993_v9  ;;  %v1088_v14 = vld [vmem:[%s1230_s28 + $0x54] sm:$0xf0]  ;;  %v1065_v15 = vld [vmem:[%s1230_s28 + $0x170] sm:$0xf]  ;;  %v1057_v20 = vld [vmem:[%s1230_s28 + $0x160] sm:$0xf] }
  0x1b   : > { %645 = vmatpush.bf16.msra.mxu1 %v1002_v8  ;;  %v1124_v16 = vld [vmem:[%s1230_s28 + $0x174] sm:$0xf0]  ;;  %v985_v17 = vld [vmem:[%s1230_s28 + $0xd0] sm:$0xf]  ;;  %v1122_v21 = vld [vmem:[%s1230_s28 + $0x164] sm:$0xf0]  ;;  %v922_v23 = vor.u32 %v1088_v14, %v921_v12 }
  0x1c   : > { %v1104_v18 = vld [vmem:[%s1230_s28 + $0xd4] sm:$0xf0]  ;;  %v1066_v19 = vor.u32 %v1124_v16, %v1065_v15  ;;  %v1091_v22 = vld [vmem:[%s1230_s28 + $0x74] sm:$0xf]  ;;  %v913_v24 = vld [vmem:[%s1230_s28 + $0x40] sm:$0xf]  ;;  %v1058_v26 = vor.u32 %v1122_v21, %v1057_v20 }
  0x1d   : > { %v1086_v25 = vld [vmem:[%s1230_s28 + $0x44] sm:$0xf0]  ;;  %v939_v27 = vld [vmem:[%s1230_s28 + $0x78] sm:$0xf0]  ;;  %v986_v28 = vor.u32 %v1104_v18, %v985_v17  ;;  %v977_v29 = vld [vmem:[%s1230_s28 + $0xc0] sm:$0xf] }
  0x1e   : > { %633 = vmatpush.bf16.msra.mxu0 %v930_v11  ;;  %658 = vmatpush.bf16.msra.mxu2 %v1066_v19  ;;  %v1102_v30 = vld [vmem:[%s1230_s28 + $0xc4] sm:$0xf0]  ;;  %v942_v31 = vor.u32 %v1091_v22, %v939_v27  ;;  %v1049_v32 = vld [vmem:[%s1230_s28 + $0x150] sm:$0xf]  ;;  %v1120_v33 = vld [vmem:[%s1230_s28 + $0x154] sm:$0xf0]  ;;  %v914_v37 = vor.u32 %v1086_v25, %v913_v24 }
  0x1f   : > { %646 = vmatpush.bf16.msra.mxu1 %v994_v13  ;;  %v1089_v34 = vld [vmem:[%s1230_s28 + $0x64] sm:$0xf]  ;;  %v931_v35 = vld [vmem:[%s1230_s28 + $0x68] sm:$0xf0]  ;;  %v905_v38 = vld [vmem:[%s1230_s28 + $0x30] sm:$0xf]  ;;  %v1050_v40 = vor.u32 %v1120_v33, %v1049_v32  ;;  %v978_v42 = vor.u32 %v1102_v30, %v977_v29 }
  0x20   : > { %671 = vmatpush.bf16.msra.mxu3 %v942_v31  ;;  %v934_v36 = vor.u32 %v1089_v34, %v931_v35  ;;  %v1084_v39 = vld [vmem:[%s1230_s28 + $0x34] sm:$0xf0]  ;;  %v1041_v41 = vld [vmem:[%s1230_s28 + $0x140] sm:$0xf]  ;;  %v1118_v43 = vld [vmem:[%s1230_s28 + $0x144] sm:$0xf0] }
  0x21   : > { %v1087_v44 = vld [vmem:[%s1230_s28 + $0x54] sm:$0xf]  ;;  %v923_v45 = vld [vmem:[%s1230_s28 + $0x58] sm:$0xf0]  ;;  %v969_v46 = vld [vmem:[%s1230_s28 + $0xb0] sm:$0xf]  ;;  %v906_v49 = vor.u32 %v1084_v39, %v905_v38  ;;  %v1042_v51 = vor.u32 %v1118_v43, %v1041_v41 }
  0x22   : > { %634 = vmatpush.bf16.msra.mxu0 %v922_v23  ;;  %659 = vmatpush.bf16.msra.mxu2 %v1058_v26  ;;  %v1100_v47 = vld [vmem:[%s1230_s28 + $0xb4] sm:$0xf0]  ;;  %v926_v48 = vor.u32 %v1087_v44, %v923_v45  ;;  %v897_v50 = vld [vmem:[%s1230_s28 + $0x20] sm:$0xf]  ;;  %v1085_v52 = vld [vmem:[%s1230_s28 + $0x44] sm:$0xf] }
  0x23   : > { %647 = vmatpush.bf16.msra.mxu1 %v986_v28  ;;  %v915_v53 = vld [vmem:[%s1230_s28 + $0x48] sm:$0xf0]  ;;  %v970_v54 = vor.u32 %v1100_v47, %v969_v46  ;;  %v1082_v55 = vld [vmem:[%s1230_s28 + $0x24] sm:$0xf0]  ;;  %v1033_v56 = vld [vmem:[%s1230_s28 + $0x130] sm:$0xf] }
  0x24   : > { %672 = vmatpush.bf16.msra.mxu3 %v934_v36  ;;  %v1116_v57 = vld [vmem:[%s1230_s28 + $0x134] sm:$0xf0]  ;;  %v961_v58 = vld [vmem:[%s1230_s28 + $0xa0] sm:$0xf]  ;;  %v1098_v59 = vld [vmem:[%s1230_s28 + $0xa4] sm:$0xf0]  ;;  %v918_v60 = vor.u32 %v1085_v52, %v915_v53  ;;  %v898_v61 = vor.u32 %v1082_v55, %v897_v50 }
  0x25   : > { %v889_v62 = vld [vmem:[%s1230_s28 + $0x10] sm:$0xf]  ;;  %v1034_v63 = vor.u32 %v1116_v57, %v1033_v56  ;;  %v1083_v0 = vld [vmem:[%s1230_s28 + $0x34] sm:$0xf]  ;;  %v907_v1 = vld [vmem:[%s1230_s28 + $0x38] sm:$0xf0]  ;;  %v962_v2 = vor.u32 %v1098_v59, %v961_v58 }
  0x26   : > { %635 = vmatpush.bf16.msra.mxu0 %v914_v37  ;;  %660 = vmatpush.bf16.msra.mxu2 %v1050_v40  ;;  %v1080_v3 = vld [vmem:[%s1230_s28 + $0x14] sm:$0xf0]  ;;  %v1025_v4 = vld [vmem:[%s1230_s28 + $0x120] sm:$0xf]  ;;  %v1114_v5 = vld [vmem:[%s1230_s28 + $0x124] sm:$0xf0]  ;;  %v910_v10 = vor.u32 %v1083_v0, %v907_v1 }
  0x27   : > { %648 = vmatpush.bf16.msra.mxu1 %v978_v42  ;;  %v953_v6 = vld [vmem:[%s1230_s28 + $0x90] sm:$0xf]  ;;  %v1096_v7 = vld [vmem:[%s1230_s28 + $0x94] sm:$0xf0]  ;;  %v881_v8 = vld [vmem:[%s1230_s28] sm:$0xf]  ;;  %v890_v11 = vor.u32 %v1080_v3, %v889_v62  ;;  %v1026_v12 = vor.u32 %v1114_v5, %v1025_v4 }
  0x28   : > { %673 = vmatpush.bf16.msra.mxu3 %v926_v48  ;;  %v1078_v9 = vld [vmem:[%s1230_s28 + $0x4] sm:$0xf0]  ;;  %v1081_v13 = vld [vmem:[%s1230_s28 + $0x24] sm:$0xf]  ;;  %v899_v14 = vld [vmem:[%s1230_s28 + $0x28] sm:$0xf0]  ;;  %v954_v16 = vor.u32 %v1096_v7, %v953_v6 }
  0x29   : > { %v331_v15 = vld [vmem:[%s1225_s24] sm:$0xff]  ;;  %v1017_v18 = vld [vmem:[%s1230_s28 + $0x110] sm:$0xf]  ;;  %v1112_v19 = vld [vmem:[%s1230_s28 + $0x114] sm:$0xf0]  ;;  %v902_v25 = vor.u32 %v1081_v13, %v899_v14  ;;  %v882_v27 = vor.u32 %v1078_v9, %v881_v8  ;;  %p1071_p7 = scmp.ne.s32.totalorder %s1164_s15, 2 }
  0x2a   : > { %636 = vmatpush.bf16.msra.mxu0 %v906_v49  ;;  %661 = vmatpush.bf16.msra.mxu2 %v1042_v51  ;;  %v945_v17 = vld [vmem:[%s1230_s28 + $0x80] sm:$0xf]  ;;  %v1094_v20 = vld [vmem:[%s1230_s28 + $0x84] sm:$0xf0]  ;;  %v1107_v21 = vld [vmem:[%s1230_s28 + $0xf4] sm:$0xf]  ;;  %v383_v26 = vunpack.c.l.b16 %v331_v15  ;;  %v1018_v28 = vor.u32 %v1112_v19, %v1017_v18  ;;  %v384_v29 = vunpack.c.h.b16 %v331_v15 }
  0x2b   : > { %649 = vmatpush.bf16.msra.mxu1 %v970_v54  ;;  %v1003_v22 = vld [vmem:[%s1230_s28 + $0xf8] sm:$0xf0]  ;;  %v1123_v23 = vld [vmem:[%s1230_s28 + $0x174] sm:$0xf]  ;;  %v332_v32 = vld [vmem:[%s1225_s24 + $0x8] sm:$0xf]  ;;  %v946_v33 = vor.u32 %v1094_v20, %v945_v17 }
  0x2c   : > { %674 = vmatpush.bf16.msra.mxu3 %v918_v60  ;;  %v1067_v24 = vld [vmem:[%s1230_s28 + $0x178] sm:$0xf0]  ;;  %v1079_v30 = vld [vmem:[%s1230_s28 + $0x14] sm:$0xf]  ;;  %v1006_v34 = vor.u32 %v1107_v21, %v1003_v22  ;;  %v1009_v35 = vld [vmem:[%s1230_s28 + $0x100] sm:$0xf]  ;;  %v386_v42 = vpack.c.b16 %v383_v26, %v383_v26  ;;  %v385_v44 = vunpack.c.l.b16 %v332_v32  ;;  %v1305_v45 = vpack.c.b16 %v384_v29, %v384_v29 }
  0x2d   : > { %v891_v31 = vld [vmem:[%s1230_s28 + $0x18] sm:$0xf0]  ;;  %v1110_v36 = vld [vmem:[%s1230_s28 + $0x104] sm:$0xf0]  ;;  %v1070_v37 = vor.u32 %v1123_v23, %v1067_v24  ;;  %v1105_v38 = vld [vmem:[%s1230_s28 + $0xe4] sm:$0xf] }
  0x2e   : > { %637 = vmatpush.bf16.msra.mxu0 %v898_v61  ;;  %662 = vmatpush.bf16.msra.mxu2 %v1034_v63  ;;  %v995_v39 = vld [vmem:[%s1230_s28 + $0xe8] sm:$0xf0]  ;;  %v1121_v40 = vld [vmem:[%s1230_s28 + $0x164] sm:$0xf]  ;;  %v894_v43 = vor.u32 %v1079_v30, %v891_v31  ;;  %v1010_v46 = vor.u32 %v1110_v36, %v1009_v35  ;;  %v1103_v51 = vld [vmem:[%s1230_s28 + $0xd4] sm:$0xf]  ;;  %v388_v55 = vpack.c.b16 %v385_v44, %v385_v44 }
  0x2f   : > { %650 = vmatpush.bf16.msra.mxu1 %v962_v2  ;;  %v1059_v41 = vld [vmem:[%s1230_s28 + $0x168] sm:$0xf0]  ;;  %v1077_v47 = vld [vmem:[%s1230_s28 + $0x4] sm:$0xf]  ;;  %v998_v49 = vor.u32 %v1105_v38, %v995_v39  ;;  %v987_v52 = vld [vmem:[%s1230_s28 + $0xd8] sm:$0xf0] }
  0x30   : > { %675 = vmatpush.bf16.msra.mxu3 %v910_v10  ;;  %v883_v48 = vld [vmem:[%s1230_s28 + $0x8] sm:$0xf0]  ;;  %v1062_v50 = vor.u32 %v1121_v40, %v1059_v41  ;;  %v1119_v53 = vld [vmem:[%s1230_s28 + $0x154] sm:$0xf]  ;;  %v1051_v54 = vld [vmem:[%s1230_s28 + $0x158] sm:$0xf0]  ;;  %v990_v57 = vor.u32 %v1103_v51, %v987_v52 }
  0x31   : > { %v886_v56 = vor.u32 %v1077_v47, %v883_v48  ;;  %v1054_v58 = vor.u32 %v1119_v53, %v1051_v54  ;;  %v1101_v59 = vld [vmem:[%s1230_s28 + $0xc4] sm:$0xf]  ;;  %v979_v60 = vld [vmem:[%s1230_s28 + $0xc8] sm:$0xf0]  ;;  %v1099_v1 = vld [vmem:[%s1230_s28 + $0xb4] sm:$0xf] }
  0x32   : > { %638 = vmatpush.bf16.msra.mxu0 %v890_v11  ;;  %663 = vmatpush.bf16.msra.mxu2 %v1026_v12  ;;  %v1117_v61 = vld [vmem:[%s1230_s28 + $0x144] sm:$0xf]  ;;  %v1043_v62 = vld [vmem:[%s1230_s28 + $0x148] sm:$0xf0]  ;;  %v982_v63 = vor.u32 %v1101_v59, %v979_v60  ;;  %v971_v2 = vld [vmem:[%s1230_s28 + $0xb8] sm:$0xf0] }
  0x33   : > { %651 = vmatpush.bf16.msra.mxu1 %v954_v16  ;;  %v1046_v0 = vor.u32 %v1117_v61, %v1043_v62  ;;  %v1115_v3 = vld [vmem:[%s1230_s28 + $0x134] sm:$0xf]  ;;  %v1035_v4 = vld [vmem:[%s1230_s28 + $0x138] sm:$0xf0]  ;;  %v974_v5 = vor.u32 %v1099_v1, %v971_v2  ;;  %v1097_v7 = vld [vmem:[%s1230_s28 + $0xa4] sm:$0xf] }
  0x34   : > { %676 = vmatpush.bf16.msra.mxu3 %v902_v25  ;;  %v1038_v6 = vor.u32 %v1115_v3, %v1035_v4  ;;  %v963_v8 = vld [vmem:[%s1230_s28 + $0xa8] sm:$0xf0]  ;;  %v1113_v9 = vld [vmem:[%s1230_s28 + $0x124] sm:$0xf]  ;;  %v1095_v13 = vld [vmem:[%s1230_s28 + $0x94] sm:$0xf] }
  0x35   : > { %v1027_v10 = vld [vmem:[%s1230_s28 + $0x128] sm:$0xf0]  ;;  %v966_v11 = vor.u32 %v1097_v7, %v963_v8  ;;  %v955_v14 = vld [vmem:[%s1230_s28 + $0x98] sm:$0xf0]  ;;  %v1111_v15 = vld [vmem:[%s1230_s28 + $0x114] sm:$0xf] }
  0x36   : > { %639 = vmatpush.bf16.msra.mxu0 %v882_v27  ;;  %664 = vmatpush.bf16.msra.mxu2 %v1018_v28  ;;  %v1030_v12 = vor.u32 %v1113_v9, %v1027_v10  ;;  %v1019_v16 = vld [vmem:[%s1230_s28 + $0x118] sm:$0xf0]  ;;  %v958_v17 = vor.u32 %v1095_v13, %v955_v14  ;;  %v1093_v19 = vld [vmem:[%s1230_s28 + $0x84] sm:$0xf]  ;;  %v947_v20 = vld [vmem:[%s1230_s28 + $0x88] sm:$0xf0] }
  0x37   : > { %652 = vmatpush.bf16.msra.mxu1 %v946_v33  ;;  %v1022_v18 = vor.u32 %v1111_v15, %v1019_v16  ;;  %v1109_v21 = vld [vmem:[%s1230_s28 + $0x104] sm:$0xf]  ;;  %v1011_v22 = vld [vmem:[%s1230_s28 + $0x108] sm:$0xf0]  ;;  %v950_v23 = vor.u32 %v1093_v19, %v947_v20 }
  0x38   : > { %677 = vmatpush.bf16.msra.mxu3 %v894_v43  ;;  %v1014_v24 = vor.u32 %v1109_v21, %v1011_v22  ;;  %v329_v30 = vld [vmem:[#allocation2] sm:$0xff]  ;;  %v330_v40 = vld [vmem:[#allocation2 + $0x8] sm:$0xff] }
  0x39   : > { %640 = vmatmul.bf16.vlgmr.msra.gmra.mxu0 %v386_v42 }
  0x3a   : > { %684 = vmatpush.bf16.msrb.mxu0 %v1006_v34  ;;  %653 = vmatmul.bf16.vlgmr.msra.gmra.mxu1 %v1305_v45 }
  0x3b   : > { %697 = vmatpush.bf16.msrb.mxu1 %v1070_v37  ;;  %665 = vmatpush.bf16.msra.mxu2 %v1010_v46 }
  0x3c   : > { %678 = vmatpush.bf16.msra.mxu3 %v886_v56 }
  0x3e   : > { %685 = vmatpush.bf16.msrb.mxu0 %v998_v49  ;;  %666 = vmatmul.bf16.vlgmr.msra.gmra.mxu2 %v388_v55 }
  0x3f   : > { %698 = vmatpush.bf16.msrb.mxu1 %v1062_v50  ;;  %679 = vmatmul.bf16.vlgmr.msra.gmra.mxu3 %v386_v42 }
  0x42   : > { %686 = vmatpush.bf16.msrb.mxu0 %v990_v57 }
  0x43   : > { %699 = vmatpush.bf16.msrb.mxu1 %v1054_v58 }
  0x46   : > { %687 = vmatpush.bf16.msrb.mxu0 %v982_v63 }
  0x47   : > { %700 = vmatpush.bf16.msrb.mxu1 %v1046_v0 }
  0x4a   : > { %688 = vmatpush.bf16.msrb.mxu0 %v974_v5 }
  0x4b   : > { %701 = vmatpush.bf16.msrb.mxu1 %v1038_v6 }
  0x4e   : > { %689 = vmatpush.bf16.msrb.mxu0 %v966_v11 }
  0x4f   : > { %702 = vmatpush.bf16.msrb.mxu1 %v1030_v12 }
  0x52   : > { %690 = vmatpush.bf16.msrb.mxu0 %v958_v17 }
  0x53   : > { %703 = vmatpush.bf16.msrb.mxu1 %v1022_v18 }
  0x56   : > { %691 = vmatpush.bf16.msrb.mxu0 %v950_v23 }
  0x57   : > { %704 = vmatpush.bf16.msrb.mxu1 %v1014_v24 }
  0x59   : > { %692 = vmatmul.bf16.vlgmr.msrb.gmra.mxu0 %v1305_v45 }
  0x5a   : > { %705 = vmatmul.bf16.vlgmr.msrb.gmra.mxu1 %v388_v55 }
  0xb6   : > { %v641_v25 = vpop.f32.mrf.mxu0 }
  0xb7   : > { %v654_v26 = vpop.f32.mrf.mxu1 }
  0xb8   : > { %v655_v27 = vadd.f32 %v654_v26, %v641_v25 }
  0xbe   : > { %v643_v28 = vpop.f32.mrf.mxu0 }
  0xbf   : > { %v656_v29 = vpop.f32.mrf.mxu1 }
  0xc1   : > { %v667_v31 = vpop.f32.mrf.mxu2 }
  0xc2   : > { %v668_v32 = vadd.f32 %v667_v31, %v655_v27  ;;  %v680_v34 = vpop.f32.mrf.mxu3 }
  0xc4   : > { %v710_v33 = vadd.f32 %v668_v32, %v329_v30 }
  0xc6   : > { %712 = vst [vmem:[#allocation2] sm:$0xff] %v710_v33 }
  0xc9   : > { %v669_v35 = vpop.f32.mrf.mxu2 }
  0xca   : > { %v682_v36 = vpop.f32.mrf.mxu3 }
  0xd6   : > { %v693_v37 = vpop.f32.mrf.mxu0 }
  0xd7   : > { %v694_v38 = vadd.f32 %v693_v37, %v680_v34  ;;  %v706_v39 = vpop.f32.mrf.mxu1 }
  0xd9   : > { %v707_v41 = vadd.f32 %v706_v39, %v694_v38 }
  0xdb   : > { %v711_v42 = vadd.f32 %v707_v41, %v330_v40  ;;  %717 = sbr.rel (%p1071_p7) target bundleno = 236 (0xec), region = 44 }
  0xdd   : > { %713 = vst [vmem:[#allocation2 + $0x8] sm:$0xff] %v711_v42 }
  0xde   : > { %v695_v43 = vpop.f32.mrf.mxu0 }
  0xdf   : > { %v708_v44 = vpop.f32.mrf.mxu1 }
  0xe0   : > { %v718_v45 = vld [vmem:[#allocation2] sm:$0xff] }
  0xe1   : > { %v720_v46 = vld [vmem:[%s1359_s2] sm:$0x3] }
  0xe2   : > { %v728_v47 = vld [vmem:[%s1360_s3] sm:$0x3]  ;;  %v722_v48 = vperm.slane %v720_v46, 0  ;;  %v723_v51 = vperm.slane %v720_v46, 1 }
  0xe3   : > { %v730_v49 = vperm.slane %v728_v47, 0  ;;  %v731_v52 = vperm.slane %v728_v47, 1 }
  0xe4   : > { %v719_v50 = vld [vmem:[#allocation2 + $0x8] sm:$0xff]  ;;  %v726_v53 = vmul.f32 %v722_v48, %v718_v45 }
  0xe5   : > { %v727_v54 = vmul.f32 %v723_v51, %v719_v50 }
  0xe6   : > { %v734_v55 = vadd.f32 %v730_v49, %v726_v53 }
  0xe7   : > { %v735_v56 = vadd.f32 %v731_v52, %v727_v54 }
  0xe8   : > { %v736_v57 = vmax.f32 %v734_v55, 0.0 }
  0xe9   : > { %v737_v58 = vmax.f32 %v735_v56, 0.0 }
  0xea   : > { %738 = vst [vmem:[%s1361_s4] sm:$0xff] %v736_v57 }
  0xeb   : > { %739 = vst [vmem:[%s1361_s4 + $0x8] sm:$0xff] %v737_v58 }
  0xec PF: > { %s14_s17 = sadd.s32 1, %s1172_s17   ;;  %s1362_s15 = smov %s1168_s16 }
  0xed   : > { %p11_p8 = scmp.ge.s32.totalorder %s14_s17, 5   ;;  %s1363_s16 = smov %s1365_s18 }
  0xef   :  { %13 = sbr.rel (!%p11_p8) target bundleno = 2 (0x2), region = 83 }

// kernel: _lambda_.33
= control target key start
LH: loop header
LB: loop body
LE: loop exit
PB: predicated region body
PF: predicated region fallthrough
CT: control target
= control target key end

     0   :  { %9 = vsyncpa [#allocation4], 0  ;;  %s305_s18 = smov [#allocation3]   ;;  %s306_s20 = smov 128   ;;  %s351_s0 = inlined_call_operand.vmem [shape: bf16[8,128], index: 0, kind: input, shape index: {}]   ;;  %s352_s1 = inlined_call_operand.hbm [shape: bf16[128,256], index: 1, kind: input, shape index: {}]   ;;  %s353_s2 = inlined_call_operand.vmem [shape: f32[1,256], index: 2, kind: input, shape index: {}]   ;;  %s354_s3 = inlined_call_operand.vmem [shape: f32[1,256], index: 3, kind: input, shape index: {}]   ;;  %s355_s4 = inlined_call_operand.vmem [shape: f32[8,256], index: 4, kind: output, shape index: {}]  }
   0x1   :  { %s16_s17 = sshll.u32 %s352_s1, 4  ;;  %s18_s19 = sshll.u32 %s305_s18, 4  ;;  %s17_s17 = int_to_ptr.hbm [resolvable:$true] %s16_s17  ;;  %s19_s19 = int_to_ptr.vmem [resolvable:$true] %s18_s19 }
   0x2   :  { %s307_s21 = smov 8  }
   0x3   :  { %24 = dma.hbm_to_vmem [thread:$0]  %s17_s17, 2048, %s19_s19, [#allocation4], %s306_s20, %s306_s20, %s307_s21  }
   0x4   :  { %303 = dma.done.wait [#allocation4], 2048  }
   0x5   :  { %304 = vsyncadd [#allocation4], 4294965248  ;;  %v254_v0 = vld [vmem:[#allocation3 + $0x70] sm:$0xf]  ;;  %v275_v1 = vld [vmem:[#allocation3 + $0x74] sm:$0xf0] }
   0x6   :  { %v274_v2 = vld [vmem:[#allocation3 + $0x74] sm:$0xf]  ;;  %v255_v3 = vor.u32 %v275_v1, %v254_v0  ;;  %v256_v4 = vld [vmem:[#allocation3 + $0x78] sm:$0xf0]  ;;  %v246_v5 = vld [vmem:[#allocation3 + $0x60] sm:$0xf] }
   0x7   :  { %v273_v6 = vld [vmem:[#allocation3 + $0x64] sm:$0xf0]  ;;  %v259_v7 = vor.u32 %v274_v2, %v256_v4  ;;  %v272_v8 = vld [vmem:[#allocation3 + $0x64] sm:$0xf]  ;;  %v248_v9 = vld [vmem:[#allocation3 + $0x68] sm:$0xf0] }
   0x8   :  { %138 = vmatpush.bf16.msra.mxu0 %v255_v3  ;;  %v247_v10 = vor.u32 %v273_v6, %v246_v5  ;;  %v251_v11 = vor.u32 %v272_v8, %v248_v9  ;;  %v238_v12 = vld [vmem:[#allocation3 + $0x50] sm:$0xf]  ;;  %v271_v13 = vld [vmem:[#allocation3 + $0x54] sm:$0xf0]  ;;  %v270_v14 = vld [vmem:[#allocation3 + $0x54] sm:$0xf] }
   0x9   :  { %151 = vmatpush.bf16.msra.mxu1 %v259_v7  ;;  %v240_v15 = vld [vmem:[#allocation3 + $0x58] sm:$0xf0]  ;;  %v239_v16 = vor.u32 %v271_v13, %v238_v12  ;;  %v230_v18 = vld [vmem:[#allocation3 + $0x40] sm:$0xf]  ;;  %v269_v19 = vld [vmem:[#allocation3 + $0x44] sm:$0xf0] }
   0xa   :  { %v243_v17 = vor.u32 %v270_v14, %v240_v15  ;;  %v268_v20 = vld [vmem:[#allocation3 + $0x44] sm:$0xf]  ;;  %v232_v21 = vld [vmem:[#allocation3 + $0x48] sm:$0xf0]  ;;  %v231_v22 = vor.u32 %v269_v19, %v230_v18  ;;  %v222_v24 = vld [vmem:[#allocation3 + $0x30] sm:$0xf] }
   0xb   :  { %v235_v23 = vor.u32 %v268_v20, %v232_v21  ;;  %v267_v25 = vld [vmem:[#allocation3 + $0x34] sm:$0xf0]  ;;  %v266_v26 = vld [vmem:[#allocation3 + $0x34] sm:$0xf]  ;;  %v224_v27 = vld [vmem:[#allocation3 + $0x38] sm:$0xf0] }
   0xc   :  { %139 = vmatpush.bf16.msra.mxu0 %v247_v10  ;;  %v223_v28 = vor.u32 %v267_v25, %v222_v24  ;;  %v227_v29 = vor.u32 %v266_v26, %v224_v27  ;;  %v214_v30 = vld [vmem:[#allocation3 + $0x20] sm:$0xf]  ;;  %v265_v31 = vld [vmem:[#allocation3 + $0x24] sm:$0xf0]  ;;  %v264_v32 = vld [vmem:[#allocation3 + $0x24] sm:$0xf] }
   0xd   :  { %152 = vmatpush.bf16.msra.mxu1 %v251_v11  ;;  %v216_v33 = vld [vmem:[#allocation3 + $0x28] sm:$0xf0]  ;;  %v215_v34 = vor.u32 %v265_v31, %v214_v30  ;;  %v206_v36 = vld [vmem:[#allocation3 + $0x10] sm:$0xf]  ;;  %v263_v37 = vld [vmem:[#allocation3 + $0x14] sm:$0xf0] }
   0xe   :  { %v219_v35 = vor.u32 %v264_v32, %v216_v33  ;;  %v262_v38 = vld [vmem:[#allocation3 + $0x14] sm:$0xf]  ;;  %v208_v39 = vld [vmem:[#allocation3 + $0x18] sm:$0xf0]  ;;  %v207_v40 = vor.u32 %v263_v37, %v206_v36  ;;  %v198_v42 = vld [vmem:[#allocation3] sm:$0xf] }
   0xf   :  { %v211_v41 = vor.u32 %v262_v38, %v208_v39  ;;  %v261_v43 = vld [vmem:[#allocation3 + $0x4] sm:$0xf0]  ;;  %v260_v44 = vld [vmem:[#allocation3 + $0x4] sm:$0xf]  ;;  %v200_v45 = vld [vmem:[#allocation3 + $0x8] sm:$0xf0] }
  0x10   :  { %140 = vmatpush.bf16.msra.mxu0 %v239_v16  ;;  %v199_v46 = vor.u32 %v261_v43, %v198_v42  ;;  %v203_v47 = vor.u32 %v260_v44, %v200_v45  ;;  %v41_v48 = vld [vmem:[%s351_s0] sm:$0xf] }
  0x11   :  { %153 = vmatpush.bf16.msra.mxu1 %v243_v17  ;;  %v173_v49 = vld [vmem:[%s353_s2] sm:$0x3] }
  0x12   :  { %v181_v50 = vld [vmem:[%s354_s3] sm:$0x3]  ;;  %v175_v51 = vperm.slane %v173_v49, 0  ;;  %v176_v52 = vperm.slane %v173_v49, 1 }
  0x13   :  { %v183_v53 = vperm.slane %v181_v50, 0  ;;  %v184_v55 = vperm.slane %v181_v50, 1 }
  0x14   :  { %141 = vmatpush.bf16.msra.mxu0 %v231_v22 }
  0x15   :  { %154 = vmatpush.bf16.msra.mxu1 %v235_v23 }
  0x18   :  { %142 = vmatpush.bf16.msra.mxu0 %v223_v28 }
  0x19   :  { %155 = vmatpush.bf16.msra.mxu1 %v227_v29 }
  0x1c   :  { %143 = vmatpush.bf16.msra.mxu0 %v215_v34 }
  0x1d   :  { %156 = vmatpush.bf16.msra.mxu1 %v219_v35 }
  0x20   :  { %144 = vmatpush.bf16.msra.mxu0 %v207_v40 }
  0x21   :  { %157 = vmatpush.bf16.msra.mxu1 %v211_v41 }
  0x24   :  { %145 = vmatpush.bf16.msra.mxu0 %v199_v46 }
  0x25   :  { %158 = vmatpush.bf16.msra.mxu1 %v203_v47 }
  0x27   :  { %146 = vmatmul.bf16.vlgmr.msra.gmra.mxu0 %v41_v48 }
  0x28   :  { %159 = vmatmul.bf16.vlgmr.msra.gmra.mxu1 %v41_v48 }
  0xa4   :  { %v147_v54 = vpop.f32.mrf.mxu0 }
  0xa5   :  { %v179_v56 = vmul.f32 %v175_v51, %v147_v54  ;;  %v160_v57 = vpop.f32.mrf.mxu1 }
  0xa6   :  { %v180_v58 = vmul.f32 %v176_v52, %v160_v57 }
  0xa7   :  { %v187_v59 = vadd.f32 %v183_v53, %v179_v56 }
  0xa8   :  { %v188_v60 = vadd.f32 %v184_v55, %v180_v58 }
  0xa9   :  { %189 = vst [vmem:[%s355_s4] sm:$0xff] %v187_v59 }
  0xaa   :  { %190 = vst [vmem:[%s355_s4 + $0x8] sm:$0xff] %v188_v60 }
  0xac   :  { %v149_v61 = vpop.f32.mrf.mxu0 }
  0xad   :  { %v162_v62 = vpop.f32.mrf.mxu1 }
  0xae   :  { %195 = vsyncpa [#allocation4], 1 }

// kernel: _lambda_.35
= control target key start
LH: loop header
LB: loop body
LE: loop exit
PB: predicated region body
PF: predicated region fallthrough
CT: control target
= control target key end

     0   :  { %9 = vsyncpa [#allocation4], 0  ;;  %s1514_s0 = inlined_call_operand.vmem [shape: bf16[8,2304], index: 0, kind: input, shape index: {}]   ;;  %s1515_s1 = inlined_call_operand.hbm [shape: bf16[2304,256], index: 1, kind: input, shape index: {}]   ;;  %s1516_s2 = inlined_call_operand.vmem [shape: f32[1,256], index: 2, kind: input, shape index: {}]   ;;  %s1517_s3 = inlined_call_operand.vmem [shape: f32[1,256], index: 3, kind: input, shape index: {}]   ;;  %s1518_s4 = inlined_call_operand.vmem [shape: f32[8,256], index: 4, kind: output, shape index: {}]  }
   0x1   :  { %11 = vsyncpa [#allocation4 + $0x1], 0  ;;  %s1313_s15 = smov 0   ;;  %s1315_s16 = smov 0  }
   0x2   :  { %s1317_s17 = smov 0   ;;  %s1319_s18 = smov 0  }
   0x3   :  { %s1321_s19 = smov 0   ;;  %s1323_s20 = smov 0  }
   0x4 LB: > { %s885_s21 = sadd.s32 4294967295, %s1283_s20   ;;  %s29_s22 = sadd.s32 1, %s1279_s19  ;;  %s1283_s20 = sphi %s1323_s20, %s17_s20   ;;  %s1279_s19 = sphi %s1321_s19, %s1524_s19   ;;  %s1275_s18 = sphi %s1319_s18, %s1523_s18   ;;  %s1271_s17 = sphi %s1317_s17, %s1522_s17   ;;  %s1267_s16 = sphi %s1315_s16, %s1521_s16   ;;  %s1263_s15 = sphi %s1313_s15, %s1520_s15  }
   0x5   : > { %p30_p0 = scmp.ge.s32.totalorder %s29_s22, 6  ;;  %s73_s23 = sadd.s32 1, %s1271_s17 }
   0x6   : > { %p80_p1 = scmp.ne.s32.totalorder %s1271_s17, %s1267_s16  ;;  %p81_p2 = scmp.eq.s32.totalorder %s1283_s20, 0 }
   0x7   : > { %s1526_s22 = smov (%p30_p0, %s29_s22), 0  ;;  %p86_p4 = scmp.ne.s32.totalorder %s1267_s16, %s1263_s15 }
   0x8   : > { %p82_p3 = por %p81_p2, %p80_p1  ;;  %s68_s24 = ssub.s32 %s1279_s19, %s1526_s22 }
   0x9   : > { %p87_p5 = scmp.eq.s32.totalorder %s885_s21, 0  ;;  %p71_p6 = scmp.eq.s32.totalorder %s68_s24, 0 }
   0xa   : > { %p1151_p8 = scmp.lt.s32.totalorder %s1283_s20, 6  ;;  %s219_s27 = sand.u32 1, %s1271_s17  }
   0xb   : > { %p1352_p7 = por %p87_p5, %p86_p4  ;;  %s1142_s28 = smul.u32 384, %s1279_s19 }
   0xc   : > { %s1358_s26 = scalar_select %p71_p6, %s1271_s17, %s73_s23  }
   0xd   : > { %s1143_s29 = smul.u32 384, %s219_s27  ;;  %s231_s6 = scalar_lea.hbm %s1515_s1, %s1142_s28 }
   0xe   : > { %p1148_p9 = pnand %p1151_p8, %p82_p3  ;;  %s232_s7 = sshll.u32 %s231_s6, 4  ;;  %s233_s7 = int_to_ptr.hbm [resolvable:$true] %s232_s7 }
   0xf   : > { %s223_s8 = scalar_lea.vmem [#allocation3], %s1143_s29  ;;  %s220_s10 = scalar_lea.sflag [#allocation4], %s219_s27 }
  0x10   : > { %s234_s9 = sshll.u32 %s223_s8, 4  ;;  %s1285_s11 = smov 128   ;;  %s235_s9 = int_to_ptr.vmem [resolvable:$true] %s234_s9 }
  0x11   : > { %s1286_s12 = smov 8   ;;  %p892_p10 = scmp.ge.s32.totalorder %s1283_s20, 1 }
  0x12   : > { %1150 = dma.hbm_to_vmem [thread:$0]  (!%p1148_p9), %s233_s7, 6144, %s235_s9, %s220_s10, %s1285_s11, %s1285_s11, %s1286_s12  }
  0x13   : > { %p242_p11 = scmp.lt.s32.totalorder %s1283_s20, 7 }
  0x15   : > { %p243_p12 = pnand %p892_p10, %p242_p11 }
  0x16   : > { %s248_s13 = sand.u32 (!%p243_p12), 1, %s1267_s16  }
  0x17   : > { %246 = sbr.rel (%p243_p12) target bundleno = 252 (0xfc), region = 36  ;;  %s249_s15 = scalar_lea.sflag (!%p243_p12), [#allocation4], %s248_s13 }
  0x18   : > { %s1144_s14 = smul.u32 (!%p243_p12), 384, %s248_s13 }
  0x1a   : > { %s1368_s21 = scalar_lea.vmem (!%p243_p12), [#allocation3], %s1144_s14 }
  0x1c   : > { %1258 = dma.done.wait (%p1352_p7), %s249_s15, 6144  }
  0x1d   : > { %1260 = vsyncadd (%p1352_p7), %s249_s15, 4294961152  ;;  %s299_s23 = smul.u32 3, %s1275_s18  ;;  %p894_p0 = scmp.ne.s32.totalorder %s1275_s18, 0 }
  0x1f   : > { %p302_p13 = scmp.lt.s32.totalorder %s299_s23, 17  ;;  %334 = sbr.rel (%p894_p0) target bundleno = 39 (0x27), region = 44 }
  0x21   : > { %s1528_s23 = smov (!%p302_p13, %s299_s23), 17 }
  0x22   : > { %s893_s24 = sshll.u32 %s1528_s23, 2 }
  0x23   : > { %s1378_s29 = scalar_lea.vmem %s1514_s0, %s893_s24 }
  0x24   : > { %v1287_v0 = vmov 0.0  }
  0x25   : > { %335 = vst [vmem:[#allocation2] sm:$0xff] %v1287_v0 }
  0x26   : > { %336 = vst [vmem:[#allocation2 + $0x8] sm:$0xff] %v1287_v0 }
  0x27 PF: > { %v953_v1 = vld [vmem:[%s1368_s21 + $0x70] sm:$0xf]  ;;  %v1109_v2 = vld [vmem:[%s1368_s21 + $0x74] sm:$0xf0]  ;;  %v945_v6 = vld [vmem:[%s1368_s21 + $0x60] sm:$0xf] }
  0x28   : > { %v1017_v3 = vld [vmem:[%s1368_s21 + $0xf0] sm:$0xf]  ;;  %v954_v4 = vor.u32 %v1109_v2, %v953_v1  ;;  %v1125_v5 = vld [vmem:[%s1368_s21 + $0xf4] sm:$0xf0]  ;;  %v1107_v7 = vld [vmem:[%s1368_s21 + $0x64] sm:$0xf0] }
  0x29   : > { %v1018_v8 = vor.u32 %v1125_v5, %v1017_v3  ;;  %v1009_v9 = vld [vmem:[%s1368_s21 + $0xe0] sm:$0xf]  ;;  %v1123_v10 = vld [vmem:[%s1368_s21 + $0xe4] sm:$0xf0]  ;;  %v946_v11 = vor.u32 %v1107_v7, %v945_v6  ;;  %v937_v12 = vld [vmem:[%s1368_s21 + $0x50] sm:$0xf] }
  0x2a   : > { %640 = vmatpush.bf16.msra.mxu0 %v954_v4  ;;  %v1010_v13 = vor.u32 %v1123_v10, %v1009_v9  ;;  %v1105_v14 = vld [vmem:[%s1368_s21 + $0x54] sm:$0xf0]  ;;  %v1081_v15 = vld [vmem:[%s1368_s21 + $0x170] sm:$0xf]  ;;  %v1073_v20 = vld [vmem:[%s1368_s21 + $0x160] sm:$0xf] }
  0x2b   : > { %653 = vmatpush.bf16.msra.mxu1 %v1018_v8  ;;  %v1141_v16 = vld [vmem:[%s1368_s21 + $0x174] sm:$0xf0]  ;;  %v1001_v17 = vld [vmem:[%s1368_s21 + $0xd0] sm:$0xf]  ;;  %v1139_v21 = vld [vmem:[%s1368_s21 + $0x164] sm:$0xf0]  ;;  %v938_v23 = vor.u32 %v1105_v14, %v937_v12 }
  0x2c   : > { %v1121_v18 = vld [vmem:[%s1368_s21 + $0xd4] sm:$0xf0]  ;;  %v1082_v19 = vor.u32 %v1141_v16, %v1081_v15  ;;  %v1108_v22 = vld [vmem:[%s1368_s21 + $0x74] sm:$0xf]  ;;  %v929_v24 = vld [vmem:[%s1368_s21 + $0x40] sm:$0xf]  ;;  %v1074_v26 = vor.u32 %v1139_v21, %v1073_v20 }
  0x2d   : > { %v1103_v25 = vld [vmem:[%s1368_s21 + $0x44] sm:$0xf0]  ;;  %v955_v27 = vld [vmem:[%s1368_s21 + $0x78] sm:$0xf0]  ;;  %v1002_v28 = vor.u32 %v1121_v18, %v1001_v17  ;;  %v993_v29 = vld [vmem:[%s1368_s21 + $0xc0] sm:$0xf] }
  0x2e   : > { %641 = vmatpush.bf16.msra.mxu0 %v946_v11  ;;  %666 = vmatpush.bf16.msra.mxu2 %v1082_v19  ;;  %v1119_v30 = vld [vmem:[%s1368_s21 + $0xc4] sm:$0xf0]  ;;  %v958_v31 = vor.u32 %v1108_v22, %v955_v27  ;;  %v1065_v32 = vld [vmem:[%s1368_s21 + $0x150] sm:$0xf]  ;;  %v1137_v33 = vld [vmem:[%s1368_s21 + $0x154] sm:$0xf0]  ;;  %v930_v37 = vor.u32 %v1103_v25, %v929_v24 }
  0x2f   : > { %654 = vmatpush.bf16.msra.mxu1 %v1010_v13  ;;  %v1106_v34 = vld [vmem:[%s1368_s21 + $0x64] sm:$0xf]  ;;  %v947_v35 = vld [vmem:[%s1368_s21 + $0x68] sm:$0xf0]  ;;  %v921_v38 = vld [vmem:[%s1368_s21 + $0x30] sm:$0xf]  ;;  %v1066_v40 = vor.u32 %v1137_v33, %v1065_v32  ;;  %v994_v42 = vor.u32 %v1119_v30, %v993_v29 }
  0x30   : > { %679 = vmatpush.bf16.msra.mxu3 %v958_v31  ;;  %v950_v36 = vor.u32 %v1106_v34, %v947_v35  ;;  %v1101_v39 = vld [vmem:[%s1368_s21 + $0x34] sm:$0xf0]  ;;  %v1057_v41 = vld [vmem:[%s1368_s21 + $0x140] sm:$0xf]  ;;  %v1135_v43 = vld [vmem:[%s1368_s21 + $0x144] sm:$0xf0] }
  0x31   : > { %v1104_v44 = vld [vmem:[%s1368_s21 + $0x54] sm:$0xf]  ;;  %v939_v45 = vld [vmem:[%s1368_s21 + $0x58] sm:$0xf0]  ;;  %v985_v46 = vld [vmem:[%s1368_s21 + $0xb0] sm:$0xf]  ;;  %v922_v49 = vor.u32 %v1101_v39, %v921_v38  ;;  %v1058_v51 = vor.u32 %v1135_v43, %v1057_v41 }
  0x32   : > { %642 = vmatpush.bf16.msra.mxu0 %v938_v23  ;;  %667 = vmatpush.bf16.msra.mxu2 %v1074_v26  ;;  %v1117_v47 = vld [vmem:[%s1368_s21 + $0xb4] sm:$0xf0]  ;;  %v942_v48 = vor.u32 %v1104_v44, %v939_v45  ;;  %v913_v50 = vld [vmem:[%s1368_s21 + $0x20] sm:$0xf]  ;;  %v1102_v52 = vld [vmem:[%s1368_s21 + $0x44] sm:$0xf] }
  0x33   : > { %655 = vmatpush.bf16.msra.mxu1 %v1002_v28  ;;  %v931_v53 = vld [vmem:[%s1368_s21 + $0x48] sm:$0xf0]  ;;  %v986_v54 = vor.u32 %v1117_v47, %v985_v46  ;;  %v1099_v55 = vld [vmem:[%s1368_s21 + $0x24] sm:$0xf0]  ;;  %v1049_v56 = vld [vmem:[%s1368_s21 + $0x130] sm:$0xf] }
  0x34   : > { %680 = vmatpush.bf16.msra.mxu3 %v950_v36  ;;  %v1133_v57 = vld [vmem:[%s1368_s21 + $0x134] sm:$0xf0]  ;;  %v977_v58 = vld [vmem:[%s1368_s21 + $0xa0] sm:$0xf]  ;;  %v1115_v59 = vld [vmem:[%s1368_s21 + $0xa4] sm:$0xf0]  ;;  %v934_v60 = vor.u32 %v1102_v52, %v931_v53  ;;  %v914_v61 = vor.u32 %v1099_v55, %v913_v50 }
  0x35   : > { %v905_v62 = vld [vmem:[%s1368_s21 + $0x10] sm:$0xf]  ;;  %v1050_v63 = vor.u32 %v1133_v57, %v1049_v56  ;;  %v1100_v0 = vld [vmem:[%s1368_s21 + $0x34] sm:$0xf]  ;;  %v923_v1 = vld [vmem:[%s1368_s21 + $0x38] sm:$0xf0]  ;;  %v978_v2 = vor.u32 %v1115_v59, %v977_v58 }
  0x36   : > { %643 = vmatpush.bf16.msra.mxu0 %v930_v37  ;;  %668 = vmatpush.bf16.msra.mxu2 %v1066_v40  ;;  %v1097_v3 = vld [vmem:[%s1368_s21 + $0x14] sm:$0xf0]  ;;  %v1041_v4 = vld [vmem:[%s1368_s21 + $0x120] sm:$0xf]  ;;  %v1131_v5 = vld [vmem:[%s1368_s21 + $0x124] sm:$0xf0]  ;;  %v926_v10 = vor.u32 %v1100_v0, %v923_v1 }
  0x37   : > { %656 = vmatpush.bf16.msra.mxu1 %v994_v42  ;;  %v969_v6 = vld [vmem:[%s1368_s21 + $0x90] sm:$0xf]  ;;  %v1113_v7 = vld [vmem:[%s1368_s21 + $0x94] sm:$0xf0]  ;;  %v897_v8 = vld [vmem:[%s1368_s21] sm:$0xf]  ;;  %v906_v11 = vor.u32 %v1097_v3, %v905_v62  ;;  %v1042_v12 = vor.u32 %v1131_v5, %v1041_v4 }
  0x38   : > { %681 = vmatpush.bf16.msra.mxu3 %v942_v48  ;;  %v1095_v9 = vld [vmem:[%s1368_s21 + $0x4] sm:$0xf0]  ;;  %v1098_v13 = vld [vmem:[%s1368_s21 + $0x24] sm:$0xf]  ;;  %v915_v14 = vld [vmem:[%s1368_s21 + $0x28] sm:$0xf0]  ;;  %v970_v16 = vor.u32 %v1113_v7, %v969_v6 }
  0x39   : > { %v339_v15 = vld [vmem:[%s1378_s29] sm:$0xff]  ;;  %v961_v17 = vld [vmem:[%s1368_s21 + $0x80] sm:$0xf]  ;;  %v1129_v19 = vld [vmem:[%s1368_s21 + $0x114] sm:$0xf0]  ;;  %v918_v25 = vor.u32 %v1098_v13, %v915_v14  ;;  %v898_v27 = vor.u32 %v1095_v9, %v897_v8  ;;  %p1087_p1 = scmp.ne.s32.totalorder %s1275_s18, 5 }
  0x3a   : > { %644 = vmatpush.bf16.msra.mxu0 %v922_v49  ;;  %669 = vmatpush.bf16.msra.mxu2 %v1058_v51  ;;  %v1033_v18 = vld [vmem:[%s1368_s21 + $0x110] sm:$0xf]  ;;  %v1111_v20 = vld [vmem:[%s1368_s21 + $0x84] sm:$0xf0]  ;;  %v1124_v21 = vld [vmem:[%s1368_s21 + $0xf4] sm:$0xf]  ;;  %v391_v26 = vunpack.c.l.b16 %v339_v15  ;;  %v392_v29 = vunpack.c.h.b16 %v339_v15 }
  0x3b   : > { %657 = vmatpush.bf16.msra.mxu1 %v986_v54  ;;  %v1019_v22 = vld [vmem:[%s1368_s21 + $0xf8] sm:$0xf0]  ;;  %v1140_v23 = vld [vmem:[%s1368_s21 + $0x174] sm:$0xf]  ;;  %v1034_v28 = vor.u32 %v1129_v19, %v1033_v18  ;;  %v340_v32 = vld [vmem:[%s1378_s29 + $0x8] sm:$0xf]  ;;  %v962_v33 = vor.u32 %v1111_v20, %v961_v17 }
  0x3c   : > { %682 = vmatpush.bf16.msra.mxu3 %v934_v60  ;;  %v1083_v24 = vld [vmem:[%s1368_s21 + $0x178] sm:$0xf0]  ;;  %v1096_v30 = vld [vmem:[%s1368_s21 + $0x14] sm:$0xf]  ;;  %v1022_v34 = vor.u32 %v1124_v21, %v1019_v22  ;;  %v1025_v35 = vld [vmem:[%s1368_s21 + $0x100] sm:$0xf]  ;;  %v394_v42 = vpack.c.b16 %v391_v26, %v391_v26  ;;  %v393_v44 = vunpack.c.l.b16 %v340_v32  ;;  %v1453_v45 = vpack.c.b16 %v392_v29, %v392_v29 }
  0x3d   : > { %v907_v31 = vld [vmem:[%s1368_s21 + $0x18] sm:$0xf0]  ;;  %v1127_v36 = vld [vmem:[%s1368_s21 + $0x104] sm:$0xf0]  ;;  %v1086_v37 = vor.u32 %v1140_v23, %v1083_v24  ;;  %v1122_v38 = vld [vmem:[%s1368_s21 + $0xe4] sm:$0xf] }
  0x3e   : > { %645 = vmatpush.bf16.msra.mxu0 %v914_v61  ;;  %670 = vmatpush.bf16.msra.mxu2 %v1050_v63  ;;  %v1011_v39 = vld [vmem:[%s1368_s21 + $0xe8] sm:$0xf0]  ;;  %v1138_v40 = vld [vmem:[%s1368_s21 + $0x164] sm:$0xf]  ;;  %v910_v43 = vor.u32 %v1096_v30, %v907_v31  ;;  %v1026_v46 = vor.u32 %v1127_v36, %v1025_v35  ;;  %v1120_v51 = vld [vmem:[%s1368_s21 + $0xd4] sm:$0xf]  ;;  %v396_v55 = vpack.c.b16 %v393_v44, %v393_v44 }
  0x3f   : > { %658 = vmatpush.bf16.msra.mxu1 %v978_v2  ;;  %v1075_v41 = vld [vmem:[%s1368_s21 + $0x168] sm:$0xf0]  ;;  %v1094_v47 = vld [vmem:[%s1368_s21 + $0x4] sm:$0xf]  ;;  %v1014_v49 = vor.u32 %v1122_v38, %v1011_v39  ;;  %v1003_v52 = vld [vmem:[%s1368_s21 + $0xd8] sm:$0xf0] }
  0x40   : > { %683 = vmatpush.bf16.msra.mxu3 %v926_v10  ;;  %v899_v48 = vld [vmem:[%s1368_s21 + $0x8] sm:$0xf0]  ;;  %v1078_v50 = vor.u32 %v1138_v40, %v1075_v41  ;;  %v1136_v53 = vld [vmem:[%s1368_s21 + $0x154] sm:$0xf]  ;;  %v1067_v54 = vld [vmem:[%s1368_s21 + $0x158] sm:$0xf0]  ;;  %v1006_v57 = vor.u32 %v1120_v51, %v1003_v52 }
  0x41   : > { %v902_v56 = vor.u32 %v1094_v47, %v899_v48  ;;  %v1070_v58 = vor.u32 %v1136_v53, %v1067_v54  ;;  %v1118_v59 = vld [vmem:[%s1368_s21 + $0xc4] sm:$0xf]  ;;  %v995_v60 = vld [vmem:[%s1368_s21 + $0xc8] sm:$0xf0]  ;;  %v1116_v1 = vld [vmem:[%s1368_s21 + $0xb4] sm:$0xf] }
  0x42   : > { %646 = vmatpush.bf16.msra.mxu0 %v906_v11  ;;  %671 = vmatpush.bf16.msra.mxu2 %v1042_v12  ;;  %v1134_v61 = vld [vmem:[%s1368_s21 + $0x144] sm:$0xf]  ;;  %v1059_v62 = vld [vmem:[%s1368_s21 + $0x148] sm:$0xf0]  ;;  %v998_v63 = vor.u32 %v1118_v59, %v995_v60  ;;  %v987_v2 = vld [vmem:[%s1368_s21 + $0xb8] sm:$0xf0] }
  0x43   : > { %659 = vmatpush.bf16.msra.mxu1 %v970_v16  ;;  %v1062_v0 = vor.u32 %v1134_v61, %v1059_v62  ;;  %v1132_v3 = vld [vmem:[%s1368_s21 + $0x134] sm:$0xf]  ;;  %v1051_v4 = vld [vmem:[%s1368_s21 + $0x138] sm:$0xf0]  ;;  %v990_v5 = vor.u32 %v1116_v1, %v987_v2  ;;  %v1114_v7 = vld [vmem:[%s1368_s21 + $0xa4] sm:$0xf] }
  0x44   : > { %684 = vmatpush.bf16.msra.mxu3 %v918_v25  ;;  %v1054_v6 = vor.u32 %v1132_v3, %v1051_v4  ;;  %v979_v8 = vld [vmem:[%s1368_s21 + $0xa8] sm:$0xf0]  ;;  %v1130_v9 = vld [vmem:[%s1368_s21 + $0x124] sm:$0xf]  ;;  %v1112_v13 = vld [vmem:[%s1368_s21 + $0x94] sm:$0xf] }
  0x45   : > { %v1043_v10 = vld [vmem:[%s1368_s21 + $0x128] sm:$0xf0]  ;;  %v982_v11 = vor.u32 %v1114_v7, %v979_v8  ;;  %v971_v14 = vld [vmem:[%s1368_s21 + $0x98] sm:$0xf0]  ;;  %v1128_v15 = vld [vmem:[%s1368_s21 + $0x114] sm:$0xf] }
  0x46   : > { %647 = vmatpush.bf16.msra.mxu0 %v898_v27  ;;  %672 = vmatpush.bf16.msra.mxu2 %v1034_v28  ;;  %v1046_v12 = vor.u32 %v1130_v9, %v1043_v10  ;;  %v1035_v16 = vld [vmem:[%s1368_s21 + $0x118] sm:$0xf0]  ;;  %v974_v17 = vor.u32 %v1112_v13, %v971_v14  ;;  %v1110_v19 = vld [vmem:[%s1368_s21 + $0x84] sm:$0xf]  ;;  %v963_v20 = vld [vmem:[%s1368_s21 + $0x88] sm:$0xf0] }
  0x47   : > { %660 = vmatpush.bf16.msra.mxu1 %v962_v33  ;;  %v1038_v18 = vor.u32 %v1128_v15, %v1035_v16  ;;  %v1126_v21 = vld [vmem:[%s1368_s21 + $0x104] sm:$0xf]  ;;  %v1027_v22 = vld [vmem:[%s1368_s21 + $0x108] sm:$0xf0]  ;;  %v966_v23 = vor.u32 %v1110_v19, %v963_v20  ;;  %v337_v30 = vld [vmem:[#allocation2] sm:$0xff] }
  0x48   : > { %685 = vmatpush.bf16.msra.mxu3 %v910_v43  ;;  %v1030_v24 = vor.u32 %v1126_v21, %v1027_v22  ;;  %v338_v40 = vld [vmem:[#allocation2 + $0x8] sm:$0xff] }
  0x49   : > { %648 = vmatmul.bf16.vlgmr.msra.gmra.mxu0 %v394_v42 }
  0x4a   : > { %692 = vmatpush.bf16.msrb.mxu0 %v1022_v34  ;;  %661 = vmatmul.bf16.vlgmr.msra.gmra.mxu1 %v1453_v45 }
  0x4b   : > { %705 = vmatpush.bf16.msrb.mxu1 %v1086_v37  ;;  %673 = vmatpush.bf16.msra.mxu2 %v1026_v46 }
  0x4c   : > { %686 = vmatpush.bf16.msra.mxu3 %v902_v56 }
  0x4e   : > { %693 = vmatpush.bf16.msrb.mxu0 %v1014_v49  ;;  %674 = vmatmul.bf16.vlgmr.msra.gmra.mxu2 %v396_v55 }
  0x4f   : > { %706 = vmatpush.bf16.msrb.mxu1 %v1078_v50  ;;  %687 = vmatmul.bf16.vlgmr.msra.gmra.mxu3 %v394_v42 }
  0x52   : > { %694 = vmatpush.bf16.msrb.mxu0 %v1006_v57 }
  0x53   : > { %707 = vmatpush.bf16.msrb.mxu1 %v1070_v58 }
  0x56   : > { %695 = vmatpush.bf16.msrb.mxu0 %v998_v63 }
  0x57   : > { %708 = vmatpush.bf16.msrb.mxu1 %v1062_v0 }
  0x5a   : > { %696 = vmatpush.bf16.msrb.mxu0 %v990_v5 }
  0x5b   : > { %709 = vmatpush.bf16.msrb.mxu1 %v1054_v6 }
  0x5e   : > { %697 = vmatpush.bf16.msrb.mxu0 %v982_v11 }
  0x5f   : > { %710 = vmatpush.bf16.msrb.mxu1 %v1046_v12 }
  0x62   : > { %698 = vmatpush.bf16.msrb.mxu0 %v974_v17 }
  0x63   : > { %711 = vmatpush.bf16.msrb.mxu1 %v1038_v18 }
  0x66   : > { %699 = vmatpush.bf16.msrb.mxu0 %v966_v23 }
  0x67   : > { %712 = vmatpush.bf16.msrb.mxu1 %v1030_v24 }
  0x69   : > { %700 = vmatmul.bf16.vlgmr.msrb.gmra.mxu0 %v1453_v45 }
  0x6a   : > { %713 = vmatmul.bf16.vlgmr.msrb.gmra.mxu1 %v396_v55 }
  0xc6   : > { %v649_v25 = vpop.f32.mrf.mxu0 }
  0xc7   : > { %v662_v26 = vpop.f32.mrf.mxu1 }
  0xc8   : > { %v663_v27 = vadd.f32 %v662_v26, %v649_v25 }
  0xce   : > { %v651_v28 = vpop.f32.mrf.mxu0 }
  0xcf   : > { %v664_v29 = vpop.f32.mrf.mxu1 }
  0xd1   : > { %v675_v31 = vpop.f32.mrf.mxu2 }
  0xd2   : > { %v676_v32 = vadd.f32 %v675_v31, %v663_v27  ;;  %v688_v34 = vpop.f32.mrf.mxu3 }
  0xd4   : > { %v718_v33 = vadd.f32 %v676_v32, %v337_v30 }
  0xd6   : > { %720 = vst [vmem:[#allocation2] sm:$0xff] %v718_v33 }
  0xd9   : > { %v677_v35 = vpop.f32.mrf.mxu2 }
  0xda   : > { %v690_v36 = vpop.f32.mrf.mxu3 }
  0xe6   : > { %v701_v37 = vpop.f32.mrf.mxu0 }
  0xe7   : > { %v702_v38 = vadd.f32 %v701_v37, %v688_v34  ;;  %v714_v39 = vpop.f32.mrf.mxu1 }
  0xe9   : > { %v715_v41 = vadd.f32 %v714_v39, %v702_v38 }
  0xeb   : > { %v719_v42 = vadd.f32 %v715_v41, %v338_v40  ;;  %725 = sbr.rel (%p1087_p1) target bundleno = 252 (0xfc), region = 48 }
  0xed   : > { %721 = vst [vmem:[#allocation2 + $0x8] sm:$0xff] %v719_v42 }
  0xee   : > { %v703_v43 = vpop.f32.mrf.mxu0 }
  0xef   : > { %v716_v44 = vpop.f32.mrf.mxu1 }
  0xf0   : > { %v726_v45 = vld [vmem:[#allocation2] sm:$0xff] }
  0xf1   : > { %v728_v46 = vld [vmem:[%s1516_s2] sm:$0x3] }
  0xf2   : > { %v736_v47 = vld [vmem:[%s1517_s3] sm:$0x3]  ;;  %v730_v48 = vperm.slane %v728_v46, 0  ;;  %v731_v51 = vperm.slane %v728_v46, 1 }
  0xf3   : > { %v738_v49 = vperm.slane %v736_v47, 0  ;;  %v739_v52 = vperm.slane %v736_v47, 1 }
  0xf4   : > { %v727_v50 = vld [vmem:[#allocation2 + $0x8] sm:$0xff]  ;;  %v734_v53 = vmul.f32 %v730_v48, %v726_v45 }
  0xf5   : > { %v735_v54 = vmul.f32 %v731_v51, %v727_v50 }
  0xf6   : > { %v742_v55 = vadd.f32 %v738_v49, %v734_v53 }
  0xf7   : > { %v743_v56 = vadd.f32 %v739_v52, %v735_v54 }
  0xf8   : > { %v744_v57 = vmax.f32 %v742_v55, 0.0 }
  0xf9   : > { %v745_v58 = vmax.f32 %v743_v56, 0.0 }
  0xfa   : > { %746 = vst [vmem:[%s1518_s4] sm:$0xff] %v744_v57 }
  0xfb   : > { %747 = vst [vmem:[%s1518_s4 + $0x8] sm:$0xff] %v745_v58 }
  0xfc PF: > { %s17_s20 = sadd.s32 1, %s1283_s20   ;;  %s1520_s15 = smov %s1267_s16 }
  0xfd   : > { %p14_p2 = scmp.ge.s32.totalorder %s17_s20, 8   ;;  %s1521_s16 = smov %s1271_s17 }
  0xfe   : > { %s1522_s17 = smov %s1358_s26  ;;  %s1523_s18 = smov %s1279_s19 }
  0xff   : > { %s1524_s19 = smov %s1526_s22  ;;  %16 = sbr.rel (!%p14_p2) target bundleno = 4 (0x4), region = 93 }
 0x104   :  { %778 = vsyncpa [#allocation4], 1 }
 0x105   :  { %780 = vsyncpa [#allocation4 + $0x1], 1 }

// kernel: _lambda_.34
= control target key start
LH: loop header
LB: loop body
LE: loop exit
PB: predicated region body
PF: predicated region fallthrough
CT: control target
= control target key end

     0   :  { %10 = vsyncpa [#allocation4], 0  ;;  %s1614_s0 = inlined_call_operand.vmem [shape: bf16[8,2304], index: 0, kind: input, shape index: {}]   ;;  %s1615_s1 = inlined_call_operand.hbm [shape: bf16[2304,256], index: 1, kind: input, shape index: {}]   ;;  %s1616_s2 = inlined_call_operand.vmem [shape: f32[1,256], index: 2, kind: input, shape index: {}]   ;;  %s1617_s3 = inlined_call_operand.vmem [shape: f32[1,256], index: 3, kind: input, shape index: {}]   ;;  %s1618_s4 = inlined_call_operand.vmem [shape: f32[8,256], index: 4, kind: input, shape index: {}]   ;;  %s1619_s5 = inlined_call_operand.vmem [shape: f32[8,256], index: 5, kind: output, shape index: {}]  }
   0x1   :  { %12 = vsyncpa [#allocation4 + $0x1], 0  ;;  %s1407_s18 = smov 0   ;;  %s1409_s19 = smov 0  }
   0x2   :  { %s1411_s20 = smov 0   ;;  %s1413_s21 = smov 0  }
   0x3   :  { %s1415_s22 = smov 0   ;;  %s1417_s23 = smov 0  }
   0x4 LB: > { %s973_s24 = sadd.s32 4294967295, %s1372_s23   ;;  %s30_s25 = sadd.s32 1, %s1368_s22  ;;  %s1372_s23 = sphi %s1417_s23, %s18_s23   ;;  %s1368_s22 = sphi %s1415_s22, %s1625_s22   ;;  %s1364_s21 = sphi %s1413_s21, %s1624_s21   ;;  %s1360_s20 = sphi %s1411_s20, %s1623_s20   ;;  %s1356_s19 = sphi %s1409_s19, %s1622_s19   ;;  %s1352_s18 = sphi %s1407_s18, %s1621_s18  }
   0x5   : > { %p31_p0 = scmp.ge.s32.totalorder %s30_s25, 6  ;;  %s74_s26 = sadd.s32 1, %s1360_s20 }
   0x6   : > { %p81_p1 = scmp.ne.s32.totalorder %s1360_s20, %s1356_s19  ;;  %p82_p2 = scmp.eq.s32.totalorder %s1372_s23, 0 }
   0x7   : > { %s1627_s25 = smov (%p31_p0, %s30_s25), 0  ;;  %p87_p4 = scmp.ne.s32.totalorder %s1356_s19, %s1352_s18 }
   0x8   : > { %p83_p3 = por %p82_p2, %p81_p1  ;;  %s69_s27 = ssub.s32 %s1368_s22, %s1627_s25 }
   0x9   : > { %p88_p5 = scmp.eq.s32.totalorder %s973_s24, 0  ;;  %p72_p6 = scmp.eq.s32.totalorder %s69_s27, 0 }
   0xa   : > { %p1240_p8 = scmp.lt.s32.totalorder %s1372_s23, 6  ;;  %s261_s30 = sand.u32 1, %s1360_s20  }
   0xb   : > { %p1446_p7 = por %p88_p5, %p87_p4  ;;  %s1231_s6 = smul.u32 384, %s1368_s22 }
   0xc   : > { %s1452_s29 = scalar_select %p72_p6, %s1360_s20, %s74_s26  }
   0xd   : > { %s1232_s7 = smul.u32 384, %s261_s30  ;;  %s273_s10 = scalar_lea.hbm %s1615_s1, %s1231_s6 }
   0xe   : > { %p1237_p9 = pnand %p1240_p8, %p83_p3  ;;  %s274_s11 = sshll.u32 %s273_s10, 4  ;;  %s275_s11 = int_to_ptr.hbm [resolvable:$true] %s274_s11 }
   0xf   : > { %s265_s12 = scalar_lea.vmem [#allocation3], %s1232_s7  ;;  %s262_s14 = scalar_lea.sflag [#allocation4], %s261_s30 }
  0x10   : > { %s276_s13 = sshll.u32 %s265_s12, 4  ;;  %s1374_s15 = smov 128   ;;  %s277_s13 = int_to_ptr.vmem [resolvable:$true] %s276_s13 }
  0x11   : > { %s1375_s16 = smov 8   ;;  %p981_p10 = scmp.ge.s32.totalorder %s1372_s23, 1 }
  0x12   : > { %1239 = dma.hbm_to_vmem [thread:$0]  (!%p1237_p9), %s275_s11, 6144, %s277_s13, %s262_s14, %s1374_s15, %s1374_s15, %s1375_s16  }
  0x13   : > { %p284_p11 = scmp.lt.s32.totalorder %s1372_s23, 7 }
  0x15   : > { %p285_p12 = pnand %p981_p10, %p284_p11 }
  0x16   : > { %s290_s17 = sand.u32 (!%p285_p12), 1, %s1356_s19  }
  0x17   : > { %288 = sbr.rel (%p285_p12) target bundleno = 254 (0xfe), region = 40  ;;  %s291_s24 = scalar_lea.sflag (!%p285_p12), [#allocation4], %s290_s17 }
  0x18   : > { %s1233_s18 = smul.u32 (!%p285_p12), 384, %s290_s17 }
  0x1a   : > { %s1462_s26 = scalar_lea.vmem (!%p285_p12), [#allocation3], %s1233_s18 }
  0x1c   : > { %1347 = dma.done.wait (%p1446_p7), %s291_s24, 6144  }
  0x1d   : > { %1349 = vsyncadd (%p1446_p7), %s291_s24, 4294961152  ;;  %s352_s27 = smul.u32 3, %s1364_s21  ;;  %p983_p0 = scmp.ne.s32.totalorder %s1364_s21, 0 }
  0x1f   : > { %p355_p13 = scmp.lt.s32.totalorder %s352_s27, 17  ;;  %397 = sbr.rel (%p983_p0) target bundleno = 39 (0x27), region = 48 }
  0x21   : > { %s1629_s27 = smov (!%p355_p13, %s352_s27), 17 }
  0x22   : > { %s982_s30 = sshll.u32 %s1629_s27, 2 }
  0x23   : > { %s1472_s8 = scalar_lea.vmem %s1614_s0, %s982_s30 }
  0x24   : > { %v1376_v0 = vmov 0.0  }
  0x25   : > { %398 = vst [vmem:[#allocation2] sm:$0xff] %v1376_v0 }
  0x26   : > { %399 = vst [vmem:[#allocation2 + $0x8] sm:$0xff] %v1376_v0 }
  0x27 PF: > { %v1042_v1 = vld [vmem:[%s1462_s26 + $0x70] sm:$0xf]  ;;  %v1198_v2 = vld [vmem:[%s1462_s26 + $0x74] sm:$0xf0]  ;;  %v1034_v6 = vld [vmem:[%s1462_s26 + $0x60] sm:$0xf] }
  0x28   : > { %v1106_v3 = vld [vmem:[%s1462_s26 + $0xf0] sm:$0xf]  ;;  %v1043_v4 = vor.u32 %v1198_v2, %v1042_v1  ;;  %v1214_v5 = vld [vmem:[%s1462_s26 + $0xf4] sm:$0xf0]  ;;  %v1196_v7 = vld [vmem:[%s1462_s26 + $0x64] sm:$0xf0] }
  0x29   : > { %v1107_v8 = vor.u32 %v1214_v5, %v1106_v3  ;;  %v1098_v9 = vld [vmem:[%s1462_s26 + $0xe0] sm:$0xf]  ;;  %v1212_v10 = vld [vmem:[%s1462_s26 + $0xe4] sm:$0xf0]  ;;  %v1035_v11 = vor.u32 %v1196_v7, %v1034_v6  ;;  %v1026_v12 = vld [vmem:[%s1462_s26 + $0x50] sm:$0xf] }
  0x2a   : > { %703 = vmatpush.bf16.msra.mxu0 %v1043_v4  ;;  %v1099_v13 = vor.u32 %v1212_v10, %v1098_v9  ;;  %v1194_v14 = vld [vmem:[%s1462_s26 + $0x54] sm:$0xf0]  ;;  %v1170_v15 = vld [vmem:[%s1462_s26 + $0x170] sm:$0xf]  ;;  %v1162_v20 = vld [vmem:[%s1462_s26 + $0x160] sm:$0xf] }
  0x2b   : > { %716 = vmatpush.bf16.msra.mxu1 %v1107_v8  ;;  %v1230_v16 = vld [vmem:[%s1462_s26 + $0x174] sm:$0xf0]  ;;  %v1090_v17 = vld [vmem:[%s1462_s26 + $0xd0] sm:$0xf]  ;;  %v1228_v21 = vld [vmem:[%s1462_s26 + $0x164] sm:$0xf0]  ;;  %v1027_v23 = vor.u32 %v1194_v14, %v1026_v12 }
  0x2c   : > { %v1210_v18 = vld [vmem:[%s1462_s26 + $0xd4] sm:$0xf0]  ;;  %v1171_v19 = vor.u32 %v1230_v16, %v1170_v15  ;;  %v1197_v22 = vld [vmem:[%s1462_s26 + $0x74] sm:$0xf]  ;;  %v1018_v24 = vld [vmem:[%s1462_s26 + $0x40] sm:$0xf]  ;;  %v1163_v26 = vor.u32 %v1228_v21, %v1162_v20 }
  0x2d   : > { %v1192_v25 = vld [vmem:[%s1462_s26 + $0x44] sm:$0xf0]  ;;  %v1044_v27 = vld [vmem:[%s1462_s26 + $0x78] sm:$0xf0]  ;;  %v1091_v28 = vor.u32 %v1210_v18, %v1090_v17  ;;  %v1082_v29 = vld [vmem:[%s1462_s26 + $0xc0] sm:$0xf] }
  0x2e   : > { %704 = vmatpush.bf16.msra.mxu0 %v1035_v11  ;;  %729 = vmatpush.bf16.msra.mxu2 %v1171_v19  ;;  %v1208_v30 = vld [vmem:[%s1462_s26 + $0xc4] sm:$0xf0]  ;;  %v1047_v31 = vor.u32 %v1197_v22, %v1044_v27  ;;  %v1154_v32 = vld [vmem:[%s1462_s26 + $0x150] sm:$0xf]  ;;  %v1226_v33 = vld [vmem:[%s1462_s26 + $0x154] sm:$0xf0]  ;;  %v1019_v37 = vor.u32 %v1192_v25, %v1018_v24 }
  0x2f   : > { %717 = vmatpush.bf16.msra.mxu1 %v1099_v13  ;;  %v1195_v34 = vld [vmem:[%s1462_s26 + $0x64] sm:$0xf]  ;;  %v1036_v35 = vld [vmem:[%s1462_s26 + $0x68] sm:$0xf0]  ;;  %v1010_v38 = vld [vmem:[%s1462_s26 + $0x30] sm:$0xf]  ;;  %v1155_v40 = vor.u32 %v1226_v33, %v1154_v32  ;;  %v1083_v42 = vor.u32 %v1208_v30, %v1082_v29 }
  0x30   : > { %742 = vmatpush.bf16.msra.mxu3 %v1047_v31  ;;  %v1039_v36 = vor.u32 %v1195_v34, %v1036_v35  ;;  %v1190_v39 = vld [vmem:[%s1462_s26 + $0x34] sm:$0xf0]  ;;  %v1146_v41 = vld [vmem:[%s1462_s26 + $0x140] sm:$0xf]  ;;  %v1224_v43 = vld [vmem:[%s1462_s26 + $0x144] sm:$0xf0] }
  0x31   : > { %v1193_v44 = vld [vmem:[%s1462_s26 + $0x54] sm:$0xf]  ;;  %v1028_v45 = vld [vmem:[%s1462_s26 + $0x58] sm:$0xf0]  ;;  %v1074_v46 = vld [vmem:[%s1462_s26 + $0xb0] sm:$0xf]  ;;  %v1011_v49 = vor.u32 %v1190_v39, %v1010_v38  ;;  %v1147_v51 = vor.u32 %v1224_v43, %v1146_v41 }
  0x32   : > { %705 = vmatpush.bf16.msra.mxu0 %v1027_v23  ;;  %730 = vmatpush.bf16.msra.mxu2 %v1163_v26  ;;  %v1206_v47 = vld [vmem:[%s1462_s26 + $0xb4] sm:$0xf0]  ;;  %v1031_v48 = vor.u32 %v1193_v44, %v1028_v45  ;;  %v1002_v50 = vld [vmem:[%s1462_s26 + $0x20] sm:$0xf]  ;;  %v1191_v52 = vld [vmem:[%s1462_s26 + $0x44] sm:$0xf] }
  0x33   : > { %718 = vmatpush.bf16.msra.mxu1 %v1091_v28  ;;  %v1020_v53 = vld [vmem:[%s1462_s26 + $0x48] sm:$0xf0]  ;;  %v1075_v54 = vor.u32 %v1206_v47, %v1074_v46  ;;  %v1188_v55 = vld [vmem:[%s1462_s26 + $0x24] sm:$0xf0]  ;;  %v1138_v56 = vld [vmem:[%s1462_s26 + $0x130] sm:$0xf] }
  0x34   : > { %743 = vmatpush.bf16.msra.mxu3 %v1039_v36  ;;  %v1222_v57 = vld [vmem:[%s1462_s26 + $0x134] sm:$0xf0]  ;;  %v1066_v58 = vld [vmem:[%s1462_s26 + $0xa0] sm:$0xf]  ;;  %v1204_v59 = vld [vmem:[%s1462_s26 + $0xa4] sm:$0xf0]  ;;  %v1023_v60 = vor.u32 %v1191_v52, %v1020_v53  ;;  %v1003_v61 = vor.u32 %v1188_v55, %v1002_v50 }
  0x35   : > { %v994_v62 = vld [vmem:[%s1462_s26 + $0x10] sm:$0xf]  ;;  %v1139_v63 = vor.u32 %v1222_v57, %v1138_v56  ;;  %v1189_v0 = vld [vmem:[%s1462_s26 + $0x34] sm:$0xf]  ;;  %v1012_v1 = vld [vmem:[%s1462_s26 + $0x38] sm:$0xf0]  ;;  %v1067_v2 = vor.u32 %v1204_v59, %v1066_v58 }
  0x36   : > { %706 = vmatpush.bf16.msra.mxu0 %v1019_v37  ;;  %731 = vmatpush.bf16.msra.mxu2 %v1155_v40  ;;  %v1186_v3 = vld [vmem:[%s1462_s26 + $0x14] sm:$0xf0]  ;;  %v1130_v4 = vld [vmem:[%s1462_s26 + $0x120] sm:$0xf]  ;;  %v1220_v5 = vld [vmem:[%s1462_s26 + $0x124] sm:$0xf0]  ;;  %v1015_v10 = vor.u32 %v1189_v0, %v1012_v1 }
  0x37   : > { %719 = vmatpush.bf16.msra.mxu1 %v1083_v42  ;;  %v1058_v6 = vld [vmem:[%s1462_s26 + $0x90] sm:$0xf]  ;;  %v1202_v7 = vld [vmem:[%s1462_s26 + $0x94] sm:$0xf0]  ;;  %v986_v8 = vld [vmem:[%s1462_s26] sm:$0xf]  ;;  %v995_v11 = vor.u32 %v1186_v3, %v994_v62  ;;  %v1131_v12 = vor.u32 %v1220_v5, %v1130_v4 }
  0x38   : > { %744 = vmatpush.bf16.msra.mxu3 %v1031_v48  ;;  %v1184_v9 = vld [vmem:[%s1462_s26 + $0x4] sm:$0xf0]  ;;  %v1187_v13 = vld [vmem:[%s1462_s26 + $0x24] sm:$0xf]  ;;  %v1004_v14 = vld [vmem:[%s1462_s26 + $0x28] sm:$0xf0]  ;;  %v1059_v16 = vor.u32 %v1202_v7, %v1058_v6 }
  0x39   : > { %v402_v15 = vld [vmem:[%s1472_s8] sm:$0xff]  ;;  %v1050_v17 = vld [vmem:[%s1462_s26 + $0x80] sm:$0xf]  ;;  %v1218_v19 = vld [vmem:[%s1462_s26 + $0x114] sm:$0xf0]  ;;  %v1007_v25 = vor.u32 %v1187_v13, %v1004_v14  ;;  %v987_v27 = vor.u32 %v1184_v9, %v986_v8  ;;  %p1176_p1 = scmp.ne.s32.totalorder %s1364_s21, 5 }
  0x3a   : > { %707 = vmatpush.bf16.msra.mxu0 %v1011_v49  ;;  %732 = vmatpush.bf16.msra.mxu2 %v1147_v51  ;;  %v1122_v18 = vld [vmem:[%s1462_s26 + $0x110] sm:$0xf]  ;;  %v1200_v20 = vld [vmem:[%s1462_s26 + $0x84] sm:$0xf0]  ;;  %v1213_v21 = vld [vmem:[%s1462_s26 + $0xf4] sm:$0xf]  ;;  %v454_v26 = vunpack.c.l.b16 %v402_v15  ;;  %v455_v29 = vunpack.c.h.b16 %v402_v15 }
  0x3b   : > { %720 = vmatpush.bf16.msra.mxu1 %v1075_v54  ;;  %v1108_v22 = vld [vmem:[%s1462_s26 + $0xf8] sm:$0xf0]  ;;  %v1229_v23 = vld [vmem:[%s1462_s26 + $0x174] sm:$0xf]  ;;  %v1123_v28 = vor.u32 %v1218_v19, %v1122_v18  ;;  %v403_v32 = vld [vmem:[%s1472_s8 + $0x8] sm:$0xf]  ;;  %v1051_v33 = vor.u32 %v1200_v20, %v1050_v17 }
  0x3c   : > { %745 = vmatpush.bf16.msra.mxu3 %v1023_v60  ;;  %v1172_v24 = vld [vmem:[%s1462_s26 + $0x178] sm:$0xf0]  ;;  %v1185_v30 = vld [vmem:[%s1462_s26 + $0x14] sm:$0xf]  ;;  %v1111_v34 = vor.u32 %v1213_v21, %v1108_v22  ;;  %v1114_v35 = vld [vmem:[%s1462_s26 + $0x100] sm:$0xf]  ;;  %v457_v42 = vpack.c.b16 %v454_v26, %v454_v26  ;;  %v456_v44 = vunpack.c.l.b16 %v403_v32  ;;  %v1547_v45 = vpack.c.b16 %v455_v29, %v455_v29 }
  0x3d   : > { %v996_v31 = vld [vmem:[%s1462_s26 + $0x18] sm:$0xf0]  ;;  %v1216_v36 = vld [vmem:[%s1462_s26 + $0x104] sm:$0xf0]  ;;  %v1175_v37 = vor.u32 %v1229_v23, %v1172_v24  ;;  %v1211_v38 = vld [vmem:[%s1462_s26 + $0xe4] sm:$0xf] }
  0x3e   : > { %708 = vmatpush.bf16.msra.mxu0 %v1003_v61  ;;  %733 = vmatpush.bf16.msra.mxu2 %v1139_v63  ;;  %v1100_v39 = vld [vmem:[%s1462_s26 + $0xe8] sm:$0xf0]  ;;  %v1227_v40 = vld [vmem:[%s1462_s26 + $0x164] sm:$0xf]  ;;  %v999_v43 = vor.u32 %v1185_v30, %v996_v31  ;;  %v1115_v46 = vor.u32 %v1216_v36, %v1114_v35  ;;  %v1209_v51 = vld [vmem:[%s1462_s26 + $0xd4] sm:$0xf]  ;;  %v459_v55 = vpack.c.b16 %v456_v44, %v456_v44 }
  0x3f   : > { %721 = vmatpush.bf16.msra.mxu1 %v1067_v2  ;;  %v1164_v41 = vld [vmem:[%s1462_s26 + $0x168] sm:$0xf0]  ;;  %v1183_v47 = vld [vmem:[%s1462_s26 + $0x4] sm:$0xf]  ;;  %v1103_v49 = vor.u32 %v1211_v38, %v1100_v39  ;;  %v1092_v52 = vld [vmem:[%s1462_s26 + $0xd8] sm:$0xf0] }
  0x40   : > { %746 = vmatpush.bf16.msra.mxu3 %v1015_v10  ;;  %v988_v48 = vld [vmem:[%s1462_s26 + $0x8] sm:$0xf0]  ;;  %v1167_v50 = vor.u32 %v1227_v40, %v1164_v41  ;;  %v1225_v53 = vld [vmem:[%s1462_s26 + $0x154] sm:$0xf]  ;;  %v1156_v54 = vld [vmem:[%s1462_s26 + $0x158] sm:$0xf0]  ;;  %v1095_v57 = vor.u32 %v1209_v51, %v1092_v52 }
  0x41   : > { %v991_v56 = vor.u32 %v1183_v47, %v988_v48  ;;  %v1159_v58 = vor.u32 %v1225_v53, %v1156_v54  ;;  %v1207_v59 = vld [vmem:[%s1462_s26 + $0xc4] sm:$0xf]  ;;  %v1084_v60 = vld [vmem:[%s1462_s26 + $0xc8] sm:$0xf0]  ;;  %v1205_v1 = vld [vmem:[%s1462_s26 + $0xb4] sm:$0xf] }
  0x42   : > { %709 = vmatpush.bf16.msra.mxu0 %v995_v11  ;;  %734 = vmatpush.bf16.msra.mxu2 %v1131_v12  ;;  %v1223_v61 = vld [vmem:[%s1462_s26 + $0x144] sm:$0xf]  ;;  %v1148_v62 = vld [vmem:[%s1462_s26 + $0x148] sm:$0xf0]  ;;  %v1087_v63 = vor.u32 %v1207_v59, %v1084_v60  ;;  %v1076_v2 = vld [vmem:[%s1462_s26 + $0xb8] sm:$0xf0] }
  0x43   : > { %722 = vmatpush.bf16.msra.mxu1 %v1059_v16  ;;  %v1151_v0 = vor.u32 %v1223_v61, %v1148_v62  ;;  %v1221_v3 = vld [vmem:[%s1462_s26 + $0x134] sm:$0xf]  ;;  %v1140_v4 = vld [vmem:[%s1462_s26 + $0x138] sm:$0xf0]  ;;  %v1079_v5 = vor.u32 %v1205_v1, %v1076_v2  ;;  %v1203_v7 = vld [vmem:[%s1462_s26 + $0xa4] sm:$0xf] }
  0x44   : > { %747 = vmatpush.bf16.msra.mxu3 %v1007_v25  ;;  %v1143_v6 = vor.u32 %v1221_v3, %v1140_v4  ;;  %v1068_v8 = vld [vmem:[%s1462_s26 + $0xa8] sm:$0xf0]  ;;  %v1219_v9 = vld [vmem:[%s1462_s26 + $0x124] sm:$0xf]  ;;  %v1201_v13 = vld [vmem:[%s1462_s26 + $0x94] sm:$0xf] }
  0x45   : > { %v1132_v10 = vld [vmem:[%s1462_s26 + $0x128] sm:$0xf0]  ;;  %v1071_v11 = vor.u32 %v1203_v7, %v1068_v8  ;;  %v1060_v14 = vld [vmem:[%s1462_s26 + $0x98] sm:$0xf0]  ;;  %v1217_v15 = vld [vmem:[%s1462_s26 + $0x114] sm:$0xf] }
  0x46   : > { %710 = vmatpush.bf16.msra.mxu0 %v987_v27  ;;  %735 = vmatpush.bf16.msra.mxu2 %v1123_v28  ;;  %v1135_v12 = vor.u32 %v1219_v9, %v1132_v10  ;;  %v1124_v16 = vld [vmem:[%s1462_s26 + $0x118] sm:$0xf0]  ;;  %v1063_v17 = vor.u32 %v1201_v13, %v1060_v14  ;;  %v1199_v19 = vld [vmem:[%s1462_s26 + $0x84] sm:$0xf]  ;;  %v1052_v20 = vld [vmem:[%s1462_s26 + $0x88] sm:$0xf0] }
  0x47   : > { %723 = vmatpush.bf16.msra.mxu1 %v1051_v33  ;;  %v1127_v18 = vor.u32 %v1217_v15, %v1124_v16  ;;  %v1215_v21 = vld [vmem:[%s1462_s26 + $0x104] sm:$0xf]  ;;  %v1116_v22 = vld [vmem:[%s1462_s26 + $0x108] sm:$0xf0]  ;;  %v1055_v23 = vor.u32 %v1199_v19, %v1052_v20  ;;  %v400_v30 = vld [vmem:[#allocation2] sm:$0xff] }
  0x48   : > { %748 = vmatpush.bf16.msra.mxu3 %v999_v43  ;;  %v1119_v24 = vor.u32 %v1215_v21, %v1116_v22  ;;  %v401_v40 = vld [vmem:[#allocation2 + $0x8] sm:$0xff] }
  0x49   : > { %711 = vmatmul.bf16.vlgmr.msra.gmra.mxu0 %v457_v42 }
  0x4a   : > { %755 = vmatpush.bf16.msrb.mxu0 %v1111_v34  ;;  %724 = vmatmul.bf16.vlgmr.msra.gmra.mxu1 %v1547_v45 }
  0x4b   : > { %768 = vmatpush.bf16.msrb.mxu1 %v1175_v37  ;;  %736 = vmatpush.bf16.msra.mxu2 %v1115_v46 }
  0x4c   : > { %749 = vmatpush.bf16.msra.mxu3 %v991_v56 }
  0x4e   : > { %756 = vmatpush.bf16.msrb.mxu0 %v1103_v49  ;;  %737 = vmatmul.bf16.vlgmr.msra.gmra.mxu2 %v459_v55 }
  0x4f   : > { %769 = vmatpush.bf16.msrb.mxu1 %v1167_v50  ;;  %750 = vmatmul.bf16.vlgmr.msra.gmra.mxu3 %v457_v42 }
  0x52   : > { %757 = vmatpush.bf16.msrb.mxu0 %v1095_v57 }
  0x53   : > { %770 = vmatpush.bf16.msrb.mxu1 %v1159_v58 }
  0x56   : > { %758 = vmatpush.bf16.msrb.mxu0 %v1087_v63 }
  0x57   : > { %771 = vmatpush.bf16.msrb.mxu1 %v1151_v0 }
  0x5a   : > { %759 = vmatpush.bf16.msrb.mxu0 %v1079_v5 }
  0x5b   : > { %772 = vmatpush.bf16.msrb.mxu1 %v1143_v6 }
  0x5e   : > { %760 = vmatpush.bf16.msrb.mxu0 %v1071_v11 }
  0x5f   : > { %773 = vmatpush.bf16.msrb.mxu1 %v1135_v12 }
  0x62   : > { %761 = vmatpush.bf16.msrb.mxu0 %v1063_v17 }
  0x63   : > { %774 = vmatpush.bf16.msrb.mxu1 %v1127_v18 }
  0x66   : > { %762 = vmatpush.bf16.msrb.mxu0 %v1055_v23 }
  0x67   : > { %775 = vmatpush.bf16.msrb.mxu1 %v1119_v24 }
  0x69   : > { %763 = vmatmul.bf16.vlgmr.msrb.gmra.mxu0 %v1547_v45 }
  0x6a   : > { %776 = vmatmul.bf16.vlgmr.msrb.gmra.mxu1 %v459_v55 }
  0xc6   : > { %v712_v25 = vpop.f32.mrf.mxu0 }
  0xc7   : > { %v725_v26 = vpop.f32.mrf.mxu1 }
  0xc8   : > { %v726_v27 = vadd.f32 %v725_v26, %v712_v25 }
  0xce   : > { %v714_v28 = vpop.f32.mrf.mxu0 }
  0xcf   : > { %v727_v29 = vpop.f32.mrf.mxu1 }
  0xd1   : > { %v738_v31 = vpop.f32.mrf.mxu2 }
  0xd2   : > { %v739_v32 = vadd.f32 %v738_v31, %v726_v27  ;;  %v751_v34 = vpop.f32.mrf.mxu3 }
  0xd4   : > { %v781_v33 = vadd.f32 %v739_v32, %v400_v30 }
  0xd6   : > { %783 = vst [vmem:[#allocation2] sm:$0xff] %v781_v33 }
  0xd9   : > { %v740_v35 = vpop.f32.mrf.mxu2 }
  0xda   : > { %v753_v36 = vpop.f32.mrf.mxu3 }
  0xe6   : > { %v764_v37 = vpop.f32.mrf.mxu0 }
  0xe7   : > { %v765_v38 = vadd.f32 %v764_v37, %v751_v34  ;;  %v777_v39 = vpop.f32.mrf.mxu1 }
  0xe9   : > { %v778_v41 = vadd.f32 %v777_v39, %v765_v38 }
  0xeb   : > { %v782_v42 = vadd.f32 %v778_v41, %v401_v40  ;;  %788 = sbr.rel (%p1176_p1) target bundleno = 254 (0xfe), region = 52 }
  0xed   : > { %784 = vst [vmem:[#allocation2 + $0x8] sm:$0xff] %v782_v42 }
  0xee   : > { %v766_v43 = vpop.f32.mrf.mxu0 }
  0xef   : > { %v779_v44 = vpop.f32.mrf.mxu1 }
  0xf0   : > { %v789_v45 = vld [vmem:[#allocation2] sm:$0xff]  ;;  %v808_v56 = vld [vmem:[%s1618_s4 + $0x8] sm:$0xff] }
  0xf1   : > { %v791_v46 = vld [vmem:[%s1616_s2] sm:$0x3] }
  0xf2   : > { %v799_v47 = vld [vmem:[%s1617_s3] sm:$0x3]  ;;  %v793_v48 = vperm.slane %v791_v46, 0  ;;  %v794_v51 = vperm.slane %v791_v46, 1 }
  0xf3   : > { %v801_v49 = vperm.slane %v799_v47, 0  ;;  %v802_v52 = vperm.slane %v799_v47, 1  ;;  %v807_v55 = vld [vmem:[%s1618_s4] sm:$0xff] }
  0xf4   : > { %v790_v50 = vld [vmem:[#allocation2 + $0x8] sm:$0xff]  ;;  %v797_v53 = vmul.f32 %v793_v48, %v789_v45 }
  0xf5   : > { %v798_v54 = vmul.f32 %v794_v51, %v790_v50 }
  0xf6   : > { %v805_v57 = vadd.f32 %v801_v49, %v797_v53 }
  0xf7   : > { %v806_v58 = vadd.f32 %v802_v52, %v798_v54 }
  0xf8   : > { %v809_v59 = vadd.f32 %v807_v55, %v805_v57 }
  0xf9   : > { %v810_v60 = vadd.f32 %v808_v56, %v806_v58 }
  0xfa   : > { %v811_v61 = vmax.f32 %v809_v59, 0.0 }
  0xfb   : > { %v812_v62 = vmax.f32 %v810_v60, 0.0 }
  0xfc   : > { %813 = vst [vmem:[%s1619_s5] sm:$0xff] %v811_v61 }
  0xfd   : > { %814 = vst [vmem:[%s1619_s5 + $0x8] sm:$0xff] %v812_v62 }
  0xfe PF: > { %s18_s23 = sadd.s32 1, %s1372_s23   ;;  %s1621_s18 = smov %s1356_s19 }
  0xff   : > { %p15_p2 = scmp.ge.s32.totalorder %s18_s23, 8   ;;  %s1622_s19 = smov %s1360_s20 }
 0x100   : > { %s1623_s20 = smov %s1452_s29  ;;  %s1624_s21 = smov %s1368_s22 }
 0x101   : > { %s1625_s22 = smov %s1627_s25  ;;  %17 = sbr.rel (!%p15_p2) target bundleno = 4 (0x4), region = 100 }
 0x106   :  { %845 = vsyncpa [#allocation4], 1 }
 0x107   :  { %847 = vsyncpa [#allocation4 + $0x1], 1 }

// kernel: _lambda_.37
= control target key start
LH: loop header
LB: loop body
LE: loop exit
PB: predicated region body
PF: predicated region fallthrough
CT: control target
= control target key end

     0   :  { %9 = vsyncpa [#allocation4], 0  ;;  %s1594_s0 = inlined_call_operand.vmem [shape: bf16[8,2304], index: 0, kind: input, shape index: {}]   ;;  %s1595_s1 = inlined_call_operand.hbm [shape: bf16[2304,512], index: 1, kind: input, shape index: {}]   ;;  %s1596_s2 = inlined_call_operand.vmem [shape: f32[1,512], index: 2, kind: input, shape index: {}]   ;;  %s1597_s3 = inlined_call_operand.vmem [shape: f32[1,512], index: 3, kind: input, shape index: {}]   ;;  %s1598_s4 = inlined_call_operand.vmem [shape: f32[8,512], index: 4, kind: output, shape index: {}]  }
   0x1   :  { %11 = vsyncpa [#allocation4 + $0x1], 0  ;;  %s1347_s15 = smov 0   ;;  %s1349_s16 = smov 0  }
   0x2   :  { %s1351_s17 = smov 0   ;;  %s1353_s18 = smov 0  }
   0x3   :  { %s1355_s19 = smov 0   ;;  %s1357_s20 = smov 0  }
   0x4   :  { %s1359_s21 = smov 0   ;;  %s1361_s22 = smov 0  }
   0x5 LB: > { %s885_s23 = sadd.s32 4294967295, %s1316_s22   ;;  %s29_s24 = sadd.s32 1, %s1308_s20  ;;  %s1316_s22 = sphi %s1361_s22, %s17_s22   ;;  %s1312_s21 = sphi %s1359_s21, %s1613_s21   ;;  %s1308_s20 = sphi %s1357_s20, %s1612_s20   ;;  %s1304_s19 = sphi %s1355_s19, %s1611_s19   ;;  %s1300_s18 = sphi %s1353_s18, %s1610_s18   ;;  %s1296_s17 = sphi %s1351_s17, %s1609_s17   ;;  %s1292_s16 = sphi %s1349_s16, %s1608_s16   ;;  %s1288_s15 = sphi %s1347_s15, %s1607_s15  }
   0x6   : > { %p30_p0 = scmp.ge.s32.totalorder %s29_s24, 6  ;;  %s32_s25 = sadd.s32 1, %s1312_s21 }
   0x7   : > { %s73_s26 = sadd.s32 1, %s1296_s17  ;;  %p80_p1 = scmp.ne.s32.totalorder %s1296_s17, %s1292_s16 }
   0x8   : > { %s1615_s24 = smov (%p30_p0, %s29_s24), 0  ;;  %s1617_s25 = smov (!%p30_p0, %s32_s25), %s1312_s21 }
   0x9   : > { %1601 = sst [smem:[#allocation6_spill]] %s1615_s24  ;;  %s68_s27 = ssub.s32 %s1308_s20, %s1615_s24 }
   0xa   : > { %p81_p2 = scmp.eq.s32.totalorder %s1316_s22, 0  ;;  %p34_p3 = scmp.ge.s32.totalorder %s1617_s25, 2 }
   0xb   : > { %p86_p4 = scmp.ne.s32.totalorder %s1292_s16, %s1288_s15  ;;  %p87_p6 = scmp.eq.s32.totalorder %s885_s23, 0 }
   0xc   : > { %p1398_p5 = por %p81_p2, %p80_p1  ;;  %s1619_s25 = smov (%p34_p3, %s1617_s25), 0 }
   0xd   : > { %1603 = sst [smem:[#allocation7_spill]] %s1619_s25  ;;  %p1404_p7 = por %p87_p6, %p86_p4 }
   0xe   : > { %s69_s30 = ssub.s32 %s1312_s21, %s1619_s25  ;;  %p1151_p8 = scmp.lt.s32.totalorder %s1316_s22, 12 }
   0xf   : > { %s70_s5 = sor.u32 %s69_s30, %s68_s27  ;;  %s203_s6 = sand.u32 1, %s1296_s17  }
  0x10   : > { %p71_p9 = scmp.eq.s32.totalorder %s70_s5, 0  ;;  %s1143_s7 = smul.u32 384, %s203_s6 }
  0x11   : > { %s889_s8 = sshll.u32 %s1312_s21, 1  ;;  %s1094_s10 = smul.u32 192, %s1308_s20 }
  0x12   : > { %s1414_s9 = scalar_select %p71_p9, %s1296_s17, %s73_s26  }
  0x13   : > { %s207_s11 = scalar_lea.vmem [#allocation3], %s1143_s7  ;;  %p1148_p10 = pnand %p1151_p8, %p1398_p5 }
  0x14   : > { %s218_s12 = sshll.u32 %s207_s11, 4  ;;  %s213_s13 = sadd.s32 %s1094_s10, %s889_s8  ;;  %s219_s12 = int_to_ptr.vmem [resolvable:$true] %s218_s12 }
  0x15   : > { %s891_s14 = sshll.u32 %s213_s13, 2  ;;  %s204_s5 = scalar_lea.sflag [#allocation4], %s203_s6 }
  0x16   : > { %s215_s27 = scalar_lea.hbm %s1595_s1, %s891_s14  ;;  %s1318_s25 = smov 256  }
  0x17   : > { %s216_s30 = sshll.u32 %s215_s27, 4  ;;  %s1319_s26 = smov 128   ;;  %s217_s30 = int_to_ptr.hbm [resolvable:$true] %s216_s30 }
  0x18   : > { %s1320_s24 = smov 8   ;;  %p892_p11 = scmp.ge.s32.totalorder %s1316_s22, 1 }
  0x19   : > { %1150 = dma.hbm_to_vmem [thread:$0]  (!%p1148_p10), %s217_s30, 6144, %s219_s12, %s204_s5, %s1318_s25, %s1319_s26, %s1320_s24  }
  0x1a   : > { %p242_p12 = scmp.lt.s32.totalorder %s1316_s22, 13 }
  0x1c   : > { %p243_p13 = pnand %p892_p11, %p242_p12 }
  0x1d   : > { %s248_s28 = sand.u32 (!%p243_p13), 1, %s1292_s16  }
  0x1e   : > { %246 = sbr.rel (%p243_p13) target bundleno = 260 (0x104), region = 36  ;;  %s249_s8 = scalar_lea.sflag (!%p243_p13), [#allocation4], %s248_s28 }
  0x1f   : > { %s1144_s7 = smul.u32 (!%p243_p13), 384, %s248_s28 }
  0x21   : > { %s1425_s10 = scalar_lea.vmem (!%p243_p13), [#allocation3], %s1144_s7 }
  0x23   : > { %1283 = dma.done.wait (%p1404_p7), %s249_s8, 6144  }
  0x24   : > { %1285 = vsyncadd (%p1404_p7), %s249_s8, 4294961152  ;;  %s299_s6 = smul.u32 3, %s1300_s18  ;;  %s894_s24 = sshll.u32 %s1304_s19, 1 }
  0x25   : > { %p312_p0 = scmp.lt.s32.totalorder %s894_s24, 3  ;;  %p898_p2 = scmp.ne.s32.totalorder %s1300_s18, 0 }
  0x26   : > { %p302_p1 = scmp.lt.s32.totalorder %s299_s6, 17 }
  0x27   : > { %s1621_s24 = smov (!%p312_p0, %s894_s24), 3  ;;  %334 = sbr.rel (%p898_p2) target bundleno = 47 (0x2f), region = 44 }
  0x28   : > { %s1623_s6 = smov (!%p302_p1, %s299_s6), 17  ;;  %s314_s12 = scalar_lea.vmem %s1596_s2, %s1621_s24 }
  0x29   : > { %s319_s29 = scalar_lea.vmem %s1597_s3, %s1621_s24  ;;  %s893_s15 = sshll.u32 %s1623_s6, 2 }
  0x2a   : > { %s897_s23 = sshll.u32 %s1621_s24, 3  ;;  %s1447_s30 = scalar_lea.vmem %s1594_s0, %s893_s15 }
  0x2b   : > { %s1452_s28 = scalar_lea.vmem %s1598_s4, %s897_s23 }
  0x2c   : > { %v1321_v0 = vmov 0.0  }
  0x2d   : > { %335 = vst [vmem:[#allocation2] sm:$0xff] %v1321_v0 }
  0x2e   : > { %336 = vst [vmem:[#allocation2 + $0x8] sm:$0xff] %v1321_v0 }
  0x2f PF: > { %v957_v1 = vld [vmem:[%s1425_s10 + $0x70] sm:$0xf]  ;;  %v1110_v2 = vld [vmem:[%s1425_s10 + $0x74] sm:$0xf0]  ;;  %v949_v6 = vld [vmem:[%s1425_s10 + $0x60] sm:$0xf] }
  0x30   : > { %v1021_v3 = vld [vmem:[%s1425_s10 + $0xf0] sm:$0xf]  ;;  %v958_v4 = vor.u32 %v1110_v2, %v957_v1  ;;  %v1126_v5 = vld [vmem:[%s1425_s10 + $0xf4] sm:$0xf0]  ;;  %v1108_v7 = vld [vmem:[%s1425_s10 + $0x64] sm:$0xf0] }
  0x31   : > { %v1022_v8 = vor.u32 %v1126_v5, %v1021_v3  ;;  %v1013_v9 = vld [vmem:[%s1425_s10 + $0xe0] sm:$0xf]  ;;  %v1124_v10 = vld [vmem:[%s1425_s10 + $0xe4] sm:$0xf0]  ;;  %v950_v11 = vor.u32 %v1108_v7, %v949_v6  ;;  %v941_v12 = vld [vmem:[%s1425_s10 + $0x50] sm:$0xf] }
  0x32   : > { %640 = vmatpush.bf16.msra.mxu0 %v958_v4  ;;  %v1014_v13 = vor.u32 %v1124_v10, %v1013_v9  ;;  %v1106_v14 = vld [vmem:[%s1425_s10 + $0x54] sm:$0xf0]  ;;  %v1085_v15 = vld [vmem:[%s1425_s10 + $0x170] sm:$0xf]  ;;  %v1077_v20 = vld [vmem:[%s1425_s10 + $0x160] sm:$0xf] }
  0x33   : > { %653 = vmatpush.bf16.msra.mxu1 %v1022_v8  ;;  %v1142_v16 = vld [vmem:[%s1425_s10 + $0x174] sm:$0xf0]  ;;  %v1005_v17 = vld [vmem:[%s1425_s10 + $0xd0] sm:$0xf]  ;;  %v1140_v21 = vld [vmem:[%s1425_s10 + $0x164] sm:$0xf0]  ;;  %v942_v23 = vor.u32 %v1106_v14, %v941_v12 }
  0x34   : > { %v1122_v18 = vld [vmem:[%s1425_s10 + $0xd4] sm:$0xf0]  ;;  %v1086_v19 = vor.u32 %v1142_v16, %v1085_v15  ;;  %v1109_v22 = vld [vmem:[%s1425_s10 + $0x74] sm:$0xf]  ;;  %v933_v24 = vld [vmem:[%s1425_s10 + $0x40] sm:$0xf]  ;;  %v1078_v26 = vor.u32 %v1140_v21, %v1077_v20 }
  0x35   : > { %v1104_v25 = vld [vmem:[%s1425_s10 + $0x44] sm:$0xf0]  ;;  %v959_v27 = vld [vmem:[%s1425_s10 + $0x78] sm:$0xf0]  ;;  %v1006_v28 = vor.u32 %v1122_v18, %v1005_v17  ;;  %v997_v29 = vld [vmem:[%s1425_s10 + $0xc0] sm:$0xf] }
  0x36   : > { %641 = vmatpush.bf16.msra.mxu0 %v950_v11  ;;  %666 = vmatpush.bf16.msra.mxu2 %v1086_v19  ;;  %v1120_v30 = vld [vmem:[%s1425_s10 + $0xc4] sm:$0xf0]  ;;  %v962_v31 = vor.u32 %v1109_v22, %v959_v27  ;;  %v1069_v32 = vld [vmem:[%s1425_s10 + $0x150] sm:$0xf]  ;;  %v1138_v33 = vld [vmem:[%s1425_s10 + $0x154] sm:$0xf0]  ;;  %v934_v37 = vor.u32 %v1104_v25, %v933_v24 }
  0x37   : > { %654 = vmatpush.bf16.msra.mxu1 %v1014_v13  ;;  %v1107_v34 = vld [vmem:[%s1425_s10 + $0x64] sm:$0xf]  ;;  %v951_v35 = vld [vmem:[%s1425_s10 + $0x68] sm:$0xf0]  ;;  %v925_v38 = vld [vmem:[%s1425_s10 + $0x30] sm:$0xf]  ;;  %v1070_v40 = vor.u32 %v1138_v33, %v1069_v32  ;;  %v998_v42 = vor.u32 %v1120_v30, %v997_v29 }
  0x38   : > { %679 = vmatpush.bf16.msra.mxu3 %v962_v31  ;;  %v954_v36 = vor.u32 %v1107_v34, %v951_v35  ;;  %v1102_v39 = vld [vmem:[%s1425_s10 + $0x34] sm:$0xf0]  ;;  %v1061_v41 = vld [vmem:[%s1425_s10 + $0x140] sm:$0xf]  ;;  %v1136_v43 = vld [vmem:[%s1425_s10 + $0x144] sm:$0xf0] }
  0x39   : > { %v1105_v44 = vld [vmem:[%s1425_s10 + $0x54] sm:$0xf]  ;;  %v943_v45 = vld [vmem:[%s1425_s10 + $0x58] sm:$0xf0]  ;;  %v989_v46 = vld [vmem:[%s1425_s10 + $0xb0] sm:$0xf]  ;;  %v926_v49 = vor.u32 %v1102_v39, %v925_v38  ;;  %v1062_v51 = vor.u32 %v1136_v43, %v1061_v41 }
  0x3a   : > { %642 = vmatpush.bf16.msra.mxu0 %v942_v23  ;;  %667 = vmatpush.bf16.msra.mxu2 %v1078_v26  ;;  %v1118_v47 = vld [vmem:[%s1425_s10 + $0xb4] sm:$0xf0]  ;;  %v946_v48 = vor.u32 %v1105_v44, %v943_v45  ;;  %v917_v50 = vld [vmem:[%s1425_s10 + $0x20] sm:$0xf]  ;;  %v1103_v52 = vld [vmem:[%s1425_s10 + $0x44] sm:$0xf] }
  0x3b   : > { %655 = vmatpush.bf16.msra.mxu1 %v1006_v28  ;;  %v935_v53 = vld [vmem:[%s1425_s10 + $0x48] sm:$0xf0]  ;;  %v990_v54 = vor.u32 %v1118_v47, %v989_v46  ;;  %v1100_v55 = vld [vmem:[%s1425_s10 + $0x24] sm:$0xf0]  ;;  %v1053_v56 = vld [vmem:[%s1425_s10 + $0x130] sm:$0xf] }
  0x3c   : > { %680 = vmatpush.bf16.msra.mxu3 %v954_v36  ;;  %v1134_v57 = vld [vmem:[%s1425_s10 + $0x134] sm:$0xf0]  ;;  %v981_v58 = vld [vmem:[%s1425_s10 + $0xa0] sm:$0xf]  ;;  %v1116_v59 = vld [vmem:[%s1425_s10 + $0xa4] sm:$0xf0]  ;;  %v938_v60 = vor.u32 %v1103_v52, %v935_v53  ;;  %v918_v61 = vor.u32 %v1100_v55, %v917_v50 }
  0x3d   : > { %v909_v62 = vld [vmem:[%s1425_s10 + $0x10] sm:$0xf]  ;;  %v1054_v63 = vor.u32 %v1134_v57, %v1053_v56  ;;  %v1101_v0 = vld [vmem:[%s1425_s10 + $0x34] sm:$0xf]  ;;  %v927_v1 = vld [vmem:[%s1425_s10 + $0x38] sm:$0xf0]  ;;  %v982_v2 = vor.u32 %v1116_v59, %v981_v58 }
  0x3e   : > { %643 = vmatpush.bf16.msra.mxu0 %v934_v37  ;;  %668 = vmatpush.bf16.msra.mxu2 %v1070_v40  ;;  %v1098_v3 = vld [vmem:[%s1425_s10 + $0x14] sm:$0xf0]  ;;  %v1045_v4 = vld [vmem:[%s1425_s10 + $0x120] sm:$0xf]  ;;  %v1132_v5 = vld [vmem:[%s1425_s10 + $0x124] sm:$0xf0]  ;;  %v930_v10 = vor.u32 %v1101_v0, %v927_v1 }
  0x3f   : > { %656 = vmatpush.bf16.msra.mxu1 %v998_v42  ;;  %v973_v6 = vld [vmem:[%s1425_s10 + $0x90] sm:$0xf]  ;;  %v1114_v7 = vld [vmem:[%s1425_s10 + $0x94] sm:$0xf0]  ;;  %v901_v8 = vld [vmem:[%s1425_s10] sm:$0xf]  ;;  %v910_v11 = vor.u32 %v1098_v3, %v909_v62  ;;  %v1046_v12 = vor.u32 %v1132_v5, %v1045_v4 }
  0x40   : > { %681 = vmatpush.bf16.msra.mxu3 %v946_v48  ;;  %v1096_v9 = vld [vmem:[%s1425_s10 + $0x4] sm:$0xf0]  ;;  %v1099_v13 = vld [vmem:[%s1425_s10 + $0x24] sm:$0xf]  ;;  %v919_v14 = vld [vmem:[%s1425_s10 + $0x28] sm:$0xf0]  ;;  %v974_v16 = vor.u32 %v1114_v7, %v973_v6 }
  0x41   : > { %v339_v15 = vld [vmem:[%s1447_s30] sm:$0xff]  ;;  %v965_v17 = vld [vmem:[%s1425_s10 + $0x80] sm:$0xf]  ;;  %v1130_v19 = vld [vmem:[%s1425_s10 + $0x114] sm:$0xf0]  ;;  %v922_v25 = vor.u32 %v1099_v13, %v919_v14  ;;  %v902_v27 = vor.u32 %v1096_v9, %v901_v8  ;;  %p1091_p3 = scmp.ne.s32.totalorder %s1300_s18, 5 }
  0x42   : > { %644 = vmatpush.bf16.msra.mxu0 %v926_v49  ;;  %669 = vmatpush.bf16.msra.mxu2 %v1062_v51  ;;  %v1037_v18 = vld [vmem:[%s1425_s10 + $0x110] sm:$0xf]  ;;  %v1112_v20 = vld [vmem:[%s1425_s10 + $0x84] sm:$0xf0]  ;;  %v1125_v21 = vld [vmem:[%s1425_s10 + $0xf4] sm:$0xf]  ;;  %v391_v26 = vunpack.c.l.b16 %v339_v15  ;;  %v392_v29 = vunpack.c.h.b16 %v339_v15 }
  0x43   : > { %657 = vmatpush.bf16.msra.mxu1 %v990_v54  ;;  %v1023_v22 = vld [vmem:[%s1425_s10 + $0xf8] sm:$0xf0]  ;;  %v1141_v23 = vld [vmem:[%s1425_s10 + $0x174] sm:$0xf]  ;;  %v1038_v28 = vor.u32 %v1130_v19, %v1037_v18  ;;  %v340_v32 = vld [vmem:[%s1447_s30 + $0x8] sm:$0xf]  ;;  %v966_v33 = vor.u32 %v1112_v20, %v965_v17 }
  0x44   : > { %682 = vmatpush.bf16.msra.mxu3 %v938_v60  ;;  %v1087_v24 = vld [vmem:[%s1425_s10 + $0x178] sm:$0xf0]  ;;  %v1097_v30 = vld [vmem:[%s1425_s10 + $0x14] sm:$0xf]  ;;  %v1026_v34 = vor.u32 %v1125_v21, %v1023_v22  ;;  %v1029_v35 = vld [vmem:[%s1425_s10 + $0x100] sm:$0xf]  ;;  %v394_v42 = vpack.c.b16 %v391_v26, %v391_v26  ;;  %v393_v44 = vunpack.c.l.b16 %v340_v32  ;;  %v1527_v45 = vpack.c.b16 %v392_v29, %v392_v29 }
  0x45   : > { %v911_v31 = vld [vmem:[%s1425_s10 + $0x18] sm:$0xf0]  ;;  %v1128_v36 = vld [vmem:[%s1425_s10 + $0x104] sm:$0xf0]  ;;  %v1090_v37 = vor.u32 %v1141_v23, %v1087_v24  ;;  %v1123_v38 = vld [vmem:[%s1425_s10 + $0xe4] sm:$0xf] }
  0x46   : > { %645 = vmatpush.bf16.msra.mxu0 %v918_v61  ;;  %670 = vmatpush.bf16.msra.mxu2 %v1054_v63  ;;  %v1015_v39 = vld [vmem:[%s1425_s10 + $0xe8] sm:$0xf0]  ;;  %v1139_v40 = vld [vmem:[%s1425_s10 + $0x164] sm:$0xf]  ;;  %v914_v43 = vor.u32 %v1097_v30, %v911_v31  ;;  %v1030_v46 = vor.u32 %v1128_v36, %v1029_v35  ;;  %v1121_v51 = vld [vmem:[%s1425_s10 + $0xd4] sm:$0xf]  ;;  %v396_v55 = vpack.c.b16 %v393_v44, %v393_v44 }
  0x47   : > { %658 = vmatpush.bf16.msra.mxu1 %v982_v2  ;;  %v1079_v41 = vld [vmem:[%s1425_s10 + $0x168] sm:$0xf0]  ;;  %v1095_v47 = vld [vmem:[%s1425_s10 + $0x4] sm:$0xf]  ;;  %v1018_v49 = vor.u32 %v1123_v38, %v1015_v39  ;;  %v1007_v52 = vld [vmem:[%s1425_s10 + $0xd8] sm:$0xf0] }
  0x48   : > { %683 = vmatpush.bf16.msra.mxu3 %v930_v10  ;;  %v903_v48 = vld [vmem:[%s1425_s10 + $0x8] sm:$0xf0]  ;;  %v1082_v50 = vor.u32 %v1139_v40, %v1079_v41  ;;  %v1137_v53 = vld [vmem:[%s1425_s10 + $0x154] sm:$0xf]  ;;  %v1071_v54 = vld [vmem:[%s1425_s10 + $0x158] sm:$0xf0]  ;;  %v1010_v57 = vor.u32 %v1121_v51, %v1007_v52 }
  0x49   : > { %v906_v56 = vor.u32 %v1095_v47, %v903_v48  ;;  %v1074_v58 = vor.u32 %v1137_v53, %v1071_v54  ;;  %v1119_v59 = vld [vmem:[%s1425_s10 + $0xc4] sm:$0xf]  ;;  %v999_v60 = vld [vmem:[%s1425_s10 + $0xc8] sm:$0xf0]  ;;  %v1117_v1 = vld [vmem:[%s1425_s10 + $0xb4] sm:$0xf] }
  0x4a   : > { %646 = vmatpush.bf16.msra.mxu0 %v910_v11  ;;  %671 = vmatpush.bf16.msra.mxu2 %v1046_v12  ;;  %v1135_v61 = vld [vmem:[%s1425_s10 + $0x144] sm:$0xf]  ;;  %v1063_v62 = vld [vmem:[%s1425_s10 + $0x148] sm:$0xf0]  ;;  %v1002_v63 = vor.u32 %v1119_v59, %v999_v60  ;;  %v991_v2 = vld [vmem:[%s1425_s10 + $0xb8] sm:$0xf0] }
  0x4b   : > { %659 = vmatpush.bf16.msra.mxu1 %v974_v16  ;;  %v1066_v0 = vor.u32 %v1135_v61, %v1063_v62  ;;  %v1133_v3 = vld [vmem:[%s1425_s10 + $0x134] sm:$0xf]  ;;  %v1055_v4 = vld [vmem:[%s1425_s10 + $0x138] sm:$0xf0]  ;;  %v994_v5 = vor.u32 %v1117_v1, %v991_v2  ;;  %v1115_v7 = vld [vmem:[%s1425_s10 + $0xa4] sm:$0xf] }
  0x4c   : > { %684 = vmatpush.bf16.msra.mxu3 %v922_v25  ;;  %v1058_v6 = vor.u32 %v1133_v3, %v1055_v4  ;;  %v983_v8 = vld [vmem:[%s1425_s10 + $0xa8] sm:$0xf0]  ;;  %v1131_v9 = vld [vmem:[%s1425_s10 + $0x124] sm:$0xf]  ;;  %v1113_v13 = vld [vmem:[%s1425_s10 + $0x94] sm:$0xf] }
  0x4d   : > { %v1047_v10 = vld [vmem:[%s1425_s10 + $0x128] sm:$0xf0]  ;;  %v986_v11 = vor.u32 %v1115_v7, %v983_v8  ;;  %v975_v14 = vld [vmem:[%s1425_s10 + $0x98] sm:$0xf0]  ;;  %v1129_v15 = vld [vmem:[%s1425_s10 + $0x114] sm:$0xf] }
  0x4e   : > { %647 = vmatpush.bf16.msra.mxu0 %v902_v27  ;;  %672 = vmatpush.bf16.msra.mxu2 %v1038_v28  ;;  %v1050_v12 = vor.u32 %v1131_v9, %v1047_v10  ;;  %v1039_v16 = vld [vmem:[%s1425_s10 + $0x118] sm:$0xf0]  ;;  %v978_v17 = vor.u32 %v1113_v13, %v975_v14  ;;  %v1111_v19 = vld [vmem:[%s1425_s10 + $0x84] sm:$0xf]  ;;  %v967_v20 = vld [vmem:[%s1425_s10 + $0x88] sm:$0xf0] }
  0x4f   : > { %660 = vmatpush.bf16.msra.mxu1 %v966_v33  ;;  %v1042_v18 = vor.u32 %v1129_v15, %v1039_v16  ;;  %v1127_v21 = vld [vmem:[%s1425_s10 + $0x104] sm:$0xf]  ;;  %v1031_v22 = vld [vmem:[%s1425_s10 + $0x108] sm:$0xf0]  ;;  %v970_v23 = vor.u32 %v1111_v19, %v967_v20  ;;  %v337_v30 = vld [vmem:[#allocation2] sm:$0xff] }
  0x50   : > { %685 = vmatpush.bf16.msra.mxu3 %v914_v43  ;;  %v1034_v24 = vor.u32 %v1127_v21, %v1031_v22  ;;  %v338_v40 = vld [vmem:[#allocation2 + $0x8] sm:$0xff] }
  0x51   : > { %648 = vmatmul.bf16.vlgmr.msra.gmra.mxu0 %v394_v42 }
  0x52   : > { %692 = vmatpush.bf16.msrb.mxu0 %v1026_v34  ;;  %661 = vmatmul.bf16.vlgmr.msra.gmra.mxu1 %v1527_v45 }
  0x53   : > { %705 = vmatpush.bf16.msrb.mxu1 %v1090_v37  ;;  %673 = vmatpush.bf16.msra.mxu2 %v1030_v46 }
  0x54   : > { %686 = vmatpush.bf16.msra.mxu3 %v906_v56 }
  0x56   : > { %693 = vmatpush.bf16.msrb.mxu0 %v1018_v49  ;;  %674 = vmatmul.bf16.vlgmr.msra.gmra.mxu2 %v396_v55 }
  0x57   : > { %706 = vmatpush.bf16.msrb.mxu1 %v1082_v50  ;;  %687 = vmatmul.bf16.vlgmr.msra.gmra.mxu3 %v394_v42 }
  0x5a   : > { %694 = vmatpush.bf16.msrb.mxu0 %v1010_v57 }
  0x5b   : > { %707 = vmatpush.bf16.msrb.mxu1 %v1074_v58 }
  0x5e   : > { %695 = vmatpush.bf16.msrb.mxu0 %v1002_v63 }
  0x5f   : > { %708 = vmatpush.bf16.msrb.mxu1 %v1066_v0 }
  0x62   : > { %696 = vmatpush.bf16.msrb.mxu0 %v994_v5 }
  0x63   : > { %709 = vmatpush.bf16.msrb.mxu1 %v1058_v6 }
  0x66   : > { %697 = vmatpush.bf16.msrb.mxu0 %v986_v11 }
  0x67   : > { %710 = vmatpush.bf16.msrb.mxu1 %v1050_v12 }
  0x6a   : > { %698 = vmatpush.bf16.msrb.mxu0 %v978_v17 }
  0x6b   : > { %711 = vmatpush.bf16.msrb.mxu1 %v1042_v18 }
  0x6e   : > { %699 = vmatpush.bf16.msrb.mxu0 %v970_v23 }
  0x6f   : > { %712 = vmatpush.bf16.msrb.mxu1 %v1034_v24 }
  0x71   : > { %700 = vmatmul.bf16.vlgmr.msrb.gmra.mxu0 %v1527_v45 }
  0x72   : > { %713 = vmatmul.bf16.vlgmr.msrb.gmra.mxu1 %v396_v55 }
  0xce   : > { %v649_v25 = vpop.f32.mrf.mxu0 }
  0xcf   : > { %v662_v26 = vpop.f32.mrf.mxu1 }
  0xd0   : > { %v663_v27 = vadd.f32 %v662_v26, %v649_v25 }
  0xd6   : > { %v651_v28 = vpop.f32.mrf.mxu0 }
  0xd7   : > { %v664_v29 = vpop.f32.mrf.mxu1 }
  0xd9   : > { %v675_v31 = vpop.f32.mrf.mxu2 }
  0xda   : > { %v676_v32 = vadd.f32 %v675_v31, %v663_v27  ;;  %v688_v34 = vpop.f32.mrf.mxu3 }
  0xdc   : > { %v718_v33 = vadd.f32 %v676_v32, %v337_v30 }
  0xde   : > { %720 = vst [vmem:[#allocation2] sm:$0xff] %v718_v33 }
  0xe1   : > { %v677_v35 = vpop.f32.mrf.mxu2 }
  0xe2   : > { %v690_v36 = vpop.f32.mrf.mxu3 }
  0xee   : > { %v701_v37 = vpop.f32.mrf.mxu0 }
  0xef   : > { %v702_v38 = vadd.f32 %v701_v37, %v688_v34  ;;  %v714_v39 = vpop.f32.mrf.mxu1 }
  0xf1   : > { %v715_v41 = vadd.f32 %v714_v39, %v702_v38 }
  0xf3   : > { %v719_v42 = vadd.f32 %v715_v41, %v338_v40  ;;  %725 = sbr.rel (%p1091_p3) target bundleno = 260 (0x104), region = 48 }
  0xf5   : > { %721 = vst [vmem:[#allocation2 + $0x8] sm:$0xff] %v719_v42 }
  0xf6   : > { %v703_v43 = vpop.f32.mrf.mxu0 }
  0xf7   : > { %v716_v44 = vpop.f32.mrf.mxu1 }
  0xf8   : > { %v726_v45 = vld [vmem:[#allocation2] sm:$0xff] }
  0xf9   : > { %v728_v46 = vld [vmem:[%s314_s12] sm:$0x3] }
  0xfa   : > { %v736_v47 = vld [vmem:[%s319_s29] sm:$0x3]  ;;  %v730_v48 = vperm.slane %v728_v46, 0  ;;  %v731_v51 = vperm.slane %v728_v46, 1 }
  0xfb   : > { %v738_v49 = vperm.slane %v736_v47, 0  ;;  %v739_v52 = vperm.slane %v736_v47, 1 }
  0xfc   : > { %v727_v50 = vld [vmem:[#allocation2 + $0x8] sm:$0xff]  ;;  %v734_v53 = vmul.f32 %v730_v48, %v726_v45 }
  0xfd   : > { %v735_v54 = vmul.f32 %v731_v51, %v727_v50 }
  0xfe   : > { %v742_v55 = vadd.f32 %v738_v49, %v734_v53 }
  0xff   : > { %v743_v56 = vadd.f32 %v739_v52, %v735_v54 }
 0x100   : > { %v744_v57 = vmax.f32 %v742_v55, 0.0 }
 0x101   : > { %v745_v58 = vmax.f32 %v743_v56, 0.0 }
 0x102   : > { %746 = vst [vmem:[%s1452_s28] sm:$0xff] %v744_v57 }
 0x103   : > { %747 = vst [vmem:[%s1452_s28 + $0x8] sm:$0xff] %v745_v58 }
 0x104 PF: > { %s17_s22 = sadd.s32 1, %s1316_s22   ;;  %s1605_s24 = sld [smem:[#allocation6_spill]] }
 0x105   : > { %p14_p4 = scmp.ge.s32.totalorder %s17_s22, 14   ;;  %s1606_s25 = sld [smem:[#allocation7_spill]] }
 0x106   : > { %s1607_s15 = smov %s1292_s16  ;;  %s1608_s16 = smov %s1296_s17 }
 0x107   : > { %s1609_s17 = smov %s1414_s9  ;;  %s1610_s18 = smov %s1308_s20 }
 0x108   : > { %s1611_s19 = smov %s1312_s21  ;;  %16 = sbr.rel (!%p14_p4) target bundleno = 5 (0x5), region = 93 }
 0x10a   : > { %s1612_s20 = smov %s1605_s24 }
 0x10b   : > { %s1613_s21 = smov %s1606_s25 }
 0x10d   :  { %778 = vsyncpa [#allocation4], 1 }
 0x10e   :  { %780 = vsyncpa [#allocation4 + $0x1], 1 }

// kernel: _lambda_.38
= control target key start
LH: loop header
LB: loop body
LE: loop exit
PB: predicated region body
PF: predicated region fallthrough
CT: control target
= control target key end

     0   :  { %9 = vsyncpa [#allocation4], 0  ;;  %s1262_s0 = inlined_call_operand.vmem [shape: bf16[8,256], index: 0, kind: input, shape index: {}]   ;;  %s1263_s1 = inlined_call_operand.hbm [shape: bf16[256,512], index: 1, kind: input, shape index: {}]   ;;  %s1264_s2 = inlined_call_operand.vmem [shape: f32[1,512], index: 2, kind: input, shape index: {}]   ;;  %s1265_s3 = inlined_call_operand.vmem [shape: f32[1,512], index: 3, kind: input, shape index: {}]   ;;  %s1266_s4 = inlined_call_operand.vmem [shape: f32[8,512], index: 4, kind: output, shape index: {}]  }
   0x1   :  { %11 = vsyncpa [#allocation4 + $0x1], 0  ;;  %s1100_s15 = smov 0   ;;  %s1102_s16 = smov 0  }
   0x2   :  { %s1104_s17 = smov 0   ;;  %s1106_s18 = smov 0  }
   0x3   :  { %s1108_s19 = smov 0   ;;  %s1110_s20 = smov 0  }
   0x4 LB: > { %s755_s21 = sadd.s32 4294967295, %s1070_s20   ;;  %s32_s22 = sadd.s32 1, %s1066_s19  ;;  %s1070_s20 = sphi %s1110_s20, %s17_s20   ;;  %s1066_s19 = sphi %s1108_s19, %s1273_s19   ;;  %s1062_s18 = sphi %s1106_s18, %s1272_s18   ;;  %s1058_s17 = sphi %s1104_s17, %s1271_s17   ;;  %s1054_s16 = sphi %s1102_s16, %s1270_s16   ;;  %s1050_s15 = sphi %s1100_s15, %s1269_s15  }
   0x5   : > { %p34_p0 = scmp.ge.s32.totalorder %s32_s22, 2  ;;  %s73_s23 = sadd.s32 1, %s1058_s17 }
   0x6   : > { %p80_p1 = scmp.ne.s32.totalorder %s1058_s17, %s1054_s16  ;;  %p81_p2 = scmp.eq.s32.totalorder %s1070_s20, 0 }
   0x7   : > { %s1275_s22 = smov (%p34_p0, %s32_s22), 0  ;;  %p86_p4 = scmp.ne.s32.totalorder %s1054_s16, %s1050_s15 }
   0x8   : > { %p1136_p3 = por %p81_p2, %p80_p1  ;;  %s69_s25 = ssub.s32 %s1066_s19, %s1275_s22 }
   0x9   : > { %p87_p5 = scmp.eq.s32.totalorder %s755_s21, 0  ;;  %p71_p6 = scmp.eq.s32.totalorder %s69_s25, 0 }
   0xa   : > { %p938_p8 = scmp.lt.s32.totalorder %s1070_s20, 2  ;;  %s203_s28 = sand.u32 1, %s1058_s17  }
   0xb   : > { %p1143_p7 = por %p87_p5, %p86_p4  ;;  %s899_s29 = sshll.u32 %s1066_s19, 3 }
   0xc   : > { %s1149_s27 = scalar_select %p71_p6, %s1058_s17, %s73_s23  }
   0xd   : > { %s760_s30 = sshll.u32 %s203_s28, 8  ;;  %s215_s7 = scalar_lea.hbm %s1263_s1, %s899_s29 }
   0xe   : > { %s216_s8 = sshll.u32 %s215_s7, 4  ;;  %s207_s9 = scalar_lea.vmem [#allocation3], %s760_s30  ;;  %s217_s8 = int_to_ptr.hbm [resolvable:$true] %s216_s8 }
   0xf   : > { %s218_s10 = sshll.u32 %s207_s9, 4  ;;  %p935_p9 = pnand %p938_p8, %p1136_p3  ;;  %s219_s10 = int_to_ptr.vmem [resolvable:$true] %s218_s10 }
  0x10   : > { %p763_p10 = scmp.ge.s32.totalorder %s1070_s20, 1  ;;  %s204_s11 = scalar_lea.sflag [#allocation4], %s203_s28 }
  0x11   : > { %s1072_s12 = smov 256   ;;  %s1073_s13 = smov 128  }
  0x12   : > { %s1074_s14 = smov 8   ;;  %p242_p11 = scmp.lt.s32.totalorder %s1070_s20, 3 }
  0x13   : > { %937 = dma.hbm_to_vmem [thread:$0]  (!%p935_p9), %s217_s8, 4096, %s219_s10, %s204_s11, %s1072_s12, %s1073_s13, %s1074_s14  }
  0x14   : > { %p243_p12 = pnand %p763_p10, %p242_p11 }
  0x15   : > { %s248_s15 = sand.u32 (!%p243_p12), 1, %s1054_s16  }
  0x16   : > { %246 = sbr.rel (%p243_p12) target bundleno = 205 (0xcd), region = 36  ;;  %s764_s21 = sshll.u32 (!%p243_p12), %s248_s15, 8 }
  0x17   : > { %s249_s23 = scalar_lea.sflag (!%p243_p12), [#allocation4], %s248_s15  ;;  %s1161_s25 = scalar_lea.vmem (!%p243_p12), [#allocation3], %s764_s21 }
  0x1b   : > { %1045 = dma.done.wait (%p1143_p7), %s249_s23, 4096  }
  0x1c   : > { %1047 = vsyncadd (%p1143_p7), %s249_s23, 4294963200  ;;  %v827_v0 = vld [vmem:[%s1161_s25 + $0x70] sm:$0xf]  ;;  %v915_v1 = vld [vmem:[%s1161_s25 + $0x74] sm:$0xf0]  ;;  %s765_s28 = sshll.u32 %s1062_s18, 1 }
  0x1d   : > { %v891_v2 = vld [vmem:[%s1161_s25 + $0xf0] sm:$0xf]  ;;  %v828_v3 = vor.u32 %v915_v1, %v827_v0  ;;  %v931_v4 = vld [vmem:[%s1161_s25 + $0xf4] sm:$0xf0]  ;;  %v914_v5 = vld [vmem:[%s1161_s25 + $0x74] sm:$0xf] }
  0x1e   : > { %v829_v6 = vld [vmem:[%s1161_s25 + $0x78] sm:$0xf0]  ;;  %v892_v7 = vor.u32 %v931_v4, %v891_v2  ;;  %v930_v9 = vld [vmem:[%s1161_s25 + $0xf4] sm:$0xf]  ;;  %v819_v11 = vld [vmem:[%s1161_s25 + $0x60] sm:$0xf] }
  0x1f   : > { %v832_v8 = vor.u32 %v914_v5, %v829_v6  ;;  %v893_v10 = vld [vmem:[%s1161_s25 + $0xf8] sm:$0xf0]  ;;  %539 = vmatpush.bf16.msra.mxu0 %v828_v3  ;;  %v913_v13 = vld [vmem:[%s1161_s25 + $0x64] sm:$0xf0]  ;;  %v883_v14 = vld [vmem:[%s1161_s25 + $0xe0] sm:$0xf] }
  0x20   : > { %v896_v12 = vor.u32 %v930_v9, %v893_v10  ;;  %v929_v15 = vld [vmem:[%s1161_s25 + $0xe4] sm:$0xf0]  ;;  %552 = vmatpush.bf16.msra.mxu1 %v892_v7  ;;  %v820_v16 = vor.u32 %v913_v13, %v819_v11  ;;  %v912_v18 = vld [vmem:[%s1161_s25 + $0x64] sm:$0xf]  ;;  %v821_v19 = vld [vmem:[%s1161_s25 + $0x68] sm:$0xf0] }
  0x21   : > { %565 = vmatpush.bf16.msra.mxu2 %v832_v8  ;;  %v884_v17 = vor.u32 %v929_v15, %v883_v14  ;;  %v928_v20 = vld [vmem:[%s1161_s25 + $0xe4] sm:$0xf]  ;;  %v824_v21 = vor.u32 %v912_v18, %v821_v19  ;;  %v885_v22 = vld [vmem:[%s1161_s25 + $0xe8] sm:$0xf0]  ;;  %v811_v23 = vld [vmem:[%s1161_s25 + $0x50] sm:$0xf] }
  0x22   : > { %578 = vmatpush.bf16.msra.mxu3 %v896_v12  ;;  %v911_v24 = vld [vmem:[%s1161_s25 + $0x54] sm:$0xf0]  ;;  %v888_v25 = vor.u32 %v928_v20, %v885_v22  ;;  %v875_v26 = vld [vmem:[%s1161_s25 + $0xd0] sm:$0xf]  ;;  %v910_v28 = vld [vmem:[%s1161_s25 + $0x54] sm:$0xf] }
  0x23   : > { %v927_v27 = vld [vmem:[%s1161_s25 + $0xd4] sm:$0xf0]  ;;  %540 = vmatpush.bf16.msra.mxu0 %v820_v16  ;;  %v812_v29 = vor.u32 %v911_v24, %v811_v23  ;;  %v813_v30 = vld [vmem:[%s1161_s25 + $0x58] sm:$0xf0]  ;;  %v926_v31 = vld [vmem:[%s1161_s25 + $0xd4] sm:$0xf] }
  0x24   : > { %v877_v32 = vld [vmem:[%s1161_s25 + $0xd8] sm:$0xf0]  ;;  %553 = vmatpush.bf16.msra.mxu1 %v884_v17  ;;  %v876_v33 = vor.u32 %v927_v27, %v875_v26  ;;  %v816_v34 = vor.u32 %v910_v28, %v813_v30  ;;  %v803_v35 = vld [vmem:[%s1161_s25 + $0x40] sm:$0xf]  ;;  %v909_v36 = vld [vmem:[%s1161_s25 + $0x44] sm:$0xf0] }
  0x25   : > { %566 = vmatpush.bf16.msra.mxu2 %v824_v21  ;;  %v867_v37 = vld [vmem:[%s1161_s25 + $0xc0] sm:$0xf]  ;;  %v880_v38 = vor.u32 %v926_v31, %v877_v32  ;;  %v925_v39 = vld [vmem:[%s1161_s25 + $0xc4] sm:$0xf0]  ;;  %v908_v40 = vld [vmem:[%s1161_s25 + $0x44] sm:$0xf]  ;;  %v804_v44 = vor.u32 %v909_v36, %v803_v35 }
  0x26   : > { %579 = vmatpush.bf16.msra.mxu3 %v888_v25  ;;  %v805_v41 = vld [vmem:[%s1161_s25 + $0x48] sm:$0xf0]  ;;  %v924_v42 = vld [vmem:[%s1161_s25 + $0xc4] sm:$0xf]  ;;  %v868_v45 = vor.u32 %v925_v39, %v867_v37  ;;  %v795_v47 = vld [vmem:[%s1161_s25 + $0x30] sm:$0xf] }
  0x27   : > { %v869_v43 = vld [vmem:[%s1161_s25 + $0xc8] sm:$0xf0]  ;;  %541 = vmatpush.bf16.msra.mxu0 %v812_v29  ;;  %v808_v46 = vor.u32 %v908_v40, %v805_v41  ;;  %v907_v48 = vld [vmem:[%s1161_s25 + $0x34] sm:$0xf0]  ;;  %v859_v49 = vld [vmem:[%s1161_s25 + $0xb0] sm:$0xf] }
  0x28   : > { %554 = vmatpush.bf16.msra.mxu1 %v876_v33  ;;  %v872_v50 = vor.u32 %v924_v42, %v869_v43  ;;  %v923_v51 = vld [vmem:[%s1161_s25 + $0xb4] sm:$0xf0]  ;;  %v906_v52 = vld [vmem:[%s1161_s25 + $0x34] sm:$0xf]  ;;  %v797_v53 = vld [vmem:[%s1161_s25 + $0x38] sm:$0xf0]  ;;  %v796_v56 = vor.u32 %v907_v48, %v795_v47 }
  0x29   : > { %567 = vmatpush.bf16.msra.mxu2 %v816_v34  ;;  %v922_v54 = vld [vmem:[%s1161_s25 + $0xb4] sm:$0xf]  ;;  %v861_v55 = vld [vmem:[%s1161_s25 + $0xb8] sm:$0xf0]  ;;  %v860_v57 = vor.u32 %v923_v51, %v859_v49  ;;  %v800_v58 = vor.u32 %v906_v52, %v797_v53  ;;  %v787_v59 = vld [vmem:[%s1161_s25 + $0x20] sm:$0xf] }
  0x2a   : > { %580 = vmatpush.bf16.msra.mxu3 %v880_v38  ;;  %v905_v60 = vld [vmem:[%s1161_s25 + $0x24] sm:$0xf0]  ;;  %v851_v61 = vld [vmem:[%s1161_s25 + $0xa0] sm:$0xf]  ;;  %v864_v62 = vor.u32 %v922_v54, %v861_v55  ;;  %v904_v0 = vld [vmem:[%s1161_s25 + $0x24] sm:$0xf] }
  0x2b   : > { %542 = vmatpush.bf16.msra.mxu0 %v804_v44  ;;  %v921_v63 = vld [vmem:[%s1161_s25 + $0xa4] sm:$0xf0]  ;;  %v789_v1 = vld [vmem:[%s1161_s25 + $0x28] sm:$0xf0]  ;;  %v920_v2 = vld [vmem:[%s1161_s25 + $0xa4] sm:$0xf]  ;;  %v788_v4 = vor.u32 %v905_v60, %v787_v59 }
  0x2c   : > { %555 = vmatpush.bf16.msra.mxu1 %v868_v45  ;;  %v853_v3 = vld [vmem:[%s1161_s25 + $0xa8] sm:$0xf0]  ;;  %v852_v5 = vor.u32 %v921_v63, %v851_v61  ;;  %v792_v6 = vor.u32 %v904_v0, %v789_v1  ;;  %v779_v7 = vld [vmem:[%s1161_s25 + $0x10] sm:$0xf]  ;;  %v903_v8 = vld [vmem:[%s1161_s25 + $0x14] sm:$0xf0] }
  0x2d   : > { %568 = vmatpush.bf16.msra.mxu2 %v808_v46  ;;  %v843_v9 = vld [vmem:[%s1161_s25 + $0x90] sm:$0xf]  ;;  %v856_v10 = vor.u32 %v920_v2, %v853_v3  ;;  %v919_v11 = vld [vmem:[%s1161_s25 + $0x94] sm:$0xf0]  ;;  %v902_v12 = vld [vmem:[%s1161_s25 + $0x14] sm:$0xf]  ;;  %v780_v16 = vor.u32 %v903_v8, %v779_v7 }
  0x2e   : > { %581 = vmatpush.bf16.msra.mxu3 %v872_v50  ;;  %v781_v13 = vld [vmem:[%s1161_s25 + $0x18] sm:$0xf0]  ;;  %v918_v14 = vld [vmem:[%s1161_s25 + $0x94] sm:$0xf]  ;;  %v339_v17 = vld [vmem:[%s1262_s0] sm:$0xff]  ;;  %v844_v18 = vor.u32 %v919_v11, %v843_v9  ;;  %p312_p13 = scmp.lt.s32.totalorder %s765_s28, 3 }
  0x2f   : > { %543 = vmatpush.bf16.msra.mxu0 %v796_v56  ;;  %v845_v15 = vld [vmem:[%s1161_s25 + $0x98] sm:$0xf0]  ;;  %v784_v19 = vor.u32 %v902_v12, %v781_v13  ;;  %v771_v20 = vld [vmem:[%s1161_s25] sm:$0xf]  ;;  %v901_v21 = vld [vmem:[%s1161_s25 + $0x4] sm:$0xf0]  ;;  %v373_v29 = vunpack.c.l.b16 %v339_v17  ;;  %v374_v31 = vunpack.c.h.b16 %v339_v17 }
  0x30   : > { %556 = vmatpush.bf16.msra.mxu1 %v860_v57  ;;  %v835_v22 = vld [vmem:[%s1161_s25 + $0x80] sm:$0xf]  ;;  %v848_v23 = vor.u32 %v918_v14, %v845_v15  ;;  %v917_v24 = vld [vmem:[%s1161_s25 + $0x84] sm:$0xf0]  ;;  %v900_v25 = vld [vmem:[%s1161_s25 + $0x4] sm:$0xf]  ;;  %v772_v30 = vor.u32 %v901_v21, %v771_v20 }
  0x31   : > { %569 = vmatpush.bf16.msra.mxu2 %v800_v58  ;;  %v773_v26 = vld [vmem:[%s1161_s25 + $0x8] sm:$0xf0]  ;;  %v916_v27 = vld [vmem:[%s1161_s25 + $0x84] sm:$0xf]  ;;  %v836_v32 = vor.u32 %v917_v24, %v835_v22  ;;  %v375_v35 = vpack.c.b16 %v373_v29, %v373_v29  ;;  %v376_v36 = vpack.c.b16 %v374_v31, %v374_v31  ;;  %s1277_s28 = smov (!%p312_p13, %s765_s28), 3 }
  0x32   : > { %582 = vmatpush.bf16.msra.mxu3 %v864_v62  ;;  %v837_v28 = vld [vmem:[%s1161_s25 + $0x88] sm:$0xf0]  ;;  %v776_v33 = vor.u32 %v900_v25, %v773_v26  ;;  %s314_s5 = scalar_lea.vmem %s1264_s2, %s1277_s28  ;;  %s319_s8 = scalar_lea.vmem %s1265_s3, %s1277_s28 }
  0x33   : > { %544 = vmatpush.bf16.msra.mxu0 %v788_v4  ;;  %v840_v34 = vor.u32 %v916_v27, %v837_v28  ;;  %v600_v37 = vld [vmem:[%s314_s5] sm:$0x3]  ;;  %s768_s9 = sshll.u32 %s1277_s28, 3 }
  0x34   : > { %557 = vmatpush.bf16.msra.mxu1 %v852_v5  ;;  %v608_v38 = vld [vmem:[%s319_s8] sm:$0x3]  ;;  %v602_v40 = vperm.slane %v600_v37, 0  ;;  %s329_s11 = scalar_lea.vmem %s1266_s4, %s768_s9  ;;  %v603_v47 = vperm.slane %v600_v37, 1 }
  0x35   : > { %570 = vmatpush.bf16.msra.mxu2 %v792_v6  ;;  %v610_v43 = vperm.slane %v608_v38, 0  ;;  %v611_v51 = vperm.slane %v608_v38, 1 }
  0x36   : > { %583 = vmatpush.bf16.msra.mxu3 %v856_v10 }
  0x37   : > { %545 = vmatpush.bf16.msra.mxu0 %v780_v16 }
  0x38   : > { %558 = vmatpush.bf16.msra.mxu1 %v844_v18 }
  0x39   : > { %571 = vmatpush.bf16.msra.mxu2 %v784_v19 }
  0x3a   : > { %584 = vmatpush.bf16.msra.mxu3 %v848_v23 }
  0x3b   : > { %546 = vmatpush.bf16.msra.mxu0 %v772_v30 }
  0x3c   : > { %559 = vmatpush.bf16.msra.mxu1 %v836_v32 }
  0x3d   : > { %572 = vmatpush.bf16.msra.mxu2 %v776_v33 }
  0x3e   : > { %585 = vmatpush.bf16.msra.mxu3 %v840_v34  ;;  %547 = vmatmul.bf16.vlgmr.msra.gmra.mxu0 %v375_v35 }
  0x3f   : > { %560 = vmatmul.bf16.vlgmr.msra.gmra.mxu1 %v376_v36 }
  0x40   : > { %573 = vmatmul.bf16.vlgmr.msra.gmra.mxu2 %v375_v35 }
  0x41   : > { %586 = vmatmul.bf16.vlgmr.msra.gmra.mxu3 %v376_v36 }
  0xbb   : > { %v548_v39 = vpop.f32.mrf.mxu0 }
  0xbc   : > { %v561_v41 = vpop.f32.mrf.mxu1 }
  0xbd   : > { %v562_v42 = vadd.f32 %v561_v41, %v548_v39 }
  0xbf   : > { %v606_v44 = vmul.f32 %v602_v40, %v562_v42 }
  0xc1   : > { %v614_v45 = vadd.f32 %v610_v43, %v606_v44 }
  0xc3   : > { %v574_v46 = vpop.f32.mrf.mxu2  ;;  %616 = vst [vmem:[%s329_s11] sm:$0xff] %v614_v45  ;;  %v550_v49 = vpop.f32.mrf.mxu0 }
  0xc4   : > { %v587_v48 = vpop.f32.mrf.mxu3  ;;  %v563_v52 = vpop.f32.mrf.mxu1 }
  0xc5   : > { %v588_v50 = vadd.f32 %v587_v48, %v574_v46 }
  0xc7   : > { %v607_v53 = vmul.f32 %v603_v47, %v588_v50 }
  0xc9   : > { %v615_v54 = vadd.f32 %v611_v51, %v607_v53 }
  0xcb   : > { %617 = vst [vmem:[%s329_s11 + $0x8] sm:$0xff] %v615_v54  ;;  %v576_v55 = vpop.f32.mrf.mxu2 }
  0xcc   : > { %v589_v56 = vpop.f32.mrf.mxu3 }
  0xcd PF: > { %s17_s20 = sadd.s32 1, %s1070_s20   ;;  %s1269_s15 = smov %s1054_s16 }
  0xce   : > { %p14_p0 = scmp.ge.s32.totalorder %s17_s20, 4   ;;  %s1270_s16 = smov %s1058_s17 }
  0xcf   : > { %s1271_s17 = smov %s1149_s27  ;;  %s1272_s18 = smov %s1066_s19 }
  0xd0   : > { %s1273_s19 = smov %s1275_s22  ;;  %16 = sbr.rel (!%p14_p0) target bundleno = 4 (0x4), region = 93 }
  0xd5   :  { %648 = vsyncpa [#allocation4], 1 }
  0xd6   :  { %650 = vsyncpa [#allocation4 + $0x1], 1 }

// kernel: _lambda_.40
= control target key start
LH: loop header
LB: loop body
LE: loop exit
PB: predicated region body
PF: predicated region fallthrough
CT: control target
= control target key end

     0   :  { %s1752_s15 = smov 0   ;;  %s1754_s16 = smov 0   ;;  %s2153_s0 = inlined_call_operand.vmem [shape: bf16[8,4608], index: 0, kind: input, shape index: {}]   ;;  %s2154_s1 = inlined_call_operand.vmem [shape: bf16[4608,512], index: 1, kind: input, shape index: {}]   ;;  %s2155_s2 = inlined_call_operand.vmem [shape: f32[1,512], index: 2, kind: input, shape index: {}]   ;;  %s2156_s3 = inlined_call_operand.vmem [shape: f32[1,512], index: 3, kind: input, shape index: {}]   ;;  %s2157_s4 = inlined_call_operand.vmem [shape: f32[8,512], index: 4, kind: output, shape index: {}]  }
   0x1   :  { %s1756_s17 = smov 0   ;;  %s1758_s18 = smov 0  }
   0x2   :  { %s1760_s19 = smov 0   ;;  %s1762_s20 = smov 0  }
   0x3   :  { %s1764_s21 = smov 0  }
   0x4 LB: > { %s26_s22 = sadd.s32 1, %s1716_s19  ;;  %s29_s23 = sadd.s32 1, %s1720_s20  ;;  %s1724_s21 = sphi %s1764_s21, %s14_s21   ;;  %s1720_s20 = sphi %s1762_s20, %s2163_s20   ;;  %s1716_s19 = sphi %s1760_s19, %s2162_s19   ;;  %s1712_s18 = sphi %s1758_s18, %s2161_s18   ;;  %s1708_s17 = sphi %s1756_s17, %s2160_s17   ;;  %s1704_s16 = sphi %s1754_s16, %s2159_s16   ;;  %s1700_s15 = sphi %s1752_s15, %s2158_s15  }
   0x5   : > { %p27_p0 = scmp.ge.s32.totalorder %s26_s22, 9  ;;  %p77_p1 = scmp.ne.s32.totalorder %s1704_s16, %s1700_s15 }
   0x6   : > { %p78_p2 = scmp.eq.s32.totalorder %s1724_s21, 0  ;;  %s70_s27 = sadd.s32 1, %s1704_s16 }
   0x7   : > { %s2165_s22 = smov (%p27_p0, %s26_s22), 0  ;;  %s2167_s23 = smov (!%p27_p0, %s29_s23), %s1720_s20 }
   0x8   : > { %p79_p3 = por %p78_p2, %p77_p1  ;;  %p31_p4 = scmp.ge.s32.totalorder %s2167_s23, 2 }
   0x9   : > { %s65_s24 = ssub.s32 %s1716_s19, %s2165_s22  ;;  %p1274_p6 = scmp.ge.s32.totalorder %s1724_s21, 18 }
   0xa   : > { %s2169_s23 = smov (%p31_p4, %s2167_s23), 0 }
   0xb   : > { %s66_s25 = ssub.s32 %s1720_s20, %s2169_s23  ;;  %183 = sbr.rel (%p1274_p6) target bundleno = 87 (0x57), region = 16 }
   0xc   : > { %s67_s26 = sor.u32 %s66_s25, %s65_s24 }
   0xd   : > { %p68_p5 = scmp.eq.s32.totalorder %s67_s26, 0 }
   0xf   : > { %s1803_s28 = scalar_select %p68_p5, %s1704_s16, %s70_s27  }
  0x10   : > { %199 = sbr.rel (!%p79_p3) target bundleno = 87 (0x57), region = 24  ;;  %s201_s29 = sand.u32 (%p79_p3), 1, %s1704_s16  }
  0x11   : > { %s1277_s30 = sshll.u32 (%p79_p3), %s1720_s20, 1  ;;  %s1275_s5 = sshll.u32 (%p79_p3), %s201_s29, 9 }
  0x12   : > { %s1548_s6 = sshll.u32 (%p79_p3), %s1716_s19, 8  ;;  %s1817_s12 = scalar_lea.vmem (%p79_p3), [#allocation3], %s1275_s5 }
  0x13   : > { %s207_s7 = sadd.s32 (%p79_p3), %s1548_s6, %s1277_s30 }
  0x14   : > { %s1279_s8 = sshll.u32 (%p79_p3), %s207_s7, 2 }
  0x15   : > { %s1812_s11 = scalar_lea.vmem %s2154_s1, %s1279_s8 }
  0x16   : > { %v364_v0 = vld [vmem:[%s1812_s11] sm:$0xff]  ;;  %v366_v1 = vld [vmem:[%s1812_s11 + $0x10] sm:$0xff] }
  0x17   : > { %v368_v2 = vld [vmem:[%s1812_s11 + $0x20] sm:$0xff]  ;;  %365 = vst [vmem:[%s1817_s12] sm:$0xff] %v364_v0  ;;  %v370_v3 = vld [vmem:[%s1812_s11 + $0x30] sm:$0xff] }
  0x18   : > { %367 = vst [vmem:[%s1817_s12 + $0x8] sm:$0xff] %v366_v1  ;;  %v372_v4 = vld [vmem:[%s1812_s11 + $0x40] sm:$0xff]  ;;  %v374_v5 = vld [vmem:[%s1812_s11 + $0x50] sm:$0xff] }
  0x19   : > { %369 = vst [vmem:[%s1817_s12 + $0x10] sm:$0xff] %v368_v2  ;;  %v376_v6 = vld [vmem:[%s1812_s11 + $0x60] sm:$0xff]  ;;  %v378_v7 = vld [vmem:[%s1812_s11 + $0x70] sm:$0xff] }
  0x1a   : > { %371 = vst [vmem:[%s1817_s12 + $0x18] sm:$0xff] %v370_v3  ;;  %v380_v8 = vld [vmem:[%s1812_s11 + $0x80] sm:$0xff]  ;;  %v382_v9 = vld [vmem:[%s1812_s11 + $0x90] sm:$0xff] }
  0x1b   : > { %373 = vst [vmem:[%s1817_s12 + $0x20] sm:$0xff] %v372_v4  ;;  %v384_v10 = vld [vmem:[%s1812_s11 + $0xa0] sm:$0xff]  ;;  %v386_v11 = vld [vmem:[%s1812_s11 + $0xb0] sm:$0xff] }
  0x1c   : > { %375 = vst [vmem:[%s1817_s12 + $0x28] sm:$0xff] %v374_v5  ;;  %v388_v12 = vld [vmem:[%s1812_s11 + $0xc0] sm:$0xff]  ;;  %v390_v13 = vld [vmem:[%s1812_s11 + $0xd0] sm:$0xff] }
  0x1d   : > { %377 = vst [vmem:[%s1817_s12 + $0x30] sm:$0xff] %v376_v6  ;;  %v392_v14 = vld [vmem:[%s1812_s11 + $0xe0] sm:$0xff]  ;;  %v394_v15 = vld [vmem:[%s1812_s11 + $0xf0] sm:$0xff] }
  0x1e   : > { %379 = vst [vmem:[%s1817_s12 + $0x38] sm:$0xff] %v378_v7  ;;  %v396_v16 = vld [vmem:[%s1812_s11 + $0x100] sm:$0xff]  ;;  %v398_v17 = vld [vmem:[%s1812_s11 + $0x110] sm:$0xff] }
  0x1f   : > { %381 = vst [vmem:[%s1817_s12 + $0x40] sm:$0xff] %v380_v8  ;;  %v400_v18 = vld [vmem:[%s1812_s11 + $0x120] sm:$0xff]  ;;  %v402_v19 = vld [vmem:[%s1812_s11 + $0x130] sm:$0xff] }
  0x20   : > { %383 = vst [vmem:[%s1817_s12 + $0x48] sm:$0xff] %v382_v9  ;;  %v404_v20 = vld [vmem:[%s1812_s11 + $0x140] sm:$0xff]  ;;  %v406_v21 = vld [vmem:[%s1812_s11 + $0x150] sm:$0xff] }
  0x21   : > { %385 = vst [vmem:[%s1817_s12 + $0x50] sm:$0xff] %v384_v10  ;;  %v408_v22 = vld [vmem:[%s1812_s11 + $0x160] sm:$0xff]  ;;  %v410_v23 = vld [vmem:[%s1812_s11 + $0x170] sm:$0xff] }
  0x22   : > { %387 = vst [vmem:[%s1817_s12 + $0x58] sm:$0xff] %v386_v11  ;;  %v412_v24 = vld [vmem:[%s1812_s11 + $0x180] sm:$0xff]  ;;  %v414_v25 = vld [vmem:[%s1812_s11 + $0x190] sm:$0xff] }
  0x23   : > { %389 = vst [vmem:[%s1817_s12 + $0x60] sm:$0xff] %v388_v12  ;;  %v416_v26 = vld [vmem:[%s1812_s11 + $0x1a0] sm:$0xff]  ;;  %v418_v27 = vld [vmem:[%s1812_s11 + $0x1b0] sm:$0xff] }
  0x24   : > { %391 = vst [vmem:[%s1817_s12 + $0x68] sm:$0xff] %v390_v13  ;;  %v420_v28 = vld [vmem:[%s1812_s11 + $0x1c0] sm:$0xff]  ;;  %v422_v29 = vld [vmem:[%s1812_s11 + $0x1d0] sm:$0xff] }
  0x25   : > { %393 = vst [vmem:[%s1817_s12 + $0x70] sm:$0xff] %v392_v14  ;;  %v424_v30 = vld [vmem:[%s1812_s11 + $0x1e0] sm:$0xff]  ;;  %v426_v31 = vld [vmem:[%s1812_s11 + $0x1f0] sm:$0xff] }
  0x26   : > { %395 = vst [vmem:[%s1817_s12 + $0x78] sm:$0xff] %v394_v15  ;;  %v428_v32 = vld [vmem:[%s1812_s11 + $0x200] sm:$0xff]  ;;  %v430_v33 = vld [vmem:[%s1812_s11 + $0x210] sm:$0xff] }
  0x27   : > { %397 = vst [vmem:[%s1817_s12 + $0x80] sm:$0xff] %v396_v16  ;;  %v432_v34 = vld [vmem:[%s1812_s11 + $0x220] sm:$0xff]  ;;  %v434_v35 = vld [vmem:[%s1812_s11 + $0x230] sm:$0xff] }
  0x28   : > { %399 = vst [vmem:[%s1817_s12 + $0x88] sm:$0xff] %v398_v17  ;;  %v436_v36 = vld [vmem:[%s1812_s11 + $0x240] sm:$0xff]  ;;  %v438_v37 = vld [vmem:[%s1812_s11 + $0x250] sm:$0xff] }
  0x29   : > { %401 = vst [vmem:[%s1817_s12 + $0x90] sm:$0xff] %v400_v18  ;;  %v440_v38 = vld [vmem:[%s1812_s11 + $0x260] sm:$0xff]  ;;  %v442_v39 = vld [vmem:[%s1812_s11 + $0x270] sm:$0xff] }
  0x2a   : > { %403 = vst [vmem:[%s1817_s12 + $0x98] sm:$0xff] %v402_v19  ;;  %v444_v40 = vld [vmem:[%s1812_s11 + $0x280] sm:$0xff]  ;;  %v446_v41 = vld [vmem:[%s1812_s11 + $0x290] sm:$0xff] }
  0x2b   : > { %405 = vst [vmem:[%s1817_s12 + $0xa0] sm:$0xff] %v404_v20  ;;  %v448_v42 = vld [vmem:[%s1812_s11 + $0x2a0] sm:$0xff]  ;;  %v450_v43 = vld [vmem:[%s1812_s11 + $0x2b0] sm:$0xff] }
  0x2c   : > { %407 = vst [vmem:[%s1817_s12 + $0xa8] sm:$0xff] %v406_v21  ;;  %v452_v44 = vld [vmem:[%s1812_s11 + $0x2c0] sm:$0xff]  ;;  %v454_v45 = vld [vmem:[%s1812_s11 + $0x2d0] sm:$0xff] }
  0x2d   : > { %409 = vst [vmem:[%s1817_s12 + $0xb0] sm:$0xff] %v408_v22  ;;  %v456_v46 = vld [vmem:[%s1812_s11 + $0x2e0] sm:$0xff]  ;;  %v458_v47 = vld [vmem:[%s1812_s11 + $0x2f0] sm:$0xff] }
  0x2e   : > { %411 = vst [vmem:[%s1817_s12 + $0xb8] sm:$0xff] %v410_v23  ;;  %v460_v48 = vld [vmem:[%s1812_s11 + $0x300] sm:$0xff]  ;;  %v462_v49 = vld [vmem:[%s1812_s11 + $0x310] sm:$0xff] }
  0x2f   : > { %413 = vst [vmem:[%s1817_s12 + $0xc0] sm:$0xff] %v412_v24  ;;  %v464_v50 = vld [vmem:[%s1812_s11 + $0x320] sm:$0xff]  ;;  %v466_v51 = vld [vmem:[%s1812_s11 + $0x330] sm:$0xff] }
  0x30   : > { %415 = vst [vmem:[%s1817_s12 + $0xc8] sm:$0xff] %v414_v25  ;;  %v468_v52 = vld [vmem:[%s1812_s11 + $0x340] sm:$0xff]  ;;  %v470_v53 = vld [vmem:[%s1812_s11 + $0x350] sm:$0xff] }
  0x31   : > { %417 = vst [vmem:[%s1817_s12 + $0xd0] sm:$0xff] %v416_v26  ;;  %v472_v54 = vld [vmem:[%s1812_s11 + $0x360] sm:$0xff]  ;;  %v474_v55 = vld [vmem:[%s1812_s11 + $0x370] sm:$0xff] }
  0x32   : > { %419 = vst [vmem:[%s1817_s12 + $0xd8] sm:$0xff] %v418_v27  ;;  %v476_v56 = vld [vmem:[%s1812_s11 + $0x380] sm:$0xff]  ;;  %v478_v57 = vld [vmem:[%s1812_s11 + $0x390] sm:$0xff] }
  0x33   : > { %421 = vst [vmem:[%s1817_s12 + $0xe0] sm:$0xff] %v420_v28  ;;  %v480_v58 = vld [vmem:[%s1812_s11 + $0x3a0] sm:$0xff]  ;;  %v482_v59 = vld [vmem:[%s1812_s11 + $0x3b0] sm:$0xff] }
  0x34   : > { %423 = vst [vmem:[%s1817_s12 + $0xe8] sm:$0xff] %v422_v29  ;;  %v484_v60 = vld [vmem:[%s1812_s11 + $0x3c0] sm:$0xff]  ;;  %v486_v61 = vld [vmem:[%s1812_s11 + $0x3d0] sm:$0xff] }
  0x35   : > { %425 = vst [vmem:[%s1817_s12 + $0xf0] sm:$0xff] %v424_v30  ;;  %v488_v62 = vld [vmem:[%s1812_s11 + $0x3e0] sm:$0xff]  ;;  %v490_v63 = vld [vmem:[%s1812_s11 + $0x3f0] sm:$0xff] }
  0x36   : > { %427 = vst [vmem:[%s1817_s12 + $0xf8] sm:$0xff] %v426_v31 }
  0x37   : > { %429 = vst [vmem:[%s1817_s12 + $0x100] sm:$0xff] %v428_v32 }
  0x38   : > { %431 = vst [vmem:[%s1817_s12 + $0x108] sm:$0xff] %v430_v33 }
  0x39   : > { %433 = vst [vmem:[%s1817_s12 + $0x110] sm:$0xff] %v432_v34 }
  0x3a   : > { %435 = vst [vmem:[%s1817_s12 + $0x118] sm:$0xff] %v434_v35 }
  0x3b   : > { %437 = vst [vmem:[%s1817_s12 + $0x120] sm:$0xff] %v436_v36 }
  0x3c   : > { %439 = vst [vmem:[%s1817_s12 + $0x128] sm:$0xff] %v438_v37 }
  0x3d   : > { %441 = vst [vmem:[%s1817_s12 + $0x130] sm:$0xff] %v440_v38 }
  0x3e   : > { %443 = vst [vmem:[%s1817_s12 + $0x138] sm:$0xff] %v442_v39 }
  0x3f   : > { %445 = vst [vmem:[%s1817_s12 + $0x140] sm:$0xff] %v444_v40 }
  0x40   : > { %447 = vst [vmem:[%s1817_s12 + $0x148] sm:$0xff] %v446_v41 }
  0x41   : > { %449 = vst [vmem:[%s1817_s12 + $0x150] sm:$0xff] %v448_v42 }
  0x42   : > { %451 = vst [vmem:[%s1817_s12 + $0x158] sm:$0xff] %v450_v43 }
  0x43   : > { %453 = vst [vmem:[%s1817_s12 + $0x160] sm:$0xff] %v452_v44 }
  0x44   : > { %455 = vst [vmem:[%s1817_s12 + $0x168] sm:$0xff] %v454_v45 }
  0x45   : > { %457 = vst [vmem:[%s1817_s12 + $0x170] sm:$0xff] %v456_v46 }
  0x46   : > { %459 = vst [vmem:[%s1817_s12 + $0x178] sm:$0xff] %v458_v47 }
  0x47   : > { %461 = vst [vmem:[%s1817_s12 + $0x180] sm:$0xff] %v460_v48 }
  0x48   : > { %463 = vst [vmem:[%s1817_s12 + $0x188] sm:$0xff] %v462_v49 }
  0x49   : > { %465 = vst [vmem:[%s1817_s12 + $0x190] sm:$0xff] %v464_v50 }
  0x4a   : > { %467 = vst [vmem:[%s1817_s12 + $0x198] sm:$0xff] %v466_v51 }
  0x4b   : > { %469 = vst [vmem:[%s1817_s12 + $0x1a0] sm:$0xff] %v468_v52 }
  0x4c   : > { %471 = vst [vmem:[%s1817_s12 + $0x1a8] sm:$0xff] %v470_v53 }
  0x4d   : > { %473 = vst [vmem:[%s1817_s12 + $0x1b0] sm:$0xff] %v472_v54 }
  0x4e   : > { %475 = vst [vmem:[%s1817_s12 + $0x1b8] sm:$0xff] %v474_v55 }
  0x4f   : > { %477 = vst [vmem:[%s1817_s12 + $0x1c0] sm:$0xff] %v476_v56 }
  0x50   : > { %479 = vst [vmem:[%s1817_s12 + $0x1c8] sm:$0xff] %v478_v57 }
  0x51   : > { %481 = vst [vmem:[%s1817_s12 + $0x1d0] sm:$0xff] %v480_v58 }
  0x52   : > { %483 = vst [vmem:[%s1817_s12 + $0x1d8] sm:$0xff] %v482_v59 }
  0x53   : > { %485 = vst [vmem:[%s1817_s12 + $0x1e0] sm:$0xff] %v484_v60 }
  0x54   : > { %487 = vst [vmem:[%s1817_s12 + $0x1e8] sm:$0xff] %v486_v61 }
  0x55   : > { %489 = vst [vmem:[%s1817_s12 + $0x1f0] sm:$0xff] %v488_v62 }
  0x56   : > { %491 = vst [vmem:[%s1817_s12 + $0x1f8] sm:$0xff] %v490_v63 }
  0x57 PF: > { %p1280_p7 = scmp.ge.s32.totalorder %s1724_s21, 1  ;;  %p512_p8 = scmp.lt.s32.totalorder %s1724_s21, 19 }
  0x59   : > { %p513_p9 = pnand %p1280_p7, %p512_p8 }
  0x5a   : > { %s519_s13 = sand.u32 (!%p513_p9), 1, %s1700_s15   ;;  %s1282_s14 = sshll.u32 (!%p513_p9), %s1708_s17, 2 }
  0x5b   : > { %516 = sbr.rel (%p513_p9) target bundleno = 328 (0x148), region = 70  ;;  %s1281_s24 = sshll.u32 (!%p513_p9), %s519_s13, 9 }
  0x5c   : > { %p568_p10 = scmp.lt.s32.totalorder (!%p513_p9), %s1282_s14, 35  ;;  %s1284_s25 = sshll.u32 (!%p513_p9), %s1712_s18, 1 }
  0x5d   : > { %p578_p11 = scmp.lt.s32.totalorder (!%p513_p9), %s1284_s25, 3  ;;  %s1970_s13 = scalar_lea.vmem (!%p513_p9), [#allocation3], %s1281_s24 }
  0x5e   : > { %p1288_p12 = scmp.ne.s32.totalorder (!%p513_p9), %s1708_s17, 0 }
  0x60   : > { %s2171_s14 = smov (!%p568_p10, %s1282_s14), 35  ;;  %s2173_s25 = smov (!%p578_p11, %s1284_s25), 3 }
  0x61   : > { %s1283_s26 = sshll.u32 %s2171_s14, 2  ;;  %s580_s15 = scalar_lea.vmem %s2155_s2, %s2173_s25 }
  0x62   : > { %s1952_s30 = scalar_lea.vmem %s2153_s0, %s1283_s26  ;;  %s585_s18 = scalar_lea.vmem %s2156_s3, %s2173_s25 }
  0x63   : > { %s1287_s9 = sshll.u32 %s2173_s25, 3  ;;  %600 = sbr.rel (%p1288_p12) target bundleno = 107 (0x6b), region = 78 }
  0x64   : > { %s1968_s12 = scalar_lea.vmem %s2157_s4, %s1287_s9 }
  0x68   : > { %v1726_v0 = vmov 0.0  }
  0x69   : > { %601 = vst [vmem:[#allocation2] sm:$0xff] %v1726_v0 }
  0x6a   : > { %602 = vst [vmem:[#allocation2 + $0x8] sm:$0xff] %v1726_v0 }
  0x6b PF: > { %v1347_v1 = vld [vmem:[%s1970_s13 + $0x70] sm:$0xf]  ;;  %v1564_v2 = vld [vmem:[%s1970_s13 + $0x74] sm:$0xf0]  ;;  %v1339_v12 = vld [vmem:[%s1970_s13 + $0x60] sm:$0xf] }
  0x6c   : > { %v1411_v3 = vld [vmem:[%s1970_s13 + $0xf0] sm:$0xf]  ;;  %v1348_v4 = vor.u32 %v1564_v2, %v1347_v1  ;;  %v1580_v5 = vld [vmem:[%s1970_s13 + $0xf4] sm:$0xf0]  ;;  %v1562_v14 = vld [vmem:[%s1970_s13 + $0x64] sm:$0xf0] }
  0x6d   : > { %v1475_v6 = vld [vmem:[%s1970_s13 + $0x170] sm:$0xf]  ;;  %v1596_v7 = vld [vmem:[%s1970_s13 + $0x174] sm:$0xf0]  ;;  %v1412_v8 = vor.u32 %v1580_v5, %v1411_v3  ;;  %v1403_v15 = vld [vmem:[%s1970_s13 + $0xe0] sm:$0xf]  ;;  %v1340_v17 = vor.u32 %v1562_v14, %v1339_v12 }
  0x6e   : > { %v1476_v9 = vor.u32 %v1596_v7, %v1475_v6  ;;  %v1539_v10 = vld [vmem:[%s1970_s13 + $0x1f0] sm:$0xf]  ;;  %v1612_v11 = vld [vmem:[%s1970_s13 + $0x1f4] sm:$0xf0]  ;;  %1005 = vmatpush.bf16.msra.mxu0 %v1348_v4  ;;  %v1578_v16 = vld [vmem:[%s1970_s13 + $0xe4] sm:$0xf0] }
  0x6f   : > { %v1540_v13 = vor.u32 %v1612_v11, %v1539_v10  ;;  %1018 = vmatpush.bf16.msra.mxu1 %v1412_v8  ;;  %v1404_v18 = vor.u32 %v1578_v16, %v1403_v15  ;;  %v1467_v19 = vld [vmem:[%s1970_s13 + $0x160] sm:$0xf]  ;;  %v1594_v20 = vld [vmem:[%s1970_s13 + $0x164] sm:$0xf0]  ;;  %v1331_v24 = vld [vmem:[%s1970_s13 + $0x50] sm:$0xf] }
  0x70   : > { %1031 = vmatpush.bf16.msra.mxu2 %v1476_v9  ;;  %v1531_v21 = vld [vmem:[%s1970_s13 + $0x1e0] sm:$0xf]  ;;  %v1468_v22 = vor.u32 %v1594_v20, %v1467_v19  ;;  %v1610_v23 = vld [vmem:[%s1970_s13 + $0x1e4] sm:$0xf0]  ;;  %v1560_v25 = vld [vmem:[%s1970_s13 + $0x54] sm:$0xf0] }
  0x71   : > { %1044 = vmatpush.bf16.msra.mxu3 %v1540_v13  ;;  %v1532_v26 = vor.u32 %v1610_v23, %v1531_v21  ;;  %v1395_v27 = vld [vmem:[%s1970_s13 + $0xd0] sm:$0xf]  ;;  %v1576_v28 = vld [vmem:[%s1970_s13 + $0xd4] sm:$0xf0]  ;;  %v1332_v30 = vor.u32 %v1560_v25, %v1331_v24  ;;  %v1323_v36 = vld [vmem:[%s1970_s13 + $0x40] sm:$0xf] }
  0x72   : > { %v1459_v29 = vld [vmem:[%s1970_s13 + $0x150] sm:$0xf]  ;;  %1006 = vmatpush.bf16.msra.mxu0 %v1340_v17  ;;  %v1592_v31 = vld [vmem:[%s1970_s13 + $0x154] sm:$0xf0]  ;;  %v1396_v34 = vor.u32 %v1576_v28, %v1395_v27  ;;  %v1558_v37 = vld [vmem:[%s1970_s13 + $0x44] sm:$0xf0] }
  0x73   : > { %v1523_v32 = vld [vmem:[%s1970_s13 + $0x1d0] sm:$0xf]  ;;  %v1608_v33 = vld [vmem:[%s1970_s13 + $0x1d4] sm:$0xf0]  ;;  %1019 = vmatpush.bf16.msra.mxu1 %v1404_v18  ;;  %v1460_v35 = vor.u32 %v1592_v31, %v1459_v29  ;;  %v1387_v38 = vld [vmem:[%s1970_s13 + $0xc0] sm:$0xf]  ;;  %v1324_v45 = vor.u32 %v1558_v37, %v1323_v36 }
  0x74   : > { %1032 = vmatpush.bf16.msra.mxu2 %v1468_v22  ;;  %v1524_v39 = vor.u32 %v1608_v33, %v1523_v32  ;;  %v1574_v40 = vld [vmem:[%s1970_s13 + $0xc4] sm:$0xf0]  ;;  %v1451_v41 = vld [vmem:[%s1970_s13 + $0x140] sm:$0xf]  ;;  %v1315_v48 = vld [vmem:[%s1970_s13 + $0x30] sm:$0xf] }
  0x75   : > { %1045 = vmatpush.bf16.msra.mxu3 %v1532_v26  ;;  %v1590_v42 = vld [vmem:[%s1970_s13 + $0x144] sm:$0xf0]  ;;  %v1515_v43 = vld [vmem:[%s1970_s13 + $0x1c0] sm:$0xf]  ;;  %v1388_v46 = vor.u32 %v1574_v40, %v1387_v38  ;;  %v1556_v49 = vld [vmem:[%s1970_s13 + $0x34] sm:$0xf0] }
  0x76   : > { %v1606_v44 = vld [vmem:[%s1970_s13 + $0x1c4] sm:$0xf0]  ;;  %1007 = vmatpush.bf16.msra.mxu0 %v1332_v30  ;;  %v1452_v47 = vor.u32 %v1590_v42, %v1451_v41  ;;  %v1379_v50 = vld [vmem:[%s1970_s13 + $0xb0] sm:$0xf]  ;;  %v1572_v52 = vld [vmem:[%s1970_s13 + $0xb4] sm:$0xf0]  ;;  %v1316_v57 = vor.u32 %v1556_v49, %v1315_v48 }
  0x77   : > { %1020 = vmatpush.bf16.msra.mxu1 %v1396_v34  ;;  %v1516_v51 = vor.u32 %v1606_v44, %v1515_v43  ;;  %v1443_v53 = vld [vmem:[%s1970_s13 + $0x130] sm:$0xf]  ;;  %v1588_v54 = vld [vmem:[%s1970_s13 + $0x134] sm:$0xf0]  ;;  %v1380_v58 = vor.u32 %v1572_v52, %v1379_v50  ;;  %v1307_v60 = vld [vmem:[%s1970_s13 + $0x20] sm:$0xf] }
  0x78   : > { %1033 = vmatpush.bf16.msra.mxu2 %v1460_v35  ;;  %v1507_v55 = vld [vmem:[%s1970_s13 + $0x1b0] sm:$0xf]  ;;  %v1604_v56 = vld [vmem:[%s1970_s13 + $0x1b4] sm:$0xf0]  ;;  %v1444_v59 = vor.u32 %v1588_v54, %v1443_v53  ;;  %v1554_v61 = vld [vmem:[%s1970_s13 + $0x24] sm:$0xf0] }
  0x79   : > { %1046 = vmatpush.bf16.msra.mxu3 %v1524_v39  ;;  %v1371_v62 = vld [vmem:[%s1970_s13 + $0xa0] sm:$0xf]  ;;  %v1508_v63 = vor.u32 %v1604_v56, %v1507_v55  ;;  %v1570_v0 = vld [vmem:[%s1970_s13 + $0xa4] sm:$0xf0]  ;;  %v1308_v5 = vor.u32 %v1554_v61, %v1307_v60  ;;  %v1299_v8 = vld [vmem:[%s1970_s13 + $0x10] sm:$0xf] }
  0x7a   : > { %1008 = vmatpush.bf16.msra.mxu0 %v1324_v45  ;;  %v1435_v1 = vld [vmem:[%s1970_s13 + $0x120] sm:$0xf]  ;;  %v1586_v2 = vld [vmem:[%s1970_s13 + $0x124] sm:$0xf0]  ;;  %v1372_v6 = vor.u32 %v1570_v0, %v1371_v62  ;;  %v1552_v9 = vld [vmem:[%s1970_s13 + $0x14] sm:$0xf0] }
  0x7b   : > { %1021 = vmatpush.bf16.msra.mxu1 %v1388_v46  ;;  %v1499_v3 = vld [vmem:[%s1970_s13 + $0x1a0] sm:$0xf]  ;;  %v1602_v4 = vld [vmem:[%s1970_s13 + $0x1a4] sm:$0xf0]  ;;  %v1436_v7 = vor.u32 %v1586_v2, %v1435_v1  ;;  %v1363_v10 = vld [vmem:[%s1970_s13 + $0x90] sm:$0xf]  ;;  %v1300_v17 = vor.u32 %v1552_v9, %v1299_v8 }
  0x7c   : > { %1034 = vmatpush.bf16.msra.mxu2 %v1452_v47  ;;  %v1500_v11 = vor.u32 %v1602_v4, %v1499_v3  ;;  %v1568_v12 = vld [vmem:[%s1970_s13 + $0x94] sm:$0xf0]  ;;  %v1427_v13 = vld [vmem:[%s1970_s13 + $0x110] sm:$0xf]  ;;  %v1291_v18 = vld [vmem:[%s1970_s13] sm:$0xf] }
  0x7d   : > { %1047 = vmatpush.bf16.msra.mxu3 %v1516_v51  ;;  %v1584_v14 = vld [vmem:[%s1970_s13 + $0x114] sm:$0xf0]  ;;  %v1491_v15 = vld [vmem:[%s1970_s13 + $0x190] sm:$0xf]  ;;  %v1550_v19 = vld [vmem:[%s1970_s13 + $0x4] sm:$0xf0]  ;;  %v1364_v21 = vor.u32 %v1568_v12, %v1363_v10 }
  0x7e   : > { %1009 = vmatpush.bf16.msra.mxu0 %v1316_v57  ;;  %v1600_v16 = vld [vmem:[%s1970_s13 + $0x194] sm:$0xf0]  ;;  %v1355_v20 = vld [vmem:[%s1970_s13 + $0x80] sm:$0xf]  ;;  %v1428_v22 = vor.u32 %v1584_v14, %v1427_v13  ;;  %v1566_v23 = vld [vmem:[%s1970_s13 + $0x84] sm:$0xf0]  ;;  %v1292_v33 = vor.u32 %v1550_v19, %v1291_v18 }
  0x7f   : > { %1022 = vmatpush.bf16.msra.mxu1 %v1380_v58  ;;  %v1419_v24 = vld [vmem:[%s1970_s13 + $0x100] sm:$0xf]  ;;  %v1582_v25 = vld [vmem:[%s1970_s13 + $0x104] sm:$0xf0]  ;;  %v1492_v26 = vor.u32 %v1600_v16, %v1491_v15  ;;  %v1563_v29 = vld [vmem:[%s1970_s13 + $0x74] sm:$0xf]  ;;  %v1356_v38 = vor.u32 %v1566_v23, %v1355_v20 }
  0x80   : > { %1035 = vmatpush.bf16.msra.mxu2 %v1444_v59  ;;  %v1483_v27 = vld [vmem:[%s1970_s13 + $0x180] sm:$0xf]  ;;  %v1598_v28 = vld [vmem:[%s1970_s13 + $0x184] sm:$0xf0]  ;;  %v1349_v30 = vld [vmem:[%s1970_s13 + $0x78] sm:$0xf0]  ;;  %v1420_v39 = vor.u32 %v1582_v25, %v1419_v24 }
  0x81   : > { %1048 = vmatpush.bf16.msra.mxu3 %v1508_v63  ;;  %v1579_v31 = vld [vmem:[%s1970_s13 + $0xf4] sm:$0xf]  ;;  %v606_v32 = vld [vmem:[%s1952_s30 + $0x8] sm:$0xff]  ;;  %v1484_v43 = vor.u32 %v1598_v28, %v1483_v27  ;;  %v1352_v44 = vor.u32 %v1563_v29, %v1349_v30  ;;  %v1561_v48 = vld [vmem:[%s1970_s13 + $0x64] sm:$0xf]  ;;  %p1545_p13 = scmp.ne.s32.totalorder %s1708_s17, 8 }
  0x82   : > { %1010 = vmatpush.bf16.msra.mxu0 %v1308_v5  ;;  %v1413_v34 = vld [vmem:[%s1970_s13 + $0xf8] sm:$0xf0]  ;;  %v1595_v35 = vld [vmem:[%s1970_s13 + $0x174] sm:$0xf]  ;;  %v675_v37 = vunpack.c.l.b16 %v606_v32  ;;  %v676_v42 = vunpack.c.h.b16 %v606_v32  ;;  %v1341_v49 = vld [vmem:[%s1970_s13 + $0x68] sm:$0xf0] }
  0x83   : > { %1023 = vmatpush.bf16.msra.mxu1 %v1372_v6  ;;  %v1477_v36 = vld [vmem:[%s1970_s13 + $0x178] sm:$0xf0]  ;;  %v1611_v40 = vld [vmem:[%s1970_s13 + $0x1f4] sm:$0xf]  ;;  %v1416_v46 = vor.u32 %v1579_v31, %v1413_v34  ;;  %v1577_v50 = vld [vmem:[%s1970_s13 + $0xe4] sm:$0xf]  ;;  %v1344_v62 = vor.u32 %v1561_v48, %v1341_v49 }
  0x84   : > { %1036 = vmatpush.bf16.msra.mxu2 %v1436_v7  ;;  %v1541_v41 = vld [vmem:[%s1970_s13 + $0x1f8] sm:$0xf0]  ;;  %v605_v45 = vld [vmem:[%s1952_s30] sm:$0xff]  ;;  %v1480_v47 = vor.u32 %v1595_v35, %v1477_v36  ;;  %v1405_v54 = vld [vmem:[%s1970_s13 + $0xe8] sm:$0xf0]  ;;  %v2053_v57 = vpack.c.b16 %v675_v37, %v675_v37  ;;  %v2057_v60 = vpack.c.b16 %v676_v42, %v676_v42 }
  0x85   : > { %1049 = vmatpush.bf16.msra.mxu3 %v1500_v11  ;;  %v673_v51 = vunpack.c.l.b16 %v605_v45  ;;  %v674_v52 = vunpack.c.h.b16 %v605_v45  ;;  %v1544_v53 = vor.u32 %v1611_v40, %v1541_v41  ;;  %v1593_v55 = vld [vmem:[%s1970_s13 + $0x164] sm:$0xf]  ;;  %v1469_v56 = vld [vmem:[%s1970_s13 + $0x168] sm:$0xf0]  ;;  %v1408_v0 = vor.u32 %v1577_v50, %v1405_v54  ;;  %v1559_v2 = vld [vmem:[%s1970_s13 + $0x54] sm:$0xf] }
  0x86   : > { %1011 = vmatpush.bf16.msra.mxu0 %v1300_v17  ;;  %v1609_v58 = vld [vmem:[%s1970_s13 + $0x1e4] sm:$0xf]  ;;  %v1533_v59 = vld [vmem:[%s1970_s13 + $0x1e8] sm:$0xf0]  ;;  %v1472_v1 = vor.u32 %v1593_v55, %v1469_v56  ;;  %v1333_v3 = vld [vmem:[%s1970_s13 + $0x58] sm:$0xf0] }
  0x87   : > { %1024 = vmatpush.bf16.msra.mxu1 %v1364_v21  ;;  %v2059_v61 = vpack.c.b16 %v673_v51, %v673_v51  ;;  %v2061_v63 = vpack.c.b16 %v674_v52, %v674_v52  ;;  %v1575_v4 = vld [vmem:[%s1970_s13 + $0xd4] sm:$0xf]  ;;  %v1536_v5 = vor.u32 %v1609_v58, %v1533_v59  ;;  %v1397_v6 = vld [vmem:[%s1970_s13 + $0xd8] sm:$0xf0]  ;;  %v1336_v11 = vor.u32 %v1559_v2, %v1333_v3  ;;  %v1557_v14 = vld [vmem:[%s1970_s13 + $0x44] sm:$0xf] }
  0x88   : > { %1037 = vmatpush.bf16.msra.mxu2 %v1428_v22  ;;  %v1591_v7 = vld [vmem:[%s1970_s13 + $0x154] sm:$0xf]  ;;  %v1461_v8 = vld [vmem:[%s1970_s13 + $0x158] sm:$0xf0]  ;;  %v1400_v12 = vor.u32 %v1575_v4, %v1397_v6  ;;  %v1325_v15 = vld [vmem:[%s1970_s13 + $0x48] sm:$0xf0] }
  0x89   : > { %1050 = vmatpush.bf16.msra.mxu3 %v1492_v26  ;;  %v1607_v9 = vld [vmem:[%s1970_s13 + $0x1d4] sm:$0xf]  ;;  %v1525_v10 = vld [vmem:[%s1970_s13 + $0x1d8] sm:$0xf0]  ;;  %v1464_v13 = vor.u32 %v1591_v7, %v1461_v8  ;;  %v1573_v16 = vld [vmem:[%s1970_s13 + $0xc4] sm:$0xf]  ;;  %v1328_v23 = vor.u32 %v1557_v14, %v1325_v15 }
  0x8a   : > { %1012 = vmatpush.bf16.msra.mxu0 %v1292_v33  ;;  %v1528_v17 = vor.u32 %v1607_v9, %v1525_v10  ;;  %v1389_v18 = vld [vmem:[%s1970_s13 + $0xc8] sm:$0xf0]  ;;  %v1589_v19 = vld [vmem:[%s1970_s13 + $0x144] sm:$0xf]  ;;  %v1555_v26 = vld [vmem:[%s1970_s13 + $0x34] sm:$0xf] }
  0x8b   : > { %1025 = vmatpush.bf16.msra.mxu1 %v1356_v38  ;;  %v1453_v20 = vld [vmem:[%s1970_s13 + $0x148] sm:$0xf0]  ;;  %v1605_v21 = vld [vmem:[%s1970_s13 + $0x1c4] sm:$0xf]  ;;  %v1392_v24 = vor.u32 %v1573_v16, %v1389_v18  ;;  %v1317_v27 = vld [vmem:[%s1970_s13 + $0x38] sm:$0xf0] }
  0x8c   : > { %1038 = vmatpush.bf16.msra.mxu2 %v1420_v39  ;;  %v1517_v22 = vld [vmem:[%s1970_s13 + $0x1c8] sm:$0xf0]  ;;  %v1456_v25 = vor.u32 %v1589_v19, %v1453_v20  ;;  %v1571_v28 = vld [vmem:[%s1970_s13 + $0xb4] sm:$0xf]  ;;  %v1381_v30 = vld [vmem:[%s1970_s13 + $0xb8] sm:$0xf0]  ;;  %v1320_v35 = vor.u32 %v1555_v26, %v1317_v27 }
  0x8d   : > { %1051 = vmatpush.bf16.msra.mxu3 %v1484_v43  ;;  %1013 = vmatmul.bf16.vlgmr.msra.gmra.mxu0 %v2059_v61  ;;  %v1520_v29 = vor.u32 %v1605_v21, %v1517_v22  ;;  %v1587_v31 = vld [vmem:[%s1970_s13 + $0x134] sm:$0xf]  ;;  %v1445_v32 = vld [vmem:[%s1970_s13 + $0x138] sm:$0xf0]  ;;  %v1384_v36 = vor.u32 %v1571_v28, %v1381_v30  ;;  %v1553_v38 = vld [vmem:[%s1970_s13 + $0x24] sm:$0xf] }
  0x8e   : > { %1057 = vmatpush.bf16.msrb.mxu0 %v1352_v44  ;;  %1026 = vmatmul.bf16.vlgmr.msra.gmra.mxu1 %v2061_v63  ;;  %v1603_v33 = vld [vmem:[%s1970_s13 + $0x1b4] sm:$0xf]  ;;  %v1509_v34 = vld [vmem:[%s1970_s13 + $0x1b8] sm:$0xf0]  ;;  %v1448_v37 = vor.u32 %v1587_v31, %v1445_v32  ;;  %v1309_v39 = vld [vmem:[%s1970_s13 + $0x28] sm:$0xf0] }
  0x8f   : > { %1070 = vmatpush.bf16.msrb.mxu1 %v1416_v46  ;;  %1039 = vmatmul.bf16.vlgmr.msra.gmra.mxu2 %v2053_v57  ;;  %v1569_v40 = vld [vmem:[%s1970_s13 + $0xa4] sm:$0xf]  ;;  %v1512_v41 = vor.u32 %v1603_v33, %v1509_v34  ;;  %v1373_v42 = vld [vmem:[%s1970_s13 + $0xa8] sm:$0xf0]  ;;  %v1551_v50 = vld [vmem:[%s1970_s13 + $0x14] sm:$0xf] }
  0x90   : > { %1083 = vmatpush.bf16.msrb.mxu2 %v1480_v47  ;;  %1052 = vmatmul.bf16.vlgmr.msra.gmra.mxu3 %v2057_v60  ;;  %v1585_v43 = vld [vmem:[%s1970_s13 + $0x124] sm:$0xf]  ;;  %v1437_v44 = vld [vmem:[%s1970_s13 + $0x128] sm:$0xf0]  ;;  %v1312_v47 = vor.u32 %v1553_v38, %v1309_v39  ;;  %v1376_v48 = vor.u32 %v1569_v40, %v1373_v42  ;;  %v1301_v51 = vld [vmem:[%s1970_s13 + $0x18] sm:$0xf0] }
  0x91   : > { %1096 = vmatpush.bf16.msrb.mxu3 %v1544_v53  ;;  %v1601_v45 = vld [vmem:[%s1970_s13 + $0x1a4] sm:$0xf]  ;;  %v1501_v46 = vld [vmem:[%s1970_s13 + $0x1a8] sm:$0xf0]  ;;  %v1440_v49 = vor.u32 %v1585_v43, %v1437_v44  ;;  %v1567_v52 = vld [vmem:[%s1970_s13 + $0x94] sm:$0xf] }
  0x92   : > { %1058 = vmatpush.bf16.msrb.mxu0 %v1344_v62  ;;  %v1504_v53 = vor.u32 %v1601_v45, %v1501_v46  ;;  %v1365_v54 = vld [vmem:[%s1970_s13 + $0x98] sm:$0xf0]  ;;  %v1583_v55 = vld [vmem:[%s1970_s13 + $0x114] sm:$0xf]  ;;  %v1304_v62 = vor.u32 %v1551_v50, %v1301_v51  ;;  %v1549_v2 = vld [vmem:[%s1970_s13 + $0x4] sm:$0xf] }
  0x93   : > { %1071 = vmatpush.bf16.msrb.mxu1 %v1408_v0  ;;  %v1429_v56 = vld [vmem:[%s1970_s13 + $0x118] sm:$0xf0]  ;;  %v1599_v58 = vld [vmem:[%s1970_s13 + $0x194] sm:$0xf]  ;;  %v1368_v0 = vor.u32 %v1567_v52, %v1365_v54  ;;  %v1293_v3 = vld [vmem:[%s1970_s13 + $0x8] sm:$0xf0] }
  0x94   : > { %1084 = vmatpush.bf16.msrb.mxu2 %v1472_v1  ;;  %v1493_v59 = vld [vmem:[%s1970_s13 + $0x198] sm:$0xf0]  ;;  %v1432_v1 = vor.u32 %v1583_v55, %v1429_v56  ;;  %v1565_v4 = vld [vmem:[%s1970_s13 + $0x84] sm:$0xf]  ;;  %v1357_v6 = vld [vmem:[%s1970_s13 + $0x88] sm:$0xf0] }
  0x95   : > { %1097 = vmatpush.bf16.msrb.mxu3 %v1536_v5  ;;  %v1496_v5 = vor.u32 %v1599_v58, %v1493_v59  ;;  %v1581_v7 = vld [vmem:[%s1970_s13 + $0x104] sm:$0xf]  ;;  %v1421_v8 = vld [vmem:[%s1970_s13 + $0x108] sm:$0xf0]  ;;  %v603_v21 = vld [vmem:[#allocation2] sm:$0xff] }
  0x96   : > { %1059 = vmatpush.bf16.msrb.mxu0 %v1336_v11  ;;  %v1597_v9 = vld [vmem:[%s1970_s13 + $0x184] sm:$0xf]  ;;  %v1485_v10 = vld [vmem:[%s1970_s13 + $0x188] sm:$0xf0]  ;;  %v1296_v11 = vor.u32 %v1549_v2, %v1293_v3  ;;  %v604_v31 = vld [vmem:[#allocation2 + $0x8] sm:$0xff] }
  0x97   : > { %1072 = vmatpush.bf16.msrb.mxu1 %v1400_v12  ;;  %v1360_v12 = vor.u32 %v1565_v4, %v1357_v6  ;;  %v1488_v14 = vor.u32 %v1597_v9, %v1485_v10 }
  0x98   : > { %1085 = vmatpush.bf16.msrb.mxu2 %v1464_v13  ;;  %v1424_v13 = vor.u32 %v1581_v7, %v1421_v8 }
  0x99   : > { %1098 = vmatpush.bf16.msrb.mxu3 %v1528_v17 }
  0x9a   : > { %1060 = vmatpush.bf16.msrb.mxu0 %v1328_v23 }
  0x9b   : > { %1073 = vmatpush.bf16.msrb.mxu1 %v1392_v24 }
  0x9c   : > { %1086 = vmatpush.bf16.msrb.mxu2 %v1456_v25 }
  0x9d   : > { %1099 = vmatpush.bf16.msrb.mxu3 %v1520_v29 }
  0x9e   : > { %1061 = vmatpush.bf16.msrb.mxu0 %v1320_v35 }
  0x9f   : > { %1074 = vmatpush.bf16.msrb.mxu1 %v1384_v36 }
  0xa0   : > { %1087 = vmatpush.bf16.msrb.mxu2 %v1448_v37 }
  0xa1   : > { %1100 = vmatpush.bf16.msrb.mxu3 %v1512_v41 }
  0xa2   : > { %1062 = vmatpush.bf16.msrb.mxu0 %v1312_v47 }
  0xa3   : > { %1075 = vmatpush.bf16.msrb.mxu1 %v1376_v48 }
  0xa4   : > { %1088 = vmatpush.bf16.msrb.mxu2 %v1440_v49 }
  0xa5   : > { %1101 = vmatpush.bf16.msrb.mxu3 %v1504_v53 }
  0xa6   : > { %1063 = vmatpush.bf16.msrb.mxu0 %v1304_v62 }
  0xa7   : > { %1076 = vmatpush.bf16.msrb.mxu1 %v1368_v0 }
  0xa8   : > { %1089 = vmatpush.bf16.msrb.mxu2 %v1432_v1 }
  0xa9   : > { %1102 = vmatpush.bf16.msrb.mxu3 %v1496_v5 }
  0xaa   : > { %1064 = vmatpush.bf16.msrb.mxu0 %v1296_v11 }
  0xab   : > { %1077 = vmatpush.bf16.msrb.mxu1 %v1360_v12 }
  0xac   : > { %1090 = vmatpush.bf16.msrb.mxu2 %v1424_v13 }
  0xad   : > { %1103 = vmatpush.bf16.msrb.mxu3 %v1488_v14  ;;  %1065 = vmatmul.bf16.vlgmr.msrb.gmra.mxu0 %v2059_v61 }
  0xae   : > { %1078 = vmatmul.bf16.vlgmr.msrb.gmra.mxu1 %v2061_v63 }
  0xaf   : > { %1091 = vmatmul.bf16.vlgmr.msrb.gmra.mxu2 %v2053_v57 }
  0xb0   : > { %1104 = vmatmul.bf16.vlgmr.msrb.gmra.mxu3 %v2057_v60 }
 0x10a   : > { %v1014_v15 = vpop.f32.mrf.mxu0 }
 0x10b   : > { %v1027_v16 = vpop.f32.mrf.mxu1 }
 0x10c   : > { %v1028_v17 = vadd.f32 %v1027_v16, %v1014_v15 }
 0x112   : > { %v1040_v18 = vpop.f32.mrf.mxu2  ;;  %v1016_v23 = vpop.f32.mrf.mxu0 }
 0x113   : > { %v1041_v19 = vadd.f32 %v1040_v18, %v1028_v17  ;;  %v1053_v20 = vpop.f32.mrf.mxu3  ;;  %v1029_v24 = vpop.f32.mrf.mxu1 }
 0x115   : > { %v1054_v22 = vadd.f32 %v1053_v20, %v1041_v19 }
 0x117   : > { %v1109_v25 = vadd.f32 %v1054_v22, %v603_v21 }
 0x119   : > { %1111 = vst [vmem:[#allocation2] sm:$0xff] %v1109_v25 }
 0x11a   : > { %v1042_v26 = vpop.f32.mrf.mxu2 }
 0x11b   : > { %v1055_v61 = vpop.f32.mrf.mxu3 }
 0x12a   : > { %v1066_v27 = vpop.f32.mrf.mxu0 }
 0x12b   : > { %v1079_v63 = vpop.f32.mrf.mxu1 }
 0x12c   : > { %v1080_v28 = vadd.f32 %v1079_v63, %v1066_v27 }
 0x132   : > { %v1092_v57 = vpop.f32.mrf.mxu2  ;;  %v1068_v30 = vpop.f32.mrf.mxu0 }
 0x133   : > { %v1093_v29 = vadd.f32 %v1092_v57, %v1080_v28  ;;  %v1105_v60 = vpop.f32.mrf.mxu3  ;;  %v1081_v32 = vpop.f32.mrf.mxu1 }
 0x135   : > { %v1106_v33 = vadd.f32 %v1105_v60, %v1093_v29 }
 0x137   : > { %v1110_v34 = vadd.f32 %v1106_v33, %v604_v31  ;;  %1116 = sbr.rel (%p1545_p13) target bundleno = 328 (0x148), region = 82 }
 0x139   : > { %1112 = vst [vmem:[#allocation2 + $0x8] sm:$0xff] %v1110_v34 }
 0x13a   : > { %v1094_v35 = vpop.f32.mrf.mxu2 }
 0x13b   : > { %v1107_v36 = vpop.f32.mrf.mxu3 }
 0x13c   : > { %v1117_v37 = vld [vmem:[#allocation2] sm:$0xff] }
 0x13d   : > { %v1119_v38 = vld [vmem:[%s580_s15] sm:$0x3] }
 0x13e   : > { %v1127_v39 = vld [vmem:[%s585_s18] sm:$0x3]  ;;  %v1121_v40 = vperm.slane %v1119_v38, 0  ;;  %v1122_v43 = vperm.slane %v1119_v38, 1 }
 0x13f   : > { %v1129_v41 = vperm.slane %v1127_v39, 0  ;;  %v1130_v44 = vperm.slane %v1127_v39, 1 }
 0x140   : > { %v1118_v42 = vld [vmem:[#allocation2 + $0x8] sm:$0xff]  ;;  %v1125_v45 = vmul.f32 %v1121_v40, %v1117_v37 }
 0x141   : > { %v1126_v46 = vmul.f32 %v1122_v43, %v1118_v42 }
 0x142   : > { %v1133_v47 = vadd.f32 %v1129_v41, %v1125_v45 }
 0x143   : > { %v1134_v48 = vadd.f32 %v1130_v44, %v1126_v46 }
 0x144   : > { %v1135_v49 = vmax.f32 %v1133_v47, 0.0 }
 0x145   : > { %v1136_v50 = vmax.f32 %v1134_v48, 0.0 }
 0x146   : > { %1137 = vst [vmem:[%s1968_s12] sm:$0xff] %v1135_v49 }
 0x147   : > { %1138 = vst [vmem:[%s1968_s12 + $0x8] sm:$0xff] %v1136_v50 }
 0x148 PF: > { %s14_s21 = sadd.s32 1, %s1724_s21   ;;  %s2158_s15 = smov %s1704_s16 }
 0x149   : > { %p11_p0 = scmp.ge.s32.totalorder %s14_s21, 20   ;;  %s2159_s16 = smov %s1803_s28 }
 0x14a   : > { %s2160_s17 = smov %s1716_s19  ;;  %s2161_s18 = smov %s1720_s20 }
 0x14b   : > { %s2162_s19 = smov %s2165_s22  ;;  %s2163_s20 = smov %s2169_s23 }
 0x14c   :  { %13 = sbr.rel (!%p11_p0) target bundleno = 4 (0x4), region = 126 }

// kernel: _lambda_.39
= control target key start
LH: loop header
LB: loop body
LE: loop exit
PB: predicated region body
PF: predicated region fallthrough
CT: control target
= control target key end

     0   :  { %10 = vsyncpa [#allocation4], 0  ;;  %s1946_s0 = inlined_call_operand.vmem [shape: bf16[8,4608], index: 0, kind: input, shape index: {}]   ;;  %s1947_s1 = inlined_call_operand.hbm [shape: bf16[4608,512], index: 1, kind: input, shape index: {}]   ;;  %s1948_s2 = inlined_call_operand.vmem [shape: f32[1,512], index: 2, kind: input, shape index: {}]   ;;  %s1949_s3 = inlined_call_operand.vmem [shape: f32[1,512], index: 3, kind: input, shape index: {}]   ;;  %s1950_s4 = inlined_call_operand.vmem [shape: f32[8,512], index: 4, kind: input, shape index: {}]   ;;  %s1951_s5 = inlined_call_operand.vmem [shape: f32[8,512], index: 5, kind: output, shape index: {}]  }
   0x1   :  { %12 = vsyncpa [#allocation4 + $0x1], 0  ;;  %s1646_s18 = smov 0   ;;  %s1648_s19 = smov 0  }
   0x2   :  { %s1650_s20 = smov 0   ;;  %s1652_s21 = smov 0  }
   0x3   :  { %s1654_s22 = smov 0   ;;  %s1656_s23 = smov 0  }
   0x4   :  { %s1658_s24 = smov 0   ;;  %s1660_s25 = smov 0  }
   0x5 LB: > { %1955 = sst [smem:[#allocation6_spill]] %s1606_s24  ;;  %s1095_s26 = sadd.s32 4294967295, %s1610_s25   ;;  %s1610_s25 = sphi %s1660_s25, %s18_s25   ;;  %s1606_s24 = sphi %s1658_s24, %s1968_s24   ;;  %s1602_s23 = sphi %s1656_s23, %s1967_s23   ;;  %s1598_s22 = sphi %s1654_s22, %s1960_s22   ;;  %s1594_s21 = sphi %s1652_s21, %s1966_s21   ;;  %s1590_s20 = sphi %s1650_s20, %s1965_s20   ;;  %s1586_s19 = sphi %s1648_s19, %s1964_s19   ;;  %s1582_s18 = sphi %s1646_s18, %s1963_s18  }
   0x6   : > { %s30_s27 = sadd.s32 1, %s1602_s23  ;;  %s33_s28 = sadd.s32 1, %s1606_s24 }
   0x7   : > { %p31_p0 = scmp.ge.s32.totalorder %s30_s27, 9  ;;  %s74_s29 = sadd.s32 1, %s1590_s20 }
   0x8   : > { %p81_p1 = scmp.ne.s32.totalorder %s1590_s20, %s1586_s19  ;;  %p82_p2 = scmp.eq.s32.totalorder %s1610_s25, 0 }
   0x9   : > { %s1970_s27 = smov (%p31_p0, %s30_s27), 0  ;;  %s1972_s28 = smov (!%p31_p0, %s33_s28), %s1606_s24 }
   0xa   : > { %1956 = sst [smem:[#allocation7_spill]] %s1970_s27  ;;  %s69_s30 = ssub.s32 %s1602_s23, %s1970_s27 }
   0xb   : > { %p35_p3 = scmp.ge.s32.totalorder %s1972_s28, 2  ;;  %p87_p4 = scmp.ne.s32.totalorder %s1586_s19, %s1582_s18 }
   0xc   : > { %p1697_p5 = por %p82_p2, %p81_p1  ;;  %p88_p6 = scmp.eq.s32.totalorder %s1095_s26, 0 }
   0xd   : > { %s1974_s28 = smov (%p35_p3, %s1972_s28), 0  ;;  %p1445_p8 = scmp.lt.s32.totalorder %s1610_s25, 18 }
   0xe   : > { %1958 = sst [smem:[#allocation8_spill]] %s1974_s28  ;;  %p1703_p7 = por %p88_p6, %p87_p4 }
   0xf   : > { %s70_s8 = ssub.s32 %s1606_s24, %s1974_s28  ;;  %s232_s10 = sand.u32 1, %s1590_s20  }
  0x10   : > { %s71_s9 = sor.u32 %s70_s8, %s69_s30  ;;  %s1099_s11 = sshll.u32 %s232_s10, 9 }
  0x11   : > { %p72_p9 = scmp.eq.s32.totalorder %s71_s9, 0  ;;  %s1101_s12 = sshll.u32 %s1606_s24, 1 }
  0x12   : > { %s1374_s14 = sshll.u32 %s1602_s23, 8  ;;  %s236_s16 = scalar_lea.vmem [#allocation3], %s1099_s11 }
  0x13   : > { %s1713_s13 = scalar_select %p72_p9, %s1590_s20, %s74_s29  }
  0x14   : > { %s242_s15 = sadd.s32 %s1374_s14, %s1101_s12  ;;  %s247_s17 = sshll.u32 %s236_s16, 4  ;;  %s248_s17 = int_to_ptr.vmem [resolvable:$true] %s247_s17 }
  0x15   : > { %s1103_s18 = sshll.u32 %s242_s15, 2  ;;  %p1442_p10 = pnand %p1445_p8, %p1697_p5 }
  0x16   : > { %s244_s28 = scalar_lea.hbm %s1947_s1, %s1103_s18  ;;  %s233_s8 = scalar_lea.sflag [#allocation4], %s232_s10 }
  0x17   : > { %s245_s30 = sshll.u32 %s244_s28, 4  ;;  %s1612_s29 = smov 256   ;;  %s246_s30 = int_to_ptr.hbm [resolvable:$true] %s245_s30 }
  0x18   : > { %s1613_s9 = smov 128   ;;  %s1614_s24 = smov 8  }
  0x19   : > { %1444 = dma.hbm_to_vmem [thread:$0]  (!%p1442_p10), %s246_s30, 8192, %s248_s17, %s233_s8, %s1612_s29, %s1613_s9, %s1614_s24  }
  0x1a   : > { %p1104_p11 = scmp.ge.s32.totalorder %s1610_s25, 1  ;;  %p284_p12 = scmp.lt.s32.totalorder %s1610_s25, 19 }
  0x1c   : > { %p285_p13 = pnand %p1104_p11, %p284_p12 }
  0x1d   : > { %s290_s11 = sand.u32 (!%p285_p13), 1, %s1586_s19  }
  0x1e   : > { %288 = sbr.rel (%p285_p13) target bundleno = 273 (0x111), region = 40  ;;  %s1105_s12 = sshll.u32 (!%p285_p13), %s290_s11, 9 }
  0x1f   : > { %s291_s27 = scalar_lea.sflag (!%p285_p13), [#allocation4], %s290_s11  ;;  %s1726_s14 = scalar_lea.vmem (!%p285_p13), [#allocation3], %s1105_s12 }
  0x23   : > { %1577 = dma.done.wait (%p1703_p7), %s291_s27, 8192  }
  0x24   : > { %1579 = vsyncadd (%p1703_p7), %s291_s27, 4294959104  ;;  %s1106_s28 = sshll.u32 %s1594_s21, 2  ;;  %s1108_s24 = sshll.u32 %s1598_s22, 1 }
  0x25   : > { %p355_p0 = scmp.lt.s32.totalorder %s1106_s28, 35  ;;  %p365_p1 = scmp.lt.s32.totalorder %s1108_s24, 3 }
  0x26   : > { %p1114_p2 = scmp.ne.s32.totalorder %s1594_s21, 0 }
  0x27   : > { %s1976_s28 = smov (!%p355_p0, %s1106_s28), 35  ;;  %s1978_s24 = smov (!%p365_p1, %s1108_s24), 3 }
  0x28   : > { %s1107_s6 = sshll.u32 %s1976_s28, 2  ;;  %s367_s18 = scalar_lea.vmem %s1948_s2, %s1978_s24 }
  0x29   : > { %s1739_s16 = scalar_lea.vmem %s1946_s0, %s1107_s6  ;;  %s372_s30 = scalar_lea.vmem %s1949_s3, %s1978_s24 }
  0x2a   : > { %s1111_s8 = sshll.u32 %s1978_s24, 3  ;;  %397 = sbr.rel (%p1114_p2) target bundleno = 50 (0x32), region = 48 }
  0x2b   : > { %s1753_s11 = scalar_lea.vmem %s1950_s4, %s1111_s8  ;;  %s1758_s28 = scalar_lea.vmem %s1951_s5, %s1111_s8 }
  0x2f   : > { %v1615_v0 = vmov 0.0  }
  0x30   : > { %398 = vst [vmem:[#allocation2] sm:$0xff] %v1615_v0 }
  0x31   : > { %399 = vst [vmem:[#allocation2 + $0x8] sm:$0xff] %v1615_v0 }
  0x32 PF: > { %v1173_v1 = vld [vmem:[%s1726_s14 + $0x70] sm:$0xf]  ;;  %v1390_v2 = vld [vmem:[%s1726_s14 + $0x74] sm:$0xf0]  ;;  %v1165_v12 = vld [vmem:[%s1726_s14 + $0x60] sm:$0xf] }
  0x33   : > { %v1237_v3 = vld [vmem:[%s1726_s14 + $0xf0] sm:$0xf]  ;;  %v1174_v4 = vor.u32 %v1390_v2, %v1173_v1  ;;  %v1406_v5 = vld [vmem:[%s1726_s14 + $0xf4] sm:$0xf0]  ;;  %v1388_v14 = vld [vmem:[%s1726_s14 + $0x64] sm:$0xf0] }
  0x34   : > { %v1301_v6 = vld [vmem:[%s1726_s14 + $0x170] sm:$0xf]  ;;  %v1422_v7 = vld [vmem:[%s1726_s14 + $0x174] sm:$0xf0]  ;;  %v1238_v8 = vor.u32 %v1406_v5, %v1237_v3  ;;  %v1229_v15 = vld [vmem:[%s1726_s14 + $0xe0] sm:$0xf]  ;;  %v1166_v17 = vor.u32 %v1388_v14, %v1165_v12 }
  0x35   : > { %v1302_v9 = vor.u32 %v1422_v7, %v1301_v6  ;;  %v1365_v10 = vld [vmem:[%s1726_s14 + $0x1f0] sm:$0xf]  ;;  %v1438_v11 = vld [vmem:[%s1726_s14 + $0x1f4] sm:$0xf0]  ;;  %802 = vmatpush.bf16.msra.mxu0 %v1174_v4  ;;  %v1404_v16 = vld [vmem:[%s1726_s14 + $0xe4] sm:$0xf0] }
  0x36   : > { %v1366_v13 = vor.u32 %v1438_v11, %v1365_v10  ;;  %815 = vmatpush.bf16.msra.mxu1 %v1238_v8  ;;  %v1230_v18 = vor.u32 %v1404_v16, %v1229_v15  ;;  %v1293_v19 = vld [vmem:[%s1726_s14 + $0x160] sm:$0xf]  ;;  %v1420_v20 = vld [vmem:[%s1726_s14 + $0x164] sm:$0xf0]  ;;  %v1157_v24 = vld [vmem:[%s1726_s14 + $0x50] sm:$0xf] }
  0x37   : > { %828 = vmatpush.bf16.msra.mxu2 %v1302_v9  ;;  %v1357_v21 = vld [vmem:[%s1726_s14 + $0x1e0] sm:$0xf]  ;;  %v1294_v22 = vor.u32 %v1420_v20, %v1293_v19  ;;  %v1436_v23 = vld [vmem:[%s1726_s14 + $0x1e4] sm:$0xf0]  ;;  %v1386_v25 = vld [vmem:[%s1726_s14 + $0x54] sm:$0xf0] }
  0x38   : > { %841 = vmatpush.bf16.msra.mxu3 %v1366_v13  ;;  %v1358_v26 = vor.u32 %v1436_v23, %v1357_v21  ;;  %v1221_v27 = vld [vmem:[%s1726_s14 + $0xd0] sm:$0xf]  ;;  %v1402_v28 = vld [vmem:[%s1726_s14 + $0xd4] sm:$0xf0]  ;;  %v1158_v30 = vor.u32 %v1386_v25, %v1157_v24  ;;  %v1149_v36 = vld [vmem:[%s1726_s14 + $0x40] sm:$0xf] }
  0x39   : > { %v1285_v29 = vld [vmem:[%s1726_s14 + $0x150] sm:$0xf]  ;;  %803 = vmatpush.bf16.msra.mxu0 %v1166_v17  ;;  %v1418_v31 = vld [vmem:[%s1726_s14 + $0x154] sm:$0xf0]  ;;  %v1222_v34 = vor.u32 %v1402_v28, %v1221_v27  ;;  %v1384_v37 = vld [vmem:[%s1726_s14 + $0x44] sm:$0xf0] }
  0x3a   : > { %v1349_v32 = vld [vmem:[%s1726_s14 + $0x1d0] sm:$0xf]  ;;  %v1434_v33 = vld [vmem:[%s1726_s14 + $0x1d4] sm:$0xf0]  ;;  %816 = vmatpush.bf16.msra.mxu1 %v1230_v18  ;;  %v1286_v35 = vor.u32 %v1418_v31, %v1285_v29  ;;  %v1213_v38 = vld [vmem:[%s1726_s14 + $0xc0] sm:$0xf]  ;;  %v1150_v45 = vor.u32 %v1384_v37, %v1149_v36 }
  0x3b   : > { %829 = vmatpush.bf16.msra.mxu2 %v1294_v22  ;;  %v1350_v39 = vor.u32 %v1434_v33, %v1349_v32  ;;  %v1400_v40 = vld [vmem:[%s1726_s14 + $0xc4] sm:$0xf0]  ;;  %v1277_v41 = vld [vmem:[%s1726_s14 + $0x140] sm:$0xf]  ;;  %v1141_v48 = vld [vmem:[%s1726_s14 + $0x30] sm:$0xf] }
  0x3c   : > { %842 = vmatpush.bf16.msra.mxu3 %v1358_v26  ;;  %v1416_v42 = vld [vmem:[%s1726_s14 + $0x144] sm:$0xf0]  ;;  %v1341_v43 = vld [vmem:[%s1726_s14 + $0x1c0] sm:$0xf]  ;;  %v1214_v46 = vor.u32 %v1400_v40, %v1213_v38  ;;  %v1382_v49 = vld [vmem:[%s1726_s14 + $0x34] sm:$0xf0] }
  0x3d   : > { %v1432_v44 = vld [vmem:[%s1726_s14 + $0x1c4] sm:$0xf0]  ;;  %804 = vmatpush.bf16.msra.mxu0 %v1158_v30  ;;  %v1278_v47 = vor.u32 %v1416_v42, %v1277_v41  ;;  %v1205_v50 = vld [vmem:[%s1726_s14 + $0xb0] sm:$0xf]  ;;  %v1398_v52 = vld [vmem:[%s1726_s14 + $0xb4] sm:$0xf0]  ;;  %v1142_v57 = vor.u32 %v1382_v49, %v1141_v48 }
  0x3e   : > { %817 = vmatpush.bf16.msra.mxu1 %v1222_v34  ;;  %v1342_v51 = vor.u32 %v1432_v44, %v1341_v43  ;;  %v1269_v53 = vld [vmem:[%s1726_s14 + $0x130] sm:$0xf]  ;;  %v1414_v54 = vld [vmem:[%s1726_s14 + $0x134] sm:$0xf0]  ;;  %v1206_v58 = vor.u32 %v1398_v52, %v1205_v50  ;;  %v1133_v60 = vld [vmem:[%s1726_s14 + $0x20] sm:$0xf] }
  0x3f   : > { %830 = vmatpush.bf16.msra.mxu2 %v1286_v35  ;;  %v1333_v55 = vld [vmem:[%s1726_s14 + $0x1b0] sm:$0xf]  ;;  %v1430_v56 = vld [vmem:[%s1726_s14 + $0x1b4] sm:$0xf0]  ;;  %v1270_v59 = vor.u32 %v1414_v54, %v1269_v53  ;;  %v1380_v61 = vld [vmem:[%s1726_s14 + $0x24] sm:$0xf0] }
  0x40   : > { %843 = vmatpush.bf16.msra.mxu3 %v1350_v39  ;;  %v1197_v62 = vld [vmem:[%s1726_s14 + $0xa0] sm:$0xf]  ;;  %v1334_v63 = vor.u32 %v1430_v56, %v1333_v55  ;;  %v1396_v0 = vld [vmem:[%s1726_s14 + $0xa4] sm:$0xf0]  ;;  %v1134_v5 = vor.u32 %v1380_v61, %v1133_v60  ;;  %v1125_v8 = vld [vmem:[%s1726_s14 + $0x10] sm:$0xf] }
  0x41   : > { %805 = vmatpush.bf16.msra.mxu0 %v1150_v45  ;;  %v1261_v1 = vld [vmem:[%s1726_s14 + $0x120] sm:$0xf]  ;;  %v1412_v2 = vld [vmem:[%s1726_s14 + $0x124] sm:$0xf0]  ;;  %v1198_v6 = vor.u32 %v1396_v0, %v1197_v62  ;;  %v1378_v9 = vld [vmem:[%s1726_s14 + $0x14] sm:$0xf0] }
  0x42   : > { %818 = vmatpush.bf16.msra.mxu1 %v1214_v46  ;;  %v1325_v3 = vld [vmem:[%s1726_s14 + $0x1a0] sm:$0xf]  ;;  %v1428_v4 = vld [vmem:[%s1726_s14 + $0x1a4] sm:$0xf0]  ;;  %v1262_v7 = vor.u32 %v1412_v2, %v1261_v1  ;;  %v1189_v10 = vld [vmem:[%s1726_s14 + $0x90] sm:$0xf]  ;;  %v1126_v17 = vor.u32 %v1378_v9, %v1125_v8 }
  0x43   : > { %831 = vmatpush.bf16.msra.mxu2 %v1278_v47  ;;  %v1326_v11 = vor.u32 %v1428_v4, %v1325_v3  ;;  %v1394_v12 = vld [vmem:[%s1726_s14 + $0x94] sm:$0xf0]  ;;  %v1253_v13 = vld [vmem:[%s1726_s14 + $0x110] sm:$0xf]  ;;  %v1117_v18 = vld [vmem:[%s1726_s14] sm:$0xf] }
  0x44   : > { %844 = vmatpush.bf16.msra.mxu3 %v1342_v51  ;;  %v1410_v14 = vld [vmem:[%s1726_s14 + $0x114] sm:$0xf0]  ;;  %v1317_v15 = vld [vmem:[%s1726_s14 + $0x190] sm:$0xf]  ;;  %v1376_v19 = vld [vmem:[%s1726_s14 + $0x4] sm:$0xf0]  ;;  %v1190_v21 = vor.u32 %v1394_v12, %v1189_v10 }
  0x45   : > { %806 = vmatpush.bf16.msra.mxu0 %v1142_v57  ;;  %v1426_v16 = vld [vmem:[%s1726_s14 + $0x194] sm:$0xf0]  ;;  %v1181_v20 = vld [vmem:[%s1726_s14 + $0x80] sm:$0xf]  ;;  %v1254_v22 = vor.u32 %v1410_v14, %v1253_v13  ;;  %v1392_v23 = vld [vmem:[%s1726_s14 + $0x84] sm:$0xf0]  ;;  %v1118_v33 = vor.u32 %v1376_v19, %v1117_v18 }
  0x46   : > { %819 = vmatpush.bf16.msra.mxu1 %v1206_v58  ;;  %v1245_v24 = vld [vmem:[%s1726_s14 + $0x100] sm:$0xf]  ;;  %v1408_v25 = vld [vmem:[%s1726_s14 + $0x104] sm:$0xf0]  ;;  %v1318_v26 = vor.u32 %v1426_v16, %v1317_v15  ;;  %v1389_v29 = vld [vmem:[%s1726_s14 + $0x74] sm:$0xf]  ;;  %v1182_v38 = vor.u32 %v1392_v23, %v1181_v20 }
  0x47   : > { %832 = vmatpush.bf16.msra.mxu2 %v1270_v59  ;;  %v1309_v27 = vld [vmem:[%s1726_s14 + $0x180] sm:$0xf]  ;;  %v1424_v28 = vld [vmem:[%s1726_s14 + $0x184] sm:$0xf0]  ;;  %v1175_v30 = vld [vmem:[%s1726_s14 + $0x78] sm:$0xf0]  ;;  %v1246_v39 = vor.u32 %v1408_v25, %v1245_v24 }
  0x48   : > { %845 = vmatpush.bf16.msra.mxu3 %v1334_v63  ;;  %v1405_v31 = vld [vmem:[%s1726_s14 + $0xf4] sm:$0xf]  ;;  %v403_v32 = vld [vmem:[%s1739_s16 + $0x8] sm:$0xff]  ;;  %v1310_v43 = vor.u32 %v1424_v28, %v1309_v27  ;;  %v1178_v44 = vor.u32 %v1389_v29, %v1175_v30  ;;  %v1387_v48 = vld [vmem:[%s1726_s14 + $0x64] sm:$0xf]  ;;  %p1371_p3 = scmp.ne.s32.totalorder %s1594_s21, 8 }
  0x49   : > { %807 = vmatpush.bf16.msra.mxu0 %v1134_v5  ;;  %v1239_v34 = vld [vmem:[%s1726_s14 + $0xf8] sm:$0xf0]  ;;  %v1421_v35 = vld [vmem:[%s1726_s14 + $0x174] sm:$0xf]  ;;  %v472_v37 = vunpack.c.l.b16 %v403_v32  ;;  %v473_v42 = vunpack.c.h.b16 %v403_v32  ;;  %v1167_v49 = vld [vmem:[%s1726_s14 + $0x68] sm:$0xf0] }
  0x4a   : > { %820 = vmatpush.bf16.msra.mxu1 %v1198_v6  ;;  %v1303_v36 = vld [vmem:[%s1726_s14 + $0x178] sm:$0xf0]  ;;  %v1437_v40 = vld [vmem:[%s1726_s14 + $0x1f4] sm:$0xf]  ;;  %v1242_v46 = vor.u32 %v1405_v31, %v1239_v34  ;;  %v1403_v50 = vld [vmem:[%s1726_s14 + $0xe4] sm:$0xf]  ;;  %v1170_v62 = vor.u32 %v1387_v48, %v1167_v49 }
  0x4b   : > { %833 = vmatpush.bf16.msra.mxu2 %v1262_v7  ;;  %v1367_v41 = vld [vmem:[%s1726_s14 + $0x1f8] sm:$0xf0]  ;;  %v402_v45 = vld [vmem:[%s1739_s16] sm:$0xff]  ;;  %v1306_v47 = vor.u32 %v1421_v35, %v1303_v36  ;;  %v1231_v54 = vld [vmem:[%s1726_s14 + $0xe8] sm:$0xf0]  ;;  %v1841_v57 = vpack.c.b16 %v472_v37, %v472_v37  ;;  %v1845_v60 = vpack.c.b16 %v473_v42, %v473_v42 }
  0x4c   : > { %846 = vmatpush.bf16.msra.mxu3 %v1326_v11  ;;  %v470_v51 = vunpack.c.l.b16 %v402_v45  ;;  %v471_v52 = vunpack.c.h.b16 %v402_v45  ;;  %v1370_v53 = vor.u32 %v1437_v40, %v1367_v41  ;;  %v1419_v55 = vld [vmem:[%s1726_s14 + $0x164] sm:$0xf]  ;;  %v1295_v56 = vld [vmem:[%s1726_s14 + $0x168] sm:$0xf0]  ;;  %v1234_v0 = vor.u32 %v1403_v50, %v1231_v54  ;;  %v1385_v2 = vld [vmem:[%s1726_s14 + $0x54] sm:$0xf] }
  0x4d   : > { %808 = vmatpush.bf16.msra.mxu0 %v1126_v17  ;;  %v1435_v58 = vld [vmem:[%s1726_s14 + $0x1e4] sm:$0xf]  ;;  %v1359_v59 = vld [vmem:[%s1726_s14 + $0x1e8] sm:$0xf0]  ;;  %v1298_v1 = vor.u32 %v1419_v55, %v1295_v56  ;;  %v1159_v3 = vld [vmem:[%s1726_s14 + $0x58] sm:$0xf0] }
  0x4e   : > { %821 = vmatpush.bf16.msra.mxu1 %v1190_v21  ;;  %v1847_v61 = vpack.c.b16 %v470_v51, %v470_v51  ;;  %v1849_v63 = vpack.c.b16 %v471_v52, %v471_v52  ;;  %v1401_v4 = vld [vmem:[%s1726_s14 + $0xd4] sm:$0xf]  ;;  %v1362_v5 = vor.u32 %v1435_v58, %v1359_v59  ;;  %v1223_v6 = vld [vmem:[%s1726_s14 + $0xd8] sm:$0xf0]  ;;  %v1162_v11 = vor.u32 %v1385_v2, %v1159_v3  ;;  %v1383_v14 = vld [vmem:[%s1726_s14 + $0x44] sm:$0xf] }
  0x4f   : > { %834 = vmatpush.bf16.msra.mxu2 %v1254_v22  ;;  %v1417_v7 = vld [vmem:[%s1726_s14 + $0x154] sm:$0xf]  ;;  %v1287_v8 = vld [vmem:[%s1726_s14 + $0x158] sm:$0xf0]  ;;  %v1226_v12 = vor.u32 %v1401_v4, %v1223_v6  ;;  %v1151_v15 = vld [vmem:[%s1726_s14 + $0x48] sm:$0xf0] }
  0x50   : > { %847 = vmatpush.bf16.msra.mxu3 %v1318_v26  ;;  %v1433_v9 = vld [vmem:[%s1726_s14 + $0x1d4] sm:$0xf]  ;;  %v1351_v10 = vld [vmem:[%s1726_s14 + $0x1d8] sm:$0xf0]  ;;  %v1290_v13 = vor.u32 %v1417_v7, %v1287_v8  ;;  %v1399_v16 = vld [vmem:[%s1726_s14 + $0xc4] sm:$0xf]  ;;  %v1154_v23 = vor.u32 %v1383_v14, %v1151_v15 }
  0x51   : > { %809 = vmatpush.bf16.msra.mxu0 %v1118_v33  ;;  %v1354_v17 = vor.u32 %v1433_v9, %v1351_v10  ;;  %v1215_v18 = vld [vmem:[%s1726_s14 + $0xc8] sm:$0xf0]  ;;  %v1415_v19 = vld [vmem:[%s1726_s14 + $0x144] sm:$0xf]  ;;  %v1381_v26 = vld [vmem:[%s1726_s14 + $0x34] sm:$0xf] }
  0x52   : > { %822 = vmatpush.bf16.msra.mxu1 %v1182_v38  ;;  %v1279_v20 = vld [vmem:[%s1726_s14 + $0x148] sm:$0xf0]  ;;  %v1431_v21 = vld [vmem:[%s1726_s14 + $0x1c4] sm:$0xf]  ;;  %v1218_v24 = vor.u32 %v1399_v16, %v1215_v18  ;;  %v1143_v27 = vld [vmem:[%s1726_s14 + $0x38] sm:$0xf0] }
  0x53   : > { %835 = vmatpush.bf16.msra.mxu2 %v1246_v39  ;;  %v1343_v22 = vld [vmem:[%s1726_s14 + $0x1c8] sm:$0xf0]  ;;  %v1282_v25 = vor.u32 %v1415_v19, %v1279_v20  ;;  %v1397_v28 = vld [vmem:[%s1726_s14 + $0xb4] sm:$0xf]  ;;  %v1207_v30 = vld [vmem:[%s1726_s14 + $0xb8] sm:$0xf0]  ;;  %v1146_v35 = vor.u32 %v1381_v26, %v1143_v27 }
  0x54   : > { %848 = vmatpush.bf16.msra.mxu3 %v1310_v43  ;;  %810 = vmatmul.bf16.vlgmr.msra.gmra.mxu0 %v1847_v61  ;;  %v1346_v29 = vor.u32 %v1431_v21, %v1343_v22  ;;  %v1413_v31 = vld [vmem:[%s1726_s14 + $0x134] sm:$0xf]  ;;  %v1271_v32 = vld [vmem:[%s1726_s14 + $0x138] sm:$0xf0]  ;;  %v1210_v36 = vor.u32 %v1397_v28, %v1207_v30  ;;  %v1379_v38 = vld [vmem:[%s1726_s14 + $0x24] sm:$0xf] }
  0x55   : > { %854 = vmatpush.bf16.msrb.mxu0 %v1178_v44  ;;  %823 = vmatmul.bf16.vlgmr.msra.gmra.mxu1 %v1849_v63  ;;  %v1429_v33 = vld [vmem:[%s1726_s14 + $0x1b4] sm:$0xf]  ;;  %v1335_v34 = vld [vmem:[%s1726_s14 + $0x1b8] sm:$0xf0]  ;;  %v1274_v37 = vor.u32 %v1413_v31, %v1271_v32  ;;  %v1135_v39 = vld [vmem:[%s1726_s14 + $0x28] sm:$0xf0] }
  0x56   : > { %867 = vmatpush.bf16.msrb.mxu1 %v1242_v46  ;;  %836 = vmatmul.bf16.vlgmr.msra.gmra.mxu2 %v1841_v57  ;;  %v1395_v40 = vld [vmem:[%s1726_s14 + $0xa4] sm:$0xf]  ;;  %v1338_v41 = vor.u32 %v1429_v33, %v1335_v34  ;;  %v1199_v42 = vld [vmem:[%s1726_s14 + $0xa8] sm:$0xf0]  ;;  %v1377_v50 = vld [vmem:[%s1726_s14 + $0x14] sm:$0xf] }
  0x57   : > { %880 = vmatpush.bf16.msrb.mxu2 %v1306_v47  ;;  %849 = vmatmul.bf16.vlgmr.msra.gmra.mxu3 %v1845_v60  ;;  %v1411_v43 = vld [vmem:[%s1726_s14 + $0x124] sm:$0xf]  ;;  %v1263_v44 = vld [vmem:[%s1726_s14 + $0x128] sm:$0xf0]  ;;  %v1138_v47 = vor.u32 %v1379_v38, %v1135_v39  ;;  %v1202_v48 = vor.u32 %v1395_v40, %v1199_v42  ;;  %v1127_v51 = vld [vmem:[%s1726_s14 + $0x18] sm:$0xf0] }
  0x58   : > { %893 = vmatpush.bf16.msrb.mxu3 %v1370_v53  ;;  %v1427_v45 = vld [vmem:[%s1726_s14 + $0x1a4] sm:$0xf]  ;;  %v1327_v46 = vld [vmem:[%s1726_s14 + $0x1a8] sm:$0xf0]  ;;  %v1266_v49 = vor.u32 %v1411_v43, %v1263_v44  ;;  %v1393_v52 = vld [vmem:[%s1726_s14 + $0x94] sm:$0xf] }
  0x59   : > { %855 = vmatpush.bf16.msrb.mxu0 %v1170_v62  ;;  %v1330_v53 = vor.u32 %v1427_v45, %v1327_v46  ;;  %v1191_v54 = vld [vmem:[%s1726_s14 + $0x98] sm:$0xf0]  ;;  %v1409_v55 = vld [vmem:[%s1726_s14 + $0x114] sm:$0xf]  ;;  %v1130_v62 = vor.u32 %v1377_v50, %v1127_v51  ;;  %v1375_v2 = vld [vmem:[%s1726_s14 + $0x4] sm:$0xf] }
  0x5a   : > { %868 = vmatpush.bf16.msrb.mxu1 %v1234_v0  ;;  %v1255_v56 = vld [vmem:[%s1726_s14 + $0x118] sm:$0xf0]  ;;  %v1425_v58 = vld [vmem:[%s1726_s14 + $0x194] sm:$0xf]  ;;  %v1194_v0 = vor.u32 %v1393_v52, %v1191_v54  ;;  %v1119_v3 = vld [vmem:[%s1726_s14 + $0x8] sm:$0xf0] }
  0x5b   : > { %881 = vmatpush.bf16.msrb.mxu2 %v1298_v1  ;;  %v1319_v59 = vld [vmem:[%s1726_s14 + $0x198] sm:$0xf0]  ;;  %v1258_v1 = vor.u32 %v1409_v55, %v1255_v56  ;;  %v1391_v4 = vld [vmem:[%s1726_s14 + $0x84] sm:$0xf]  ;;  %v1183_v6 = vld [vmem:[%s1726_s14 + $0x88] sm:$0xf0] }
  0x5c   : > { %894 = vmatpush.bf16.msrb.mxu3 %v1362_v5  ;;  %v1322_v5 = vor.u32 %v1425_v58, %v1319_v59  ;;  %v1407_v7 = vld [vmem:[%s1726_s14 + $0x104] sm:$0xf]  ;;  %v1247_v8 = vld [vmem:[%s1726_s14 + $0x108] sm:$0xf0]  ;;  %v400_v21 = vld [vmem:[#allocation2] sm:$0xff] }
  0x5d   : > { %856 = vmatpush.bf16.msrb.mxu0 %v1162_v11  ;;  %v1423_v9 = vld [vmem:[%s1726_s14 + $0x184] sm:$0xf]  ;;  %v1311_v10 = vld [vmem:[%s1726_s14 + $0x188] sm:$0xf0]  ;;  %v1122_v11 = vor.u32 %v1375_v2, %v1119_v3  ;;  %v401_v31 = vld [vmem:[#allocation2 + $0x8] sm:$0xff] }
  0x5e   : > { %869 = vmatpush.bf16.msrb.mxu1 %v1226_v12  ;;  %v1186_v12 = vor.u32 %v1391_v4, %v1183_v6  ;;  %v1314_v14 = vor.u32 %v1423_v9, %v1311_v10 }
  0x5f   : > { %882 = vmatpush.bf16.msrb.mxu2 %v1290_v13  ;;  %v1250_v13 = vor.u32 %v1407_v7, %v1247_v8 }
  0x60   : > { %895 = vmatpush.bf16.msrb.mxu3 %v1354_v17 }
  0x61   : > { %857 = vmatpush.bf16.msrb.mxu0 %v1154_v23 }
  0x62   : > { %870 = vmatpush.bf16.msrb.mxu1 %v1218_v24 }
  0x63   : > { %883 = vmatpush.bf16.msrb.mxu2 %v1282_v25 }
  0x64   : > { %896 = vmatpush.bf16.msrb.mxu3 %v1346_v29 }
  0x65   : > { %858 = vmatpush.bf16.msrb.mxu0 %v1146_v35 }
  0x66   : > { %871 = vmatpush.bf16.msrb.mxu1 %v1210_v36 }
  0x67   : > { %884 = vmatpush.bf16.msrb.mxu2 %v1274_v37 }
  0x68   : > { %897 = vmatpush.bf16.msrb.mxu3 %v1338_v41 }
  0x69   : > { %859 = vmatpush.bf16.msrb.mxu0 %v1138_v47 }
  0x6a   : > { %872 = vmatpush.bf16.msrb.mxu1 %v1202_v48 }
  0x6b   : > { %885 = vmatpush.bf16.msrb.mxu2 %v1266_v49 }
  0x6c   : > { %898 = vmatpush.bf16.msrb.mxu3 %v1330_v53 }
  0x6d   : > { %860 = vmatpush.bf16.msrb.mxu0 %v1130_v62 }
  0x6e   : > { %873 = vmatpush.bf16.msrb.mxu1 %v1194_v0 }
  0x6f   : > { %886 = vmatpush.bf16.msrb.mxu2 %v1258_v1 }
  0x70   : > { %899 = vmatpush.bf16.msrb.mxu3 %v1322_v5 }
  0x71   : > { %861 = vmatpush.bf16.msrb.mxu0 %v1122_v11 }
  0x72   : > { %874 = vmatpush.bf16.msrb.mxu1 %v1186_v12 }
  0x73   : > { %887 = vmatpush.bf16.msrb.mxu2 %v1250_v13 }
  0x74   : > { %900 = vmatpush.bf16.msrb.mxu3 %v1314_v14  ;;  %862 = vmatmul.bf16.vlgmr.msrb.gmra.mxu0 %v1847_v61 }
  0x75   : > { %875 = vmatmul.bf16.vlgmr.msrb.gmra.mxu1 %v1849_v63 }
  0x76   : > { %888 = vmatmul.bf16.vlgmr.msrb.gmra.mxu2 %v1841_v57 }
  0x77   : > { %901 = vmatmul.bf16.vlgmr.msrb.gmra.mxu3 %v1845_v60 }
  0xd1   : > { %v811_v15 = vpop.f32.mrf.mxu0 }
  0xd2   : > { %v824_v16 = vpop.f32.mrf.mxu1 }
  0xd3   : > { %v825_v17 = vadd.f32 %v824_v16, %v811_v15 }
  0xd9   : > { %v837_v18 = vpop.f32.mrf.mxu2  ;;  %v813_v23 = vpop.f32.mrf.mxu0 }
  0xda   : > { %v838_v19 = vadd.f32 %v837_v18, %v825_v17  ;;  %v850_v20 = vpop.f32.mrf.mxu3  ;;  %v826_v24 = vpop.f32.mrf.mxu1 }
  0xdc   : > { %v851_v22 = vadd.f32 %v850_v20, %v838_v19 }
  0xde   : > { %v906_v25 = vadd.f32 %v851_v22, %v400_v21 }
  0xe0   : > { %908 = vst [vmem:[#allocation2] sm:$0xff] %v906_v25 }
  0xe1   : > { %v839_v26 = vpop.f32.mrf.mxu2 }
  0xe2   : > { %v852_v61 = vpop.f32.mrf.mxu3 }
  0xf1   : > { %v863_v27 = vpop.f32.mrf.mxu0 }
  0xf2   : > { %v876_v63 = vpop.f32.mrf.mxu1 }
  0xf3   : > { %v877_v28 = vadd.f32 %v876_v63, %v863_v27 }
  0xf9   : > { %v889_v57 = vpop.f32.mrf.mxu2  ;;  %v865_v30 = vpop.f32.mrf.mxu0 }
  0xfa   : > { %v890_v29 = vadd.f32 %v889_v57, %v877_v28  ;;  %v902_v60 = vpop.f32.mrf.mxu3  ;;  %v878_v32 = vpop.f32.mrf.mxu1 }
  0xfc   : > { %v903_v33 = vadd.f32 %v902_v60, %v890_v29 }
  0xfe   : > { %v907_v34 = vadd.f32 %v903_v33, %v401_v31  ;;  %913 = sbr.rel (%p1371_p3) target bundleno = 273 (0x111), region = 52 }
 0x100   : > { %909 = vst [vmem:[#allocation2 + $0x8] sm:$0xff] %v907_v34 }
 0x101   : > { %v891_v35 = vpop.f32.mrf.mxu2 }
 0x102   : > { %v904_v36 = vpop.f32.mrf.mxu3 }
 0x103   : > { %v914_v37 = vld [vmem:[#allocation2] sm:$0xff]  ;;  %v933_v48 = vld [vmem:[%s1753_s11 + $0x8] sm:$0xff] }
 0x104   : > { %v916_v38 = vld [vmem:[%s367_s18] sm:$0x3] }
 0x105   : > { %v924_v39 = vld [vmem:[%s372_s30] sm:$0x3]  ;;  %v918_v40 = vperm.slane %v916_v38, 0  ;;  %v919_v43 = vperm.slane %v916_v38, 1 }
 0x106   : > { %v926_v41 = vperm.slane %v924_v39, 0  ;;  %v927_v44 = vperm.slane %v924_v39, 1  ;;  %v932_v47 = vld [vmem:[%s1753_s11] sm:$0xff] }
 0x107   : > { %v915_v42 = vld [vmem:[#allocation2 + $0x8] sm:$0xff]  ;;  %v922_v45 = vmul.f32 %v918_v40, %v914_v37 }
 0x108   : > { %v923_v46 = vmul.f32 %v919_v43, %v915_v42 }
 0x109   : > { %v930_v49 = vadd.f32 %v926_v41, %v922_v45 }
 0x10a   : > { %v931_v50 = vadd.f32 %v927_v44, %v923_v46 }
 0x10b   : > { %v934_v51 = vadd.f32 %v932_v47, %v930_v49 }
 0x10c   : > { %v935_v52 = vadd.f32 %v933_v48, %v931_v50 }
 0x10d   : > { %v936_v53 = vmax.f32 %v934_v51, 0.0 }
 0x10e   : > { %v937_v54 = vmax.f32 %v935_v52, 0.0 }
 0x10f   : > { %938 = vst [vmem:[%s1758_s28] sm:$0xff] %v936_v53 }
 0x110   : > { %939 = vst [vmem:[%s1758_s28 + $0x8] sm:$0xff] %v937_v54 }
 0x111 PF: > { %s18_s25 = sadd.s32 1, %s1610_s25   ;;  %s1960_s22 = sld [smem:[#allocation6_spill]] }
 0x112   : > { %p15_p4 = scmp.ge.s32.totalorder %s18_s25, 20   ;;  %s1961_s24 = sld [smem:[#allocation7_spill]] }
 0x113   : > { %s1962_s16 = sld [smem:[#allocation8_spill]]  ;;  %s1963_s18 = smov %s1586_s19 }
 0x114   : > { %s1964_s19 = smov %s1590_s20  ;;  %s1965_s20 = smov %s1713_s13 }
 0x115   : > { %s1966_s21 = smov %s1602_s23  ;;  %17 = sbr.rel (!%p15_p4) target bundleno = 5 (0x5), region = 100 }
 0x118   : > { %s1967_s23 = smov %s1961_s24 }
 0x119   : > { %s1968_s24 = smov %s1962_s16 }
 0x11a   :  { %970 = vsyncpa [#allocation4], 1 }
 0x11b   :  { %972 = vsyncpa [#allocation4 + $0x1], 1 }

// kernel: _lambda_.41
= control target key start
LH: loop header
LB: loop body
LE: loop exit
PB: predicated region body
PF: predicated region fallthrough
CT: control target
= control target key end

     0   :  { %s1844_s18 = smov 0   ;;  %s1846_s19 = smov 0   ;;  %s2252_s0 = inlined_call_operand.vmem [shape: bf16[8,4608], index: 0, kind: input, shape index: {}]   ;;  %s2253_s1 = inlined_call_operand.vmem [shape: bf16[4608,512], index: 1, kind: input, shape index: {}]   ;;  %s2254_s2 = inlined_call_operand.vmem [shape: f32[1,512], index: 2, kind: input, shape index: {}]   ;;  %s2255_s3 = inlined_call_operand.vmem [shape: f32[1,512], index: 3, kind: input, shape index: {}]   ;;  %s2256_s4 = inlined_call_operand.vmem [shape: f32[8,512], index: 4, kind: input, shape index: {}]   ;;  %s2257_s5 = inlined_call_operand.vmem [shape: f32[8,512], index: 5, kind: output, shape index: {}]  }
   0x1   :  { %s1848_s20 = smov 0   ;;  %s1850_s21 = smov 0  }
   0x2   :  { %s1852_s22 = smov 0   ;;  %s1854_s23 = smov 0  }
   0x3   :  { %s1856_s24 = smov 0  }
   0x4 LB: > { %s27_s25 = sadd.s32 1, %s1803_s22  ;;  %s30_s26 = sadd.s32 1, %s1807_s23  ;;  %s1811_s24 = sphi %s1856_s24, %s15_s24   ;;  %s1807_s23 = sphi %s1854_s23, %s2263_s23   ;;  %s1803_s22 = sphi %s1852_s22, %s2262_s22   ;;  %s1799_s21 = sphi %s1850_s21, %s2261_s21   ;;  %s1795_s20 = sphi %s1848_s20, %s2260_s20   ;;  %s1791_s19 = sphi %s1846_s19, %s2259_s19   ;;  %s1787_s18 = sphi %s1844_s18, %s2258_s18  }
   0x5   : > { %p28_p0 = scmp.ge.s32.totalorder %s27_s25, 9  ;;  %p78_p1 = scmp.ne.s32.totalorder %s1791_s19, %s1787_s18 }
   0x6   : > { %p79_p2 = scmp.eq.s32.totalorder %s1811_s24, 0  ;;  %s71_s30 = sadd.s32 1, %s1791_s19 }
   0x7   : > { %s2265_s25 = smov (%p28_p0, %s27_s25), 0  ;;  %s2267_s26 = smov (!%p28_p0, %s30_s26), %s1807_s23 }
   0x8   : > { %p80_p3 = por %p79_p2, %p78_p1  ;;  %p32_p4 = scmp.ge.s32.totalorder %s2267_s26, 2 }
   0x9   : > { %s66_s27 = ssub.s32 %s1803_s22, %s2265_s25  ;;  %p1359_p6 = scmp.ge.s32.totalorder %s1811_s24, 18 }
   0xa   : > { %s2269_s26 = smov (%p32_p4, %s2267_s26), 0 }
   0xb   : > { %s67_s28 = ssub.s32 %s1807_s23, %s2269_s26  ;;  %212 = sbr.rel (%p1359_p6) target bundleno = 87 (0x57), region = 16 }
   0xc   : > { %s68_s29 = sor.u32 %s67_s28, %s66_s27 }
   0xd   : > { %p69_p5 = scmp.eq.s32.totalorder %s68_s29, 0 }
   0xf   : > { %s1895_s6 = scalar_select %p69_p5, %s1791_s19, %s71_s30  }
  0x10   : > { %228 = sbr.rel (!%p80_p3) target bundleno = 87 (0x57), region = 24  ;;  %s230_s7 = sand.u32 (%p80_p3), 1, %s1791_s19  }
  0x11   : > { %s1362_s8 = sshll.u32 (%p80_p3), %s1807_s23, 1  ;;  %s1360_s9 = sshll.u32 (%p80_p3), %s230_s7, 9 }
  0x12   : > { %s1635_s10 = sshll.u32 (%p80_p3), %s1803_s22, 8  ;;  %s1909_s16 = scalar_lea.vmem (%p80_p3), [#allocation3], %s1360_s9 }
  0x13   : > { %s236_s11 = sadd.s32 (%p80_p3), %s1635_s10, %s1362_s8 }
  0x14   : > { %s1364_s12 = sshll.u32 (%p80_p3), %s236_s11, 2 }
  0x15   : > { %s1904_s15 = scalar_lea.vmem %s2253_s1, %s1364_s12 }
  0x16   : > { %v393_v0 = vld [vmem:[%s1904_s15] sm:$0xff]  ;;  %v395_v1 = vld [vmem:[%s1904_s15 + $0x10] sm:$0xff] }
  0x17   : > { %v397_v2 = vld [vmem:[%s1904_s15 + $0x20] sm:$0xff]  ;;  %394 = vst [vmem:[%s1909_s16] sm:$0xff] %v393_v0  ;;  %v399_v3 = vld [vmem:[%s1904_s15 + $0x30] sm:$0xff] }
  0x18   : > { %396 = vst [vmem:[%s1909_s16 + $0x8] sm:$0xff] %v395_v1  ;;  %v401_v4 = vld [vmem:[%s1904_s15 + $0x40] sm:$0xff]  ;;  %v403_v5 = vld [vmem:[%s1904_s15 + $0x50] sm:$0xff] }
  0x19   : > { %398 = vst [vmem:[%s1909_s16 + $0x10] sm:$0xff] %v397_v2  ;;  %v405_v6 = vld [vmem:[%s1904_s15 + $0x60] sm:$0xff]  ;;  %v407_v7 = vld [vmem:[%s1904_s15 + $0x70] sm:$0xff] }
  0x1a   : > { %400 = vst [vmem:[%s1909_s16 + $0x18] sm:$0xff] %v399_v3  ;;  %v409_v8 = vld [vmem:[%s1904_s15 + $0x80] sm:$0xff]  ;;  %v411_v9 = vld [vmem:[%s1904_s15 + $0x90] sm:$0xff] }
  0x1b   : > { %402 = vst [vmem:[%s1909_s16 + $0x20] sm:$0xff] %v401_v4  ;;  %v413_v10 = vld [vmem:[%s1904_s15 + $0xa0] sm:$0xff]  ;;  %v415_v11 = vld [vmem:[%s1904_s15 + $0xb0] sm:$0xff] }
  0x1c   : > { %404 = vst [vmem:[%s1909_s16 + $0x28] sm:$0xff] %v403_v5  ;;  %v417_v12 = vld [vmem:[%s1904_s15 + $0xc0] sm:$0xff]  ;;  %v419_v13 = vld [vmem:[%s1904_s15 + $0xd0] sm:$0xff] }
  0x1d   : > { %406 = vst [vmem:[%s1909_s16 + $0x30] sm:$0xff] %v405_v6  ;;  %v421_v14 = vld [vmem:[%s1904_s15 + $0xe0] sm:$0xff]  ;;  %v423_v15 = vld [vmem:[%s1904_s15 + $0xf0] sm:$0xff] }
  0x1e   : > { %408 = vst [vmem:[%s1909_s16 + $0x38] sm:$0xff] %v407_v7  ;;  %v425_v16 = vld [vmem:[%s1904_s15 + $0x100] sm:$0xff]  ;;  %v427_v17 = vld [vmem:[%s1904_s15 + $0x110] sm:$0xff] }
  0x1f   : > { %410 = vst [vmem:[%s1909_s16 + $0x40] sm:$0xff] %v409_v8  ;;  %v429_v18 = vld [vmem:[%s1904_s15 + $0x120] sm:$0xff]  ;;  %v431_v19 = vld [vmem:[%s1904_s15 + $0x130] sm:$0xff] }
  0x20   : > { %412 = vst [vmem:[%s1909_s16 + $0x48] sm:$0xff] %v411_v9  ;;  %v433_v20 = vld [vmem:[%s1904_s15 + $0x140] sm:$0xff]  ;;  %v435_v21 = vld [vmem:[%s1904_s15 + $0x150] sm:$0xff] }
  0x21   : > { %414 = vst [vmem:[%s1909_s16 + $0x50] sm:$0xff] %v413_v10  ;;  %v437_v22 = vld [vmem:[%s1904_s15 + $0x160] sm:$0xff]  ;;  %v439_v23 = vld [vmem:[%s1904_s15 + $0x170] sm:$0xff] }
  0x22   : > { %416 = vst [vmem:[%s1909_s16 + $0x58] sm:$0xff] %v415_v11  ;;  %v441_v24 = vld [vmem:[%s1904_s15 + $0x180] sm:$0xff]  ;;  %v443_v25 = vld [vmem:[%s1904_s15 + $0x190] sm:$0xff] }
  0x23   : > { %418 = vst [vmem:[%s1909_s16 + $0x60] sm:$0xff] %v417_v12  ;;  %v445_v26 = vld [vmem:[%s1904_s15 + $0x1a0] sm:$0xff]  ;;  %v447_v27 = vld [vmem:[%s1904_s15 + $0x1b0] sm:$0xff] }
  0x24   : > { %420 = vst [vmem:[%s1909_s16 + $0x68] sm:$0xff] %v419_v13  ;;  %v449_v28 = vld [vmem:[%s1904_s15 + $0x1c0] sm:$0xff]  ;;  %v451_v29 = vld [vmem:[%s1904_s15 + $0x1d0] sm:$0xff] }
  0x25   : > { %422 = vst [vmem:[%s1909_s16 + $0x70] sm:$0xff] %v421_v14  ;;  %v453_v30 = vld [vmem:[%s1904_s15 + $0x1e0] sm:$0xff]  ;;  %v455_v31 = vld [vmem:[%s1904_s15 + $0x1f0] sm:$0xff] }
  0x26   : > { %424 = vst [vmem:[%s1909_s16 + $0x78] sm:$0xff] %v423_v15  ;;  %v457_v32 = vld [vmem:[%s1904_s15 + $0x200] sm:$0xff]  ;;  %v459_v33 = vld [vmem:[%s1904_s15 + $0x210] sm:$0xff] }
  0x27   : > { %426 = vst [vmem:[%s1909_s16 + $0x80] sm:$0xff] %v425_v16  ;;  %v461_v34 = vld [vmem:[%s1904_s15 + $0x220] sm:$0xff]  ;;  %v463_v35 = vld [vmem:[%s1904_s15 + $0x230] sm:$0xff] }
  0x28   : > { %428 = vst [vmem:[%s1909_s16 + $0x88] sm:$0xff] %v427_v17  ;;  %v465_v36 = vld [vmem:[%s1904_s15 + $0x240] sm:$0xff]  ;;  %v467_v37 = vld [vmem:[%s1904_s15 + $0x250] sm:$0xff] }
  0x29   : > { %430 = vst [vmem:[%s1909_s16 + $0x90] sm:$0xff] %v429_v18  ;;  %v469_v38 = vld [vmem:[%s1904_s15 + $0x260] sm:$0xff]  ;;  %v471_v39 = vld [vmem:[%s1904_s15 + $0x270] sm:$0xff] }
  0x2a   : > { %432 = vst [vmem:[%s1909_s16 + $0x98] sm:$0xff] %v431_v19  ;;  %v473_v40 = vld [vmem:[%s1904_s15 + $0x280] sm:$0xff]  ;;  %v475_v41 = vld [vmem:[%s1904_s15 + $0x290] sm:$0xff] }
  0x2b   : > { %434 = vst [vmem:[%s1909_s16 + $0xa0] sm:$0xff] %v433_v20  ;;  %v477_v42 = vld [vmem:[%s1904_s15 + $0x2a0] sm:$0xff]  ;;  %v479_v43 = vld [vmem:[%s1904_s15 + $0x2b0] sm:$0xff] }
  0x2c   : > { %436 = vst [vmem:[%s1909_s16 + $0xa8] sm:$0xff] %v435_v21  ;;  %v481_v44 = vld [vmem:[%s1904_s15 + $0x2c0] sm:$0xff]  ;;  %v483_v45 = vld [vmem:[%s1904_s15 + $0x2d0] sm:$0xff] }
  0x2d   : > { %438 = vst [vmem:[%s1909_s16 + $0xb0] sm:$0xff] %v437_v22  ;;  %v485_v46 = vld [vmem:[%s1904_s15 + $0x2e0] sm:$0xff]  ;;  %v487_v47 = vld [vmem:[%s1904_s15 + $0x2f0] sm:$0xff] }
  0x2e   : > { %440 = vst [vmem:[%s1909_s16 + $0xb8] sm:$0xff] %v439_v23  ;;  %v489_v48 = vld [vmem:[%s1904_s15 + $0x300] sm:$0xff]  ;;  %v491_v49 = vld [vmem:[%s1904_s15 + $0x310] sm:$0xff] }
  0x2f   : > { %442 = vst [vmem:[%s1909_s16 + $0xc0] sm:$0xff] %v441_v24  ;;  %v493_v50 = vld [vmem:[%s1904_s15 + $0x320] sm:$0xff]  ;;  %v495_v51 = vld [vmem:[%s1904_s15 + $0x330] sm:$0xff] }
  0x30   : > { %444 = vst [vmem:[%s1909_s16 + $0xc8] sm:$0xff] %v443_v25  ;;  %v497_v52 = vld [vmem:[%s1904_s15 + $0x340] sm:$0xff]  ;;  %v499_v53 = vld [vmem:[%s1904_s15 + $0x350] sm:$0xff] }
  0x31   : > { %446 = vst [vmem:[%s1909_s16 + $0xd0] sm:$0xff] %v445_v26  ;;  %v501_v54 = vld [vmem:[%s1904_s15 + $0x360] sm:$0xff]  ;;  %v503_v55 = vld [vmem:[%s1904_s15 + $0x370] sm:$0xff] }
  0x32   : > { %448 = vst [vmem:[%s1909_s16 + $0xd8] sm:$0xff] %v447_v27  ;;  %v505_v56 = vld [vmem:[%s1904_s15 + $0x380] sm:$0xff]  ;;  %v507_v57 = vld [vmem:[%s1904_s15 + $0x390] sm:$0xff] }
  0x33   : > { %450 = vst [vmem:[%s1909_s16 + $0xe0] sm:$0xff] %v449_v28  ;;  %v509_v58 = vld [vmem:[%s1904_s15 + $0x3a0] sm:$0xff]  ;;  %v511_v59 = vld [vmem:[%s1904_s15 + $0x3b0] sm:$0xff] }
  0x34   : > { %452 = vst [vmem:[%s1909_s16 + $0xe8] sm:$0xff] %v451_v29  ;;  %v513_v60 = vld [vmem:[%s1904_s15 + $0x3c0] sm:$0xff]  ;;  %v515_v61 = vld [vmem:[%s1904_s15 + $0x3d0] sm:$0xff] }
  0x35   : > { %454 = vst [vmem:[%s1909_s16 + $0xf0] sm:$0xff] %v453_v30  ;;  %v517_v62 = vld [vmem:[%s1904_s15 + $0x3e0] sm:$0xff]  ;;  %v519_v63 = vld [vmem:[%s1904_s15 + $0x3f0] sm:$0xff] }
  0x36   : > { %456 = vst [vmem:[%s1909_s16 + $0xf8] sm:$0xff] %v455_v31 }
  0x37   : > { %458 = vst [vmem:[%s1909_s16 + $0x100] sm:$0xff] %v457_v32 }
  0x38   : > { %460 = vst [vmem:[%s1909_s16 + $0x108] sm:$0xff] %v459_v33 }
  0x39   : > { %462 = vst [vmem:[%s1909_s16 + $0x110] sm:$0xff] %v461_v34 }
  0x3a   : > { %464 = vst [vmem:[%s1909_s16 + $0x118] sm:$0xff] %v463_v35 }
  0x3b   : > { %466 = vst [vmem:[%s1909_s16 + $0x120] sm:$0xff] %v465_v36 }
  0x3c   : > { %468 = vst [vmem:[%s1909_s16 + $0x128] sm:$0xff] %v467_v37 }
  0x3d   : > { %470 = vst [vmem:[%s1909_s16 + $0x130] sm:$0xff] %v469_v38 }
  0x3e   : > { %472 = vst [vmem:[%s1909_s16 + $0x138] sm:$0xff] %v471_v39 }
  0x3f   : > { %474 = vst [vmem:[%s1909_s16 + $0x140] sm:$0xff] %v473_v40 }
  0x40   : > { %476 = vst [vmem:[%s1909_s16 + $0x148] sm:$0xff] %v475_v41 }
  0x41   : > { %478 = vst [vmem:[%s1909_s16 + $0x150] sm:$0xff] %v477_v42 }
  0x42   : > { %480 = vst [vmem:[%s1909_s16 + $0x158] sm:$0xff] %v479_v43 }
  0x43   : > { %482 = vst [vmem:[%s1909_s16 + $0x160] sm:$0xff] %v481_v44 }
  0x44   : > { %484 = vst [vmem:[%s1909_s16 + $0x168] sm:$0xff] %v483_v45 }
  0x45   : > { %486 = vst [vmem:[%s1909_s16 + $0x170] sm:$0xff] %v485_v46 }
  0x46   : > { %488 = vst [vmem:[%s1909_s16 + $0x178] sm:$0xff] %v487_v47 }
  0x47   : > { %490 = vst [vmem:[%s1909_s16 + $0x180] sm:$0xff] %v489_v48 }
  0x48   : > { %492 = vst [vmem:[%s1909_s16 + $0x188] sm:$0xff] %v491_v49 }
  0x49   : > { %494 = vst [vmem:[%s1909_s16 + $0x190] sm:$0xff] %v493_v50 }
  0x4a   : > { %496 = vst [vmem:[%s1909_s16 + $0x198] sm:$0xff] %v495_v51 }
  0x4b   : > { %498 = vst [vmem:[%s1909_s16 + $0x1a0] sm:$0xff] %v497_v52 }
  0x4c   : > { %500 = vst [vmem:[%s1909_s16 + $0x1a8] sm:$0xff] %v499_v53 }
  0x4d   : > { %502 = vst [vmem:[%s1909_s16 + $0x1b0] sm:$0xff] %v501_v54 }
  0x4e   : > { %504 = vst [vmem:[%s1909_s16 + $0x1b8] sm:$0xff] %v503_v55 }
  0x4f   : > { %506 = vst [vmem:[%s1909_s16 + $0x1c0] sm:$0xff] %v505_v56 }
  0x50   : > { %508 = vst [vmem:[%s1909_s16 + $0x1c8] sm:$0xff] %v507_v57 }
  0x51   : > { %510 = vst [vmem:[%s1909_s16 + $0x1d0] sm:$0xff] %v509_v58 }
  0x52   : > { %512 = vst [vmem:[%s1909_s16 + $0x1d8] sm:$0xff] %v511_v59 }
  0x53   : > { %514 = vst [vmem:[%s1909_s16 + $0x1e0] sm:$0xff] %v513_v60 }
  0x54   : > { %516 = vst [vmem:[%s1909_s16 + $0x1e8] sm:$0xff] %v515_v61 }
  0x55   : > { %518 = vst [vmem:[%s1909_s16 + $0x1f0] sm:$0xff] %v517_v62 }
  0x56   : > { %520 = vst [vmem:[%s1909_s16 + $0x1f8] sm:$0xff] %v519_v63 }
  0x57 PF: > { %p1365_p7 = scmp.ge.s32.totalorder %s1811_s24, 1  ;;  %p554_p8 = scmp.lt.s32.totalorder %s1811_s24, 19 }
  0x59   : > { %p555_p9 = pnand %p1365_p7, %p554_p8 }
  0x5a   : > { %s561_s17 = sand.u32 (!%p555_p9), 1, %s1787_s18   ;;  %s1367_s27 = sshll.u32 (!%p555_p9), %s1795_s20, 2 }
  0x5b   : > { %558 = sbr.rel (%p555_p9) target bundleno = 330 (0x14a), region = 74  ;;  %s1366_s28 = sshll.u32 (!%p555_p9), %s561_s17, 9 }
  0x5c   : > { %p621_p10 = scmp.lt.s32.totalorder (!%p555_p9), %s1367_s27, 35  ;;  %s1369_s29 = sshll.u32 (!%p555_p9), %s1799_s21, 1 }
  0x5d   : > { %p631_p11 = scmp.lt.s32.totalorder (!%p555_p9), %s1369_s29, 3  ;;  %s2067_s8 = scalar_lea.vmem (!%p555_p9), [#allocation3], %s1366_s28 }
  0x5e   : > { %p1375_p12 = scmp.ne.s32.totalorder (!%p555_p9), %s1795_s20, 0 }
  0x60   : > { %s2271_s27 = smov (!%p621_p10, %s1367_s27), 35  ;;  %s2273_s29 = smov (!%p631_p11, %s1369_s29), 3 }
  0x61   : > { %s1368_s30 = sshll.u32 %s2271_s27, 2  ;;  %s633_s18 = scalar_lea.vmem %s2254_s2, %s2273_s29 }
  0x62   : > { %s2044_s9 = scalar_lea.vmem %s2252_s0, %s1368_s30  ;;  %s638_s21 = scalar_lea.vmem %s2255_s3, %s2273_s29 }
  0x63   : > { %s1372_s14 = sshll.u32 %s2273_s29, 3  ;;  %663 = sbr.rel (%p1375_p12) target bundleno = 107 (0x6b), region = 82 }
  0x64   : > { %s2060_s17 = scalar_lea.vmem %s2256_s4, %s1372_s14  ;;  %s2065_s7 = scalar_lea.vmem %s2257_s5, %s1372_s14 }
  0x68   : > { %v1813_v0 = vmov 0.0  }
  0x69   : > { %664 = vst [vmem:[#allocation2] sm:$0xff] %v1813_v0 }
  0x6a   : > { %665 = vst [vmem:[#allocation2 + $0x8] sm:$0xff] %v1813_v0 }
  0x6b PF: > { %v1434_v1 = vld [vmem:[%s2067_s8 + $0x70] sm:$0xf]  ;;  %v1651_v2 = vld [vmem:[%s2067_s8 + $0x74] sm:$0xf0]  ;;  %v1426_v12 = vld [vmem:[%s2067_s8 + $0x60] sm:$0xf] }
  0x6c   : > { %v1498_v3 = vld [vmem:[%s2067_s8 + $0xf0] sm:$0xf]  ;;  %v1435_v4 = vor.u32 %v1651_v2, %v1434_v1  ;;  %v1667_v5 = vld [vmem:[%s2067_s8 + $0xf4] sm:$0xf0]  ;;  %v1649_v14 = vld [vmem:[%s2067_s8 + $0x64] sm:$0xf0] }
  0x6d   : > { %v1562_v6 = vld [vmem:[%s2067_s8 + $0x170] sm:$0xf]  ;;  %v1683_v7 = vld [vmem:[%s2067_s8 + $0x174] sm:$0xf0]  ;;  %v1499_v8 = vor.u32 %v1667_v5, %v1498_v3  ;;  %v1490_v15 = vld [vmem:[%s2067_s8 + $0xe0] sm:$0xf]  ;;  %v1427_v17 = vor.u32 %v1649_v14, %v1426_v12 }
  0x6e   : > { %v1563_v9 = vor.u32 %v1683_v7, %v1562_v6  ;;  %v1626_v10 = vld [vmem:[%s2067_s8 + $0x1f0] sm:$0xf]  ;;  %v1699_v11 = vld [vmem:[%s2067_s8 + $0x1f4] sm:$0xf0]  ;;  %1068 = vmatpush.bf16.msra.mxu0 %v1435_v4  ;;  %v1665_v16 = vld [vmem:[%s2067_s8 + $0xe4] sm:$0xf0] }
  0x6f   : > { %v1627_v13 = vor.u32 %v1699_v11, %v1626_v10  ;;  %1081 = vmatpush.bf16.msra.mxu1 %v1499_v8  ;;  %v1491_v18 = vor.u32 %v1665_v16, %v1490_v15  ;;  %v1554_v19 = vld [vmem:[%s2067_s8 + $0x160] sm:$0xf]  ;;  %v1681_v20 = vld [vmem:[%s2067_s8 + $0x164] sm:$0xf0]  ;;  %v1418_v24 = vld [vmem:[%s2067_s8 + $0x50] sm:$0xf] }
  0x70   : > { %1094 = vmatpush.bf16.msra.mxu2 %v1563_v9  ;;  %v1618_v21 = vld [vmem:[%s2067_s8 + $0x1e0] sm:$0xf]  ;;  %v1555_v22 = vor.u32 %v1681_v20, %v1554_v19  ;;  %v1697_v23 = vld [vmem:[%s2067_s8 + $0x1e4] sm:$0xf0]  ;;  %v1647_v25 = vld [vmem:[%s2067_s8 + $0x54] sm:$0xf0] }
  0x71   : > { %1107 = vmatpush.bf16.msra.mxu3 %v1627_v13  ;;  %v1619_v26 = vor.u32 %v1697_v23, %v1618_v21  ;;  %v1482_v27 = vld [vmem:[%s2067_s8 + $0xd0] sm:$0xf]  ;;  %v1663_v28 = vld [vmem:[%s2067_s8 + $0xd4] sm:$0xf0]  ;;  %v1419_v30 = vor.u32 %v1647_v25, %v1418_v24  ;;  %v1410_v36 = vld [vmem:[%s2067_s8 + $0x40] sm:$0xf] }
  0x72   : > { %v1546_v29 = vld [vmem:[%s2067_s8 + $0x150] sm:$0xf]  ;;  %1069 = vmatpush.bf16.msra.mxu0 %v1427_v17  ;;  %v1679_v31 = vld [vmem:[%s2067_s8 + $0x154] sm:$0xf0]  ;;  %v1483_v34 = vor.u32 %v1663_v28, %v1482_v27  ;;  %v1645_v37 = vld [vmem:[%s2067_s8 + $0x44] sm:$0xf0] }
  0x73   : > { %v1610_v32 = vld [vmem:[%s2067_s8 + $0x1d0] sm:$0xf]  ;;  %v1695_v33 = vld [vmem:[%s2067_s8 + $0x1d4] sm:$0xf0]  ;;  %1082 = vmatpush.bf16.msra.mxu1 %v1491_v18  ;;  %v1547_v35 = vor.u32 %v1679_v31, %v1546_v29  ;;  %v1474_v38 = vld [vmem:[%s2067_s8 + $0xc0] sm:$0xf]  ;;  %v1411_v45 = vor.u32 %v1645_v37, %v1410_v36 }
  0x74   : > { %1095 = vmatpush.bf16.msra.mxu2 %v1555_v22  ;;  %v1611_v39 = vor.u32 %v1695_v33, %v1610_v32  ;;  %v1661_v40 = vld [vmem:[%s2067_s8 + $0xc4] sm:$0xf0]  ;;  %v1538_v41 = vld [vmem:[%s2067_s8 + $0x140] sm:$0xf]  ;;  %v1402_v48 = vld [vmem:[%s2067_s8 + $0x30] sm:$0xf] }
  0x75   : > { %1108 = vmatpush.bf16.msra.mxu3 %v1619_v26  ;;  %v1677_v42 = vld [vmem:[%s2067_s8 + $0x144] sm:$0xf0]  ;;  %v1602_v43 = vld [vmem:[%s2067_s8 + $0x1c0] sm:$0xf]  ;;  %v1475_v46 = vor.u32 %v1661_v40, %v1474_v38  ;;  %v1643_v49 = vld [vmem:[%s2067_s8 + $0x34] sm:$0xf0] }
  0x76   : > { %v1693_v44 = vld [vmem:[%s2067_s8 + $0x1c4] sm:$0xf0]  ;;  %1070 = vmatpush.bf16.msra.mxu0 %v1419_v30  ;;  %v1539_v47 = vor.u32 %v1677_v42, %v1538_v41  ;;  %v1466_v50 = vld [vmem:[%s2067_s8 + $0xb0] sm:$0xf]  ;;  %v1659_v52 = vld [vmem:[%s2067_s8 + $0xb4] sm:$0xf0]  ;;  %v1403_v57 = vor.u32 %v1643_v49, %v1402_v48 }
  0x77   : > { %1083 = vmatpush.bf16.msra.mxu1 %v1483_v34  ;;  %v1603_v51 = vor.u32 %v1693_v44, %v1602_v43  ;;  %v1530_v53 = vld [vmem:[%s2067_s8 + $0x130] sm:$0xf]  ;;  %v1675_v54 = vld [vmem:[%s2067_s8 + $0x134] sm:$0xf0]  ;;  %v1467_v58 = vor.u32 %v1659_v52, %v1466_v50  ;;  %v1394_v60 = vld [vmem:[%s2067_s8 + $0x20] sm:$0xf] }
  0x78   : > { %1096 = vmatpush.bf16.msra.mxu2 %v1547_v35  ;;  %v1594_v55 = vld [vmem:[%s2067_s8 + $0x1b0] sm:$0xf]  ;;  %v1691_v56 = vld [vmem:[%s2067_s8 + $0x1b4] sm:$0xf0]  ;;  %v1531_v59 = vor.u32 %v1675_v54, %v1530_v53  ;;  %v1641_v61 = vld [vmem:[%s2067_s8 + $0x24] sm:$0xf0] }
  0x79   : > { %1109 = vmatpush.bf16.msra.mxu3 %v1611_v39  ;;  %v1458_v62 = vld [vmem:[%s2067_s8 + $0xa0] sm:$0xf]  ;;  %v1595_v63 = vor.u32 %v1691_v56, %v1594_v55  ;;  %v1657_v0 = vld [vmem:[%s2067_s8 + $0xa4] sm:$0xf0]  ;;  %v1395_v5 = vor.u32 %v1641_v61, %v1394_v60  ;;  %v1386_v8 = vld [vmem:[%s2067_s8 + $0x10] sm:$0xf] }
  0x7a   : > { %1071 = vmatpush.bf16.msra.mxu0 %v1411_v45  ;;  %v1522_v1 = vld [vmem:[%s2067_s8 + $0x120] sm:$0xf]  ;;  %v1673_v2 = vld [vmem:[%s2067_s8 + $0x124] sm:$0xf0]  ;;  %v1459_v6 = vor.u32 %v1657_v0, %v1458_v62  ;;  %v1639_v9 = vld [vmem:[%s2067_s8 + $0x14] sm:$0xf0] }
  0x7b   : > { %1084 = vmatpush.bf16.msra.mxu1 %v1475_v46  ;;  %v1586_v3 = vld [vmem:[%s2067_s8 + $0x1a0] sm:$0xf]  ;;  %v1689_v4 = vld [vmem:[%s2067_s8 + $0x1a4] sm:$0xf0]  ;;  %v1523_v7 = vor.u32 %v1673_v2, %v1522_v1  ;;  %v1450_v10 = vld [vmem:[%s2067_s8 + $0x90] sm:$0xf]  ;;  %v1387_v17 = vor.u32 %v1639_v9, %v1386_v8 }
  0x7c   : > { %1097 = vmatpush.bf16.msra.mxu2 %v1539_v47  ;;  %v1587_v11 = vor.u32 %v1689_v4, %v1586_v3  ;;  %v1655_v12 = vld [vmem:[%s2067_s8 + $0x94] sm:$0xf0]  ;;  %v1514_v13 = vld [vmem:[%s2067_s8 + $0x110] sm:$0xf]  ;;  %v1378_v18 = vld [vmem:[%s2067_s8] sm:$0xf] }
  0x7d   : > { %1110 = vmatpush.bf16.msra.mxu3 %v1603_v51  ;;  %v1671_v14 = vld [vmem:[%s2067_s8 + $0x114] sm:$0xf0]  ;;  %v1578_v15 = vld [vmem:[%s2067_s8 + $0x190] sm:$0xf]  ;;  %v1637_v19 = vld [vmem:[%s2067_s8 + $0x4] sm:$0xf0]  ;;  %v1451_v21 = vor.u32 %v1655_v12, %v1450_v10 }
  0x7e   : > { %1072 = vmatpush.bf16.msra.mxu0 %v1403_v57  ;;  %v1687_v16 = vld [vmem:[%s2067_s8 + $0x194] sm:$0xf0]  ;;  %v1442_v20 = vld [vmem:[%s2067_s8 + $0x80] sm:$0xf]  ;;  %v1515_v22 = vor.u32 %v1671_v14, %v1514_v13  ;;  %v1653_v23 = vld [vmem:[%s2067_s8 + $0x84] sm:$0xf0]  ;;  %v1379_v33 = vor.u32 %v1637_v19, %v1378_v18 }
  0x7f   : > { %1085 = vmatpush.bf16.msra.mxu1 %v1467_v58  ;;  %v1506_v24 = vld [vmem:[%s2067_s8 + $0x100] sm:$0xf]  ;;  %v1669_v25 = vld [vmem:[%s2067_s8 + $0x104] sm:$0xf0]  ;;  %v1579_v26 = vor.u32 %v1687_v16, %v1578_v15  ;;  %v1650_v29 = vld [vmem:[%s2067_s8 + $0x74] sm:$0xf]  ;;  %v1443_v38 = vor.u32 %v1653_v23, %v1442_v20 }
  0x80   : > { %1098 = vmatpush.bf16.msra.mxu2 %v1531_v59  ;;  %v1570_v27 = vld [vmem:[%s2067_s8 + $0x180] sm:$0xf]  ;;  %v1685_v28 = vld [vmem:[%s2067_s8 + $0x184] sm:$0xf0]  ;;  %v1436_v30 = vld [vmem:[%s2067_s8 + $0x78] sm:$0xf0]  ;;  %v1507_v39 = vor.u32 %v1669_v25, %v1506_v24 }
  0x81   : > { %1111 = vmatpush.bf16.msra.mxu3 %v1595_v63  ;;  %v1666_v31 = vld [vmem:[%s2067_s8 + $0xf4] sm:$0xf]  ;;  %v669_v32 = vld [vmem:[%s2044_s9 + $0x8] sm:$0xff]  ;;  %v1571_v43 = vor.u32 %v1685_v28, %v1570_v27  ;;  %v1439_v44 = vor.u32 %v1650_v29, %v1436_v30  ;;  %v1648_v48 = vld [vmem:[%s2067_s8 + $0x64] sm:$0xf]  ;;  %p1632_p13 = scmp.ne.s32.totalorder %s1795_s20, 8 }
  0x82   : > { %1073 = vmatpush.bf16.msra.mxu0 %v1395_v5  ;;  %v1500_v34 = vld [vmem:[%s2067_s8 + $0xf8] sm:$0xf0]  ;;  %v1682_v35 = vld [vmem:[%s2067_s8 + $0x174] sm:$0xf]  ;;  %v738_v37 = vunpack.c.l.b16 %v669_v32  ;;  %v739_v42 = vunpack.c.h.b16 %v669_v32  ;;  %v1428_v49 = vld [vmem:[%s2067_s8 + $0x68] sm:$0xf0] }
  0x83   : > { %1086 = vmatpush.bf16.msra.mxu1 %v1459_v6  ;;  %v1564_v36 = vld [vmem:[%s2067_s8 + $0x178] sm:$0xf0]  ;;  %v1698_v40 = vld [vmem:[%s2067_s8 + $0x1f4] sm:$0xf]  ;;  %v1503_v46 = vor.u32 %v1666_v31, %v1500_v34  ;;  %v1664_v50 = vld [vmem:[%s2067_s8 + $0xe4] sm:$0xf]  ;;  %v1431_v62 = vor.u32 %v1648_v48, %v1428_v49 }
  0x84   : > { %1099 = vmatpush.bf16.msra.mxu2 %v1523_v7  ;;  %v1628_v41 = vld [vmem:[%s2067_s8 + $0x1f8] sm:$0xf0]  ;;  %v668_v45 = vld [vmem:[%s2044_s9] sm:$0xff]  ;;  %v1567_v47 = vor.u32 %v1682_v35, %v1564_v36  ;;  %v1492_v54 = vld [vmem:[%s2067_s8 + $0xe8] sm:$0xf0]  ;;  %v2150_v57 = vpack.c.b16 %v738_v37, %v738_v37  ;;  %v2154_v60 = vpack.c.b16 %v739_v42, %v739_v42 }
  0x85   : > { %1112 = vmatpush.bf16.msra.mxu3 %v1587_v11  ;;  %v736_v51 = vunpack.c.l.b16 %v668_v45  ;;  %v737_v52 = vunpack.c.h.b16 %v668_v45  ;;  %v1631_v53 = vor.u32 %v1698_v40, %v1628_v41  ;;  %v1680_v55 = vld [vmem:[%s2067_s8 + $0x164] sm:$0xf]  ;;  %v1556_v56 = vld [vmem:[%s2067_s8 + $0x168] sm:$0xf0]  ;;  %v1495_v0 = vor.u32 %v1664_v50, %v1492_v54  ;;  %v1646_v2 = vld [vmem:[%s2067_s8 + $0x54] sm:$0xf] }
  0x86   : > { %1074 = vmatpush.bf16.msra.mxu0 %v1387_v17  ;;  %v1696_v58 = vld [vmem:[%s2067_s8 + $0x1e4] sm:$0xf]  ;;  %v1620_v59 = vld [vmem:[%s2067_s8 + $0x1e8] sm:$0xf0]  ;;  %v1559_v1 = vor.u32 %v1680_v55, %v1556_v56  ;;  %v1420_v3 = vld [vmem:[%s2067_s8 + $0x58] sm:$0xf0] }
  0x87   : > { %1087 = vmatpush.bf16.msra.mxu1 %v1451_v21  ;;  %v2156_v61 = vpack.c.b16 %v736_v51, %v736_v51  ;;  %v2158_v63 = vpack.c.b16 %v737_v52, %v737_v52  ;;  %v1662_v4 = vld [vmem:[%s2067_s8 + $0xd4] sm:$0xf]  ;;  %v1623_v5 = vor.u32 %v1696_v58, %v1620_v59  ;;  %v1484_v6 = vld [vmem:[%s2067_s8 + $0xd8] sm:$0xf0]  ;;  %v1423_v11 = vor.u32 %v1646_v2, %v1420_v3  ;;  %v1644_v14 = vld [vmem:[%s2067_s8 + $0x44] sm:$0xf] }
  0x88   : > { %1100 = vmatpush.bf16.msra.mxu2 %v1515_v22  ;;  %v1678_v7 = vld [vmem:[%s2067_s8 + $0x154] sm:$0xf]  ;;  %v1548_v8 = vld [vmem:[%s2067_s8 + $0x158] sm:$0xf0]  ;;  %v1487_v12 = vor.u32 %v1662_v4, %v1484_v6  ;;  %v1412_v15 = vld [vmem:[%s2067_s8 + $0x48] sm:$0xf0] }
  0x89   : > { %1113 = vmatpush.bf16.msra.mxu3 %v1579_v26  ;;  %v1694_v9 = vld [vmem:[%s2067_s8 + $0x1d4] sm:$0xf]  ;;  %v1612_v10 = vld [vmem:[%s2067_s8 + $0x1d8] sm:$0xf0]  ;;  %v1551_v13 = vor.u32 %v1678_v7, %v1548_v8  ;;  %v1660_v16 = vld [vmem:[%s2067_s8 + $0xc4] sm:$0xf]  ;;  %v1415_v23 = vor.u32 %v1644_v14, %v1412_v15 }
  0x8a   : > { %1075 = vmatpush.bf16.msra.mxu0 %v1379_v33  ;;  %v1615_v17 = vor.u32 %v1694_v9, %v1612_v10  ;;  %v1476_v18 = vld [vmem:[%s2067_s8 + $0xc8] sm:$0xf0]  ;;  %v1676_v19 = vld [vmem:[%s2067_s8 + $0x144] sm:$0xf]  ;;  %v1642_v26 = vld [vmem:[%s2067_s8 + $0x34] sm:$0xf] }
  0x8b   : > { %1088 = vmatpush.bf16.msra.mxu1 %v1443_v38  ;;  %v1540_v20 = vld [vmem:[%s2067_s8 + $0x148] sm:$0xf0]  ;;  %v1692_v21 = vld [vmem:[%s2067_s8 + $0x1c4] sm:$0xf]  ;;  %v1479_v24 = vor.u32 %v1660_v16, %v1476_v18  ;;  %v1404_v27 = vld [vmem:[%s2067_s8 + $0x38] sm:$0xf0] }
  0x8c   : > { %1101 = vmatpush.bf16.msra.mxu2 %v1507_v39  ;;  %v1604_v22 = vld [vmem:[%s2067_s8 + $0x1c8] sm:$0xf0]  ;;  %v1543_v25 = vor.u32 %v1676_v19, %v1540_v20  ;;  %v1658_v28 = vld [vmem:[%s2067_s8 + $0xb4] sm:$0xf]  ;;  %v1468_v30 = vld [vmem:[%s2067_s8 + $0xb8] sm:$0xf0]  ;;  %v1407_v35 = vor.u32 %v1642_v26, %v1404_v27 }
  0x8d   : > { %1114 = vmatpush.bf16.msra.mxu3 %v1571_v43  ;;  %1076 = vmatmul.bf16.vlgmr.msra.gmra.mxu0 %v2156_v61  ;;  %v1607_v29 = vor.u32 %v1692_v21, %v1604_v22  ;;  %v1674_v31 = vld [vmem:[%s2067_s8 + $0x134] sm:$0xf]  ;;  %v1532_v32 = vld [vmem:[%s2067_s8 + $0x138] sm:$0xf0]  ;;  %v1471_v36 = vor.u32 %v1658_v28, %v1468_v30  ;;  %v1640_v38 = vld [vmem:[%s2067_s8 + $0x24] sm:$0xf] }
  0x8e   : > { %1120 = vmatpush.bf16.msrb.mxu0 %v1439_v44  ;;  %1089 = vmatmul.bf16.vlgmr.msra.gmra.mxu1 %v2158_v63  ;;  %v1690_v33 = vld [vmem:[%s2067_s8 + $0x1b4] sm:$0xf]  ;;  %v1596_v34 = vld [vmem:[%s2067_s8 + $0x1b8] sm:$0xf0]  ;;  %v1535_v37 = vor.u32 %v1674_v31, %v1532_v32  ;;  %v1396_v39 = vld [vmem:[%s2067_s8 + $0x28] sm:$0xf0] }
  0x8f   : > { %1133 = vmatpush.bf16.msrb.mxu1 %v1503_v46  ;;  %1102 = vmatmul.bf16.vlgmr.msra.gmra.mxu2 %v2150_v57  ;;  %v1656_v40 = vld [vmem:[%s2067_s8 + $0xa4] sm:$0xf]  ;;  %v1599_v41 = vor.u32 %v1690_v33, %v1596_v34  ;;  %v1460_v42 = vld [vmem:[%s2067_s8 + $0xa8] sm:$0xf0]  ;;  %v1638_v50 = vld [vmem:[%s2067_s8 + $0x14] sm:$0xf] }
  0x90   : > { %1146 = vmatpush.bf16.msrb.mxu2 %v1567_v47  ;;  %1115 = vmatmul.bf16.vlgmr.msra.gmra.mxu3 %v2154_v60  ;;  %v1672_v43 = vld [vmem:[%s2067_s8 + $0x124] sm:$0xf]  ;;  %v1524_v44 = vld [vmem:[%s2067_s8 + $0x128] sm:$0xf0]  ;;  %v1399_v47 = vor.u32 %v1640_v38, %v1396_v39  ;;  %v1463_v48 = vor.u32 %v1656_v40, %v1460_v42  ;;  %v1388_v51 = vld [vmem:[%s2067_s8 + $0x18] sm:$0xf0] }
  0x91   : > { %1159 = vmatpush.bf16.msrb.mxu3 %v1631_v53  ;;  %v1688_v45 = vld [vmem:[%s2067_s8 + $0x1a4] sm:$0xf]  ;;  %v1588_v46 = vld [vmem:[%s2067_s8 + $0x1a8] sm:$0xf0]  ;;  %v1527_v49 = vor.u32 %v1672_v43, %v1524_v44  ;;  %v1654_v52 = vld [vmem:[%s2067_s8 + $0x94] sm:$0xf] }
  0x92   : > { %1121 = vmatpush.bf16.msrb.mxu0 %v1431_v62  ;;  %v1591_v53 = vor.u32 %v1688_v45, %v1588_v46  ;;  %v1452_v54 = vld [vmem:[%s2067_s8 + $0x98] sm:$0xf0]  ;;  %v1670_v55 = vld [vmem:[%s2067_s8 + $0x114] sm:$0xf]  ;;  %v1391_v62 = vor.u32 %v1638_v50, %v1388_v51  ;;  %v1636_v2 = vld [vmem:[%s2067_s8 + $0x4] sm:$0xf] }
  0x93   : > { %1134 = vmatpush.bf16.msrb.mxu1 %v1495_v0  ;;  %v1516_v56 = vld [vmem:[%s2067_s8 + $0x118] sm:$0xf0]  ;;  %v1686_v58 = vld [vmem:[%s2067_s8 + $0x194] sm:$0xf]  ;;  %v1455_v0 = vor.u32 %v1654_v52, %v1452_v54  ;;  %v1380_v3 = vld [vmem:[%s2067_s8 + $0x8] sm:$0xf0] }
  0x94   : > { %1147 = vmatpush.bf16.msrb.mxu2 %v1559_v1  ;;  %v1580_v59 = vld [vmem:[%s2067_s8 + $0x198] sm:$0xf0]  ;;  %v1519_v1 = vor.u32 %v1670_v55, %v1516_v56  ;;  %v1652_v4 = vld [vmem:[%s2067_s8 + $0x84] sm:$0xf]  ;;  %v1444_v6 = vld [vmem:[%s2067_s8 + $0x88] sm:$0xf0] }
  0x95   : > { %1160 = vmatpush.bf16.msrb.mxu3 %v1623_v5  ;;  %v1583_v5 = vor.u32 %v1686_v58, %v1580_v59  ;;  %v1668_v7 = vld [vmem:[%s2067_s8 + $0x104] sm:$0xf]  ;;  %v1508_v8 = vld [vmem:[%s2067_s8 + $0x108] sm:$0xf0]  ;;  %v666_v21 = vld [vmem:[#allocation2] sm:$0xff] }
  0x96   : > { %1122 = vmatpush.bf16.msrb.mxu0 %v1423_v11  ;;  %v1684_v9 = vld [vmem:[%s2067_s8 + $0x184] sm:$0xf]  ;;  %v1572_v10 = vld [vmem:[%s2067_s8 + $0x188] sm:$0xf0]  ;;  %v1383_v11 = vor.u32 %v1636_v2, %v1380_v3  ;;  %v667_v31 = vld [vmem:[#allocation2 + $0x8] sm:$0xff] }
  0x97   : > { %1135 = vmatpush.bf16.msrb.mxu1 %v1487_v12  ;;  %v1447_v12 = vor.u32 %v1652_v4, %v1444_v6  ;;  %v1575_v14 = vor.u32 %v1684_v9, %v1572_v10 }
  0x98   : > { %1148 = vmatpush.bf16.msrb.mxu2 %v1551_v13  ;;  %v1511_v13 = vor.u32 %v1668_v7, %v1508_v8 }
  0x99   : > { %1161 = vmatpush.bf16.msrb.mxu3 %v1615_v17 }
  0x9a   : > { %1123 = vmatpush.bf16.msrb.mxu0 %v1415_v23 }
  0x9b   : > { %1136 = vmatpush.bf16.msrb.mxu1 %v1479_v24 }
  0x9c   : > { %1149 = vmatpush.bf16.msrb.mxu2 %v1543_v25 }
  0x9d   : > { %1162 = vmatpush.bf16.msrb.mxu3 %v1607_v29 }
  0x9e   : > { %1124 = vmatpush.bf16.msrb.mxu0 %v1407_v35 }
  0x9f   : > { %1137 = vmatpush.bf16.msrb.mxu1 %v1471_v36 }
  0xa0   : > { %1150 = vmatpush.bf16.msrb.mxu2 %v1535_v37 }
  0xa1   : > { %1163 = vmatpush.bf16.msrb.mxu3 %v1599_v41 }
  0xa2   : > { %1125 = vmatpush.bf16.msrb.mxu0 %v1399_v47 }
  0xa3   : > { %1138 = vmatpush.bf16.msrb.mxu1 %v1463_v48 }
  0xa4   : > { %1151 = vmatpush.bf16.msrb.mxu2 %v1527_v49 }
  0xa5   : > { %1164 = vmatpush.bf16.msrb.mxu3 %v1591_v53 }
  0xa6   : > { %1126 = vmatpush.bf16.msrb.mxu0 %v1391_v62 }
  0xa7   : > { %1139 = vmatpush.bf16.msrb.mxu1 %v1455_v0 }
  0xa8   : > { %1152 = vmatpush.bf16.msrb.mxu2 %v1519_v1 }
  0xa9   : > { %1165 = vmatpush.bf16.msrb.mxu3 %v1583_v5 }
  0xaa   : > { %1127 = vmatpush.bf16.msrb.mxu0 %v1383_v11 }
  0xab   : > { %1140 = vmatpush.bf16.msrb.mxu1 %v1447_v12 }
  0xac   : > { %1153 = vmatpush.bf16.msrb.mxu2 %v1511_v13 }
  0xad   : > { %1166 = vmatpush.bf16.msrb.mxu3 %v1575_v14  ;;  %1128 = vmatmul.bf16.vlgmr.msrb.gmra.mxu0 %v2156_v61 }
  0xae   : > { %1141 = vmatmul.bf16.vlgmr.msrb.gmra.mxu1 %v2158_v63 }
  0xaf   : > { %1154 = vmatmul.bf16.vlgmr.msrb.gmra.mxu2 %v2150_v57 }
  0xb0   : > { %1167 = vmatmul.bf16.vlgmr.msrb.gmra.mxu3 %v2154_v60 }
 0x10a   : > { %v1077_v15 = vpop.f32.mrf.mxu0 }
 0x10b   : > { %v1090_v16 = vpop.f32.mrf.mxu1 }
 0x10c   : > { %v1091_v17 = vadd.f32 %v1090_v16, %v1077_v15 }
 0x112   : > { %v1103_v18 = vpop.f32.mrf.mxu2  ;;  %v1079_v23 = vpop.f32.mrf.mxu0 }
 0x113   : > { %v1104_v19 = vadd.f32 %v1103_v18, %v1091_v17  ;;  %v1116_v20 = vpop.f32.mrf.mxu3  ;;  %v1092_v24 = vpop.f32.mrf.mxu1 }
 0x115   : > { %v1117_v22 = vadd.f32 %v1116_v20, %v1104_v19 }
 0x117   : > { %v1172_v25 = vadd.f32 %v1117_v22, %v666_v21 }
 0x119   : > { %1174 = vst [vmem:[#allocation2] sm:$0xff] %v1172_v25 }
 0x11a   : > { %v1105_v26 = vpop.f32.mrf.mxu2 }
 0x11b   : > { %v1118_v61 = vpop.f32.mrf.mxu3 }
 0x12a   : > { %v1129_v27 = vpop.f32.mrf.mxu0 }
 0x12b   : > { %v1142_v63 = vpop.f32.mrf.mxu1 }
 0x12c   : > { %v1143_v28 = vadd.f32 %v1142_v63, %v1129_v27 }
 0x132   : > { %v1155_v57 = vpop.f32.mrf.mxu2  ;;  %v1131_v30 = vpop.f32.mrf.mxu0 }
 0x133   : > { %v1156_v29 = vadd.f32 %v1155_v57, %v1143_v28  ;;  %v1168_v60 = vpop.f32.mrf.mxu3  ;;  %v1144_v32 = vpop.f32.mrf.mxu1 }
 0x135   : > { %v1169_v33 = vadd.f32 %v1168_v60, %v1156_v29 }
 0x137   : > { %v1173_v34 = vadd.f32 %v1169_v33, %v667_v31  ;;  %1179 = sbr.rel (%p1632_p13) target bundleno = 330 (0x14a), region = 86 }
 0x139   : > { %1175 = vst [vmem:[#allocation2 + $0x8] sm:$0xff] %v1173_v34 }
 0x13a   : > { %v1157_v35 = vpop.f32.mrf.mxu2 }
 0x13b   : > { %v1170_v36 = vpop.f32.mrf.mxu3 }
 0x13c   : > { %v1180_v37 = vld [vmem:[#allocation2] sm:$0xff]  ;;  %v1199_v48 = vld [vmem:[%s2060_s17 + $0x8] sm:$0xff] }
 0x13d   : > { %v1182_v38 = vld [vmem:[%s633_s18] sm:$0x3] }
 0x13e   : > { %v1190_v39 = vld [vmem:[%s638_s21] sm:$0x3]  ;;  %v1184_v40 = vperm.slane %v1182_v38, 0  ;;  %v1185_v43 = vperm.slane %v1182_v38, 1 }
 0x13f   : > { %v1192_v41 = vperm.slane %v1190_v39, 0  ;;  %v1193_v44 = vperm.slane %v1190_v39, 1  ;;  %v1198_v47 = vld [vmem:[%s2060_s17] sm:$0xff] }
 0x140   : > { %v1181_v42 = vld [vmem:[#allocation2 + $0x8] sm:$0xff]  ;;  %v1188_v45 = vmul.f32 %v1184_v40, %v1180_v37 }
 0x141   : > { %v1189_v46 = vmul.f32 %v1185_v43, %v1181_v42 }
 0x142   : > { %v1196_v49 = vadd.f32 %v1192_v41, %v1188_v45 }
 0x143   : > { %v1197_v50 = vadd.f32 %v1193_v44, %v1189_v46 }
 0x144   : > { %v1200_v51 = vadd.f32 %v1198_v47, %v1196_v49 }
 0x145   : > { %v1201_v52 = vadd.f32 %v1199_v48, %v1197_v50 }
 0x146   : > { %v1202_v53 = vmax.f32 %v1200_v51, 0.0 }
 0x147   : > { %v1203_v54 = vmax.f32 %v1201_v52, 0.0 }
 0x148   : > { %1204 = vst [vmem:[%s2065_s7] sm:$0xff] %v1202_v53 }
 0x149   : > { %1205 = vst [vmem:[%s2065_s7 + $0x8] sm:$0xff] %v1203_v54 }
 0x14a PF: > { %s15_s24 = sadd.s32 1, %s1811_s24   ;;  %s2258_s18 = smov %s1791_s19 }
 0x14b   : > { %p12_p0 = scmp.ge.s32.totalorder %s15_s24, 20   ;;  %s2259_s19 = smov %s1895_s6 }
 0x14c   : > { %s2260_s20 = smov %s1803_s22  ;;  %s2261_s21 = smov %s1807_s23 }
 0x14d   : > { %s2262_s22 = smov %s2265_s25  ;;  %s2263_s23 = smov %s2269_s26 }
 0x14e   :  { %14 = sbr.rel (!%p12_p0) target bundleno = 4 (0x4), region = 133 }

// kernel: tile.8
= control target key start
LH: loop header
LB: loop body
LE: loop exit
PB: predicated region body
PF: predicated region fallthrough
CT: control target
= control target key end

     0   :  { %s28_s0 = inlined_call_operand.vmem [shape: f32[16], index: 0, kind: input, shape index: {}]   ;;  %s29_s1 = inlined_call_operand.vmem [shape: f32[16,16], index: 1, kind: output, shape index: {}]  }
   0x1   :  { %v4_v0 = vld [vmem:[%s28_s0] ss:$0 sm:$0xff] }
   0x2   :  { %5 = vst [vmem:[%s29_s1] sm:$0xff] %v4_v0 }
   0x3   :  { %8 = vst [vmem:[%s29_s1 + $0x8] sm:$0xff] %v4_v0 }

// kernel: _lambda_.42
= control target key start
LH: loop header
LB: loop body
LE: loop exit
PB: predicated region body
PF: predicated region fallthrough
CT: control target
= control target key end

     0   :  { %s666_s1 = inlined_call_operand.vmem [shape: bf16[512,128], index: 1, kind: input, shape index: {}]   ;;  %s667_s0 = inlined_call_operand.vmem [shape: bf16[8,512], index: 0, kind: input, shape index: {}]   ;;  %s668_s2 = inlined_call_operand.vmem [shape: f32[1,128], index: 2, kind: input, shape index: {}]   ;;  %s669_s3 = inlined_call_operand.vmem [shape: f32[1,128], index: 3, kind: input, shape index: {}]   ;;  %s670_s4 = inlined_call_operand.vmem [shape: f32[8,128], index: 4, kind: output, shape index: {}]  }
   0x1   :  { %v503_v0 = vld [vmem:[%s666_s1 + $0x38] sm:$0xff]  ;;  %v502_v4 = vld [vmem:[%s666_s1 + $0x30] sm:$0xff]  ;;  %v501_v8 = vld [vmem:[%s666_s1 + $0x28] sm:$0xff] }
   0x2   :  { %v511_v1 = vld [vmem:[%s666_s1 + $0x78] sm:$0xff]  ;;  %295 = vmatpush.bf16.msra.mxu0 %v503_v0  ;;  %v510_v5 = vld [vmem:[%s666_s1 + $0x70] sm:$0xff]  ;;  %v509_v9 = vld [vmem:[%s666_s1 + $0x68] sm:$0xff] }
   0x3   :  { %v519_v2 = vld [vmem:[%s666_s1 + $0xb8] sm:$0xff]  ;;  %308 = vmatpush.bf16.msra.mxu1 %v511_v1  ;;  %v518_v6 = vld [vmem:[%s666_s1 + $0xb0] sm:$0xff]  ;;  %v517_v10 = vld [vmem:[%s666_s1 + $0xa8] sm:$0xff] }
   0x4   :  { %v527_v3 = vld [vmem:[%s666_s1 + $0xf8] sm:$0xff]  ;;  %321 = vmatpush.bf16.msra.mxu2 %v519_v2  ;;  %v526_v7 = vld [vmem:[%s666_s1 + $0xf0] sm:$0xff]  ;;  %v525_v11 = vld [vmem:[%s666_s1 + $0xe8] sm:$0xff] }
   0x5   :  { %334 = vmatpush.bf16.msra.mxu3 %v527_v3  ;;  %v500_v12 = vld [vmem:[%s666_s1 + $0x20] sm:$0xff]  ;;  %v499_v16 = vld [vmem:[%s666_s1 + $0x18] sm:$0xff]  ;;  %v498_v20 = vld [vmem:[%s666_s1 + $0x10] sm:$0xff] }
   0x6   :  { %296 = vmatpush.bf16.msra.mxu0 %v502_v4  ;;  %v508_v13 = vld [vmem:[%s666_s1 + $0x60] sm:$0xff]  ;;  %v507_v17 = vld [vmem:[%s666_s1 + $0x58] sm:$0xff]  ;;  %v506_v21 = vld [vmem:[%s666_s1 + $0x50] sm:$0xff] }
   0x7   :  { %309 = vmatpush.bf16.msra.mxu1 %v510_v5  ;;  %v516_v14 = vld [vmem:[%s666_s1 + $0xa0] sm:$0xff]  ;;  %v515_v18 = vld [vmem:[%s666_s1 + $0x98] sm:$0xff]  ;;  %v514_v22 = vld [vmem:[%s666_s1 + $0x90] sm:$0xff] }
   0x8   :  { %322 = vmatpush.bf16.msra.mxu2 %v518_v6  ;;  %v524_v15 = vld [vmem:[%s666_s1 + $0xe0] sm:$0xff]  ;;  %v523_v19 = vld [vmem:[%s666_s1 + $0xd8] sm:$0xff]  ;;  %v522_v23 = vld [vmem:[%s666_s1 + $0xd0] sm:$0xff] }
   0x9   :  { %335 = vmatpush.bf16.msra.mxu3 %v526_v7  ;;  %v497_v24 = vld [vmem:[%s666_s1 + $0x8] sm:$0xff]  ;;  %v23_v26 = vld [vmem:[%s667_s0] sm:$0xff] }
   0xa   :  { %297 = vmatpush.bf16.msra.mxu0 %v501_v8  ;;  %v505_v25 = vld [vmem:[%s666_s1 + $0x48] sm:$0xff]  ;;  %v91_v30 = vunpack.c.l.b16 %v23_v26  ;;  %v92_v31 = vunpack.c.h.b16 %v23_v26  ;;  %v496_v32 = vld [vmem:[%s666_s1] sm:$0xff] }
   0xb   :  { %310 = vmatpush.bf16.msra.mxu1 %v509_v9  ;;  %v513_v27 = vld [vmem:[%s666_s1 + $0x88] sm:$0xff]  ;;  %v504_v33 = vld [vmem:[%s666_s1 + $0x40] sm:$0xff] }
   0xc   :  { %323 = vmatpush.bf16.msra.mxu2 %v517_v10  ;;  %v521_v28 = vld [vmem:[%s666_s1 + $0xc8] sm:$0xff]  ;;  %v512_v36 = vld [vmem:[%s666_s1 + $0x80] sm:$0xff]  ;;  %v95_v38 = vpack.c.b16 %v91_v30, %v91_v30  ;;  %v96_v39 = vpack.c.b16 %v92_v31, %v92_v31 }
   0xd   :  { %336 = vmatpush.bf16.msra.mxu3 %v525_v11  ;;  %v24_v29 = vld [vmem:[%s667_s0 + $0x8] sm:$0xff]  ;;  %v520_v37 = vld [vmem:[%s666_s1 + $0xc0] sm:$0xff] }
   0xe   :  { %298 = vmatpush.bf16.msra.mxu0 %v500_v12  ;;  %v93_v34 = vunpack.c.l.b16 %v24_v29  ;;  %v94_v35 = vunpack.c.h.b16 %v24_v29  ;;  %v528_v48 = vld [vmem:[%s668_s2] ss:$0 sm:$0xff] }
   0xf   :  { %311 = vmatpush.bf16.msra.mxu1 %v508_v13  ;;  %v529_v52 = vld [vmem:[%s669_s3] ss:$0 sm:$0xff] }
  0x10   :  { %324 = vmatpush.bf16.msra.mxu2 %v516_v14  ;;  %v97_v40 = vpack.c.b16 %v93_v34, %v93_v34  ;;  %v98_v41 = vpack.c.b16 %v94_v35, %v94_v35 }
  0x11   :  { %337 = vmatpush.bf16.msra.mxu3 %v524_v15 }
  0x12   :  { %299 = vmatpush.bf16.msra.mxu0 %v499_v16 }
  0x13   :  { %312 = vmatpush.bf16.msra.mxu1 %v507_v17 }
  0x14   :  { %325 = vmatpush.bf16.msra.mxu2 %v515_v18 }
  0x15   :  { %338 = vmatpush.bf16.msra.mxu3 %v523_v19 }
  0x16   :  { %300 = vmatpush.bf16.msra.mxu0 %v498_v20 }
  0x17   :  { %313 = vmatpush.bf16.msra.mxu1 %v506_v21 }
  0x18   :  { %326 = vmatpush.bf16.msra.mxu2 %v514_v22 }
  0x19   :  { %339 = vmatpush.bf16.msra.mxu3 %v522_v23 }
  0x1a   :  { %301 = vmatpush.bf16.msra.mxu0 %v497_v24 }
  0x1b   :  { %314 = vmatpush.bf16.msra.mxu1 %v505_v25 }
  0x1c   :  { %327 = vmatpush.bf16.msra.mxu2 %v513_v27 }
  0x1d   :  { %340 = vmatpush.bf16.msra.mxu3 %v521_v28 }
  0x1e   :  { %302 = vmatpush.bf16.msra.mxu0 %v496_v32 }
  0x1f   :  { %315 = vmatpush.bf16.msra.mxu1 %v504_v33 }
  0x20   :  { %328 = vmatpush.bf16.msra.mxu2 %v512_v36 }
  0x21   :  { %341 = vmatpush.bf16.msra.mxu3 %v520_v37  ;;  %303 = vmatmul.bf16.vlgmr.msra.gmra.mxu0 %v95_v38 }
  0x22   :  { %316 = vmatmul.bf16.vlgmr.msra.gmra.mxu1 %v96_v39 }
  0x23   :  { %329 = vmatmul.bf16.vlgmr.msra.gmra.mxu2 %v97_v40 }
  0x24   :  { %342 = vmatmul.bf16.vlgmr.msra.gmra.mxu3 %v98_v41 }
  0x9e   :  { %v304_v42 = vpop.f32.mrf.mxu0 }
  0x9f   :  { %v317_v43 = vpop.f32.mrf.mxu1 }
  0xa0   :  { %v318_v44 = vadd.f32 %v317_v43, %v304_v42 }
  0xa6   :  { %v330_v45 = vpop.f32.mrf.mxu2  ;;  %v306_v49 = vpop.f32.mrf.mxu0 }
  0xa7   :  { %v343_v46 = vpop.f32.mrf.mxu3  ;;  %v331_v47 = vadd.f32 %v330_v45, %v318_v44  ;;  %v319_v50 = vpop.f32.mrf.mxu1 }
  0xa9   :  { %v344_v51 = vadd.f32 %v343_v46, %v331_v47 }
  0xab   :  { %v357_v53 = vmul.f32 %v528_v48, %v344_v51 }
  0xad   :  { %v362_v54 = vadd.f32 %v529_v52, %v357_v53 }
  0xae   :  { %v332_v55 = vpop.f32.mrf.mxu2 }
  0xaf   :  { %v345_v56 = vpop.f32.mrf.mxu3  ;;  %363 = vst [vmem:[%s670_s4] sm:$0xff] %v362_v54 }

// kernel: _lambda_.43
= control target key start
LH: loop header
LB: loop body
LE: loop exit
PB: predicated region body
PF: predicated region fallthrough
CT: control target
= control target key end

     0   :  { %s675_s15 = smov 0   ;;  %s789_s0 = inlined_call_operand.vmem [shape: f32[2,1,6], index: 0, kind: input, shape index: {}]   ;;  %s790_s1 = inlined_call_operand.vmem [shape: f32[1,256], index: 1, kind: input, shape index: {}]   ;;  %s791_s2 = inlined_call_operand.vmem [shape: f32[1,256], index: 2, kind: input, shape index: {}]   ;;  %s792_s3 = inlined_call_operand.vmem [shape: f32[2,48,16], index: 3, kind: input, shape index: {}]   ;;  %s793_s4 = inlined_call_operand.vmem [shape: f32[2,3,256], index: 4, kind: output, shape index: {}]  }
   0x1 LB: > { %s581_s16 = sadd.s32 4294967295, %s642_s15   ;;  %p585_p0 = scmp.ge.s32.totalorder %s642_s15, 1  ;;  %s642_s15 = sphi %s675_s15, %s14_s15  }
   0x2   : > { %p170_p1 = scmp.lt.s32.totalorder %s642_s15, 3 }
   0x4   : > { %p171_p2 = pnand %p585_p0, %p170_p1 }
   0x5   : > { %p199_p3 = scmp.lt.s32.totalorder (!%p171_p2), %s581_s16, 1 }
   0x6   : > { %174 = sbr.rel (%p171_p2) target bundleno = 343 (0x157), region = 36 }
   0xb   : > { %v644_v0 = vmov 0   ;;  %v645_v1 = vmov 2   ;;  %s809_s16 = smov (!%p199_p3, %s581_s16), 1  ;;  %v646_v3 = vmov 1   ;;  %v647_v4 = vmov 3  }
   0xc   : > { %629 = vset.pattern.permute.xlu0 %v644_v0  ;;  %631 = vset.pattern.permute.xlu1 %v645_v1  ;;  %s201_s19 = scalar_lea.vmem %s789_s0, %s809_s16  ;;  %v692_v7 = vld [vmem:[%s790_s1] sm:$0x3]  ;;  %v648_v15 = vmov 4   ;;  %v270_v20 = vlaneseq  ;;  %v649_v21 = vmov 5   ;;  %s610_s24 = smul.u32 48, %s809_s16  ;;  %vm349_vm8 = vcmask 130048  }
   0xd   : > { %v212_v2 = vld [vmem:[%s201_s19] sm:$0x1]  ;;  %633 = vset.pattern.permute.xlu2 %v648_v15  ;;  %s605_s28 = sshll.u32 %s809_s16, 3 }
   0xe   : > { %217 = vperm.xlu0 %629, %v212_v2   ;;  %230 = vperm.xlu1 %631, %v212_v2   ;;  %v697_v8 = vld [vmem:[%s791_s2] sm:$0x3]  ;;  %v701_v24 = vshrl.u32 %v270_v20, 7  ;;  %s206_s27 = scalar_lea.vmem %s792_s3, %s610_s24  ;;  %s211_s5 = scalar_lea.vmem %s793_s4, %s605_s28 }
   0xf   : > { %242 = vperm.xlu2 %633, %v212_v2   ;;  %v343_v55 = vld [vmem:[%s206_s27] sm:$0xff]  ;;  %v346_v56 = vld [vmem:[%s206_s27 + $0x18] sm:$0xff]  ;;  %v344_v57 = vld [vmem:[%s206_s27 + $0x8] sm:$0xff] }
  0x10   : > { %v704_v28 = vadd.s32 8, %v701_v24  ;;  %v347_v58 = vld [vmem:[%s206_s27 + $0x20] sm:$0xff]  ;;  %v345_v59 = vld [vmem:[%s206_s27 + $0x10] sm:$0xff]  ;;  %v348_v60 = vld [vmem:[%s206_s27 + $0x28] sm:$0xff] }
  0x16   : > { %630 = vset.pattern.permute.xlu0 %v646_v3  ;;  %632 = vset.pattern.permute.xlu1 %v647_v4 }
  0x17   : > { %223 = vperm.xlu0 %630, %v212_v2   ;;  %236 = vperm.xlu1 %632, %v212_v2  }
  0x18   : > { %634 = vset.pattern.permute.xlu2 %v649_v21 }
  0x19   : > { %249 = vperm.xlu2 %634, %v212_v2  }
  0x1f   : > { %635 = vset.pattern.permute.xlu0 %v649_v21 }
  0x69   : > { %v243_v61 = vpop.permute.xlu2 %242 }
  0x6a   : > { %v245_v63 = vperm.slane %v243_v61, 0 }
  0x6c   : > { %v246_v1 = vmul.f32 %v245_v63, %v697_v8 }
  0x73   : > { %v250_v3 = vpop.permute.xlu2 %249 }
  0x80   : > { %v218_v5 = vpop.permute.xlu0 %217  ;;  %v231_v10 = vpop.permute.xlu1 %230 }
  0x81   : > { %v220_v6 = vperm.slane %v218_v5, 0  ;;  %v233_v14 = vperm.slane %v231_v10, 0  ;;  %v252_v5 = vperm.slane %v250_v3, 0 }
  0x83   : > { %v221_v12 = vmul.f32 %v220_v6, %v692_v7 }
  0x89   : > { %v224_v9 = vpop.permute.xlu0 %223  ;;  %v237_v62 = vpop.permute.xlu1 %236 }
  0x8a   : > { %v226_v11 = vperm.slane %v224_v9, 0  ;;  %v239_v0 = vperm.slane %v237_v62, 0 }
  0x8c   : > { %v227_v13 = vmul.f32 %v226_v11, %v697_v8  ;;  %v240_v2 = vmul.f32 %v239_v0, %v692_v7 }
  0x8e   : > { %v228_v16 = vadd.f32 %v227_v13, %v221_v12  ;;  %v247_v4 = vadd.f32 %v246_v1, %v240_v2 }
  0x90   : > { %v234_v17 = vadd.f32 %v233_v14, %v228_v16  ;;  %v253_v6 = vadd.f32 %v252_v5, %v247_v4 }
  0x92   : > { %v254_v18 = vadd.f32 1.0, %v234_v17  ;;  %v258_v9 = vadd.f32 1.0, %v253_v6 }
  0x94   : > { %v255_v19 = vmul.f32 16.0, %v254_v18  ;;  %v259_v10 = vmul.f32 16.0, %v258_v9 }
  0x96   : > { %v589_v22 = vadd.f32 -1.0, %v255_v19  ;;  %v590_v11 = vadd.f32 -1.0, %v259_v10 }
  0x98   : > { %v257_v23 = vmul.f32 0.5, %v589_v22  ;;  %v261_v12 = vmul.f32 0.5, %v590_v11 }
  0x9a   : > { %v262_v25 = vfloor.f32 %v257_v23  ;;  %v263_v13 = vfloor.f32 %v261_v12 }
  0x9c   : > { %v264_v26 = vsub.f32 %v257_v23, %v262_v25  ;;  %v612_v27 = vcvt.f32.s32 %v262_v25  ;;  %v614_v14 = vcvt.f32.s32 %v263_v13  ;;  %v266_v15 = vsub.f32 %v261_v12, %v263_v13 }
  0x9e   : > { %v265_v29 = vsub.f32 1.0, %v264_v26  ;;  %v273_v30 = vperm.slane %v612_v27, 0  ;;  %v288_v31 = vadd.s32 1, %v612_v27  ;;  %v296_v32 = vperm.slane %v264_v26, 0 }
  0x9f   : > { %v274_v33 = vperm.slane %v612_v27, 1  ;;  %v297_v34 = vperm.slane %v264_v26, 1  ;;  %v323_v16 = vadd.s32 1, %v614_v14  ;;  %v267_v17 = vsub.f32 1.0, %v266_v15 }
  0xa0   : > { %vm707_vm0 = vcmp.eq.s32.totalorder %v704_v28, %v273_v30  ;;  %v280_v36 = vperm.slane %v265_v29, 0  ;;  %v289_v37 = vperm.slane %v288_v31, 0  ;;  %v281_v38 = vperm.slane %v265_v29, 1 }
  0xa1   : > { %vm713_vm1 = vcmp.eq.s32.totalorder %v704_v28, %v274_v33  ;;  %v290_v40 = vperm.slane %v288_v31, 1  ;;  %vm718_vm2 = vcmp.eq.s32.totalorder %v701_v24, %v273_v30  ;;  %vm723_vm3 = vcmp.eq.s32.totalorder %v701_v24, %v274_v33 }
  0xa2   : > { %v286_v43 = vsel %vm707_vm0, %v280_v36, 0.0  ;;  %vm293_vm4 = vcmp.eq.s32.totalorder %v704_v28, %v289_v37  ;;  %v287_v44 = vsel %vm713_vm1, %v281_v38, 0.0  ;;  %v284_v45 = vsel %vm718_vm2, %v280_v36, 0.0 }
  0xa3   : > { %v302_v46 = vsel %vm293_vm4, %v296_v32, 0.0  ;;  %vm294_vm5 = vcmp.eq.s32.totalorder %v704_v28, %v290_v40  ;;  %vm291_vm6 = vcmp.eq.s32.totalorder %v701_v24, %v289_v37  ;;  %v285_v47 = vsel %vm723_vm3, %v281_v38, 0.0 }
  0xa4   : > { %v306_v48 = vadd.f32 %v302_v46, %v286_v43  ;;  %v303_v49 = vsel %vm294_vm5, %v297_v34, 0.0  ;;  %v300_v50 = vsel %vm291_vm6, %v296_v32, 0.0  ;;  %vm292_vm7 = vcmp.eq.s32.totalorder %v701_v24, %v290_v40 }
  0xa5   : > { %v307_v51 = vadd.f32 %v303_v49, %v287_v44  ;;  %v301_v52 = vsel %vm292_vm7, %v297_v34, 0.0  ;;  %v304_v53 = vadd.f32 %v300_v50, %v284_v45  ;;  %v309_v18 = vperm.slane %v614_v14, 1 }
  0xa6   : > { %382 = vmatpush.msra.mxu0 %v306_v48  ;;  %606 = vmatpush.msra.mxu2 %v306_v48  ;;  %v305_v54 = vadd.f32 %v301_v52, %v285_v47  ;;  %v325_v19 = vperm.slane %v323_v16, 1  ;;  %v308_v20 = vperm.slane %v614_v14, 0  ;;  %v324_v21 = vperm.slane %v323_v16, 0 }
  0xa7   : > { %417 = vmatpush.msra.mxu1 %v307_v51  ;;  %608 = vmatpush.msra.mxu3 %v307_v51  ;;  %v316_v8 = vperm.slane %v267_v17, 1  ;;  %v332_v22 = vperm.slane %v266_v15, 1  ;;  %vm757_vm9 = vcmp.eq.s32.totalorder %v701_v24, %v309_v18  ;;  %v315_v26 = vperm.slane %v267_v17, 0 }
  0xa8   : > { %383 = vmatpush.msra.mxu0 %v304_v53  ;;  %607 = vmatpush.msra.mxu2 %v304_v53  ;;  %vm327_vm10 = vcmp.eq.s32.totalorder %v701_v24, %v325_v19  ;;  %vm763_vm11 = vcmp.eq.s32.totalorder %v704_v28, %v308_v20  ;;  %vm328_vm12 = vcmp.eq.s32.totalorder %v704_v28, %v324_v21  ;;  %v331_v27 = vperm.slane %v266_v15, 0 }
  0xa9   : > { %418 = vmatpush.msra.mxu1 %v305_v54  ;;  %609 = vmatpush.msra.mxu3 %v305_v54  ;;  %vm769_vm13 = vcmp.eq.s32.totalorder %v701_v24, %v308_v20  ;;  %vm326_vm14 = vcmp.eq.s32.totalorder %v701_v24, %v324_v21  ;;  %vm313_vm15 = vcmp.eq.s32.totalorder %v704_v28, %v309_v18  ;;  %v320_v31 = vsel %vm757_vm9, %v316_v8, 0.0 }
  0xaa   : > { %591 = vmatmul.msk.f32.vlgmr.msra.gmra.mxu0 %vm349_vm8, %v343_v55  ;;  %594 = vmatmul.msk.f32.vlgmr.msra.gmra.mxu2 %vm349_vm8, %v346_v56  ;;  %vm329_vm0 = vcmp.eq.s32.totalorder %v704_v28, %v325_v19  ;;  %v336_v32 = vsel %vm327_vm10, %v332_v22, 0.0  ;;  %v321_v33 = vsel %vm763_vm11, %v315_v26, 0.0  ;;  %v337_v34 = vsel %vm328_vm12, %v331_v27, 0.0 }
  0xab   : > { %597 = vmatmul.msk.f32.vlgmr.msra.gmra.mxu1 %vm349_vm8, %v343_v55  ;;  %600 = vmatmul.msk.f32.vlgmr.msra.gmra.mxu3 %vm349_vm8, %v346_v56  ;;  %v319_v35 = vsel %vm769_vm13, %v315_v26, 0.0  ;;  %v335_v36 = vsel %vm326_vm14, %v331_v27, 0.0  ;;  %v322_v37 = vsel %vm313_vm15, %v316_v8, 0.0  ;;  %v338_v38 = vsel %vm329_vm0, %v332_v22, 0.0 }
  0xac   : > { %v340_v39 = vadd.f32 %v336_v32, %v320_v31  ;;  %v341_v24 = vadd.f32 %v337_v34, %v321_v33  ;;  %v339_v42 = vadd.f32 %v335_v36, %v319_v35  ;;  %v342_v28 = vadd.f32 %v338_v38, %v322_v37 }
  0xad   : > { %vm501_vm1 = vcmask 1043456   ;;  %vm506_vm2 = vcmask 1041409   ;;  %vm508_vm3 = vcmask 1045509   ;;  %vm511_vm4 = vcmask 1042434  }
  0xae   : > { %vm513_vm5 = vcmask 1046534  }
  0xb2   : > { %592 = vmatmul.msk.f32.gmra.mxu0 %vm349_vm8, %v344_v57  ;;  %595 = vmatmul.msk.f32.gmra.mxu2 %vm349_vm8, %v347_v58 }
  0xb3   : > { %598 = vmatmul.msk.f32.gmra.mxu1 %vm349_vm8, %v344_v57  ;;  %601 = vmatmul.msk.f32.gmra.mxu3 %vm349_vm8, %v347_v58 }
  0xba   : > { %593 = vmatmul.msk.f32.gmra.mxu0 %vm349_vm8, %v345_v59  ;;  %596 = vmatmul.msk.f32.gmra.mxu2 %vm349_vm8, %v348_v60 }
  0xbb   : > { %599 = vmatmul.msk.f32.gmra.mxu1 %vm349_vm8, %v345_v59  ;;  %602 = vmatmul.msk.f32.gmra.mxu3 %vm349_vm8, %v348_v60 }
 0x127   : > { %v385_v7 = vpop.f32.mrf.mxu0 }
 0x128   : > { %v420_v29 = vpop.f32.mrf.mxu1  ;;  %v438_v48 = vmul.f32 %v385_v7, %v339_v42 }
 0x129   : > { %v439_v45 = vmul.f32 %v420_v29, %v340_v39 }
 0x12d   : > { %v394_v40 = vpop.f32.mrf.mxu2 }
 0x12e   : > { %v429_v41 = vpop.f32.mrf.mxu3  ;;  %v444_v56 = vmul.f32 %v394_v40, %v341_v24 }
 0x12f   : > { %v388_v43 = vpop.f32.mrf.mxu0  ;;  %v445_v59 = vmul.f32 %v429_v41, %v342_v28 }
 0x130   : > { %v423_v44 = vpop.f32.mrf.mxu1  ;;  %v440_v46 = vmul.f32 %v388_v43, %v341_v24 }
 0x131   : > { %v441_v47 = vmul.f32 %v423_v44, %v342_v28 }
 0x132   : > { %v450_v50 = vadd.f32 %v440_v46, %v438_v48 }
 0x133   : > { %v457_v49 = vadd.f32 %v441_v47, %v439_v45 }
 0x134   : > { %v451_v60 = vrot.slane %v450_v50, 4 }
 0x135   : > { %v458_v51 = vrot.slane %v457_v49, 4  ;;  %v397_v52 = vpop.f32.mrf.mxu2 }
 0x136   : > { %v432_v53 = vpop.f32.mrf.mxu3  ;;  %v452_v2 = vadd.f32 %v451_v60, %v450_v50  ;;  %v446_v5 = vmul.f32 %v397_v52, %v339_v42 }
 0x137   : > { %v459_v54 = vadd.f32 %v458_v51, %v457_v49  ;;  %v391_v55 = vpop.f32.mrf.mxu0  ;;  %v447_v12 = vmul.f32 %v432_v53, %v340_v39 }
 0x138   : > { %v442_v57 = vmul.f32 %v391_v55, %v339_v42  ;;  %v426_v58 = vpop.f32.mrf.mxu1  ;;  %v453_v17 = vrot.slane %v452_v2, 2 }
 0x139   : > { %v443_v61 = vmul.f32 %v426_v58, %v340_v39  ;;  %v460_v63 = vrot.slane %v459_v54, 2 }
 0x13a   : > { %v464_v62 = vadd.f32 %v444_v56, %v442_v57  ;;  %v454_v25 = vadd.f32 %v453_v17, %v452_v2 }
 0x13b   : > { %v471_v0 = vadd.f32 %v445_v59, %v443_v61  ;;  %v461_v11 = vadd.f32 %v460_v63, %v459_v54 }
 0x13c   : > { %v465_v1 = vrot.slane %v464_v62, 4  ;;  %v455_v35 = vrot.slane %v454_v25, 1 }
 0x13d   : > { %v472_v3 = vrot.slane %v471_v0, 4  ;;  %v400_v4 = vpop.f32.mrf.mxu2  ;;  %v462_v8 = vrot.slane %v461_v11, 1 }
 0x13e   : > { %v466_v6 = vadd.f32 %v465_v1, %v464_v62  ;;  %v448_v9 = vmul.f32 %v400_v4, %v341_v24  ;;  %v435_v10 = vpop.f32.mrf.mxu3 }
 0x13f   : > { %v473_v13 = vadd.f32 %v472_v3, %v471_v0  ;;  %v449_v14 = vmul.f32 %v435_v10, %v342_v28  ;;  %v463_v31 = vadd.f32 %v462_v8, %v461_v11  ;;  %v456_v28 = vadd.f32 %v455_v35, %v454_v25 }
 0x140   : > { %v467_v15 = vrot.slane %v466_v6, 2  ;;  %v478_v16 = vadd.f32 %v448_v9, %v446_v5 }
 0x141   : > { %v474_v18 = vrot.slane %v473_v13, 2  ;;  %v485_v19 = vadd.f32 %v449_v14, %v447_v12  ;;  %v498_v39 = vrot.slane %v463_v31, 4 }
 0x142   : > { %v468_v20 = vadd.f32 %v467_v15, %v466_v6  ;;  %v479_v21 = vrot.slane %v478_v16, 4 }
 0x143   : > { %v475_v22 = vadd.f32 %v474_v18, %v473_v13  ;;  %v486_v7 = vrot.slane %v485_v19, 4  ;;  %v502_v44 = vsel %vm501_vm1, %v456_v28, %v498_v39 }
 0x144   : > { %v480_v23 = vadd.f32 %v479_v21, %v478_v16  ;;  %v469_v26 = vrot.slane %v468_v20, 1 }
 0x145   : > { %v476_v27 = vrot.slane %v475_v22, 1  ;;  %v487_v29 = vadd.f32 %v486_v7, %v485_v19 }
 0x146   : > { %v481_v30 = vrot.slane %v480_v23, 2  ;;  %v470_v36 = vadd.f32 %v469_v26, %v468_v20 }
 0x147   : > { %v477_v32 = vadd.f32 %v476_v27, %v475_v22  ;;  %v488_v33 = vrot.slane %v487_v29, 2 }
 0x148   : > { %v482_v34 = vadd.f32 %v481_v30, %v480_v23 }
 0x149   : > { %v499_v37 = vrot.slane %v477_v32, 4  ;;  %v489_v38 = vadd.f32 %v488_v33, %v487_v29 }
 0x14a   : > { %v483_v40 = vrot.slane %v482_v34, 1 }
 0x14b   : > { %v503_v24 = vsel %vm501_vm1, %v470_v36, %v499_v37  ;;  %v490_v41 = vrot.slane %v489_v38, 1 }
 0x14c   : > { %v505_v42 = vrot.slane %v503_v24, 7  ;;  %v484_v45 = vadd.f32 %v483_v40, %v482_v34 }
 0x14d   : > { %v491_v43 = vadd.f32 %v490_v41, %v489_v38 }
 0x14e   : > { %v507_v47 = vsel %vm506_vm2, %v505_v42, %v502_v44 }
 0x14f   : > { %v500_v46 = vrot.slane %v491_v43, 4  ;;  %v509_v50 = vsel %vm508_vm3, %v505_v42, %v507_v47 }
 0x151   : > { %v504_v48 = vsel %vm501_vm1, %v484_v45, %v500_v46 }
 0x152   : > { %v510_v49 = vrot.slane %v504_v48, 6 }
 0x154   : > { %v512_v51 = vsel %vm511_vm4, %v510_v49, %v509_v50 }
 0x155   : > { %v514_v52 = vsel %vm513_vm5, %v510_v49, %v512_v51 }
 0x156   : > { %516 = vst [vmem:[%s211_s5] sm:$0x77] %v514_v52 }
 0x157 PF: > { %s14_s15 = sadd.s32 1, %s642_s15  }
 0x158   : > { %p11_p4 = scmp.ge.s32.totalorder %s14_s15, 4  }
 0x15a   :  { %13 = sbr.rel (!%p11_p4) target bundleno = 1 (0x1), region = 69 }

</bundles_post_ra>
